<compile_context>
chip_gen: v6e
topology: v6e:2x2x1
jax: 0.10.0
libtpu: 0.0.40
codegen_flags: <defaults>
</compile_context>

<pallas_src>
import functools

import jax
import jax.numpy as jnp
from jax.experimental import pallas as pl
from jax.experimental.pallas import tpu as pltpu


def _round_up(x, m):
    return ((x + m - 1) // m) * m


def _matmul_dtype():
    # bf16 matmul operands (f32 accumulation) on real TPUs; plain f32 elsewhere
    # (e.g. CPU / interpret runs, whose XLA dot rejects BF16 x BF16 = F32).
    return jnp.bfloat16 if jax.default_backend() == "tpu" else jnp.float32


def _prep_gate_matrix(w, H, Hp, *, in_pad):
    """PyTorch (4H, K) gate-stacked [i; f; g; o] -> (K + in_pad, 4*Hp) with columns
    [i | f | o | g]; each gate block is zero-padded from H to Hp columns."""
    i, f, g, o = jnp.split(w, 4, axis=0)
    blocks = [jnp.pad(b, ((0, Hp - H), (0, 0))) for b in (i, f, o, g)]
    w_t = jnp.concatenate(blocks, axis=0).T
    if in_pad:
        w_t = jnp.pad(w_t, ((0, in_pad), (0, 0)))
    return w_t


def _prep_gate_bias(b_ih, b_hh, H, Hp):
    b = (b_ih + b_hh).astype(jnp.float32)
    i, f, g, o = jnp.split(b, 4)
    return jnp.concatenate([jnp.pad(x, (0, Hp - H)) for x in (i, f, o, g)])


def _lstm_recurrence_kernel(xproj_ref, whh0_ref, w1s_ref, b1_ref, out_ref,
                            hcat, c0, c1, *, hidden_dim, time_block, batch_block):
    """Runs `time_block` steps of the 2-layer LSTM recurrence per grid step.

    Grid = (batch_blocks, time_blocks); time is the inner, sequential
    ("arbitrary") axis.  State lives in VMEM scratch, persists across the time
    grid and is re-zeroed whenever a new batch block starts.  `hcat` holds
    [h0 | h1] side by side (in the MXU dtype) so the fused layer-1 matmul
    needs no per-step concatenation.  Gate columns are pre-permuted to
    (i, f, o, g) and each gate block is padded to Hp.
    """
    H = hidden_dim
    tb = pl.program_id(1)

    @pl.when(tb == 0)
    def _():
        hcat[...] = jnp.zeros_like(hcat)
        c0[...] = jnp.zeros_like(c0)
        c1[...] = jnp.zeros_like(c1)

    whh0 = whh0_ref[...]          # (Hp, 4Hp)   MXU dtype
    w1s = w1s_ref[...]            # (2Hp, 4Hp)  MXU dtype, stacked [W_ih_l1; W_hh_l1]
    # Hoisted out of the unrolled loop (JAX does not CSE broadcast_in_dim).
    b1b = jnp.broadcast_to(b1_ref[...], (batch_block, 4 * H))   # f32

    def gates_to_hc(gates, c_prev):
        # Gate columns are (i, f, o, g): one wide sigmoid slab + one tanh (EUP);
        # all elementwise state math stays f32 (v5e has no bf16 VPU/EUP).
        # TODO(synk): on v6e/v7x the sigmoid/tanh slabs could run in bf16 (2x EUP).
        sio = jax.nn.sigmoid(gates[:, :3 * H])
        i = sio[:, 0 * H:1 * H]
        f = sio[:, 1 * H:2 * H]
        o = sio[:, 2 * H:3 * H]
        g = jnp.tanh(gates[:, 3 * H:])
        c_new = f * c_prev + i * g
        h_new = o * jnp.tanh(c_new)
        return h_new, c_new

    def step(t, carry):
        # Layer 0: x @ W_ih0 + b0 was hoisted out of the recurrence (it is the
        # precomputed xproj input); only the recurrent matmul remains here.
        h0_prev = hcat[:, :H]
        g0 = xproj_ref[t].astype(jnp.float32) + jnp.dot(
            h0_prev, whh0, preferred_element_type=jnp.float32)
        h0_new, c0_new = gates_to_hc(g0, c0[...])
        hcat[:, :H] = h0_new.astype(hcat.dtype)   # hcat now holds [h0_t | h1_{t-1}]
        c0[...] = c0_new

        # Layer 1: single fused MXU push over K = 2*Hp.
        g1 = jnp.dot(hcat[...], w1s, preferred_element_type=jnp.float32) + b1b
        h1_new, c1_new = gates_to_hc(g1, c1[...])
        hcat[:, H:] = h1_new.astype(hcat.dtype)
        c1[...] = c1_new

        out_ref[t] = h1_new.astype(out_ref.dtype)
        return carry

    # TODO(synk): for tiny per-core batches (latency-bound regime), interleave two
    # independent batch halves inside step() to hide MXU/EUP FIFO latency.
    jax.lax.fori_loop(0, time_block, step, 0, unroll=min(8, time_block))


def lstm_language_model(x_ids, params, *, time_block=16, batch_block=None):
    """Forward pass matching torch LSTMLanguageModel.eval(); returns (B, T, V) logits."""
    emb = params["embedding"]                          # (V, E)
    B, T = x_ids.shape
    V, E = emb.shape
    H = params["weight_hh_l0"].shape[1]
    Hp = _round_up(H, 128)          # lane-aligned hidden dim; padding is exact
                                    # (zero gate columns -> padded h/c stay 0)
    compute_dtype = _matmul_dtype()

    # ---- one-time weight prep: gate reorder (i,f,g,o)->(i,f,o,g), per-gate pad
    #      to Hp, transpose, stack, cast matmul operands to the MXU dtype -------
    wih0_t = _prep_gate_matrix(params["weight_ih_l0"], H, Hp,
                               in_pad=0).astype(compute_dtype)             # (E, 4Hp)
    whh0_t = _prep_gate_matrix(params["weight_hh_l0"], H, Hp,
                               in_pad=Hp - H).astype(compute_dtype)        # (Hp, 4Hp)
    b0 = _prep_gate_bias(params["bias_ih_l0"], params["bias_hh_l0"], H, Hp)  # (4Hp,)
    w1s = jnp.concatenate(
        [_prep_gate_matrix(params["weight_ih_l1"], H, Hp, in_pad=Hp - H),
         _prep_gate_matrix(params["weight_hh_l1"], H, Hp, in_pad=Hp - H)],
        axis=0).astype(compute_dtype)                                      # (2Hp, 4Hp)
    b1 = _prep_gate_bias(params["bias_ih_l1"], params["bias_hh_l1"],
                         H, Hp).reshape(1, 4 * Hp)                         # (1, 4Hp)
    wfc_t = jnp.pad(params["fc_weight"].T,
                    ((0, Hp - H), (0, 0))).astype(compute_dtype)           # (Hp, V)
    bfc = params["fc_bias"]                                                # (V,)

    # ---- block sizes / padding -----------------------------------------------
    if batch_block is None:
        # Amortize the per-step MXU weight stream over up to 256 rows.
        batch_block = min(_round_up(B, 8), 256)
    batch_block = max(8, _round_up(batch_block, 8))
    time_block = max(1, min(time_block, T))
    B_pad = _round_up(B, batch_block)
    T_pad = _round_up(T, time_block)
    n_bb = B_pad // batch_block
    n_tb = T_pad // time_block

    # ---- embedding gather, time-major (transpose int32 ids, not f32 embeds) --
    ids_tm = x_ids.T                                                       # (T, B)
    embeds_tm = jnp.take(emb, ids_tm, axis=0)                              # (T, B, E)
    embeds_tm = jnp.pad(embeds_tm, ((0, 0), (0, B_pad - B), (0, 0)))

    # ---- hoisted layer-0 input projection (parallel over all T*B rows), stored
    #      in the MXU dtype to halve the HBM stream into the recurrence --------
    xproj0 = (jnp.einsum("tbe,eg->tbg",
                         embeds_tm.astype(compute_dtype), wih0_t,
                         preferred_element_type=jnp.float32)
              + b0).astype(compute_dtype)                                  # (T, B_pad, 4Hp)
    xproj0 = jnp.pad(xproj0, ((0, T_pad - T), (0, 0), (0, 0)))

    kernel = functools.partial(_lstm_recurrence_kernel, hidden_dim=Hp,
                               time_block=time_block, batch_block=batch_block)

    # Explicit VMEM budget: single-buffered weights + double-buffered io blocks +
    # scratch, so large batch/time blocks compile on v5e (16 MiB default scoped
    # limit) and stay inside v7x's 64 MiB physical VMEM.
    itemsize = jnp.dtype(compute_dtype).itemsize
    weight_bytes = (Hp * 4 * Hp + 2 * Hp * 4 * Hp) * itemsize + 4 * Hp * 4
    io_block_bytes = time_block * batch_block * 5 * Hp * itemsize   # xproj(4Hp)+out(Hp)
    scratch_bytes = batch_block * 2 * Hp * itemsize + 2 * batch_block * Hp * 4
    vmem_needed = 2 * weight_bytes + 2 * io_block_bytes + scratch_bytes
    vmem_limit = int(min(max(3 * vmem_needed // 2 + (2 << 20), 32 << 20), 100 << 20))

    def _grid_spec(single_buffer_weights):
        wkw = {"pipeline_mode": pl.Buffered(1)} if single_buffer_weights else {}
        return pltpu.PrefetchScalarGridSpec(
            num_scalar_prefetch=0,
            grid=(n_bb, n_tb),                    # (parallel batch, sequential time)
            in_specs=[
                pl.BlockSpec((time_block, batch_block, 4 * Hp),
                             lambda b, t: (t, b, 0)),
                # Grid-invariant weights: single-buffer so the constant set is not
                # duplicated in VMEM (matters at large H, esp. on v7x's 64 MiB).
                pl.BlockSpec((Hp, 4 * Hp), lambda b, t: (0, 0), **wkw),
                pl.BlockSpec((2 * Hp, 4 * Hp), lambda b, t: (0, 0), **wkw),
                pl.BlockSpec((1, 4 * Hp), lambda b, t: (0, 0), **wkw),
            ],
            out_specs=pl.BlockSpec((time_block, batch_block, Hp),
                                   lambda b, t: (t, b, 0)),
            scratch_shapes=[
                pltpu.VMEM((batch_block, 2 * Hp), compute_dtype),  # [h0 | h1]
                pltpu.VMEM((batch_block, Hp), jnp.float32),        # c0
                pltpu.VMEM((batch_block, Hp), jnp.float32),        # c1
            ])

    def _run(single_buffer_weights):
        return pl.pallas_call(
            kernel,
            out_shape=jax.ShapeDtypeStruct((T_pad, B_pad, Hp), compute_dtype),
            grid_spec=_grid_spec(single_buffer_weights),
            compiler_params=pltpu.CompilerParams(
                dimension_semantics=("parallel", "arbitrary"),
                vmem_limit_bytes=vmem_limit),
        )(xproj0, whh0_t, w1s, b1)

    try:
        h1_all = _run(True)
    except Exception:
        # Pallas builds / interpret paths without pipeline_mode support: fall back
        # to default double-buffered weights (identical semantics).
        h1_all = _run(False)

    # ---- hoisted vocab projection; fold the (T,B)->(B,T) transpose in --------
    h_seq = h1_all[:T, :B]                                                 # (T, B, Hp)
    logits = jnp.einsum("tbh,hv->btv", h_seq, wfc_t,
                        preferred_element_type=jnp.float32) + bfc
    return logits                                                          # (B, T, V)


def init_params(key, vocab_size, embed_dim, hidden_dim):
    """Deterministic parameters in native PyTorch layout (uniform +-1/sqrt(H))."""
    H, E, V = hidden_dim, embed_dim, vocab_size
    ks = jax.random.split(key, 11)
    bound = 1.0 / jnp.sqrt(jnp.float32(H))

    def u(k, shape):
        return jax.random.uniform(k, shape, jnp.float32, -bound, bound)

    return {
        "embedding": jax.random.normal(ks[0], (V, E), jnp.float32),
        "weight_ih_l0": u(ks[1], (4 * H, E)),
        "weight_hh_l0": u(ks[2], (4 * H, H)),
        "bias_ih_l0": u(ks[3], (4 * H,)),
        "bias_hh_l0": u(ks[4], (4 * H,)),
        "weight_ih_l1": u(ks[5], (4 * H, H)),
        "weight_hh_l1": u(ks[6], (4 * H, H)),
        "bias_ih_l1": u(ks[7], (4 * H,)),
        "bias_hh_l1": u(ks[8], (4 * H,)),
        "fc_weight": u(ks[9], (V, H)),
        "fc_bias": u(ks[10], (V,)),
    }


def reference_forward(x_ids, params):
    """Pure-JAX f32 reference mirroring torch semantics (eval mode, batch_first)."""
    H = params["weight_hh_l0"].shape[1]

    def lstm_layer(inp, w_ih, w_hh, b_ih, b_hh):
        Bb = inp.shape[0]
        wih_t, whh_t, b = w_ih.T, w_hh.T, b_ih + b_hh

        def step(carry, x_t):
            h, c = carry
            gates = x_t @ wih_t + h @ whh_t + b
            i = jax.nn.sigmoid(gates[:, 0 * H:1 * H])
            f = jax.nn.sigmoid(gates[:, 1 * H:2 * H])
            g = jnp.tanh(gates[:, 2 * H:3 * H])
            o = jax.nn.sigmoid(gates[:, 3 * H:4 * H])
            c = f * c + i * g
            h = o * jnp.tanh(c)
            return (h, c), h

        init = (jnp.zeros((Bb, H), jnp.float32), jnp.zeros((Bb, H), jnp.float32))
        _, hs = jax.lax.scan(step, init, jnp.transpose(inp, (1, 0, 2)))
        return jnp.transpose(hs, (1, 0, 2))

    embeds = jnp.take(params["embedding"], x_ids, axis=0)                  # (B, T, E)
    out0 = lstm_layer(embeds, params["weight_ih_l0"], params["weight_hh_l0"],
                      params["bias_ih_l0"], params["bias_hh_l0"])
    out1 = lstm_layer(out0, params["weight_ih_l1"], params["weight_hh_l1"],
                      params["bias_ih_l1"], params["bias_hh_l1"])
    return (jnp.einsum("bth,vh->btv", out1, params["fc_weight"])
            + params["fc_bias"])


if __name__ == "__main__":
    vocab_size, embed_dim, hidden_dim = 64, 32, 32
    B, T = 2, 8

    key = jax.random.PRNGKey(0)
    k_params, k_ids = jax.random.split(key)
    params = init_params(k_params, vocab_size, embed_dim, hidden_dim)
    x_ids = jax.random.randint(k_ids, (B, T), 0, vocab_size, dtype=jnp.int32)

    # time_block=4 -> two sequential time-grid steps, exercising the VMEM state
    # carry across grid iterations (use larger time_block for long sequences).
    logits = lstm_language_model(x_ids, params, time_block=4)
    jax.block_until_ready(logits)
    assert logits.shape == (B, T, vocab_size)

    # f32 path (non-TPU / interpret backends) should be near-exact; the bf16 MXU
    # path (real TPU) gets a looser budget covering the deliberate bf16 casts.
    ref = reference_forward(x_ids, params)
    tol = 2e-4 if _matmul_dtype() == jnp.float32 else 1e-1
    assert jnp.allclose(logits, ref, atol=tol, rtol=tol), "mismatch vs f32 reference"

    print("KERNEL_OK")
</pallas_src>

<mosaic_0001>
module attributes {stable_mosaic.version = 11 : i64} {
  func.func @_lstm_recurrence_kernel(%arg0: i32, %arg1: i32, %arg2: memref<4x8x512xf32, #tpu.memory_space<vmem>>, %arg3: memref<128x512xf32, #tpu.memory_space<vmem>>, %arg4: memref<256x512xf32, #tpu.memory_space<vmem>>, %arg5: memref<1x512xf32, #tpu.memory_space<vmem>>, %arg6: memref<4x8x128xf32, #tpu.memory_space<vmem>>, %arg7: memref<8x256xf32, #tpu.memory_space<vmem>>, %arg8: memref<8x128xf32, #tpu.memory_space<vmem>>, %arg9: memref<8x128xf32, #tpu.memory_space<vmem>>) attributes {dimension_semantics = [#tpu.dimension_semantics<parallel>, #tpu.dimension_semantics<arbitrary>], iteration_bounds = array<i64: 1, 2>, scalar_prefetch = 0 : i64, scratch_operands = 3 : i64, tpu.core_type = #tpu.core_type<tc>, window_params = [{transform_indices = @transform_0, window_bounds = array<i64: 4, 8, 512>}, {pipeline_mode = #tpu.pipeline_mode<synchronous>, transform_indices = @transform_1, window_bounds = array<i64: 128, 512>}, {pipeline_mode = #tpu.pipeline_mode<synchronous>, transform_indices = @transform_2, window_bounds = array<i64: 256, 512>}, {pipeline_mode = #tpu.pipeline_mode<synchronous>, transform_indices = @transform_3, window_bounds = array<i64: 1, 512>}, {transform_indices = @transform_4, window_bounds = array<i64: 4, 8, 128>}]} {
    %c0_i32 = arith.constant 0 : i32
    %0 = arith.cmpi eq, %arg1, %c0_i32 : i32
    %1 = arith.extui %0 : i1 to i32
    %c0_i32_0 = arith.constant 0 : i32
    %2 = arith.cmpi ne, %1, %c0_i32_0 : i32
    scf.if %2 {
      %cst_101 = arith.constant 0.000000e+00 : f32
      %212 = vector.broadcast %cst_101 : f32 to vector<8x256xf32>
      %c0_102 = arith.constant 0 : index
      %c0_103 = arith.constant 0 : index
      %213 = vector.load %arg7[%c0_102, %c0_103] : memref<8x256xf32, #tpu.memory_space<vmem>>, vector<8x256xf32>
      tpu.vector_store %arg7[%c0_102, %c0_103], %212 {strides = array<i32>} : memref<8x256xf32, #tpu.memory_space<vmem>>, vector<8x256xf32>,
      %cst_104 = arith.constant 0.000000e+00 : f32
      %214 = vector.broadcast %cst_104 : f32 to vector<8x128xf32>
      %c0_105 = arith.constant 0 : index
      %c0_106 = arith.constant 0 : index
      %215 = vector.load %arg8[%c0_105, %c0_106] : memref<8x128xf32, #tpu.memory_space<vmem>>, vector<8x128xf32>
      tpu.vector_store %arg8[%c0_105, %c0_106], %214 {strides = array<i32>} : memref<8x128xf32, #tpu.memory_space<vmem>>, vector<8x128xf32>,
      %cst_107 = arith.constant 0.000000e+00 : f32
      %216 = vector.broadcast %cst_107 : f32 to vector<8x128xf32>
      %c0_108 = arith.constant 0 : index
      %c0_109 = arith.constant 0 : index
      %217 = vector.load %arg9[%c0_108, %c0_109] : memref<8x128xf32, #tpu.memory_space<vmem>>, vector<8x128xf32>
      tpu.vector_store %arg9[%c0_108, %c0_109], %216 {strides = array<i32>} : memref<8x128xf32, #tpu.memory_space<vmem>>, vector<8x128xf32>,
    } else {
    }
    %c0 = arith.constant 0 : index
    %c0_1 = arith.constant 0 : index
    %3 = vector.load %arg3[%c0, %c0_1] : memref<128x512xf32, #tpu.memory_space<vmem>>, vector<128x512xf32>
    %c0_2 = arith.constant 0 : index
    %c0_3 = arith.constant 0 : index
    %4 = vector.load %arg4[%c0_2, %c0_3] : memref<256x512xf32, #tpu.memory_space<vmem>>, vector<256x512xf32>
    %c0_4 = arith.constant 0 : index
    %c0_5 = arith.constant 0 : index
    %5 = vector.load %arg5[%c0_4, %c0_5] : memref<1x512xf32, #tpu.memory_space<vmem>>, vector<1x512xf32>
    %6 = vector.shape_cast %5 : vector<1x512xf32> to vector<1x512xf32>
    %7 = vector.broadcast %6 : vector<1x512xf32> to vector<8x512xf32>
    %c0_i32_6 = arith.constant 0 : i32
    %c0_7 = arith.constant 0 : index
    %c0_8 = arith.constant 0 : index
    %8 = vector.load %arg7[%c0_7, %c0_8] : memref<8x256xf32, #tpu.memory_space<vmem>>, vector<8x128xf32>
    %9 = arith.index_cast %c0_i32_6 : i32 to index
    %c0_9 = arith.constant 0 : index
    %c0_10 = arith.constant 0 : index
    %10 = vector.load %arg2[%9, %c0_9, %c0_10] : memref<4x8x512xf32, #tpu.memory_space<vmem>>, vector<1x8x512xf32>
    %11 = vector.shape_cast %10 : vector<1x8x512xf32> to vector<8x512xf32>
    %cst = arith.constant dense<0.000000e+00> : vector<8x512xf32>
    %12 = tpu.matmul %8, %3, %cst {dimension_numbers = #tpu.dot_dimension_numbers<[1], [0], [0], [1], [0, 0, 1, 1], [], []>} : vector<8x128xf32>, vector<128x512xf32>, vector<8x512xf32> -> vector<8x512xf32>
    %13 = arith.addf %11, %12 : vector<8x512xf32>
    %c0_11 = arith.constant 0 : index
    %c0_12 = arith.constant 0 : index
    %14 = vector.load %arg8[%c0_11, %c0_12] : memref<8x128xf32, #tpu.memory_space<vmem>>, vector<8x128xf32>
    %15 = vector.extract_strided_slice %13 {offsets = [0, 0], sizes = [8, 384], strides = [1, 1]} : vector<8x512xf32> to vector<8x384xf32>
    %16 = arith.negf %15 : vector<8x384xf32>
    %17 = math.exp %16 : vector<8x384xf32>
    %cst_13 = arith.constant 1.000000e+00 : f32
    %18 = vector.broadcast %cst_13 : f32 to vector<8x384xf32>
    %19 = arith.addf %18, %17 : vector<8x384xf32>
    %20 = arith.divf %18, %19 : vector<8x384xf32>
    %21 = vector.extract_strided_slice %20 {offsets = [0, 0], sizes = [8, 128], strides = [1, 1]} : vector<8x384xf32> to vector<8x128xf32>
    %22 = vector.extract_strided_slice %20 {offsets = [0, 128], sizes = [8, 128], strides = [1, 1]} : vector<8x384xf32> to vector<8x128xf32>
    %23 = vector.extract_strided_slice %20 {offsets = [0, 256], sizes = [8, 128], strides = [1, 1]} : vector<8x384xf32> to vector<8x128xf32>
    %24 = vector.extract_strided_slice %13 {offsets = [0, 384], sizes = [8, 128], strides = [1, 1]} : vector<8x512xf32> to vector<8x128xf32>
    %25 = math.tanh %24 : vector<8x128xf32>
    %26 = arith.mulf %22, %14 : vector<8x128xf32>
    %27 = arith.mulf %21, %25 : vector<8x128xf32>
    %28 = arith.addf %26, %27 : vector<8x128xf32>
    %29 = math.tanh %28 : vector<8x128xf32>
    %30 = arith.mulf %23, %29 : vector<8x128xf32>
    %c0_14 = arith.constant 0 : index
    %c0_15 = arith.constant 0 : index
    %31 = vector.load %arg7[%c0_14, %c0_15] : memref<8x256xf32, #tpu.memory_space<vmem>>, vector<8x128xf32>
    tpu.vector_store %arg7[%c0_14, %c0_15], %30 {strides = array<i32>} : memref<8x256xf32, #tpu.memory_space<vmem>>, vector<8x128xf32>,
    %c0_16 = arith.constant 0 : index
    %c0_17 = arith.constant 0 : index
    %32 = vector.load %arg8[%c0_16, %c0_17] : memref<8x128xf32, #tpu.memory_space<vmem>>, vector<8x128xf32>
    tpu.vector_store %arg8[%c0_16, %c0_17], %28 {strides = array<i32>} : memref<8x128xf32, #tpu.memory_space<vmem>>, vector<8x128xf32>,
    %c0_18 = arith.constant 0 : index
    %c0_19 = arith.constant 0 : index
    %33 = vector.load %arg7[%c0_18, %c0_19] : memref<8x256xf32, #tpu.memory_space<vmem>>, vector<8x256xf32>
    %cst_20 = arith.constant dense<0.000000e+00> : vector<8x512xf32>
    %34 = tpu.matmul %33, %4, %cst_20 {dimension_numbers = #tpu.dot_dimension_numbers<[1], [0], [0], [1], [0, 0, 1, 1], [], []>} : vector<8x256xf32>, vector<256x512xf32>, vector<8x512xf32> -> vector<8x512xf32>
    %35 = arith.addf %34, %7 : vector<8x512xf32>
    %c0_21 = arith.constant 0 : index
    %c0_22 = arith.constant 0 : index
    %36 = vector.load %arg9[%c0_21, %c0_22] : memref<8x128xf32, #tpu.memory_space<vmem>>, vector<8x128xf32>
    %37 = vector.extract_strided_slice %35 {offsets = [0, 0], sizes = [8, 384], strides = [1, 1]} : vector<8x512xf32> to vector<8x384xf32>
    %38 = arith.negf %37 : vector<8x384xf32>
    %39 = math.exp %38 : vector<8x384xf32>
    %cst_23 = arith.constant 1.000000e+00 : f32
    %40 = vector.broadcast %cst_23 : f32 to vector<8x384xf32>
    %41 = arith.addf %40, %39 : vector<8x384xf32>
    %42 = arith.divf %40, %41 : vector<8x384xf32>
    %43 = vector.extract_strided_slice %42 {offsets = [0, 0], sizes = [8, 128], strides = [1, 1]} : vector<8x384xf32> to vector<8x128xf32>
    %44 = vector.extract_strided_slice %42 {offsets = [0, 128], sizes = [8, 128], strides = [1, 1]} : vector<8x384xf32> to vector<8x128xf32>
    %45 = vector.extract_strided_slice %42 {offsets = [0, 256], sizes = [8, 128], strides = [1, 1]} : vector<8x384xf32> to vector<8x128xf32>
    %46 = vector.extract_strided_slice %35 {offsets = [0, 384], sizes = [8, 128], strides = [1, 1]} : vector<8x512xf32> to vector<8x128xf32>
    %47 = math.tanh %46 : vector<8x128xf32>
    %48 = arith.mulf %44, %36 : vector<8x128xf32>
    %49 = arith.mulf %43, %47 : vector<8x128xf32>
    %50 = arith.addf %48, %49 : vector<8x128xf32>
    %51 = math.tanh %50 : vector<8x128xf32>
    %52 = arith.mulf %45, %51 : vector<8x128xf32>
    %c0_24 = arith.constant 0 : index
    %c128 = arith.constant 128 : index
    %53 = vector.load %arg7[%c0_24, %c128] : memref<8x256xf32, #tpu.memory_space<vmem>>, vector<8x128xf32>
    tpu.vector_store %arg7[%c0_24, %c128], %52 {strides = array<i32>} : memref<8x256xf32, #tpu.memory_space<vmem>>, vector<8x128xf32>,
    %c0_25 = arith.constant 0 : index
    %c0_26 = arith.constant 0 : index
    %54 = vector.load %arg9[%c0_25, %c0_26] : memref<8x128xf32, #tpu.memory_space<vmem>>, vector<8x128xf32>
    tpu.vector_store %arg9[%c0_25, %c0_26], %50 {strides = array<i32>} : memref<8x128xf32, #tpu.memory_space<vmem>>, vector<8x128xf32>,
    %55 = arith.index_cast %c0_i32_6 : i32 to index
    %c0_27 = arith.constant 0 : index
    %c0_28 = arith.constant 0 : index
    %56 = vector.load %arg6[%55, %c0_27, %c0_28] : memref<4x8x128xf32, #tpu.memory_space<vmem>>, vector<1x8x128xf32>
    %57 = vector.shape_cast %56 : vector<1x8x128xf32> to vector<8x128xf32>
    %58 = vector.shape_cast %52 : vector<8x128xf32> to vector<1x8x128xf32>
    tpu.vector_store %arg6[%55, %c0_27, %c0_28], %58 {strides = array<i32>} : memref<4x8x128xf32, #tpu.memory_space<vmem>>, vector<1x8x128xf32>,
    %c1_i32 = arith.constant 1 : i32
    %c0_29 = arith.constant 0 : index
    %c0_30 = arith.constant 0 : index
    %59 = vector.load %arg7[%c0_29, %c0_30] : memref<8x256xf32, #tpu.memory_space<vmem>>, vector<8x128xf32>
    %60 = arith.index_cast %c1_i32 : i32 to index
    %c0_31 = arith.constant 0 : index
    %c0_32 = arith.constant 0 : index
    %61 = vector.load %arg2[%60, %c0_31, %c0_32] : memref<4x8x512xf32, #tpu.memory_space<vmem>>, vector<1x8x512xf32>
    %62 = vector.shape_cast %61 : vector<1x8x512xf32> to vector<8x512xf32>
    %cst_33 = arith.constant dense<0.000000e+00> : vector<8x512xf32>
    %63 = tpu.matmul %59, %3, %cst_33 {dimension_numbers = #tpu.dot_dimension_numbers<[1], [0], [0], [1], [0, 0, 1, 1], [], []>} : vector<8x128xf32>, vector<128x512xf32>, vector<8x512xf32> -> vector<8x512xf32>
    %64 = arith.addf %62, %63 : vector<8x512xf32>
    %c0_34 = arith.constant 0 : index
    %c0_35 = arith.constant 0 : index
    %65 = vector.load %arg8[%c0_34, %c0_35] : memref<8x128xf32, #tpu.memory_space<vmem>>, vector<8x128xf32>
    %66 = vector.extract_strided_slice %64 {offsets = [0, 0], sizes = [8, 384], strides = [1, 1]} : vector<8x512xf32> to vector<8x384xf32>
    %67 = arith.negf %66 : vector<8x384xf32>
    %68 = math.exp %67 : vector<8x384xf32>
    %cst_36 = arith.constant 1.000000e+00 : f32
    %69 = vector.broadcast %cst_36 : f32 to vector<8x384xf32>
    %70 = arith.addf %69, %68 : vector<8x384xf32>
    %71 = arith.divf %69, %70 : vector<8x384xf32>
    %72 = vector.extract_strided_slice %71 {offsets = [0, 0], sizes = [8, 128], strides = [1, 1]} : vector<8x384xf32> to vector<8x128xf32>
    %73 = vector.extract_strided_slice %71 {offsets = [0, 128], sizes = [8, 128], strides = [1, 1]} : vector<8x384xf32> to vector<8x128xf32>
    %74 = vector.extract_strided_slice %71 {offsets = [0, 256], sizes = [8, 128], strides = [1, 1]} : vector<8x384xf32> to vector<8x128xf32>
    %75 = vector.extract_strided_slice %64 {offsets = [0, 384], sizes = [8, 128], strides = [1, 1]} : vector<8x512xf32> to vector<8x128xf32>
    %76 = math.tanh %75 : vector<8x128xf32>
    %77 = arith.mulf %73, %65 : vector<8x128xf32>
    %78 = arith.mulf %72, %76 : vector<8x128xf32>
    %79 = arith.addf %77, %78 : vector<8x128xf32>
    %80 = math.tanh %79 : vector<8x128xf32>
    %81 = arith.mulf %74, %80 : vector<8x128xf32>
    %c0_37 = arith.constant 0 : index
    %c0_38 = arith.constant 0 : index
    %82 = vector.load %arg7[%c0_37, %c0_38] : memref<8x256xf32, #tpu.memory_space<vmem>>, vector<8x128xf32>
    tpu.vector_store %arg7[%c0_37, %c0_38], %81 {strides = array<i32>} : memref<8x256xf32, #tpu.memory_space<vmem>>, vector<8x128xf32>,
    %c0_39 = arith.constant 0 : index
    %c0_40 = arith.constant 0 : index
    %83 = vector.load %arg8[%c0_39, %c0_40] : memref<8x128xf32, #tpu.memory_space<vmem>>, vector<8x128xf32>
    tpu.vector_store %arg8[%c0_39, %c0_40], %79 {strides = array<i32>} : memref<8x128xf32, #tpu.memory_space<vmem>>, vector<8x128xf32>,
    %c0_41 = arith.constant 0 : index
    %c0_42 = arith.constant 0 : index
    %84 = vector.load %arg7[%c0_41, %c0_42] : memref<8x256xf32, #tpu.memory_space<vmem>>, vector<8x256xf32>
    %cst_43 = arith.constant dense<0.000000e+00> : vector<8x512xf32>
    %85 = tpu.matmul %84, %4, %cst_43 {dimension_numbers = #tpu.dot_dimension_numbers<[1], [0], [0], [1], [0, 0, 1, 1], [], []>} : vector<8x256xf32>, vector<256x512xf32>, vector<8x512xf32> -> vector<8x512xf32>
    %86 = arith.addf %85, %7 : vector<8x512xf32>
    %c0_44 = arith.constant 0 : index
    %c0_45 = arith.constant 0 : index
    %87 = vector.load %arg9[%c0_44, %c0_45] : memref<8x128xf32, #tpu.memory_space<vmem>>, vector<8x128xf32>
    %88 = vector.extract_strided_slice %86 {offsets = [0, 0], sizes = [8, 384], strides = [1, 1]} : vector<8x512xf32> to vector<8x384xf32>
    %89 = arith.negf %88 : vector<8x384xf32>
    %90 = math.exp %89 : vector<8x384xf32>
    %cst_46 = arith.constant 1.000000e+00 : f32
    %91 = vector.broadcast %cst_46 : f32 to vector<8x384xf32>
    %92 = arith.addf %91, %90 : vector<8x384xf32>
    %93 = arith.divf %91, %92 : vector<8x384xf32>
    %94 = vector.extract_strided_slice %93 {offsets = [0, 0], sizes = [8, 128], strides = [1, 1]} : vector<8x384xf32> to vector<8x128xf32>
    %95 = vector.extract_strided_slice %93 {offsets = [0, 128], sizes = [8, 128], strides = [1, 1]} : vector<8x384xf32> to vector<8x128xf32>
    %96 = vector.extract_strided_slice %93 {offsets = [0, 256], sizes = [8, 128], strides = [1, 1]} : vector<8x384xf32> to vector<8x128xf32>
    %97 = vector.extract_strided_slice %86 {offsets = [0, 384], sizes = [8, 128], strides = [1, 1]} : vector<8x512xf32> to vector<8x128xf32>
    %98 = math.tanh %97 : vector<8x128xf32>
    %99 = arith.mulf %95, %87 : vector<8x128xf32>
    %100 = arith.mulf %94, %98 : vector<8x128xf32>
    %101 = arith.addf %99, %100 : vector<8x128xf32>
    %102 = math.tanh %101 : vector<8x128xf32>
    %103 = arith.mulf %96, %102 : vector<8x128xf32>
    %c0_47 = arith.constant 0 : index
    %c128_48 = arith.constant 128 : index
    %104 = vector.load %arg7[%c0_47, %c128_48] : memref<8x256xf32, #tpu.memory_space<vmem>>, vector<8x128xf32>
    tpu.vector_store %arg7[%c0_47, %c128_48], %103 {strides = array<i32>} : memref<8x256xf32, #tpu.memory_space<vmem>>, vector<8x128xf32>,
    %c0_49 = arith.constant 0 : index
    %c0_50 = arith.constant 0 : index
    %105 = vector.load %arg9[%c0_49, %c0_50] : memref<8x128xf32, #tpu.memory_space<vmem>>, vector<8x128xf32>
    tpu.vector_store %arg9[%c0_49, %c0_50], %101 {strides = array<i32>} : memref<8x128xf32, #tpu.memory_space<vmem>>, vector<8x128xf32>,
    %106 = arith.index_cast %c1_i32 : i32 to index
    %c0_51 = arith.constant 0 : index
    %c0_52 = arith.constant 0 : index
    %107 = vector.load %arg6[%106, %c0_51, %c0_52] : memref<4x8x128xf32, #tpu.memory_space<vmem>>, vector<1x8x128xf32>
    %108 = vector.shape_cast %107 : vector<1x8x128xf32> to vector<8x128xf32>
    %109 = vector.shape_cast %103 : vector<8x128xf32> to vector<1x8x128xf32>
    tpu.vector_store %arg6[%106, %c0_51, %c0_52], %109 {strides = array<i32>} : memref<4x8x128xf32, #tpu.memory_space<vmem>>, vector<1x8x128xf32>,
    %c2_i32 = arith.constant 2 : i32
    %c0_53 = arith.constant 0 : index
    %c0_54 = arith.constant 0 : index
    %110 = vector.load %arg7[%c0_53, %c0_54] : memref<8x256xf32, #tpu.memory_space<vmem>>, vector<8x128xf32>
    %111 = arith.index_cast %c2_i32 : i32 to index
    %c0_55 = arith.constant 0 : index
    %c0_56 = arith.constant 0 : index
    %112 = vector.load %arg2[%111, %c0_55, %c0_56] : memref<4x8x512xf32, #tpu.memory_space<vmem>>, vector<1x8x512xf32>
    %113 = vector.shape_cast %112 : vector<1x8x512xf32> to vector<8x512xf32>
    %cst_57 = arith.constant dense<0.000000e+00> : vector<8x512xf32>
    %114 = tpu.matmul %110, %3, %cst_57 {dimension_numbers = #tpu.dot_dimension_numbers<[1], [0], [0], [1], [0, 0, 1, 1], [], []>} : vector<8x128xf32>, vector<128x512xf32>, vector<8x512xf32> -> vector<8x512xf32>
    %115 = arith.addf %113, %114 : vector<8x512xf32>
    %c0_58 = arith.constant 0 : index
    %c0_59 = arith.constant 0 : index
    %116 = vector.load %arg8[%c0_58, %c0_59] : memref<8x128xf32, #tpu.memory_space<vmem>>, vector<8x128xf32>
    %117 = vector.extract_strided_slice %115 {offsets = [0, 0], sizes = [8, 384], strides = [1, 1]} : vector<8x512xf32> to vector<8x384xf32>
    %118 = arith.negf %117 : vector<8x384xf32>
    %119 = math.exp %118 : vector<8x384xf32>
    %cst_60 = arith.constant 1.000000e+00 : f32
    %120 = vector.broadcast %cst_60 : f32 to vector<8x384xf32>
    %121 = arith.addf %120, %119 : vector<8x384xf32>
    %122 = arith.divf %120, %121 : vector<8x384xf32>
    %123 = vector.extract_strided_slice %122 {offsets = [0, 0], sizes = [8, 128], strides = [1, 1]} : vector<8x384xf32> to vector<8x128xf32>
    %124 = vector.extract_strided_slice %122 {offsets = [0, 128], sizes = [8, 128], strides = [1, 1]} : vector<8x384xf32> to vector<8x128xf32>
    %125 = vector.extract_strided_slice %122 {offsets = [0, 256], sizes = [8, 128], strides = [1, 1]} : vector<8x384xf32> to vector<8x128xf32>
    %126 = vector.extract_strided_slice %115 {offsets = [0, 384], sizes = [8, 128], strides = [1, 1]} : vector<8x512xf32> to vector<8x128xf32>
    %127 = math.tanh %126 : vector<8x128xf32>
    %128 = arith.mulf %124, %116 : vector<8x128xf32>
    %129 = arith.mulf %123, %127 : vector<8x128xf32>
    %130 = arith.addf %128, %129 : vector<8x128xf32>
    %131 = math.tanh %130 : vector<8x128xf32>
    %132 = arith.mulf %125, %131 : vector<8x128xf32>
    %c0_61 = arith.constant 0 : index
    %c0_62 = arith.constant 0 : index
    %133 = vector.load %arg7[%c0_61, %c0_62] : memref<8x256xf32, #tpu.memory_space<vmem>>, vector<8x128xf32>
    tpu.vector_store %arg7[%c0_61, %c0_62], %132 {strides = array<i32>} : memref<8x256xf32, #tpu.memory_space<vmem>>, vector<8x128xf32>,
    %c0_63 = arith.constant 0 : index
    %c0_64 = arith.constant 0 : index
    %134 = vector.load %arg8[%c0_63, %c0_64] : memref<8x128xf32, #tpu.memory_space<vmem>>, vector<8x128xf32>
    tpu.vector_store %arg8[%c0_63, %c0_64], %130 {strides = array<i32>} : memref<8x128xf32, #tpu.memory_space<vmem>>, vector<8x128xf32>,
    %c0_65 = arith.constant 0 : index
    %c0_66 = arith.constant 0 : index
    %135 = vector.load %arg7[%c0_65, %c0_66] : memref<8x256xf32, #tpu.memory_space<vmem>>, vector<8x256xf32>
    %cst_67 = arith.constant dense<0.000000e+00> : vector<8x512xf32>
    %136 = tpu.matmul %135, %4, %cst_67 {dimension_numbers = #tpu.dot_dimension_numbers<[1], [0], [0], [1], [0, 0, 1, 1], [], []>} : vector<8x256xf32>, vector<256x512xf32>, vector<8x512xf32> -> vector<8x512xf32>
    %137 = arith.addf %136, %7 : vector<8x512xf32>
    %c0_68 = arith.constant 0 : index
    %c0_69 = arith.constant 0 : index
    %138 = vector.load %arg9[%c0_68, %c0_69] : memref<8x128xf32, #tpu.memory_space<vmem>>, vector<8x128xf32>
    %139 = vector.extract_strided_slice %137 {offsets = [0, 0], sizes = [8, 384], strides = [1, 1]} : vector<8x512xf32> to vector<8x384xf32>
    %140 = arith.negf %139 : vector<8x384xf32>
    %141 = math.exp %140 : vector<8x384xf32>
    %cst_70 = arith.constant 1.000000e+00 : f32
    %142 = vector.broadcast %cst_70 : f32 to vector<8x384xf32>
    %143 = arith.addf %142, %141 : vector<8x384xf32>
    %144 = arith.divf %142, %143 : vector<8x384xf32>
    %145 = vector.extract_strided_slice %144 {offsets = [0, 0], sizes = [8, 128], strides = [1, 1]} : vector<8x384xf32> to vector<8x128xf32>
    %146 = vector.extract_strided_slice %144 {offsets = [0, 128], sizes = [8, 128], strides = [1, 1]} : vector<8x384xf32> to vector<8x128xf32>
    %147 = vector.extract_strided_slice %144 {offsets = [0, 256], sizes = [8, 128], strides = [1, 1]} : vector<8x384xf32> to vector<8x128xf32>
    %148 = vector.extract_strided_slice %137 {offsets = [0, 384], sizes = [8, 128], strides = [1, 1]} : vector<8x512xf32> to vector<8x128xf32>
    %149 = math.tanh %148 : vector<8x128xf32>
    %150 = arith.mulf %146, %138 : vector<8x128xf32>
    %151 = arith.mulf %145, %149 : vector<8x128xf32>
    %152 = arith.addf %150, %151 : vector<8x128xf32>
    %153 = math.tanh %152 : vector<8x128xf32>
    %154 = arith.mulf %147, %153 : vector<8x128xf32>
    %c0_71 = arith.constant 0 : index
    %c128_72 = arith.constant 128 : index
    %155 = vector.load %arg7[%c0_71, %c128_72] : memref<8x256xf32, #tpu.memory_space<vmem>>, vector<8x128xf32>
    tpu.vector_store %arg7[%c0_71, %c128_72], %154 {strides = array<i32>} : memref<8x256xf32, #tpu.memory_space<vmem>>, vector<8x128xf32>,
    %c0_73 = arith.constant 0 : index
    %c0_74 = arith.constant 0 : index
    %156 = vector.load %arg9[%c0_73, %c0_74] : memref<8x128xf32, #tpu.memory_space<vmem>>, vector<8x128xf32>
    tpu.vector_store %arg9[%c0_73, %c0_74], %152 {strides = array<i32>} : memref<8x128xf32, #tpu.memory_space<vmem>>, vector<8x128xf32>,
    %157 = arith.index_cast %c2_i32 : i32 to index
    %c0_75 = arith.constant 0 : index
    %c0_76 = arith.constant 0 : index
    %158 = vector.load %arg6[%157, %c0_75, %c0_76] : memref<4x8x128xf32, #tpu.memory_space<vmem>>, vector<1x8x128xf32>
    %159 = vector.shape_cast %158 : vector<1x8x128xf32> to vector<8x128xf32>
    %160 = vector.shape_cast %154 : vector<8x128xf32> to vector<1x8x128xf32>
    tpu.vector_store %arg6[%157, %c0_75, %c0_76], %160 {strides = array<i32>} : memref<4x8x128xf32, #tpu.memory_space<vmem>>, vector<1x8x128xf32>,
    %c3_i32 = arith.constant 3 : i32
    %c0_77 = arith.constant 0 : index
    %c0_78 = arith.constant 0 : index
    %161 = vector.load %arg7[%c0_77, %c0_78] : memref<8x256xf32, #tpu.memory_space<vmem>>, vector<8x128xf32>
    %162 = arith.index_cast %c3_i32 : i32 to index
    %c0_79 = arith.constant 0 : index
    %c0_80 = arith.constant 0 : index
    %163 = vector.load %arg2[%162, %c0_79, %c0_80] : memref<4x8x512xf32, #tpu.memory_space<vmem>>, vector<1x8x512xf32>
    %164 = vector.shape_cast %163 : vector<1x8x512xf32> to vector<8x512xf32>
    %cst_81 = arith.constant dense<0.000000e+00> : vector<8x512xf32>
    %165 = tpu.matmul %161, %3, %cst_81 {dimension_numbers = #tpu.dot_dimension_numbers<[1], [0], [0], [1], [0, 0, 1, 1], [], []>} : vector<8x128xf32>, vector<128x512xf32>, vector<8x512xf32> -> vector<8x512xf32>
    %166 = arith.addf %164, %165 : vector<8x512xf32>
    %c0_82 = arith.constant 0 : index
    %c0_83 = arith.constant 0 : index
    %167 = vector.load %arg8[%c0_82, %c0_83] : memref<8x128xf32, #tpu.memory_space<vmem>>, vector<8x128xf32>
    %168 = vector.extract_strided_slice %166 {offsets = [0, 0], sizes = [8, 384], strides = [1, 1]} : vector<8x512xf32> to vector<8x384xf32>
    %169 = arith.negf %168 : vector<8x384xf32>
    %170 = math.exp %169 : vector<8x384xf32>
    %cst_84 = arith.constant 1.000000e+00 : f32
    %171 = vector.broadcast %cst_84 : f32 to vector<8x384xf32>
    %172 = arith.addf %171, %170 : vector<8x384xf32>
    %173 = arith.divf %171, %172 : vector<8x384xf32>
    %174 = vector.extract_strided_slice %173 {offsets = [0, 0], sizes = [8, 128], strides = [1, 1]} : vector<8x384xf32> to vector<8x128xf32>
    %175 = vector.extract_strided_slice %173 {offsets = [0, 128], sizes = [8, 128], strides = [1, 1]} : vector<8x384xf32> to vector<8x128xf32>
    %176 = vector.extract_strided_slice %173 {offsets = [0, 256], sizes = [8, 128], strides = [1, 1]} : vector<8x384xf32> to vector<8x128xf32>
    %177 = vector.extract_strided_slice %166 {offsets = [0, 384], sizes = [8, 128], strides = [1, 1]} : vector<8x512xf32> to vector<8x128xf32>
    %178 = math.tanh %177 : vector<8x128xf32>
    %179 = arith.mulf %175, %167 : vector<8x128xf32>
    %180 = arith.mulf %174, %178 : vector<8x128xf32>
    %181 = arith.addf %179, %180 : vector<8x128xf32>
    %182 = math.tanh %181 : vector<8x128xf32>
    %183 = arith.mulf %176, %182 : vector<8x128xf32>
    %c0_85 = arith.constant 0 : index
    %c0_86 = arith.constant 0 : index
    %184 = vector.load %arg7[%c0_85, %c0_86] : memref<8x256xf32, #tpu.memory_space<vmem>>, vector<8x128xf32>
    tpu.vector_store %arg7[%c0_85, %c0_86], %183 {strides = array<i32>} : memref<8x256xf32, #tpu.memory_space<vmem>>, vector<8x128xf32>,
    %c0_87 = arith.constant 0 : index
    %c0_88 = arith.constant 0 : index
    %185 = vector.load %arg8[%c0_87, %c0_88] : memref<8x128xf32, #tpu.memory_space<vmem>>, vector<8x128xf32>
    tpu.vector_store %arg8[%c0_87, %c0_88], %181 {strides = array<i32>} : memref<8x128xf32, #tpu.memory_space<vmem>>, vector<8x128xf32>,
    %c0_89 = arith.constant 0 : index
    %c0_90 = arith.constant 0 : index
    %186 = vector.load %arg7[%c0_89, %c0_90] : memref<8x256xf32, #tpu.memory_space<vmem>>, vector<8x256xf32>
    %cst_91 = arith.constant dense<0.000000e+00> : vector<8x512xf32>
    %187 = tpu.matmul %186, %4, %cst_91 {dimension_numbers = #tpu.dot_dimension_numbers<[1], [0], [0], [1], [0, 0, 1, 1], [], []>} : vector<8x256xf32>, vector<256x512xf32>, vector<8x512xf32> -> vector<8x512xf32>
    %188 = arith.addf %187, %7 : vector<8x512xf32>
    %c0_92 = arith.constant 0 : index
    %c0_93 = arith.constant 0 : index
    %189 = vector.load %arg9[%c0_92, %c0_93] : memref<8x128xf32, #tpu.memory_space<vmem>>, vector<8x128xf32>
    %190 = vector.extract_strided_slice %188 {offsets = [0, 0], sizes = [8, 384], strides = [1, 1]} : vector<8x512xf32> to vector<8x384xf32>
    %191 = arith.negf %190 : vector<8x384xf32>
    %192 = math.exp %191 : vector<8x384xf32>
    %cst_94 = arith.constant 1.000000e+00 : f32
    %193 = vector.broadcast %cst_94 : f32 to vector<8x384xf32>
    %194 = arith.addf %193, %192 : vector<8x384xf32>
    %195 = arith.divf %193, %194 : vector<8x384xf32>
    %196 = vector.extract_strided_slice %195 {offsets = [0, 0], sizes = [8, 128], strides = [1, 1]} : vector<8x384xf32> to vector<8x128xf32>
    %197 = vector.extract_strided_slice %195 {offsets = [0, 128], sizes = [8, 128], strides = [1, 1]} : vector<8x384xf32> to vector<8x128xf32>
    %198 = vector.extract_strided_slice %195 {offsets = [0, 256], sizes = [8, 128], strides = [1, 1]} : vector<8x384xf32> to vector<8x128xf32>
    %199 = vector.extract_strided_slice %188 {offsets = [0, 384], sizes = [8, 128], strides = [1, 1]} : vector<8x512xf32> to vector<8x128xf32>
    %200 = math.tanh %199 : vector<8x128xf32>
    %201 = arith.mulf %197, %189 : vector<8x128xf32>
    %202 = arith.mulf %196, %200 : vector<8x128xf32>
    %203 = arith.addf %201, %202 : vector<8x128xf32>
    %204 = math.tanh %203 : vector<8x128xf32>
    %205 = arith.mulf %198, %204 : vector<8x128xf32>
    %c0_95 = arith.constant 0 : index
    %c128_96 = arith.constant 128 : index
    %206 = vector.load %arg7[%c0_95, %c128_96] : memref<8x256xf32, #tpu.memory_space<vmem>>, vector<8x128xf32>
    tpu.vector_store %arg7[%c0_95, %c128_96], %205 {strides = array<i32>} : memref<8x256xf32, #tpu.memory_space<vmem>>, vector<8x128xf32>,
    %c0_97 = arith.constant 0 : index
    %c0_98 = arith.constant 0 : index
    %207 = vector.load %arg9[%c0_97, %c0_98] : memref<8x128xf32, #tpu.memory_space<vmem>>, vector<8x128xf32>
    tpu.vector_store %arg9[%c0_97, %c0_98], %203 {strides = array<i32>} : memref<8x128xf32, #tpu.memory_space<vmem>>, vector<8x128xf32>,
    %208 = arith.index_cast %c3_i32 : i32 to index
    %c0_99 = arith.constant 0 : index
    %c0_100 = arith.constant 0 : index
    %209 = vector.load %arg6[%208, %c0_99, %c0_100] : memref<4x8x128xf32, #tpu.memory_space<vmem>>, vector<1x8x128xf32>
    %210 = vector.shape_cast %209 : vector<1x8x128xf32> to vector<8x128xf32>
    %211 = vector.shape_cast %205 : vector<8x128xf32> to vector<1x8x128xf32>
    tpu.vector_store %arg6[%208, %c0_99, %c0_100], %211 {strides = array<i32>} : memref<4x8x128xf32, #tpu.memory_space<vmem>>, vector<1x8x128xf32>,
    %c4_i32 = arith.constant 4 : i32
    return
  }
  func.func @transform_0(%arg0: i32, %arg1: i32) -> (i32, i32, i32) {
    %c0_i32 = arith.constant 0 : i32
    %c0_i32_0 = arith.constant 0 : i32
    return %arg1, %arg0, %c0_i32 : i32, i32, i32
  }
  func.func @transform_1(%arg0: i32, %arg1: i32) -> (i32, i32) {
    %c0_i32 = arith.constant 0 : i32
    %c0_i32_0 = arith.constant 0 : i32
    %c0_i32_1 = arith.constant 0 : i32
    return %c0_i32, %c0_i32_0 : i32, i32
  }
  func.func @transform_2(%arg0: i32, %arg1: i32) -> (i32, i32) {
    %c0_i32 = arith.constant 0 : i32
    %c0_i32_0 = arith.constant 0 : i32
    %c0_i32_1 = arith.constant 0 : i32
    return %c0_i32, %c0_i32_0 : i32, i32
  }
  func.func @transform_3(%arg0: i32, %arg1: i32) -> (i32, i32) {
    %c0_i32 = arith.constant 0 : i32
    %c0_i32_0 = arith.constant 0 : i32
    %c0_i32_1 = arith.constant 0 : i32
    return %c0_i32, %c0_i32_0 : i32, i32
  }
  func.func @transform_4(%arg0: i32, %arg1: i32) -> (i32, i32, i32) {
    %c0_i32 = arith.constant 0 : i32
    %c0_i32_0 = arith.constant 0 : i32
    return %arg1, %arg0, %c0_i32 : i32, i32, i32
  }
}

module attributes {stable_mosaic.version = 11 : i64} {
  func.func @_lstm_recurrence_kernel(%arg0: i32, %arg1: i32, %arg2: memref<4x8x512xf32, #tpu.memory_space<vmem>>, %arg3: memref<128x512xf32, #tpu.memory_space<vmem>>, %arg4: memref<256x512xf32, #tpu.memory_space<vmem>>, %arg5: memref<1x512xf32, #tpu.memory_space<vmem>>, %arg6: memref<4x8x128xf32, #tpu.memory_space<vmem>>, %arg7: memref<8x256xf32, #tpu.memory_space<vmem>>, %arg8: memref<8x128xf32, #tpu.memory_space<vmem>>, %arg9: memref<8x128xf32, #tpu.memory_space<vmem>>) attributes {dimension_semantics = [#tpu.dimension_semantics<parallel>, #tpu.dimension_semantics<arbitrary>], iteration_bounds = array<i64: 1, 2>, scalar_prefetch = 0 : i64, scratch_operands = 3 : i64, tpu.core_type = #tpu.core_type<tc>, window_params = [{transform_indices = @transform_0, window_bounds = array<i64: 4, 8, 512>}, {pipeline_mode = #tpu.pipeline_mode<synchronous>, transform_indices = @transform_1, window_bounds = array<i64: 128, 512>}, {pipeline_mode = #tpu.pipeline_mode<synchronous>, transform_indices = @transform_2, window_bounds = array<i64: 256, 512>}, {pipeline_mode = #tpu.pipeline_mode<synchronous>, transform_indices = @transform_3, window_bounds = array<i64: 1, 512>}, {transform_indices = @transform_4, window_bounds = array<i64: 4, 8, 128>}]} {
    %c0_i32 = arith.constant 0 : i32
    %0 = arith.cmpi eq, %arg1, %c0_i32 : i32
    %1 = arith.extui %0 : i1 to i32
    %c0_i32_0 = arith.constant 0 : i32
    %2 = arith.cmpi ne, %1, %c0_i32_0 : i32
    scf.if %2 {
      %cst_101 = arith.constant 0.000000e+00 : f32
      %212 = vector.broadcast %cst_101 : f32 to vector<8x256xf32>
      %c0_102 = arith.constant 0 : index
      %c0_103 = arith.constant 0 : index
      %213 = vector.load %arg7[%c0_102, %c0_103] : memref<8x256xf32, #tpu.memory_space<vmem>>, vector<8x256xf32>
      tpu.vector_store %arg7[%c0_102, %c0_103], %212 {strides = array<i32>} : memref<8x256xf32, #tpu.memory_space<vmem>>, vector<8x256xf32>,
      %cst_104 = arith.constant 0.000000e+00 : f32
      %214 = vector.broadcast %cst_104 : f32 to vector<8x128xf32>
      %c0_105 = arith.constant 0 : index
      %c0_106 = arith.constant 0 : index
      %215 = vector.load %arg8[%c0_105, %c0_106] : memref<8x128xf32, #tpu.memory_space<vmem>>, vector<8x128xf32>
      tpu.vector_store %arg8[%c0_105, %c0_106], %214 {strides = array<i32>} : memref<8x128xf32, #tpu.memory_space<vmem>>, vector<8x128xf32>,
      %cst_107 = arith.constant 0.000000e+00 : f32
      %216 = vector.broadcast %cst_107 : f32 to vector<8x128xf32>
      %c0_108 = arith.constant 0 : index
      %c0_109 = arith.constant 0 : index
      %217 = vector.load %arg9[%c0_108, %c0_109] : memref<8x128xf32, #tpu.memory_space<vmem>>, vector<8x128xf32>
      tpu.vector_store %arg9[%c0_108, %c0_109], %216 {strides = array<i32>} : memref<8x128xf32, #tpu.memory_space<vmem>>, vector<8x128xf32>,
    } else {
    }
    %c0 = arith.constant 0 : index
    %c0_1 = arith.constant 0 : index
    %3 = vector.load %arg3[%c0, %c0_1] : memref<128x512xf32, #tpu.memory_space<vmem>>, vector<128x512xf32>
    %c0_2 = arith.constant 0 : index
    %c0_3 = arith.constant 0 : index
    %4 = vector.load %arg4[%c0_2, %c0_3] : memref<256x512xf32, #tpu.memory_space<vmem>>, vector<256x512xf32>
    %c0_4 = arith.constant 0 : index
    %c0_5 = arith.constant 0 : index
    %5 = vector.load %arg5[%c0_4, %c0_5] : memref<1x512xf32, #tpu.memory_space<vmem>>, vector<1x512xf32>
    %6 = vector.shape_cast %5 : vector<1x512xf32> to vector<1x512xf32>
    %7 = vector.broadcast %6 : vector<1x512xf32> to vector<8x512xf32>
    %c0_i32_6 = arith.constant 0 : i32
    %c0_7 = arith.constant 0 : index
    %c0_8 = arith.constant 0 : index
    %8 = vector.load %arg7[%c0_7, %c0_8] : memref<8x256xf32, #tpu.memory_space<vmem>>, vector<8x128xf32>
    %9 = arith.index_cast %c0_i32_6 : i32 to index
    %c0_9 = arith.constant 0 : index
    %c0_10 = arith.constant 0 : index
    %10 = vector.load %arg2[%9, %c0_9, %c0_10] : memref<4x8x512xf32, #tpu.memory_space<vmem>>, vector<1x8x512xf32>
    %11 = vector.shape_cast %10 : vector<1x8x512xf32> to vector<8x512xf32>
    %cst = arith.constant dense<0.000000e+00> : vector<8x512xf32>
    %12 = tpu.matmul %8, %3, %cst {dimension_numbers = #tpu.dot_dimension_numbers<[1], [0], [0], [1], [0, 0, 1, 1], [], []>} : vector<8x128xf32>, vector<128x512xf32>, vector<8x512xf32> -> vector<8x512xf32>
    %13 = arith.addf %11, %12 : vector<8x512xf32>
    %c0_11 = arith.constant 0 : index
    %c0_12 = arith.constant 0 : index
    %14 = vector.load %arg8[%c0_11, %c0_12] : memref<8x128xf32, #tpu.memory_space<vmem>>, vector<8x128xf32>
    %15 = vector.extract_strided_slice %13 {offsets = [0, 0], sizes = [8, 384], strides = [1, 1]} : vector<8x512xf32> to vector<8x384xf32>
    %16 = arith.negf %15 : vector<8x384xf32>
    %17 = math.exp %16 : vector<8x384xf32>
    %cst_13 = arith.constant 1.000000e+00 : f32
    %18 = vector.broadcast %cst_13 : f32 to vector<8x384xf32>
    %19 = arith.addf %18, %17 : vector<8x384xf32>
    %20 = arith.divf %18, %19 : vector<8x384xf32>
    %21 = vector.extract_strided_slice %20 {offsets = [0, 0], sizes = [8, 128], strides = [1, 1]} : vector<8x384xf32> to vector<8x128xf32>
    %22 = vector.extract_strided_slice %20 {offsets = [0, 128], sizes = [8, 128], strides = [1, 1]} : vector<8x384xf32> to vector<8x128xf32>
    %23 = vector.extract_strided_slice %20 {offsets = [0, 256], sizes = [8, 128], strides = [1, 1]} : vector<8x384xf32> to vector<8x128xf32>
    %24 = vector.extract_strided_slice %13 {offsets = [0, 384], sizes = [8, 128], strides = [1, 1]} : vector<8x512xf32> to vector<8x128xf32>
    %25 = math.tanh %24 : vector<8x128xf32>
    %26 = arith.mulf %22, %14 : vector<8x128xf32>
    %27 = arith.mulf %21, %25 : vector<8x128xf32>
    %28 = arith.addf %26, %27 : vector<8x128xf32>
    %29 = math.tanh %28 : vector<8x128xf32>
    %30 = arith.mulf %23, %29 : vector<8x128xf32>
    %c0_14 = arith.constant 0 : index
    %c0_15 = arith.constant 0 : index
    %31 = vector.load %arg7[%c0_14, %c0_15] : memref<8x256xf32, #tpu.memory_space<vmem>>, vector<8x128xf32>
    tpu.vector_store %arg7[%c0_14, %c0_15], %30 {strides = array<i32>} : memref<8x256xf32, #tpu.memory_space<vmem>>, vector<8x128xf32>,
    %c0_16 = arith.constant 0 : index
    %c0_17 = arith.constant 0 : index
    %32 = vector.load %arg8[%c0_16, %c0_17] : memref<8x128xf32, #tpu.memory_space<vmem>>, vector<8x128xf32>
    tpu.vector_store %arg8[%c0_16, %c0_17], %28 {strides = array<i32>} : memref<8x128xf32, #tpu.memory_space<vmem>>, vector<8x128xf32>,
    %c0_18 = arith.constant 0 : index
    %c0_19 = arith.constant 0 : index
    %33 = vector.load %arg7[%c0_18, %c0_19] : memref<8x256xf32, #tpu.memory_space<vmem>>, vector<8x256xf32>
    %cst_20 = arith.constant dense<0.000000e+00> : vector<8x512xf32>
    %34 = tpu.matmul %33, %4, %cst_20 {dimension_numbers = #tpu.dot_dimension_numbers<[1], [0], [0], [1], [0, 0, 1, 1], [], []>} : vector<8x256xf32>, vector<256x512xf32>, vector<8x512xf32> -> vector<8x512xf32>
    %35 = arith.addf %34, %7 : vector<8x512xf32>
    %c0_21 = arith.constant 0 : index
    %c0_22 = arith.constant 0 : index
    %36 = vector.load %arg9[%c0_21, %c0_22] : memref<8x128xf32, #tpu.memory_space<vmem>>, vector<8x128xf32>
    %37 = vector.extract_strided_slice %35 {offsets = [0, 0], sizes = [8, 384], strides = [1, 1]} : vector<8x512xf32> to vector<8x384xf32>
    %38 = arith.negf %37 : vector<8x384xf32>
    %39 = math.exp %38 : vector<8x384xf32>
    %cst_23 = arith.constant 1.000000e+00 : f32
    %40 = vector.broadcast %cst_23 : f32 to vector<8x384xf32>
    %41 = arith.addf %40, %39 : vector<8x384xf32>
    %42 = arith.divf %40, %41 : vector<8x384xf32>
    %43 = vector.extract_strided_slice %42 {offsets = [0, 0], sizes = [8, 128], strides = [1, 1]} : vector<8x384xf32> to vector<8x128xf32>
    %44 = vector.extract_strided_slice %42 {offsets = [0, 128], sizes = [8, 128], strides = [1, 1]} : vector<8x384xf32> to vector<8x128xf32>
    %45 = vector.extract_strided_slice %42 {offsets = [0, 256], sizes = [8, 128], strides = [1, 1]} : vector<8x384xf32> to vector<8x128xf32>
    %46 = vector.extract_strided_slice %35 {offsets = [0, 384], sizes = [8, 128], strides = [1, 1]} : vector<8x512xf32> to vector<8x128xf32>
    %47 = math.tanh %46 : vector<8x128xf32>
    %48 = arith.mulf %44, %36 : vector<8x128xf32>
    %49 = arith.mulf %43, %47 : vector<8x128xf32>
    %50 = arith.addf %48, %49 : vector<8x128xf32>
    %51 = math.tanh %50 : vector<8x128xf32>
    %52 = arith.mulf %45, %51 : vector<8x128xf32>
    %c0_24 = arith.constant 0 : index
    %c128 = arith.constant 128 : index
    %53 = vector.load %arg7[%c0_24, %c128] : memref<8x256xf32, #tpu.memory_space<vmem>>, vector<8x128xf32>
    tpu.vector_store %arg7[%c0_24, %c128], %52 {strides = array<i32>} : memref<8x256xf32, #tpu.memory_space<vmem>>, vector<8x128xf32>,
    %c0_25 = arith.constant 0 : index
    %c0_26 = arith.constant 0 : index
    %54 = vector.load %arg9[%c0_25, %c0_26] : memref<8x128xf32, #tpu.memory_space<vmem>>, vector<8x128xf32>
    tpu.vector_store %arg9[%c0_25, %c0_26], %50 {strides = array<i32>} : memref<8x128xf32, #tpu.memory_space<vmem>>, vector<8x128xf32>,
    %55 = arith.index_cast %c0_i32_6 : i32 to index
    %c0_27 = arith.constant 0 : index
    %c0_28 = arith.constant 0 : index
    %56 = vector.load %arg6[%55, %c0_27, %c0_28] : memref<4x8x128xf32, #tpu.memory_space<vmem>>, vector<1x8x128xf32>
    %57 = vector.shape_cast %56 : vector<1x8x128xf32> to vector<8x128xf32>
    %58 = vector.shape_cast %52 : vector<8x128xf32> to vector<1x8x128xf32>
    tpu.vector_store %arg6[%55, %c0_27, %c0_28], %58 {strides = array<i32>} : memref<4x8x128xf32, #tpu.memory_space<vmem>>, vector<1x8x128xf32>,
    %c1_i32 = arith.constant 1 : i32
    %c0_29 = arith.constant 0 : index
    %c0_30 = arith.constant 0 : index
    %59 = vector.load %arg7[%c0_29, %c0_30] : memref<8x256xf32, #tpu.memory_space<vmem>>, vector<8x128xf32>
    %60 = arith.index_cast %c1_i32 : i32 to index
    %c0_31 = arith.constant 0 : index
    %c0_32 = arith.constant 0 : index
    %61 = vector.load %arg2[%60, %c0_31, %c0_32] : memref<4x8x512xf32, #tpu.memory_space<vmem>>, vector<1x8x512xf32>
    %62 = vector.shape_cast %61 : vector<1x8x512xf32> to vector<8x512xf32>
    %cst_33 = arith.constant dense<0.000000e+00> : vector<8x512xf32>
    %63 = tpu.matmul %59, %3, %cst_33 {dimension_numbers = #tpu.dot_dimension_numbers<[1], [0], [0], [1], [0, 0, 1, 1], [], []>} : vector<8x128xf32>, vector<128x512xf32>, vector<8x512xf32> -> vector<8x512xf32>
    %64 = arith.addf %62, %63 : vector<8x512xf32>
    %c0_34 = arith.constant 0 : index
    %c0_35 = arith.constant 0 : index
    %65 = vector.load %arg8[%c0_34, %c0_35] : memref<8x128xf32, #tpu.memory_space<vmem>>, vector<8x128xf32>
    %66 = vector.extract_strided_slice %64 {offsets = [0, 0], sizes = [8, 384], strides = [1, 1]} : vector<8x512xf32> to vector<8x384xf32>
    %67 = arith.negf %66 : vector<8x384xf32>
    %68 = math.exp %67 : vector<8x384xf32>
    %cst_36 = arith.constant 1.000000e+00 : f32
    %69 = vector.broadcast %cst_36 : f32 to vector<8x384xf32>
    %70 = arith.addf %69, %68 : vector<8x384xf32>
    %71 = arith.divf %69, %70 : vector<8x384xf32>
    %72 = vector.extract_strided_slice %71 {offsets = [0, 0], sizes = [8, 128], strides = [1, 1]} : vector<8x384xf32> to vector<8x128xf32>
    %73 = vector.extract_strided_slice %71 {offsets = [0, 128], sizes = [8, 128], strides = [1, 1]} : vector<8x384xf32> to vector<8x128xf32>
    %74 = vector.extract_strided_slice %71 {offsets = [0, 256], sizes = [8, 128], strides = [1, 1]} : vector<8x384xf32> to vector<8x128xf32>
    %75 = vector.extract_strided_slice %64 {offsets = [0, 384], sizes = [8, 128], strides = [1, 1]} : vector<8x512xf32> to vector<8x128xf32>
    %76 = math.tanh %75 : vector<8x128xf32>
    %77 = arith.mulf %73, %65 : vector<8x128xf32>
    %78 = arith.mulf %72, %76 : vector<8x128xf32>
    %79 = arith.addf %77, %78 : vector<8x128xf32>
    %80 = math.tanh %79 : vector<8x128xf32>
    %81 = arith.mulf %74, %80 : vector<8x128xf32>
    %c0_37 = arith.constant 0 : index
    %c0_38 = arith.constant 0 : index
    %82 = vector.load %arg7[%c0_37, %c0_38] : memref<8x256xf32, #tpu.memory_space<vmem>>, vector<8x128xf32>
    tpu.vector_store %arg7[%c0_37, %c0_38], %81 {strides = array<i32>} : memref<8x256xf32, #tpu.memory_space<vmem>>, vector<8x128xf32>,
    %c0_39 = arith.constant 0 : index
    %c0_40 = arith.constant 0 : index
    %83 = vector.load %arg8[%c0_39, %c0_40] : memref<8x128xf32, #tpu.memory_space<vmem>>, vector<8x128xf32>
    tpu.vector_store %arg8[%c0_39, %c0_40], %79 {strides = array<i32>} : memref<8x128xf32, #tpu.memory_space<vmem>>, vector<8x128xf32>,
    %c0_41 = arith.constant 0 : index
    %c0_42 = arith.constant 0 : index
    %84 = vector.load %arg7[%c0_41, %c0_42] : memref<8x256xf32, #tpu.memory_space<vmem>>, vector<8x256xf32>
    %cst_43 = arith.constant dense<0.000000e+00> : vector<8x512xf32>
    %85 = tpu.matmul %84, %4, %cst_43 {dimension_numbers = #tpu.dot_dimension_numbers<[1], [0], [0], [1], [0, 0, 1, 1], [], []>} : vector<8x256xf32>, vector<256x512xf32>, vector<8x512xf32> -> vector<8x512xf32>
    %86 = arith.addf %85, %7 : vector<8x512xf32>
    %c0_44 = arith.constant 0 : index
    %c0_45 = arith.constant 0 : index
    %87 = vector.load %arg9[%c0_44, %c0_45] : memref<8x128xf32, #tpu.memory_space<vmem>>, vector<8x128xf32>
    %88 = vector.extract_strided_slice %86 {offsets = [0, 0], sizes = [8, 384], strides = [1, 1]} : vector<8x512xf32> to vector<8x384xf32>
    %89 = arith.negf %88 : vector<8x384xf32>
    %90 = math.exp %89 : vector<8x384xf32>
    %cst_46 = arith.constant 1.000000e+00 : f32
    %91 = vector.broadcast %cst_46 : f32 to vector<8x384xf32>
    %92 = arith.addf %91, %90 : vector<8x384xf32>
    %93 = arith.divf %91, %92 : vector<8x384xf32>
    %94 = vector.extract_strided_slice %93 {offsets = [0, 0], sizes = [8, 128], strides = [1, 1]} : vector<8x384xf32> to vector<8x128xf32>
    %95 = vector.extract_strided_slice %93 {offsets = [0, 128], sizes = [8, 128], strides = [1, 1]} : vector<8x384xf32> to vector<8x128xf32>
    %96 = vector.extract_strided_slice %93 {offsets = [0, 256], sizes = [8, 128], strides = [1, 1]} : vector<8x384xf32> to vector<8x128xf32>
    %97 = vector.extract_strided_slice %86 {offsets = [0, 384], sizes = [8, 128], strides = [1, 1]} : vector<8x512xf32> to vector<8x128xf32>
    %98 = math.tanh %97 : vector<8x128xf32>
    %99 = arith.mulf %95, %87 : vector<8x128xf32>
    %100 = arith.mulf %94, %98 : vector<8x128xf32>
    %101 = arith.addf %99, %100 : vector<8x128xf32>
    %102 = math.tanh %101 : vector<8x128xf32>
    %103 = arith.mulf %96, %102 : vector<8x128xf32>
    %c0_47 = arith.constant 0 : index
    %c128_48 = arith.constant 128 : index
    %104 = vector.load %arg7[%c0_47, %c128_48] : memref<8x256xf32, #tpu.memory_space<vmem>>, vector<8x128xf32>
    tpu.vector_store %arg7[%c0_47, %c128_48], %103 {strides = array<i32>} : memref<8x256xf32, #tpu.memory_space<vmem>>, vector<8x128xf32>,
    %c0_49 = arith.constant 0 : index
    %c0_50 = arith.constant 0 : index
    %105 = vector.load %arg9[%c0_49, %c0_50] : memref<8x128xf32, #tpu.memory_space<vmem>>, vector<8x128xf32>
    tpu.vector_store %arg9[%c0_49, %c0_50], %101 {strides = array<i32>} : memref<8x128xf32, #tpu.memory_space<vmem>>, vector<8x128xf32>,
    %106 = arith.index_cast %c1_i32 : i32 to index
    %c0_51 = arith.constant 0 : index
    %c0_52 = arith.constant 0 : index
    %107 = vector.load %arg6[%106, %c0_51, %c0_52] : memref<4x8x128xf32, #tpu.memory_space<vmem>>, vector<1x8x128xf32>
    %108 = vector.shape_cast %107 : vector<1x8x128xf32> to vector<8x128xf32>
    %109 = vector.shape_cast %103 : vector<8x128xf32> to vector<1x8x128xf32>
    tpu.vector_store %arg6[%106, %c0_51, %c0_52], %109 {strides = array<i32>} : memref<4x8x128xf32, #tpu.memory_space<vmem>>, vector<1x8x128xf32>,
    %c2_i32 = arith.constant 2 : i32
    %c0_53 = arith.constant 0 : index
    %c0_54 = arith.constant 0 : index
    %110 = vector.load %arg7[%c0_53, %c0_54] : memref<8x256xf32, #tpu.memory_space<vmem>>, vector<8x128xf32>
    %111 = arith.index_cast %c2_i32 : i32 to index
    %c0_55 = arith.constant 0 : index
    %c0_56 = arith.constant 0 : index
    %112 = vector.load %arg2[%111, %c0_55, %c0_56] : memref<4x8x512xf32, #tpu.memory_space<vmem>>, vector<1x8x512xf32>
    %113 = vector.shape_cast %112 : vector<1x8x512xf32> to vector<8x512xf32>
    %cst_57 = arith.constant dense<0.000000e+00> : vector<8x512xf32>
    %114 = tpu.matmul %110, %3, %cst_57 {dimension_numbers = #tpu.dot_dimension_numbers<[1], [0], [0], [1], [0, 0, 1, 1], [], []>} : vector<8x128xf32>, vector<128x512xf32>, vector<8x512xf32> -> vector<8x512xf32>
    %115 = arith.addf %113, %114 : vector<8x512xf32>
    %c0_58 = arith.constant 0 : index
    %c0_59 = arith.constant 0 : index
    %116 = vector.load %arg8[%c0_58, %c0_59] : memref<8x128xf32, #tpu.memory_space<vmem>>, vector<8x128xf32>
    %117 = vector.extract_strided_slice %115 {offsets = [0, 0], sizes = [8, 384], strides = [1, 1]} : vector<8x512xf32> to vector<8x384xf32>
    %118 = arith.negf %117 : vector<8x384xf32>
    %119 = math.exp %118 : vector<8x384xf32>
    %cst_60 = arith.constant 1.000000e+00 : f32
    %120 = vector.broadcast %cst_60 : f32 to vector<8x384xf32>
    %121 = arith.addf %120, %119 : vector<8x384xf32>
    %122 = arith.divf %120, %121 : vector<8x384xf32>
    %123 = vector.extract_strided_slice %122 {offsets = [0, 0], sizes = [8, 128], strides = [1, 1]} : vector<8x384xf32> to vector<8x128xf32>
    %124 = vector.extract_strided_slice %122 {offsets = [0, 128], sizes = [8, 128], strides = [1, 1]} : vector<8x384xf32> to vector<8x128xf32>
    %125 = vector.extract_strided_slice %122 {offsets = [0, 256], sizes = [8, 128], strides = [1, 1]} : vector<8x384xf32> to vector<8x128xf32>
    %126 = vector.extract_strided_slice %115 {offsets = [0, 384], sizes = [8, 128], strides = [1, 1]} : vector<8x512xf32> to vector<8x128xf32>
    %127 = math.tanh %126 : vector<8x128xf32>
    %128 = arith.mulf %124, %116 : vector<8x128xf32>
    %129 = arith.mulf %123, %127 : vector<8x128xf32>
    %130 = arith.addf %128, %129 : vector<8x128xf32>
    %131 = math.tanh %130 : vector<8x128xf32>
    %132 = arith.mulf %125, %131 : vector<8x128xf32>
    %c0_61 = arith.constant 0 : index
    %c0_62 = arith.constant 0 : index
    %133 = vector.load %arg7[%c0_61, %c0_62] : memref<8x256xf32, #tpu.memory_space<vmem>>, vector<8x128xf32>
    tpu.vector_store %arg7[%c0_61, %c0_62], %132 {strides = array<i32>} : memref<8x256xf32, #tpu.memory_space<vmem>>, vector<8x128xf32>,
    %c0_63 = arith.constant 0 : index
    %c0_64 = arith.constant 0 : index
    %134 = vector.load %arg8[%c0_63, %c0_64] : memref<8x128xf32, #tpu.memory_space<vmem>>, vector<8x128xf32>
    tpu.vector_store %arg8[%c0_63, %c0_64], %130 {strides = array<i32>} : memref<8x128xf32, #tpu.memory_space<vmem>>, vector<8x128xf32>,
    %c0_65 = arith.constant 0 : index
    %c0_66 = arith.constant 0 : index
    %135 = vector.load %arg7[%c0_65, %c0_66] : memref<8x256xf32, #tpu.memory_space<vmem>>, vector<8x256xf32>
    %cst_67 = arith.constant dense<0.000000e+00> : vector<8x512xf32>
    %136 = tpu.matmul %135, %4, %cst_67 {dimension_numbers = #tpu.dot_dimension_numbers<[1], [0], [0], [1], [0, 0, 1, 1], [], []>} : vector<8x256xf32>, vector<256x512xf32>, vector<8x512xf32> -> vector<8x512xf32>
    %137 = arith.addf %136, %7 : vector<8x512xf32>
    %c0_68 = arith.constant 0 : index
    %c0_69 = arith.constant 0 : index
    %138 = vector.load %arg9[%c0_68, %c0_69] : memref<8x128xf32, #tpu.memory_space<vmem>>, vector<8x128xf32>
    %139 = vector.extract_strided_slice %137 {offsets = [0, 0], sizes = [8, 384], strides = [1, 1]} : vector<8x512xf32> to vector<8x384xf32>
    %140 = arith.negf %139 : vector<8x384xf32>
    %141 = math.exp %140 : vector<8x384xf32>
    %cst_70 = arith.constant 1.000000e+00 : f32
    %142 = vector.broadcast %cst_70 : f32 to vector<8x384xf32>
    %143 = arith.addf %142, %141 : vector<8x384xf32>
    %144 = arith.divf %142, %143 : vector<8x384xf32>
    %145 = vector.extract_strided_slice %144 {offsets = [0, 0], sizes = [8, 128], strides = [1, 1]} : vector<8x384xf32> to vector<8x128xf32>
    %146 = vector.extract_strided_slice %144 {offsets = [0, 128], sizes = [8, 128], strides = [1, 1]} : vector<8x384xf32> to vector<8x128xf32>
    %147 = vector.extract_strided_slice %144 {offsets = [0, 256], sizes = [8, 128], strides = [1, 1]} : vector<8x384xf32> to vector<8x128xf32>
    %148 = vector.extract_strided_slice %137 {offsets = [0, 384], sizes = [8, 128], strides = [1, 1]} : vector<8x512xf32> to vector<8x128xf32>
    %149 = math.tanh %148 : vector<8x128xf32>
    %150 = arith.mulf %146, %138 : vector<8x128xf32>
    %151 = arith.mulf %145, %149 : vector<8x128xf32>
    %152 = arith.addf %150, %151 : vector<8x128xf32>
    %153 = math.tanh %152 : vector<8x128xf32>
    %154 = arith.mulf %147, %153 : vector<8x128xf32>
    %c0_71 = arith.constant 0 : index
    %c128_72 = arith.constant 128 : index
    %155 = vector.load %arg7[%c0_71, %c128_72] : memref<8x256xf32, #tpu.memory_space<vmem>>, vector<8x128xf32>
    tpu.vector_store %arg7[%c0_71, %c128_72], %154 {strides = array<i32>} : memref<8x256xf32, #tpu.memory_space<vmem>>, vector<8x128xf32>,
    %c0_73 = arith.constant 0 : index
    %c0_74 = arith.constant 0 : index
    %156 = vector.load %arg9[%c0_73, %c0_74] : memref<8x128xf32, #tpu.memory_space<vmem>>, vector<8x128xf32>
    tpu.vector_store %arg9[%c0_73, %c0_74], %152 {strides = array<i32>} : memref<8x128xf32, #tpu.memory_space<vmem>>, vector<8x128xf32>,
    %157 = arith.index_cast %c2_i32 : i32 to index
    %c0_75 = arith.constant 0 : index
    %c0_76 = arith.constant 0 : index
    %158 = vector.load %arg6[%157, %c0_75, %c0_76] : memref<4x8x128xf32, #tpu.memory_space<vmem>>, vector<1x8x128xf32>
    %159 = vector.shape_cast %158 : vector<1x8x128xf32> to vector<8x128xf32>
    %160 = vector.shape_cast %154 : vector<8x128xf32> to vector<1x8x128xf32>
    tpu.vector_store %arg6[%157, %c0_75, %c0_76], %160 {strides = array<i32>} : memref<4x8x128xf32, #tpu.memory_space<vmem>>, vector<1x8x128xf32>,
    %c3_i32 = arith.constant 3 : i32
    %c0_77 = arith.constant 0 : index
    %c0_78 = arith.constant 0 : index
    %161 = vector.load %arg7[%c0_77, %c0_78] : memref<8x256xf32, #tpu.memory_space<vmem>>, vector<8x128xf32>
    %162 = arith.index_cast %c3_i32 : i32 to index
    %c0_79 = arith.constant 0 : index
    %c0_80 = arith.constant 0 : index
    %163 = vector.load %arg2[%162, %c0_79, %c0_80] : memref<4x8x512xf32, #tpu.memory_space<vmem>>, vector<1x8x512xf32>
    %164 = vector.shape_cast %163 : vector<1x8x512xf32> to vector<8x512xf32>
    %cst_81 = arith.constant dense<0.000000e+00> : vector<8x512xf32>
    %165 = tpu.matmul %161, %3, %cst_81 {dimension_numbers = #tpu.dot_dimension_numbers<[1], [0], [0], [1], [0, 0, 1, 1], [], []>} : vector<8x128xf32>, vector<128x512xf32>, vector<8x512xf32> -> vector<8x512xf32>
    %166 = arith.addf %164, %165 : vector<8x512xf32>
    %c0_82 = arith.constant 0 : index
    %c0_83 = arith.constant 0 : index
    %167 = vector.load %arg8[%c0_82, %c0_83] : memref<8x128xf32, #tpu.memory_space<vmem>>, vector<8x128xf32>
    %168 = vector.extract_strided_slice %166 {offsets = [0, 0], sizes = [8, 384], strides = [1, 1]} : vector<8x512xf32> to vector<8x384xf32>
    %169 = arith.negf %168 : vector<8x384xf32>
    %170 = math.exp %169 : vector<8x384xf32>
    %cst_84 = arith.constant 1.000000e+00 : f32
    %171 = vector.broadcast %cst_84 : f32 to vector<8x384xf32>
    %172 = arith.addf %171, %170 : vector<8x384xf32>
    %173 = arith.divf %171, %172 : vector<8x384xf32>
    %174 = vector.extract_strided_slice %173 {offsets = [0, 0], sizes = [8, 128], strides = [1, 1]} : vector<8x384xf32> to vector<8x128xf32>
    %175 = vector.extract_strided_slice %173 {offsets = [0, 128], sizes = [8, 128], strides = [1, 1]} : vector<8x384xf32> to vector<8x128xf32>
    %176 = vector.extract_strided_slice %173 {offsets = [0, 256], sizes = [8, 128], strides = [1, 1]} : vector<8x384xf32> to vector<8x128xf32>
    %177 = vector.extract_strided_slice %166 {offsets = [0, 384], sizes = [8, 128], strides = [1, 1]} : vector<8x512xf32> to vector<8x128xf32>
    %178 = math.tanh %177 : vector<8x128xf32>
    %179 = arith.mulf %175, %167 : vector<8x128xf32>
    %180 = arith.mulf %174, %178 : vector<8x128xf32>
    %181 = arith.addf %179, %180 : vector<8x128xf32>
    %182 = math.tanh %181 : vector<8x128xf32>
    %183 = arith.mulf %176, %182 : vector<8x128xf32>
    %c0_85 = arith.constant 0 : index
    %c0_86 = arith.constant 0 : index
    %184 = vector.load %arg7[%c0_85, %c0_86] : memref<8x256xf32, #tpu.memory_space<vmem>>, vector<8x128xf32>
    tpu.vector_store %arg7[%c0_85, %c0_86], %183 {strides = array<i32>} : memref<8x256xf32, #tpu.memory_space<vmem>>, vector<8x128xf32>,
    %c0_87 = arith.constant 0 : index
    %c0_88 = arith.constant 0 : index
    %185 = vector.load %arg8[%c0_87, %c0_88] : memref<8x128xf32, #tpu.memory_space<vmem>>, vector<8x128xf32>
    tpu.vector_store %arg8[%c0_87, %c0_88], %181 {strides = array<i32>} : memref<8x128xf32, #tpu.memory_space<vmem>>, vector<8x128xf32>,
    %c0_89 = arith.constant 0 : index
    %c0_90 = arith.constant 0 : index
    %186 = vector.load %arg7[%c0_89, %c0_90] : memref<8x256xf32, #tpu.memory_space<vmem>>, vector<8x256xf32>
    %cst_91 = arith.constant dense<0.000000e+00> : vector<8x512xf32>
    %187 = tpu.matmul %186, %4, %cst_91 {dimension_numbers = #tpu.dot_dimension_numbers<[1], [0], [0], [1], [0, 0, 1, 1], [], []>} : vector<8x256xf32>, vector<256x512xf32>, vector<8x512xf32> -> vector<8x512xf32>
    %188 = arith.addf %187, %7 : vector<8x512xf32>
    %c0_92 = arith.constant 0 : index
    %c0_93 = arith.constant 0 : index
    %189 = vector.load %arg9[%c0_92, %c0_93] : memref<8x128xf32, #tpu.memory_space<vmem>>, vector<8x128xf32>
    %190 = vector.extract_strided_slice %188 {offsets = [0, 0], sizes = [8, 384], strides = [1, 1]} : vector<8x512xf32> to vector<8x384xf32>
    %191 = arith.negf %190 : vector<8x384xf32>
    %192 = math.exp %191 : vector<8x384xf32>
    %cst_94 = arith.constant 1.000000e+00 : f32
    %193 = vector.broadcast %cst_94 : f32 to vector<8x384xf32>
    %194 = arith.addf %193, %192 : vector<8x384xf32>
    %195 = arith.divf %193, %194 : vector<8x384xf32>
    %196 = vector.extract_strided_slice %195 {offsets = [0, 0], sizes = [8, 128], strides = [1, 1]} : vector<8x384xf32> to vector<8x128xf32>
    %197 = vector.extract_strided_slice %195 {offsets = [0, 128], sizes = [8, 128], strides = [1, 1]} : vector<8x384xf32> to vector<8x128xf32>
    %198 = vector.extract_strided_slice %195 {offsets = [0, 256], sizes = [8, 128], strides = [1, 1]} : vector<8x384xf32> to vector<8x128xf32>
    %199 = vector.extract_strided_slice %188 {offsets = [0, 384], sizes = [8, 128], strides = [1, 1]} : vector<8x512xf32> to vector<8x128xf32>
    %200 = math.tanh %199 : vector<8x128xf32>
    %201 = arith.mulf %197, %189 : vector<8x128xf32>
    %202 = arith.mulf %196, %200 : vector<8x128xf32>
    %203 = arith.addf %201, %202 : vector<8x128xf32>
    %204 = math.tanh %203 : vector<8x128xf32>
    %205 = arith.mulf %198, %204 : vector<8x128xf32>
    %c0_95 = arith.constant 0 : index
    %c128_96 = arith.constant 128 : index
    %206 = vector.load %arg7[%c0_95, %c128_96] : memref<8x256xf32, #tpu.memory_space<vmem>>, vector<8x128xf32>
    tpu.vector_store %arg7[%c0_95, %c128_96], %205 {strides = array<i32>} : memref<8x256xf32, #tpu.memory_space<vmem>>, vector<8x128xf32>,
    %c0_97 = arith.constant 0 : index
    %c0_98 = arith.constant 0 : index
    %207 = vector.load %arg9[%c0_97, %c0_98] : memref<8x128xf32, #tpu.memory_space<vmem>>, vector<8x128xf32>
    tpu.vector_store %arg9[%c0_97, %c0_98], %203 {strides = array<i32>} : memref<8x128xf32, #tpu.memory_space<vmem>>, vector<8x128xf32>,
    %208 = arith.index_cast %c3_i32 : i32 to index
    %c0_99 = arith.constant 0 : index
    %c0_100 = arith.constant 0 : index
    %209 = vector.load %arg6[%208, %c0_99, %c0_100] : memref<4x8x128xf32, #tpu.memory_space<vmem>>, vector<1x8x128xf32>
    %210 = vector.shape_cast %209 : vector<1x8x128xf32> to vector<8x128xf32>
    %211 = vector.shape_cast %205 : vector<8x128xf32> to vector<1x8x128xf32>
    tpu.vector_store %arg6[%208, %c0_99, %c0_100], %211 {strides = array<i32>} : memref<4x8x128xf32, #tpu.memory_space<vmem>>, vector<1x8x128xf32>,
    %c4_i32 = arith.constant 4 : i32
    return
  }
  func.func @transform_0(%arg0: i32, %arg1: i32) -> (i32, i32, i32) {
    %c0_i32 = arith.constant 0 : i32
    %c0_i32_0 = arith.constant 0 : i32
    return %arg1, %arg0, %c0_i32 : i32, i32, i32
  }
  func.func @transform_1(%arg0: i32, %arg1: i32) -> (i32, i32) {
    %c0_i32 = arith.constant 0 : i32
    %c0_i32_0 = arith.constant 0 : i32
    %c0_i32_1 = arith.constant 0 : i32
    return %c0_i32, %c0_i32_0 : i32, i32
  }
  func.func @transform_2(%arg0: i32, %arg1: i32) -> (i32, i32) {
    %c0_i32 = arith.constant 0 : i32
    %c0_i32_0 = arith.constant 0 : i32
    %c0_i32_1 = arith.constant 0 : i32
    return %c0_i32, %c0_i32_0 : i32, i32
  }
  func.func @transform_3(%arg0: i32, %arg1: i32) -> (i32, i32) {
    %c0_i32 = arith.constant 0 : i32
    %c0_i32_0 = arith.constant 0 : i32
    %c0_i32_1 = arith.constant 0 : i32
    return %c0_i32, %c0_i32_0 : i32, i32
  }
  func.func @transform_4(%arg0: i32, %arg1: i32) -> (i32, i32, i32) {
    %c0_i32 = arith.constant 0 : i32
    %c0_i32_0 = arith.constant 0 : i32
    return %arg1, %arg0, %c0_i32 : i32, i32, i32
  }
}

</mosaic_0001>

<bundles_post_ra>
// kernel: tpu_custom_call.1
= control target key start
LH: loop header
LB: loop body
LE: loop exit
PB: predicated region body
PF: predicated region fallthrough
CT: control target
= control target key end

     0   :  { %9 = vsyncpa [#allocation6], 0  ;;  %s4524_s0 = inlined_call_operand.hbm [shape: f32[8,8,512], index: 0, kind: input, shape index: {}]   ;;  %s4525_s1 = inlined_call_operand.hbm [shape: f32[128,512], index: 1, kind: input, shape index: {}]   ;;  %s4526_s2 = inlined_call_operand.hbm [shape: f32[256,512], index: 2, kind: input, shape index: {}]   ;;  %s4527_s3 = inlined_call_operand.vmem [shape: f32[1,512], index: 3, kind: input, shape index: {}]   ;;  %s4528_s4 = inlined_call_operand.hbm [shape: f32[8,8,128], index: 4, kind: output, shape index: {}]  }
   0x1   :  { %11 = vsyncpa [#allocation6 + $0x1], 0 }
   0x2   :  { %12 = vsyncpa [#allocation9], 0 }
   0x3   :  { %13 = vsyncpa [#allocation7], 0 }
   0x4   :  { %15 = vsyncpa [#allocation7 + $0x1], 0  ;;  %s2687_s15 = smov 0   ;;  %s2689_s16 = smov 0  }
   0x5   :  { %s2691_s17 = smov 0   ;;  %s2693_s18 = smov 0  }
   0x6   :  { %s2695_s19 = smov 0   ;;  %s2697_s20 = smov 0  }
   0x7 LB: > { %s2014_s21 = sadd.s32 4294967295, %s2650_s20   ;;  %s2015_s22 = sadd.s32 4294967294, %s2650_s20   ;;  %s2650_s20 = sphi %s2697_s20, %s21_s20   ;;  %s2646_s19 = sphi %s2695_s19, %s5441_s19   ;;  %s2642_s18 = sphi %s2693_s18, %s5440_s18   ;;  %s2638_s17 = sphi %s2691_s17, %s5439_s17   ;;  %s2634_s16 = sphi %s2689_s16, %s5438_s16   ;;  %s2630_s15 = sphi %s2687_s15, %s5437_s15  }
   0x8   : > { %p55_p0 = scmp.ne.s32.totalorder %s2634_s16, %s2630_s15  ;;  %p2721_p1 = scmp.eq.s32.totalorder %s2014_s21, 0 }
   0x9   : > { %p2725_p2 = scmp.eq.s32.totalorder %s2014_s21, 1  ;;  %p150_p3 = scmp.eq.s32.totalorder %s2015_s22, 1 }
   0xa   : > { %p2731_p4 = por %p2721_p1, %p55_p0  ;;  %p2016_p5 = scmp.ge.s32.totalorder %s2650_s20, 1 }
   0xb   : > { %p2736_p6 = por %p150_p3, %p55_p0  ;;  %p157_p7 = scmp.lt.s32.totalorder %s2650_s20, 3 }
   0xc   : > { %s2652_s28 = smov [#allocation8]   ;;  %s2653_s5 = smov [#allocation10]  }
   0xd   : > { %s4836_s26 = scalar_select %p2736_p6, 1, 0 }
   0xe   : > { %p2741_p8 = pnand %p2016_p5, %p157_p7  ;;  %s169_s29 = sshll.u32 %s2652_s28, 4  ;;  %s170_s29 = int_to_ptr.vmem [resolvable:$true] %s169_s29 }
   0xf   : > { %s182_s6 = sshll.u32 %s2653_s5, 4  ;;  %s2497_s7 = scalar_lea.vmem %s170_s29, 8192  ;;  %s183_s6 = int_to_ptr.vmem [resolvable:$true] %s182_s6 }
  0x10   : > { %p2089_p9 = pneg %p2741_p8  ;;  %p2498_p13 = scmp.ne.s32.totalorder %s170_s29, %s2497_s7 }
  0x11   : > { %p2505_p5 = scmp.lt.s32.totalorder %s170_s29, %s170_s29  ;;  %p2506_p7 = scmp.lt.s32.totalorder %s2497_s7, %s2497_s7 }
  0x12   : > { %p2750_p11 = pnand %p2089_p9, %p2721_p1 }
  0x13   : > { %p2507_p10 = por %p2506_p7, %p2505_p5 }
  0x14   : > { %p2488_p12 = pneg %p2750_p11 }
  0x16   : > { %p2500_p0 = pnand %p2498_p13, %p2488_p12 }
  0x18   : > { %p2501_p3 = pneg %p2500_p0 }
  0x1a   : > { %p2508_p9 = pnand %p2507_p10, %p2501_p3 }
  0x1c   : > { %2511 = shalt.err (!%p2508_p9)
}
  0x1d   : > { %s4529_s8 = smov 512   ;;  %s4530_s9 = smov 32  }
  0x1e   : > { %2092 = dma.hbm_to_vmem [thread:$0]  (!%p2750_p11), %s4525_s1, 8192, %s170_s29, [#allocation9], %s4529_s8, %s4529_s8, %s4530_s9  }
  0x1f   : > { %s2523_s12 = scalar_lea.vmem %s183_s6, 16384  ;;  %p2531_p10 = scmp.lt.s32.totalorder %s183_s6, %s183_s6 }
  0x20   : > { %p2524_p13 = scmp.ne.s32.totalorder %s183_s6, %s2523_s12  ;;  %p2532_p3 = scmp.lt.s32.totalorder %s2523_s12, %s2523_s12 }
  0x22   : > { %p2526_p0 = pnand %p2524_p13, %p2488_p12  ;;  %p2533_p7 = por %p2532_p3, %p2531_p10 }
  0x24   : > { %p2527_p5 = pneg %p2526_p0 }
  0x26   : > { %p2534_p9 = pnand %p2533_p7, %p2527_p5 }
  0x28   : > { %2537 = shalt.err (!%p2534_p9)
}
  0x29   : > { %2095 = dma.hbm_to_vmem [thread:$0]  (!%p2750_p11), %s4526_s2, 16384, %s183_s6, [#allocation9], %s4529_s8, %s4529_s8, %s4530_s9  }
  0x2a   : > { %s30_s21 = sadd.s32 1, %s2646_s19  ;;  %s42_s22 = sadd.s32 1, %s2638_s17 }
  0x2b   : > { %p31_p12 = scmp.ge.s32.totalorder %s30_s21, 2  ;;  %p49_p13 = scmp.ne.s32.totalorder %s2638_s17, %s2634_s16 }
  0x2c   : > { %p50_p0 = scmp.eq.s32.totalorder %s2650_s20, 0  ;;  %p2106_p5 = scmp.lt.s32.totalorder %s2650_s20, 2 }
  0x2d   : > { %s5443_s21 = smov (%p31_p12, %s30_s21), 0  ;;  %p2788_p3 = por %p2725_p2, %p49_p13 }
  0x2e   : > { %p51_p10 = por %p50_p0, %p49_p13  ;;  %s37_s29 = ssub.s32 %s2646_s19, %s5443_s21 }
  0x2f   : > { %s199_s30 = sand.u32 1, %s2638_s17   ;;  %p40_p7 = scmp.eq.s32.totalorder %s37_s29, 0 }
  0x30   : > { %s2020_s5 = sshll.u32 %s199_s30, 7  ;;  %s2075_s6 = sshll.u32 %s2646_s19, 11 }
  0x31   : > { %s2797_s7 = scalar_select %p40_p7, %s2638_s17, %s42_s22  }
  0x32   : > { %s212_s12 = scalar_lea.hbm %s4524_s0, %s2075_s6  ;;  %s203_s13 = scalar_lea.vmem [#allocation5], %s2020_s5 }
  0x33   : > { %s213_s14 = sshll.u32 %s203_s13, 4  ;;  %p2804_p11 = pnand %p2106_p5, %p51_p10  ;;  %s214_s14 = int_to_ptr.vmem [resolvable:$true] %s213_s14 }
  0x34   : > { %s200_s8 = scalar_lea.sflag [#allocation6], %s199_s30  ;;  %s2551_s29 = scalar_lea.vmem %s214_s14, 2048 }
  0x35   : > { %p2540_p2 = pneg %p2804_p11  ;;  %p2552_p9 = scmp.ne.s32.totalorder %s214_s14, %s2551_s29 }
  0x36   : > { %s2656_s22 = smov [#allocation5]  }
  0x37   : > { %p2554_p12 = pnand %p2552_p9, %p2540_p2  ;;  %s2556_s9 = sshll.u32 %s2656_s22, 4  ;;  %s2557_s9 = int_to_ptr.vmem [resolvable:$false] %s2556_s9 }
  0x38   : > { %s2558_s6 = scalar_lea.vmem %s2557_s9, 4096  ;;  %p2559_p0 = scmp.lt.s32.totalorder %s214_s14, %s2557_s9 }
  0x39   : > { %p2555_p13 = pneg %p2554_p12  ;;  %p2560_p7 = scmp.lt.s32.totalorder %s2558_s6, %s2551_s29 }
  0x3b   : > { %p2561_p6 = por %p2560_p7, %p2559_p0 }
  0x3d   : > { %p2562_p5 = pnand %p2561_p6, %p2555_p13 }
  0x3f   : > { %2565 = shalt.err (!%p2562_p5)
}
  0x40   : > { %s4841_s5 = smov 32   ;;  %s4842_s10 = smov 512  }
  0x41   : > { %2099 = dma.hbm_to_vmem [thread:$0]  (!%p2804_p11), %s212_s12, 2048, %s214_s14, %s200_s8, %s4842_s10, %s4842_s10, %s4841_s5  }
  0x42   : > { %225 = sbr.rel (%p2741_p8) target bundleno = 1478 (0x5c6), region = 36 }
  0x47   : > { %s2818_s30 = sand.u32 1, %s2634_s16  }
  0x48   : > { %s2025_s9 = sshll.u32 %s2818_s30, 7  ;;  %s228_s11 = scalar_lea.sflag [#allocation6], %s2818_s30 }
  0x49   : > { %s2822_s13 = scalar_lea.vmem [#allocation5], %s2025_s9 }
  0x4a   : > { %2617 = dma.done.wait (%p2731_p4), %s228_s11, 2048  }
  0x4b   : > { %2619 = vsyncadd (%p2731_p4), %s228_s11, 4294965248 }
  0x4c   : > { %2621 = dma.done.wait (%p2721_p1), [#allocation9], 24576  }
  0x4d   : > { %2623 = vsyncadd (%p2721_p1), [#allocation9], 4294942720  ;;  %s2028_s27 = sshll.u32 %s2818_s30, 5  ;;  %p2029_p6 = scmp.ne.s32.totalorder %s2642_s18, 0 }
  0x4e   : > { %s2833_s8 = scalar_lea.vmem [#allocation11], %s2028_s27 }
  0x4f   : > { %269 = sbr.rel (%p2029_p6) target bundleno = 87 (0x57), region = 52 }
  0x54   : > { %v2657_v0 = vmov 0.0  }
  0x55   : > { %270 = vst [vmem:[#allocation2] sm:$0xff] %v2657_v0  ;;  %271 = vst [vmem:[#allocation2 + $0x8] sm:$0xff] %v2657_v0 }
  0x56   : > { %272 = vst [vmem:[#allocation3] sm:$0xff] %v2657_v0  ;;  %273 = vst [vmem:[#allocation4] sm:$0xff] %v2657_v0 }
  0x57 PF: > { %v2836_v1 = vld [vmem:[#allocation8 + $0x1e8] sm:$0xff]  ;;  %v2838_v2 = vld [vmem:[#allocation8 + $0x1e0] sm:$0xff]  ;;  %v4531_v5 = vmov 0.0   ;;  %v2859_v10 = vld [vmem:[#allocation8 + $0x1f8] sm:$0xff]  ;;  %s2076_s12 = sshll.u32 %s2642_s18, 9  ;;  %s1909_s14 = sshll.u32 %s2833_s8, 4  ;;  %s4475_s14 = int_to_ptr.vmem [resolvable:$true] %s1909_s14 }
  0x58   : > { %v2840_v3 = vld [vmem:[#allocation8 + $0x1c8] sm:$0xff]  ;;  %493 = vmatprep.subr.mxu0 %v2836_v1  ;;  %v2843_v4 = vld [vmem:[#allocation8 + $0x1c0] sm:$0xff]  ;;  %557 = vmatprep.mubr.f32.mxu0 %v4531_v5  ;;  %v2865_v12 = vld [vmem:[#allocation8 + $0x1f0] sm:$0xff]  ;;  %s4473_s22 = scalar_lea.hbm %s4528_s4, %s2076_s12  ;;  %s1895_s6 = scalar_lea.sflag [#allocation7], %s2818_s30 }
  0x59   : > { %494 = vmatpush1.msra.mxu0 %v2838_v2  ;;  %v2847_v6 = vld [vmem:[#allocation8 + $0x1a8] sm:$0xff]  ;;  %628 = vmatprep.mubr.f32.mxu1 %v4531_v5  ;;  %v2851_v7 = vld [vmem:[#allocation8 + $0x1a0] sm:$0xff]  ;;  %v2871_v14 = vld [vmem:[#allocation8 + $0x1d8] sm:$0xff]  ;;  %s2566_s5 = scalar_lea.vmem %s4475_s14, 512  ;;  %s2659_s18 = smov [#allocation11]  }
  0x5a   : > { %495 = vmatprep.subr.mxu0 %v2840_v3  ;;  %v2854_v8 = vld [vmem:[#allocation8 + $0x188] sm:$0xff]  ;;  %v2857_v9 = vld [vmem:[#allocation8 + $0x180] sm:$0xff]  ;;  %564 = vmatprep.subr.mxu1 %v2859_v10  ;;  %v2873_v15 = vld [vmem:[#allocation8 + $0x1d0] sm:$0xff]  ;;  %p2567_p1 = scmp.ne.s32.totalorder %s4475_s14, %s2566_s5  ;;  %s2570_s10 = sshll.u32 %s2659_s18, 4  ;;  %s2571_s10 = int_to_ptr.vmem [resolvable:$false] %s2570_s10 }
  0x5b   : > { %496 = vmatpush1.msra.mxu0 %v2843_v4  ;;  %v2862_v11 = vld [vmem:[#allocation8 + $0x168] sm:$0xff]  ;;  %v2868_v13 = vld [vmem:[#allocation8 + $0x160] sm:$0xff]  ;;  %565 = vmatpush1.msra.mxu1 %v2865_v12  ;;  %v2879_v17 = vld [vmem:[#allocation8 + $0x1b8] sm:$0xff]  ;;  %s2572_s9 = scalar_lea.vmem %s2571_s10, 1024  ;;  %p2573_p10 = scmp.lt.s32.totalorder %s4475_s14, %s2571_s10 }
  0x5c   : > { %497 = vmatprep.subr.mxu0 %v2847_v6  ;;  %v2876_v16 = vld [vmem:[#allocation8 + $0x148] sm:$0xff]  ;;  %566 = vmatprep.subr.mxu1 %v2871_v14  ;;  %v2882_v18 = vld [vmem:[#allocation8 + $0x140] sm:$0xff]  ;;  %v2885_v19 = vld [vmem:[#allocation8 + $0x1b0] sm:$0xff]  ;;  %p2568_p4 = pnand %p2567_p1, %p2788_p3  ;;  %p2574_p11 = scmp.lt.s32.totalorder %s2572_s9, %s2566_s5 }
  0x5d   : > { %498 = vmatpush1.msra.mxu0 %v2851_v7  ;;  %567 = vmatpush1.msra.mxu1 %v2873_v15  ;;  %v2887_v20 = vld [vmem:[#allocation8 + $0x198] sm:$0xff]  ;;  %v2890_v21 = vld [vmem:[#allocation8 + $0x128] sm:$0xff]  ;;  %v2893_v22 = vld [vmem:[#allocation8 + $0x190] sm:$0xff] }
  0x5e   : > { %499 = vmatprep.subr.mxu0 %v2854_v8  ;;  %568 = vmatprep.subr.mxu1 %v2879_v17  ;;  %v2896_v23 = vld [vmem:[#allocation8 + $0x120] sm:$0xff]  ;;  %v2899_v24 = vld [vmem:[#allocation8 + $0x178] sm:$0xff]  ;;  %v2902_v25 = vld [vmem:[#allocation8 + $0x108] sm:$0xff]  ;;  %p2569_p8 = pneg %p2568_p4  ;;  %p2575_p2 = por %p2574_p11, %p2573_p10 }
  0x5f   : > { %500 = vmatpush1.msra.mxu0 %v2857_v9  ;;  %569 = vmatpush1.msra.mxu1 %v2885_v19  ;;  %v2905_v26 = vld [vmem:[#allocation8 + $0x170] sm:$0xff]  ;;  %v2908_v27 = vld [vmem:[#allocation8 + $0x100] sm:$0xff]  ;;  %v2911_v28 = vld [vmem:[#allocation8 + $0x158] sm:$0xff] }
  0x60   : > { %501 = vmatprep.subr.mxu0 %v2862_v11  ;;  %570 = vmatprep.subr.mxu1 %v2887_v20  ;;  %v2914_v29 = vld [vmem:[#allocation8 + $0xe8] sm:$0xff]  ;;  %v2917_v30 = vld [vmem:[#allocation8 + $0x150] sm:$0xff]  ;;  %v2920_v31 = vld [vmem:[#allocation8 + $0xe0] sm:$0xff]  ;;  %p2576_p9 = pnand %p2575_p2, %p2569_p8 }
  0x61   : > { %502 = vmatpush1.msra.mxu0 %v2868_v13  ;;  %571 = vmatpush1.msra.mxu1 %v2893_v22  ;;  %v2923_v32 = vld [vmem:[#allocation8 + $0x138] sm:$0xff]  ;;  %v2926_v33 = vld [vmem:[#allocation8 + $0xc8] sm:$0xff]  ;;  %v2929_v34 = vld [vmem:[#allocation8 + $0x130] sm:$0xff] }
  0x62   : > { %503 = vmatprep.subr.mxu0 %v2876_v16  ;;  %572 = vmatprep.subr.mxu1 %v2899_v24  ;;  %v2932_v35 = vld [vmem:[#allocation8 + $0xc0] sm:$0xff]  ;;  %v2935_v36 = vld [vmem:[#allocation8 + $0x118] sm:$0xff]  ;;  %v2938_v37 = vld [vmem:[#allocation8 + $0xa8] sm:$0xff] }
  0x63   : > { %504 = vmatpush1.msra.mxu0 %v2882_v18  ;;  %573 = vmatpush1.msra.mxu1 %v2905_v26  ;;  %v2941_v38 = vld [vmem:[#allocation8 + $0x110] sm:$0xff]  ;;  %v2944_v39 = vld [vmem:[#allocation8 + $0xa0] sm:$0xff]  ;;  %v2947_v40 = vld [vmem:[#allocation8 + $0xf8] sm:$0xff] }
  0x64   : > { %505 = vmatprep.subr.mxu0 %v2890_v21  ;;  %574 = vmatprep.subr.mxu1 %v2911_v28  ;;  %v2950_v41 = vld [vmem:[#allocation8 + $0x88] sm:$0xff]  ;;  %v2953_v42 = vld [vmem:[#allocation8 + $0xf0] sm:$0xff]  ;;  %v2956_v43 = vld [vmem:[#allocation8 + $0x80] sm:$0xff] }
  0x65   : > { %506 = vmatpush1.msra.mxu0 %v2896_v23  ;;  %575 = vmatpush1.msra.mxu1 %v2917_v30  ;;  %v2959_v44 = vld [vmem:[#allocation8 + $0xd8] sm:$0xff]  ;;  %v2962_v45 = vld [vmem:[#allocation8 + $0x68] sm:$0xff]  ;;  %v2965_v46 = vld [vmem:[#allocation8 + $0xd0] sm:$0xff] }
  0x66   : > { %507 = vmatprep.subr.mxu0 %v2902_v25  ;;  %576 = vmatprep.subr.mxu1 %v2923_v32  ;;  %4843 = vst [vmem:[#allocation15_spill] sm:$0xff] %v2962_v45  ;;  %v2968_v47 = vld [vmem:[#allocation8 + $0x60] sm:$0xff]  ;;  %v2971_v48 = vld [vmem:[#allocation8 + $0xb8] sm:$0xff]  ;;  %v2974_v49 = vld [vmem:[#allocation8 + $0x48] sm:$0xff] }
  0x67   : > { %508 = vmatpush1.msra.mxu0 %v2908_v27  ;;  %577 = vmatpush1.msra.mxu1 %v2929_v34  ;;  %4844 = vst [vmem:[#allocation16_spill] sm:$0xff] %v2968_v47  ;;  %4845 = vst [vmem:[#allocation17_spill] sm:$0xff] %v2974_v49  ;;  %v2977_v50 = vld [vmem:[#allocation8 + $0xb0] sm:$0xff]  ;;  %v2980_v51 = vld [vmem:[#allocation8 + $0x40] sm:$0xff] }
  0x68   : > { %509 = vmatprep.subr.mxu0 %v2914_v29  ;;  %578 = vmatprep.subr.mxu1 %v2935_v36  ;;  %4846 = vst [vmem:[#allocation18_spill] sm:$0xff] %v2980_v51  ;;  %v2983_v52 = vld [vmem:[#allocation8 + $0x98] sm:$0xff]  ;;  %v2986_v53 = vld [vmem:[#allocation8 + $0x28] sm:$0xff]  ;;  %v2989_v54 = vld [vmem:[#allocation8 + $0x90] sm:$0xff] }
  0x69   : > { %510 = vmatpush1.msra.mxu0 %v2920_v31  ;;  %579 = vmatpush1.msra.mxu1 %v2941_v38  ;;  %4847 = vst [vmem:[#allocation19_spill] sm:$0xff] %v2986_v53  ;;  %v2992_v55 = vld [vmem:[#allocation8 + $0x20] sm:$0xff]  ;;  %v2995_v56 = vld [vmem:[#allocation8 + $0x78] sm:$0xff]  ;;  %v2998_v57 = vld [vmem:[#allocation8 + $0x8] sm:$0xff] }
  0x6a   : > { %511 = vmatprep.subr.mxu0 %v2926_v33  ;;  %580 = vmatprep.subr.mxu1 %v2947_v40  ;;  %4848 = vst [vmem:[#allocation20_spill] sm:$0xff] %v2992_v55  ;;  %4849 = vst [vmem:[#allocation21_spill] sm:$0xff] %v2995_v56  ;;  %v3001_v58 = vld [vmem:[#allocation8 + $0x70] sm:$0xff]  ;;  %v3004_v59 = vld [vmem:[#allocation8] sm:$0xff] }
  0x6b   : > { %512 = vmatpush1.msra.mxu0 %v2932_v35  ;;  %581 = vmatpush1.msra.mxu1 %v2953_v42  ;;  %4850 = vst [vmem:[#allocation22_spill] sm:$0xff] %v2998_v57  ;;  %4851 = vst [vmem:[#allocation23_spill] sm:$0xff] %v3001_v58  ;;  %v3007_v60 = vld [vmem:[#allocation8 + $0x58] sm:$0xff]  ;;  %v488_v61 = vld [vmem:[#allocation2] sm:$0xff] }
  0x6c   : > { %513 = vmatprep.subr.mxu0 %v2938_v37  ;;  %582 = vmatprep.subr.mxu1 %v2959_v44  ;;  %4852 = vst [vmem:[#allocation24_spill] sm:$0xff] %v3004_v59  ;;  %4853 = vst [vmem:[#allocation25_spill] sm:$0xff] %v3007_v60  ;;  %v3011_v62 = vld [vmem:[#allocation8 + $0x50] sm:$0xff]  ;;  %v3015_v63 = vld [vmem:[#allocation8 + $0x38] sm:$0xff] }
  0x6d   : > { %514 = vmatpush1.msra.mxu0 %v2944_v39  ;;  %583 = vmatpush1.msra.mxu1 %v2965_v46  ;;  %4854 = vst [vmem:[#allocation26_spill] sm:$0xff] %v3011_v62  ;;  %4855 = vst [vmem:[#allocation27_spill] sm:$0xff] %v3015_v63  ;;  %v3019_v0 = vld [vmem:[#allocation8 + $0x30] sm:$0xff]  ;;  %v3022_v5 = vld [vmem:[#allocation8 + $0x18] sm:$0xff] }
  0x6e   : > { %515 = vmatprep.subr.mxu0 %v2950_v41  ;;  %584 = vmatprep.subr.mxu1 %v2971_v48  ;;  %4856 = vst [vmem:[#allocation28_spill] sm:$0xff] %v3019_v0  ;;  %4857 = vst [vmem:[#allocation29_spill] sm:$0xff] %v3022_v5 }
  0x6f   : > { %516 = vmatpush1.msra.mxu0 %v2956_v43  ;;  %585 = vmatpush1.msra.mxu1 %v2977_v50 }
  0x70   : > { %517 = vmatprep.subr.mxu0 %v2962_v45  ;;  %586 = vmatprep.subr.mxu1 %v2983_v52 }
  0x71   : > { %518 = vmatpush1.msra.mxu0 %v2968_v47  ;;  %587 = vmatpush1.msra.mxu1 %v2989_v54 }
  0x72   : > { %519 = vmatprep.subr.mxu0 %v2974_v49  ;;  %588 = vmatprep.subr.mxu1 %v2995_v56 }
  0x73   : > { %520 = vmatpush1.msra.mxu0 %v2980_v51  ;;  %589 = vmatpush1.msra.mxu1 %v3001_v58  ;;  %v492_v58 = vld [vmem:[%s2822_s13 + $0x18] sm:$0xff] }
  0x74   : > { %521 = vmatprep.subr.mxu0 %v2986_v53  ;;  %590 = vmatprep.subr.mxu1 %v3007_v60  ;;  %v3036_v53 = vld [vmem:[#allocation10 + $0x1e0] sm:$0xff]  ;;  %v491_v60 = vld [vmem:[%s2822_s13 + $0x10] sm:$0xff] }
  0x75   : > { %522 = vmatpush1.msra.mxu0 %v2992_v55  ;;  %591 = vmatpush1.msra.mxu1 %v3011_v62  ;;  %v3025_v55 = vld [vmem:[#allocation8 + $0x10] sm:$0xff]  ;;  %4861 = vst [vmem:[#allocation33_spill] sm:$0xff] %v3036_v53 }
  0x76   : > { %523 = vmatprep.subr.mxu0 %v2998_v57  ;;  %592 = vmatprep.subr.mxu1 %v3015_v63  ;;  %4858 = vst [vmem:[#allocation30_spill] sm:$0xff] %v3025_v55  ;;  %v3032_v57 = vld [vmem:[#allocation10 + $0x1f8] sm:$0xff]  ;;  %v3038_v63 = vld [vmem:[#allocation10 + $0x1f0] sm:$0xff] }
  0x77   : > { %524 = vmatpush1.msra.mxu0 %v3004_v59  ;;  %593 = vmatpush1.msra.mxu1 %v3019_v0  ;;  %v3030_v59 = vld [vmem:[#allocation10 + $0x1e8] sm:$0xff]  ;;  %4860 = vst [vmem:[#allocation32_spill] sm:$0xff] %v3032_v57  ;;  %4862 = vst [vmem:[#allocation34_spill] sm:$0xff] %v3038_v63  ;;  %v3199_v0 = vld [vmem:[#allocation10 + $0x38] sm:$0xff] }
  0x78   : > { %558 = vmatmul.mubr.f32.vlgmr.msra.gmra.mxu0 %v488_v61  ;;  %594 = vmatprep.subr.mxu1 %v3022_v5  ;;  %4859 = vst [vmem:[#allocation31_spill] sm:$0xff] %v3030_v59  ;;  %v3042_v5 = vld [vmem:[#allocation10 + $0x1c8] sm:$0xff]  ;;  %4916 = vst [vmem:[#allocation88_spill] sm:$0xff] %v3199_v0 }
  0x79   : > { %595 = vmatpush1.msra.mxu1 %v3025_v55  ;;  %668 = vmatprep.subr.mxu0 %v3030_v59  ;;  %4863 = vst [vmem:[#allocation35_spill] sm:$0xff] %v3042_v5  ;;  %v3044_v55 = vld [vmem:[#allocation10 + $0x1d8] sm:$0xff]  ;;  %v3050_v59 = vld [vmem:[#allocation10 + $0x1d0] sm:$0xff] }
  0x7a   : > { %629 = vmatmul.mubr.f32.vlgmr.msra.gmra.mxu1 %v488_v61  ;;  %739 = vmatprep.subr.mxu1 %v3032_v57  ;;  %4864 = vst [vmem:[#allocation36_spill] sm:$0xff] %v3044_v55  ;;  %v3048_v61 = vld [vmem:[#allocation10 + $0x1c0] sm:$0xff]  ;;  %4866 = vst [vmem:[#allocation38_spill] sm:$0xff] %v3050_v59  ;;  %v3054_v57 = vld [vmem:[#allocation10 + $0x1a8] sm:$0xff] }
  0x7b   : > { %669 = vmatpush1.msra.mxu0 %v3036_v53  ;;  %740 = vmatpush1.msra.mxu1 %v3038_v63  ;;  %4865 = vst [vmem:[#allocation37_spill] sm:$0xff] %v3048_v61  ;;  %4867 = vst [vmem:[#allocation39_spill] sm:$0xff] %v3054_v57  ;;  %v3056_v53 = vld [vmem:[#allocation10 + $0x1b8] sm:$0xff]  ;;  %v3060_v63 = vld [vmem:[#allocation10 + $0x1a0] sm:$0xff] }
  0x7c   : > { %670 = vmatprep.subr.mxu0 %v3042_v5  ;;  %741 = vmatprep.subr.mxu1 %v3044_v55  ;;  %4868 = vst [vmem:[#allocation40_spill] sm:$0xff] %v3056_v53  ;;  %4869 = vst [vmem:[#allocation41_spill] sm:$0xff] %v3060_v63  ;;  %v3062_v5 = vld [vmem:[#allocation10 + $0x1b0] sm:$0xff]  ;;  %v3066_v55 = vld [vmem:[#allocation10 + $0x188] sm:$0xff] }
  0x7d   : > { %671 = vmatpush1.msra.mxu0 %v3048_v61  ;;  %742 = vmatpush1.msra.mxu1 %v3050_v59  ;;  %4870 = vst [vmem:[#allocation42_spill] sm:$0xff] %v3062_v5  ;;  %4871 = vst [vmem:[#allocation43_spill] sm:$0xff] %v3066_v55  ;;  %v3068_v61 = vld [vmem:[#allocation10 + $0x198] sm:$0xff]  ;;  %v3072_v59 = vld [vmem:[#allocation10 + $0x180] sm:$0xff] }
  0x7e   : > { %672 = vmatprep.subr.mxu0 %v3054_v57  ;;  %743 = vmatprep.subr.mxu1 %v3056_v53  ;;  %4872 = vst [vmem:[#allocation44_spill] sm:$0xff] %v3068_v61  ;;  %4873 = vst [vmem:[#allocation45_spill] sm:$0xff] %v3072_v59  ;;  %v3074_v57 = vld [vmem:[#allocation10 + $0x190] sm:$0xff]  ;;  %v3078_v53 = vld [vmem:[#allocation10 + $0x168] sm:$0xff] }
  0x7f   : > { %673 = vmatpush1.msra.mxu0 %v3060_v63  ;;  %744 = vmatpush1.msra.mxu1 %v3062_v5  ;;  %4874 = vst [vmem:[#allocation46_spill] sm:$0xff] %v3074_v57  ;;  %4875 = vst [vmem:[#allocation47_spill] sm:$0xff] %v3078_v53  ;;  %v3080_v63 = vld [vmem:[#allocation10 + $0x178] sm:$0xff]  ;;  %v3084_v5 = vld [vmem:[#allocation10 + $0x160] sm:$0xff] }
  0x80   : > { %674 = vmatprep.subr.mxu0 %v3066_v55  ;;  %745 = vmatprep.subr.mxu1 %v3068_v61  ;;  %4876 = vst [vmem:[#allocation48_spill] sm:$0xff] %v3080_v63  ;;  %4877 = vst [vmem:[#allocation49_spill] sm:$0xff] %v3084_v5  ;;  %v3086_v55 = vld [vmem:[#allocation10 + $0x170] sm:$0xff]  ;;  %v3090_v61 = vld [vmem:[#allocation10 + $0x148] sm:$0xff] }
  0x81   : > { %675 = vmatpush1.msra.mxu0 %v3072_v59  ;;  %746 = vmatpush1.msra.mxu1 %v3074_v57  ;;  %4878 = vst [vmem:[#allocation50_spill] sm:$0xff] %v3086_v55  ;;  %4879 = vst [vmem:[#allocation51_spill] sm:$0xff] %v3090_v61  ;;  %v3092_v59 = vld [vmem:[#allocation10 + $0x158] sm:$0xff]  ;;  %v3096_v57 = vld [vmem:[#allocation10 + $0x140] sm:$0xff] }
  0x82   : > { %676 = vmatprep.subr.mxu0 %v3078_v53  ;;  %747 = vmatprep.subr.mxu1 %v3080_v63  ;;  %4880 = vst [vmem:[#allocation52_spill] sm:$0xff] %v3092_v59  ;;  %4881 = vst [vmem:[#allocation53_spill] sm:$0xff] %v3096_v57  ;;  %v3098_v53 = vld [vmem:[#allocation10 + $0x150] sm:$0xff]  ;;  %v3102_v63 = vld [vmem:[#allocation10 + $0x128] sm:$0xff] }
  0x83   : > { %677 = vmatpush1.msra.mxu0 %v3084_v5  ;;  %748 = vmatpush1.msra.mxu1 %v3086_v55  ;;  %4882 = vst [vmem:[#allocation54_spill] sm:$0xff] %v3098_v53  ;;  %4883 = vst [vmem:[#allocation55_spill] sm:$0xff] %v3102_v63  ;;  %v3104_v5 = vld [vmem:[#allocation10 + $0x138] sm:$0xff]  ;;  %v3108_v55 = vld [vmem:[#allocation10 + $0x120] sm:$0xff] }
  0x84   : > { %678 = vmatprep.subr.mxu0 %v3090_v61  ;;  %749 = vmatprep.subr.mxu1 %v3092_v59  ;;  %4884 = vst [vmem:[#allocation56_spill] sm:$0xff] %v3104_v5  ;;  %4885 = vst [vmem:[#allocation57_spill] sm:$0xff] %v3108_v55  ;;  %v3110_v61 = vld [vmem:[#allocation10 + $0x130] sm:$0xff]  ;;  %v3114_v59 = vld [vmem:[#allocation10 + $0x108] sm:$0xff] }
  0x85   : > { %679 = vmatpush1.msra.mxu0 %v3096_v57  ;;  %750 = vmatpush1.msra.mxu1 %v3098_v53  ;;  %4886 = vst [vmem:[#allocation58_spill] sm:$0xff] %v3110_v61  ;;  %4887 = vst [vmem:[#allocation59_spill] sm:$0xff] %v3114_v59  ;;  %v3116_v57 = vld [vmem:[#allocation10 + $0x118] sm:$0xff]  ;;  %v3120_v53 = vld [vmem:[#allocation10 + $0x100] sm:$0xff] }
  0x86   : > { %680 = vmatprep.subr.mxu0 %v3102_v63  ;;  %751 = vmatprep.subr.mxu1 %v3104_v5  ;;  %4888 = vst [vmem:[#allocation60_spill] sm:$0xff] %v3116_v57  ;;  %4889 = vst [vmem:[#allocation61_spill] sm:$0xff] %v3120_v53  ;;  %v3122_v63 = vld [vmem:[#allocation10 + $0x110] sm:$0xff]  ;;  %v3126_v5 = vld [vmem:[#allocation10 + $0xe8] sm:$0xff] }
  0x87   : > { %681 = vmatpush1.msra.mxu0 %v3108_v55  ;;  %752 = vmatpush1.msra.mxu1 %v3110_v61  ;;  %4890 = vst [vmem:[#allocation62_spill] sm:$0xff] %v3122_v63  ;;  %4891 = vst [vmem:[#allocation63_spill] sm:$0xff] %v3126_v5  ;;  %v3128_v55 = vld [vmem:[#allocation10 + $0xf8] sm:$0xff]  ;;  %v3132_v61 = vld [vmem:[#allocation10 + $0xe0] sm:$0xff] }
  0x88   : > { %682 = vmatprep.subr.mxu0 %v3114_v59  ;;  %753 = vmatprep.subr.mxu1 %v3116_v57  ;;  %4892 = vst [vmem:[#allocation64_spill] sm:$0xff] %v3128_v55  ;;  %4893 = vst [vmem:[#allocation65_spill] sm:$0xff] %v3132_v61  ;;  %v3134_v59 = vld [vmem:[#allocation10 + $0xf0] sm:$0xff]  ;;  %v3138_v57 = vld [vmem:[#allocation10 + $0xc8] sm:$0xff] }
  0x89   : > { %683 = vmatpush1.msra.mxu0 %v3120_v53  ;;  %754 = vmatpush1.msra.mxu1 %v3122_v63  ;;  %4894 = vst [vmem:[#allocation66_spill] sm:$0xff] %v3134_v59  ;;  %4895 = vst [vmem:[#allocation67_spill] sm:$0xff] %v3138_v57  ;;  %v3140_v53 = vld [vmem:[#allocation10 + $0xd8] sm:$0xff]  ;;  %v3144_v63 = vld [vmem:[#allocation10 + $0xc0] sm:$0xff] }
  0x8a   : > { %684 = vmatprep.subr.mxu0 %v3126_v5  ;;  %755 = vmatprep.subr.mxu1 %v3128_v55  ;;  %4896 = vst [vmem:[#allocation68_spill] sm:$0xff] %v3140_v53  ;;  %4897 = vst [vmem:[#allocation69_spill] sm:$0xff] %v3144_v63  ;;  %v3146_v5 = vld [vmem:[#allocation10 + $0xd0] sm:$0xff]  ;;  %v3150_v55 = vld [vmem:[#allocation10 + $0xa8] sm:$0xff] }
  0x8b   : > { %685 = vmatpush1.msra.mxu0 %v3132_v61  ;;  %756 = vmatpush1.msra.mxu1 %v3134_v59  ;;  %4898 = vst [vmem:[#allocation70_spill] sm:$0xff] %v3146_v5  ;;  %4899 = vst [vmem:[#allocation71_spill] sm:$0xff] %v3150_v55  ;;  %v3152_v61 = vld [vmem:[#allocation10 + $0xb8] sm:$0xff]  ;;  %v3156_v59 = vld [vmem:[#allocation10 + $0xa0] sm:$0xff] }
  0x8c   : > { %686 = vmatprep.subr.mxu0 %v3138_v57  ;;  %757 = vmatprep.subr.mxu1 %v3140_v53  ;;  %4900 = vst [vmem:[#allocation72_spill] sm:$0xff] %v3152_v61  ;;  %4901 = vst [vmem:[#allocation73_spill] sm:$0xff] %v3156_v59  ;;  %v3158_v57 = vld [vmem:[#allocation10 + $0xb0] sm:$0xff]  ;;  %v3162_v53 = vld [vmem:[#allocation10 + $0x88] sm:$0xff] }
  0x8d   : > { %687 = vmatpush1.msra.mxu0 %v3144_v63  ;;  %758 = vmatpush1.msra.mxu1 %v3146_v5  ;;  %4902 = vst [vmem:[#allocation74_spill] sm:$0xff] %v3158_v57  ;;  %4903 = vst [vmem:[#allocation75_spill] sm:$0xff] %v3162_v53  ;;  %v3164_v63 = vld [vmem:[#allocation10 + $0x98] sm:$0xff]  ;;  %v3168_v5 = vld [vmem:[#allocation10 + $0x80] sm:$0xff] }
  0x8e   : > { %688 = vmatprep.subr.mxu0 %v3150_v55  ;;  %759 = vmatprep.subr.mxu1 %v3152_v61  ;;  %4904 = vst [vmem:[#allocation76_spill] sm:$0xff] %v3164_v63  ;;  %4905 = vst [vmem:[#allocation77_spill] sm:$0xff] %v3168_v5  ;;  %v3170_v55 = vld [vmem:[#allocation10 + $0x90] sm:$0xff]  ;;  %v3174_v61 = vld [vmem:[#allocation10 + $0x68] sm:$0xff] }
  0x8f   : > { %689 = vmatpush1.msra.mxu0 %v3156_v59  ;;  %760 = vmatpush1.msra.mxu1 %v3158_v57  ;;  %4906 = vst [vmem:[#allocation78_spill] sm:$0xff] %v3170_v55  ;;  %4907 = vst [vmem:[#allocation79_spill] sm:$0xff] %v3174_v61  ;;  %v3176_v59 = vld [vmem:[#allocation10 + $0x78] sm:$0xff]  ;;  %v3180_v57 = vld [vmem:[#allocation10 + $0x60] sm:$0xff] }
  0x90   : > { %690 = vmatprep.subr.mxu0 %v3162_v53  ;;  %761 = vmatprep.subr.mxu1 %v3164_v63  ;;  %4908 = vst [vmem:[#allocation80_spill] sm:$0xff] %v3176_v59  ;;  %4909 = vst [vmem:[#allocation81_spill] sm:$0xff] %v3180_v57  ;;  %v3182_v53 = vld [vmem:[#allocation10 + $0x70] sm:$0xff]  ;;  %v3186_v63 = vld [vmem:[#allocation10 + $0x48] sm:$0xff] }
  0x91   : > { %691 = vmatpush1.msra.mxu0 %v3168_v5  ;;  %762 = vmatpush1.msra.mxu1 %v3170_v55  ;;  %4910 = vst [vmem:[#allocation82_spill] sm:$0xff] %v3182_v53  ;;  %4911 = vst [vmem:[#allocation83_spill] sm:$0xff] %v3186_v63  ;;  %v3188_v5 = vld [vmem:[#allocation10 + $0x58] sm:$0xff]  ;;  %v3192_v55 = vld [vmem:[#allocation10 + $0x40] sm:$0xff] }
  0x92   : > { %692 = vmatprep.subr.mxu0 %v3174_v61  ;;  %763 = vmatprep.subr.mxu1 %v3176_v59  ;;  %4912 = vst [vmem:[#allocation84_spill] sm:$0xff] %v3188_v5  ;;  %4913 = vst [vmem:[#allocation85_spill] sm:$0xff] %v3192_v55  ;;  %v3195_v59 = vld [vmem:[#allocation10 + $0x50] sm:$0xff]  ;;  %v3197_v61 = vld [vmem:[#allocation10 + $0x28] sm:$0xff] }
  0x93   : > { %693 = vmatpush1.msra.mxu0 %v3180_v57  ;;  %764 = vmatpush1.msra.mxu1 %v3182_v53  ;;  %4914 = vst [vmem:[#allocation86_spill] sm:$0xff] %v3195_v59  ;;  %4915 = vst [vmem:[#allocation87_spill] sm:$0xff] %v3197_v61  ;;  %v3203_v53 = vld [vmem:[#allocation10 + $0x20] sm:$0xff]  ;;  %v3205_v57 = vld [vmem:[#allocation10 + $0x30] sm:$0xff] }
  0x94   : > { %694 = vmatprep.subr.mxu0 %v3186_v63  ;;  %765 = vmatprep.subr.mxu1 %v3188_v5  ;;  %4917 = vst [vmem:[#allocation89_spill] sm:$0xff] %v3203_v53  ;;  %4918 = vst [vmem:[#allocation90_spill] sm:$0xff] %v3205_v57  ;;  %v3209_v5 = vld [vmem:[#allocation10 + $0x8] sm:$0xff]  ;;  %v3215_v63 = vld [vmem:[#allocation10] sm:$0xff] }
  0x95   : > { %695 = vmatpush1.msra.mxu0 %v3192_v55  ;;  %766 = vmatpush1.msra.mxu1 %v3195_v59  ;;  %4919 = vst [vmem:[#allocation91_spill] sm:$0xff] %v3209_v5  ;;  %v3211_v55 = vld [vmem:[#allocation10 + $0x18] sm:$0xff]  ;;  %4921 = vst [vmem:[#allocation93_spill] sm:$0xff] %v3215_v63  ;;  %v3217_v59 = vld [vmem:[#allocation10 + $0x10] sm:$0xff] }
  0x96   : > { %696 = vmatprep.subr.mxu0 %v3197_v61  ;;  %767 = vmatprep.subr.mxu1 %v3199_v0  ;;  %4920 = vst [vmem:[#allocation92_spill] sm:$0xff] %v3211_v55  ;;  %4922 = vst [vmem:[#allocation94_spill] sm:$0xff] %v3217_v59  ;;  %v3221_v61 = vld [vmem:[#allocation10 + $0x3e8] sm:$0xff]  ;;  %v3223_v0 = vld [vmem:[#allocation10 + $0x3f8] sm:$0xff] }
  0x97   : > { %697 = vmatpush1.msra.mxu0 %v3203_v53  ;;  %768 = vmatpush1.msra.mxu1 %v3205_v57  ;;  %4923 = vst [vmem:[#allocation95_spill] sm:$0xff] %v3221_v61  ;;  %4924 = vst [vmem:[#allocation96_spill] sm:$0xff] %v3223_v0  ;;  %v3227_v53 = vld [vmem:[#allocation10 + $0x3e0] sm:$0xff]  ;;  %v3229_v57 = vld [vmem:[#allocation10 + $0x3f0] sm:$0xff] }
  0x98   : > { %698 = vmatprep.subr.mxu0 %v3209_v5  ;;  %769 = vmatprep.subr.mxu1 %v3211_v55  ;;  %4925 = vst [vmem:[#allocation97_spill] sm:$0xff] %v3227_v53  ;;  %4926 = vst [vmem:[#allocation98_spill] sm:$0xff] %v3229_v57  ;;  %v3233_v5 = vld [vmem:[#allocation10 + $0x3c8] sm:$0xff]  ;;  %v3235_v55 = vld [vmem:[#allocation10 + $0x3d8] sm:$0xff] }
  0x99   : > { %699 = vmatpush1.msra.mxu0 %v3215_v63  ;;  %770 = vmatpush1.msra.mxu1 %v3217_v59  ;;  %4927 = vst [vmem:[#allocation99_spill] sm:$0xff] %v3233_v5  ;;  %4928 = vst [vmem:[#allocation100_spill] sm:$0xff] %v3235_v55  ;;  %v3239_v63 = vld [vmem:[#allocation10 + $0x3c0] sm:$0xff]  ;;  %v3241_v59 = vld [vmem:[#allocation10 + $0x3d0] sm:$0xff] }
  0x9a   : > { %700 = vmatprep.subr.mxu0 %v3221_v61  ;;  %771 = vmatprep.subr.mxu1 %v3223_v0  ;;  %4929 = vst [vmem:[#allocation101_spill] sm:$0xff] %v3239_v63  ;;  %4930 = vst [vmem:[#allocation102_spill] sm:$0xff] %v3241_v59  ;;  %v3245_v61 = vld [vmem:[#allocation10 + $0x3a8] sm:$0xff]  ;;  %v3247_v0 = vld [vmem:[#allocation10 + $0x3b8] sm:$0xff] }
  0x9b   : > { %701 = vmatpush2.msra.mxu0 %v3227_v53  ;;  %772 = vmatpush2.msra.mxu1 %v3229_v57  ;;  %4931 = vst [vmem:[#allocation103_spill] sm:$0xff] %v3245_v61  ;;  %4932 = vst [vmem:[#allocation104_spill] sm:$0xff] %v3247_v0  ;;  %v3251_v53 = vld [vmem:[#allocation10 + $0x3a0] sm:$0xff]  ;;  %v3253_v57 = vld [vmem:[#allocation10 + $0x3b0] sm:$0xff] }
  0x9c   : > { %702 = vmatprep.subr.mxu0 %v3233_v5  ;;  %773 = vmatprep.subr.mxu1 %v3235_v55  ;;  %4933 = vst [vmem:[#allocation105_spill] sm:$0xff] %v3251_v53  ;;  %4934 = vst [vmem:[#allocation106_spill] sm:$0xff] %v3253_v57  ;;  %v3257_v5 = vld [vmem:[#allocation10 + $0x388] sm:$0xff]  ;;  %v3259_v55 = vld [vmem:[#allocation10 + $0x398] sm:$0xff] }
  0x9d   : > { %703 = vmatpush2.msra.mxu0 %v3239_v63  ;;  %774 = vmatpush2.msra.mxu1 %v3241_v59  ;;  %4935 = vst [vmem:[#allocation107_spill] sm:$0xff] %v3257_v5  ;;  %4936 = vst [vmem:[#allocation108_spill] sm:$0xff] %v3259_v55  ;;  %v3263_v63 = vld [vmem:[#allocation10 + $0x380] sm:$0xff]  ;;  %v3265_v59 = vld [vmem:[#allocation10 + $0x390] sm:$0xff] }
  0x9e   : > { %704 = vmatprep.subr.mxu0 %v3245_v61  ;;  %775 = vmatprep.subr.mxu1 %v3247_v0  ;;  %4937 = vst [vmem:[#allocation109_spill] sm:$0xff] %v3263_v63  ;;  %4938 = vst [vmem:[#allocation110_spill] sm:$0xff] %v3265_v59  ;;  %v3269_v61 = vld [vmem:[#allocation10 + $0x368] sm:$0xff]  ;;  %v3271_v0 = vld [vmem:[#allocation10 + $0x378] sm:$0xff] }
  0x9f   : > { %705 = vmatpush2.msra.mxu0 %v3251_v53  ;;  %776 = vmatpush2.msra.mxu1 %v3253_v57  ;;  %4939 = vst [vmem:[#allocation111_spill] sm:$0xff] %v3269_v61  ;;  %4940 = vst [vmem:[#allocation112_spill] sm:$0xff] %v3271_v0  ;;  %v3275_v53 = vld [vmem:[#allocation10 + $0x360] sm:$0xff]  ;;  %v3277_v57 = vld [vmem:[#allocation10 + $0x370] sm:$0xff] }
  0xa0   : > { %706 = vmatprep.subr.mxu0 %v3257_v5  ;;  %777 = vmatprep.subr.mxu1 %v3259_v55  ;;  %4941 = vst [vmem:[#allocation113_spill] sm:$0xff] %v3275_v53  ;;  %4942 = vst [vmem:[#allocation114_spill] sm:$0xff] %v3277_v57  ;;  %v3281_v5 = vld [vmem:[#allocation10 + $0x348] sm:$0xff]  ;;  %v3283_v55 = vld [vmem:[#allocation10 + $0x358] sm:$0xff] }
  0xa1   : > { %707 = vmatpush2.msra.mxu0 %v3263_v63  ;;  %778 = vmatpush2.msra.mxu1 %v3265_v59  ;;  %4943 = vst [vmem:[#allocation115_spill] sm:$0xff] %v3281_v5  ;;  %4944 = vst [vmem:[#allocation116_spill] sm:$0xff] %v3283_v55  ;;  %v3287_v63 = vld [vmem:[#allocation10 + $0x340] sm:$0xff]  ;;  %v3289_v59 = vld [vmem:[#allocation10 + $0x350] sm:$0xff] }
  0xa2   : > { %708 = vmatprep.subr.mxu0 %v3269_v61  ;;  %779 = vmatprep.subr.mxu1 %v3271_v0  ;;  %4945 = vst [vmem:[#allocation117_spill] sm:$0xff] %v3287_v63  ;;  %4946 = vst [vmem:[#allocation118_spill] sm:$0xff] %v3289_v59  ;;  %v3293_v61 = vld [vmem:[#allocation10 + $0x328] sm:$0xff]  ;;  %v3295_v0 = vld [vmem:[#allocation10 + $0x338] sm:$0xff] }
  0xa3   : > { %709 = vmatpush2.msra.mxu0 %v3275_v53  ;;  %780 = vmatpush2.msra.mxu1 %v3277_v57  ;;  %4947 = vst [vmem:[#allocation119_spill] sm:$0xff] %v3293_v61  ;;  %4948 = vst [vmem:[#allocation120_spill] sm:$0xff] %v3295_v0  ;;  %v3299_v53 = vld [vmem:[#allocation10 + $0x320] sm:$0xff]  ;;  %v3301_v57 = vld [vmem:[#allocation10 + $0x330] sm:$0xff] }
  0xa4   : > { %710 = vmatprep.subr.mxu0 %v3281_v5  ;;  %781 = vmatprep.subr.mxu1 %v3283_v55  ;;  %4949 = vst [vmem:[#allocation121_spill] sm:$0xff] %v3299_v53  ;;  %4950 = vst [vmem:[#allocation122_spill] sm:$0xff] %v3301_v57  ;;  %v3305_v5 = vld [vmem:[#allocation10 + $0x308] sm:$0xff]  ;;  %v3307_v55 = vld [vmem:[#allocation10 + $0x318] sm:$0xff] }
  0xa5   : > { %711 = vmatpush2.msra.mxu0 %v3287_v63  ;;  %782 = vmatpush2.msra.mxu1 %v3289_v59  ;;  %4951 = vst [vmem:[#allocation123_spill] sm:$0xff] %v3305_v5  ;;  %4952 = vst [vmem:[#allocation124_spill] sm:$0xff] %v3307_v55  ;;  %v3311_v63 = vld [vmem:[#allocation10 + $0x300] sm:$0xff]  ;;  %v3313_v59 = vld [vmem:[#allocation10 + $0x310] sm:$0xff] }
  0xa6   : > { %712 = vmatprep.subr.mxu0 %v3293_v61  ;;  %783 = vmatprep.subr.mxu1 %v3295_v0  ;;  %4953 = vst [vmem:[#allocation125_spill] sm:$0xff] %v3311_v63  ;;  %4954 = vst [vmem:[#allocation126_spill] sm:$0xff] %v3313_v59  ;;  %v3317_v61 = vld [vmem:[#allocation10 + $0x2e8] sm:$0xff]  ;;  %v3319_v0 = vld [vmem:[#allocation10 + $0x2f8] sm:$0xff] }
  0xa7   : > { %713 = vmatpush2.msra.mxu0 %v3299_v53  ;;  %784 = vmatpush2.msra.mxu1 %v3301_v57  ;;  %4955 = vst [vmem:[#allocation127_spill] sm:$0xff] %v3317_v61  ;;  %4956 = vst [vmem:[#allocation128_spill] sm:$0xff] %v3319_v0  ;;  %v3323_v53 = vld [vmem:[#allocation10 + $0x2e0] sm:$0xff]  ;;  %v3325_v57 = vld [vmem:[#allocation10 + $0x2f0] sm:$0xff] }
  0xa8   : > { %714 = vmatprep.subr.mxu0 %v3305_v5  ;;  %785 = vmatprep.subr.mxu1 %v3307_v55  ;;  %4957 = vst [vmem:[#allocation129_spill] sm:$0xff] %v3323_v53  ;;  %4958 = vst [vmem:[#allocation130_spill] sm:$0xff] %v3325_v57  ;;  %v3329_v5 = vld [vmem:[#allocation10 + $0x2c8] sm:$0xff]  ;;  %v3331_v55 = vld [vmem:[#allocation10 + $0x2d8] sm:$0xff] }
  0xa9   : > { %715 = vmatpush2.msra.mxu0 %v3311_v63  ;;  %786 = vmatpush2.msra.mxu1 %v3313_v59  ;;  %4959 = vst [vmem:[#allocation131_spill] sm:$0xff] %v3329_v5  ;;  %4960 = vst [vmem:[#allocation132_spill] sm:$0xff] %v3331_v55  ;;  %v3335_v63 = vld [vmem:[#allocation10 + $0x2c0] sm:$0xff]  ;;  %v3337_v59 = vld [vmem:[#allocation10 + $0x2d0] sm:$0xff] }
  0xaa   : > { %716 = vmatprep.subr.mxu0 %v3317_v61  ;;  %787 = vmatprep.subr.mxu1 %v3319_v0  ;;  %4961 = vst [vmem:[#allocation133_spill] sm:$0xff] %v3335_v63  ;;  %4962 = vst [vmem:[#allocation134_spill] sm:$0xff] %v3337_v59  ;;  %v3341_v61 = vld [vmem:[#allocation10 + $0x2a8] sm:$0xff]  ;;  %v3343_v0 = vld [vmem:[#allocation10 + $0x2b8] sm:$0xff] }
  0xab   : > { %717 = vmatpush2.msra.mxu0 %v3323_v53  ;;  %788 = vmatpush2.msra.mxu1 %v3325_v57  ;;  %4963 = vst [vmem:[#allocation135_spill] sm:$0xff] %v3341_v61  ;;  %4964 = vst [vmem:[#allocation136_spill] sm:$0xff] %v3343_v0  ;;  %v3347_v53 = vld [vmem:[#allocation10 + $0x2a0] sm:$0xff]  ;;  %v3349_v57 = vld [vmem:[#allocation10 + $0x2b0] sm:$0xff] }
  0xac   : > { %718 = vmatprep.subr.mxu0 %v3329_v5  ;;  %789 = vmatprep.subr.mxu1 %v3331_v55  ;;  %4965 = vst [vmem:[#allocation137_spill] sm:$0xff] %v3347_v53  ;;  %4966 = vst [vmem:[#allocation138_spill] sm:$0xff] %v3349_v57  ;;  %v3353_v5 = vld [vmem:[#allocation10 + $0x288] sm:$0xff]  ;;  %v3355_v55 = vld [vmem:[#allocation10 + $0x298] sm:$0xff] }
  0xad   : > { %719 = vmatpush2.msra.mxu0 %v3335_v63  ;;  %790 = vmatpush2.msra.mxu1 %v3337_v59  ;;  %4967 = vst [vmem:[#allocation139_spill] sm:$0xff] %v3353_v5  ;;  %4968 = vst [vmem:[#allocation140_spill] sm:$0xff] %v3355_v55  ;;  %v3359_v63 = vld [vmem:[#allocation10 + $0x280] sm:$0xff]  ;;  %v3361_v59 = vld [vmem:[#allocation10 + $0x290] sm:$0xff] }
  0xae   : > { %720 = vmatprep.subr.mxu0 %v3341_v61  ;;  %791 = vmatprep.subr.mxu1 %v3343_v0  ;;  %4969 = vst [vmem:[#allocation141_spill] sm:$0xff] %v3359_v63  ;;  %4970 = vst [vmem:[#allocation142_spill] sm:$0xff] %v3361_v59  ;;  %v3365_v61 = vld [vmem:[#allocation10 + $0x268] sm:$0xff]  ;;  %v3367_v0 = vld [vmem:[#allocation10 + $0x278] sm:$0xff] }
  0xaf   : > { %721 = vmatpush2.msra.mxu0 %v3347_v53  ;;  %792 = vmatpush2.msra.mxu1 %v3349_v57  ;;  %4971 = vst [vmem:[#allocation143_spill] sm:$0xff] %v3365_v61  ;;  %4972 = vst [vmem:[#allocation144_spill] sm:$0xff] %v3367_v0  ;;  %v3371_v53 = vld [vmem:[#allocation10 + $0x260] sm:$0xff]  ;;  %v3373_v57 = vld [vmem:[#allocation10 + $0x270] sm:$0xff] }
  0xb0   : > { %722 = vmatprep.subr.mxu0 %v3353_v5  ;;  %793 = vmatprep.subr.mxu1 %v3355_v55  ;;  %4973 = vst [vmem:[#allocation145_spill] sm:$0xff] %v3371_v53  ;;  %4974 = vst [vmem:[#allocation146_spill] sm:$0xff] %v3373_v57  ;;  %v3377_v5 = vld [vmem:[#allocation10 + $0x248] sm:$0xff]  ;;  %v3379_v55 = vld [vmem:[#allocation10 + $0x258] sm:$0xff] }
  0xb1   : > { %723 = vmatpush2.msra.mxu0 %v3359_v63  ;;  %794 = vmatpush2.msra.mxu1 %v3361_v59  ;;  %4975 = vst [vmem:[#allocation147_spill] sm:$0xff] %v3377_v5  ;;  %4976 = vst [vmem:[#allocation148_spill] sm:$0xff] %v3379_v55  ;;  %v3383_v63 = vld [vmem:[#allocation10 + $0x240] sm:$0xff]  ;;  %v3385_v59 = vld [vmem:[#allocation10 + $0x250] sm:$0xff] }
  0xb2   : > { %724 = vmatprep.subr.mxu0 %v3365_v61  ;;  %795 = vmatprep.subr.mxu1 %v3367_v0  ;;  %4977 = vst [vmem:[#allocation149_spill] sm:$0xff] %v3383_v63  ;;  %4978 = vst [vmem:[#allocation150_spill] sm:$0xff] %v3385_v59  ;;  %v3389_v61 = vld [vmem:[#allocation10 + $0x228] sm:$0xff]  ;;  %v3391_v0 = vld [vmem:[#allocation10 + $0x238] sm:$0xff] }
  0xb3   : > { %725 = vmatpush2.msra.mxu0 %v3371_v53  ;;  %796 = vmatpush2.msra.mxu1 %v3373_v57  ;;  %4979 = vst [vmem:[#allocation151_spill] sm:$0xff] %v3389_v61  ;;  %4980 = vst [vmem:[#allocation152_spill] sm:$0xff] %v3391_v0  ;;  %v3395_v53 = vld [vmem:[#allocation10 + $0x220] sm:$0xff]  ;;  %v3397_v57 = vld [vmem:[#allocation10 + $0x230] sm:$0xff] }
  0xb4   : > { %726 = vmatprep.subr.mxu0 %v3377_v5  ;;  %797 = vmatprep.subr.mxu1 %v3379_v55  ;;  %4981 = vst [vmem:[#allocation153_spill] sm:$0xff] %v3395_v53  ;;  %4982 = vst [vmem:[#allocation154_spill] sm:$0xff] %v3397_v57  ;;  %v3401_v55 = vld [vmem:[#allocation10 + $0x208] sm:$0xff] }
  0xb5   : > { %727 = vmatpush2.msra.mxu0 %v3383_v63  ;;  %798 = vmatpush2.msra.mxu1 %v3385_v59  ;;  %4983 = vst [vmem:[#allocation155_spill] sm:$0xff] %v3401_v55  ;;  %v3403_v63 = vld [vmem:[#allocation10 + $0x218] sm:$0xff]  ;;  %v3407_v59 = vld [vmem:[#allocation10 + $0x200] sm:$0xff] }
  0xb6   : > { %728 = vmatprep.subr.mxu0 %v3389_v61  ;;  %799 = vmatprep.subr.mxu1 %v3391_v0  ;;  %4984 = vst [vmem:[#allocation156_spill] sm:$0xff] %v3403_v63  ;;  %4985 = vst [vmem:[#allocation157_spill] sm:$0xff] %v3407_v59  ;;  %v3409_v61 = vld [vmem:[#allocation10 + $0x210] sm:$0xff]  ;;  %v667_v0 = vld [vmem:[#allocation2 + $0x8] sm:$0xff] }
  0xb7   : > { %729 = vmatpush2.msra.mxu0 %v3395_v53  ;;  %800 = vmatpush2.msra.mxu1 %v3397_v57  ;;  %4986 = vst [vmem:[#allocation158_spill] sm:$0xff] %v3409_v61  ;;  %v490_v53 = vld [vmem:[%s2822_s13 + $0x8] sm:$0xff] }
  0xb8   : > { %730 = vmatprep.subr.mxu0 %v3401_v55  ;;  %801 = vmatprep.subr.mxu1 %v3403_v63  ;;  %v489_v55 = vld [vmem:[%s2822_s13] sm:$0xff] }
  0xb9   : > { %731 = vmatpush2.msra.mxu0 %v3407_v59  ;;  %802 = vmatpush2.msra.mxu1 %v3409_v61 }
  0xba   : > { %732 = vmatprep.mubr.f32.mxu0 %v667_v0  ;;  %803 = vmatprep.mubr.f32.mxu1 %v667_v0 }
  0xbb   : > { %844 = vmatprep.subr.mxu0 %v2836_v1  ;;  %915 = vmatprep.subr.mxu1 %v2859_v10 }
 0x138   : > { %v559_v57 = vpop.f32.mrf.mxu0 }
 0x139   : > { %v635_v5 = vadd.f32 %v559_v57, %v489_v55  ;;  %v639_v57 = vld [vmem:[#allocation3] sm:$0xff] }
 0x13a   : > { %v561_v62 = vpop.f32.mrf.mxu0  ;;  %v630_v49 = vpop.f32.mrf.mxu1 }
 0x13b   : > { %v2030_v51 = vmul.f32 -1.442695, %v635_v5  ;;  %v636_v63 = vadd.f32 %v561_v62, %v490_v53  ;;  %v637_v61 = vadd.f32 %v630_v49, %v491_v60 }
 0x13c   : > { %v632_v0 = vpop.f32.mrf.mxu1 }
 0x13d   : > { %2166 = vpow2.f32 %v2030_v51  ;;  %v2031_v59 = vmul.f32 -1.442695, %v636_v63  ;;  %v2032_v47 = vmul.f32 -1.442695, %v637_v61  ;;  %v638_v56 = vadd.f32 %v632_v0, %v492_v58  ;;  %v5035_v0 = vld [vmem:[#allocation62_spill] sm:$0xff] }
 0x13f   : > { %2168 = vpow2.f32 %v2031_v59 }
 0x140   : > { %2170 = vpow2.f32 %v2032_v47 }
 0x141   : > { %2172 = vtanh.f32 %v638_v56  ;;  %v5034_v56 = vld [vmem:[#allocation61_spill] sm:$0xff] }
 0x14a   : > { %v2167_v1 = vpop.eup %2166 }
 0x14b   : > { %v649_v45 = vadd.f32 1.0, %v2167_v1  ;;  %v5036_v1 = vld [vmem:[#allocation63_spill] sm:$0xff] }
 0x14c   : > { %v2169_v10 = vpop.eup %2168 }
 0x14d   : > { %2174 = vrcp.f32 %v649_v45  ;;  %v650_v55 = vadd.f32 1.0, %v2169_v10  ;;  %v2171_v5 = vpop.eup %2170  ;;  %v5028_v45 = vld [vmem:[#allocation55_spill] sm:$0xff]  ;;  %v5037_v10 = vld [vmem:[#allocation64_spill] sm:$0xff] }
 0x14e   : > { %v2173_v53 = vpop.eup %2172  ;;  %v651_v62 = vadd.f32 1.0, %v2171_v5  ;;  %v5039_v5 = vld [vmem:[#allocation66_spill] sm:$0xff] }
 0x14f   : > { %2176 = vrcp.f32 %v650_v55  ;;  %v5038_v55 = vld [vmem:[#allocation65_spill] sm:$0xff] }
 0x150   : > { %2178 = vrcp.f32 %v651_v62  ;;  %v5044_v62 = vld [vmem:[#allocation71_spill] sm:$0xff] }
 0x15a   : > { %v2175_v51 = vpop.eup %2174 }
 0x15b   : > { %v660_v49 = vmul.f32 %v2175_v51, %v2173_v53  ;;  %v5040_v53 = vld [vmem:[#allocation67_spill] sm:$0xff]  ;;  %v5041_v51 = vld [vmem:[#allocation68_spill] sm:$0xff] }
 0x15c   : > { %v2177_v59 = vpop.eup %2176 }
 0x15d   : > { %v659_v63 = vmul.f32 %v2177_v59, %v639_v57  ;;  %v2179_v58 = vpop.eup %2178  ;;  %v5042_v57 = vld [vmem:[#allocation69_spill] sm:$0xff]  ;;  %v5043_v59 = vld [vmem:[#allocation70_spill] sm:$0xff] }
 0x15f   : > { %v3420_v60 = vadd.f32 %v660_v49, %v659_v63  ;;  %v5045_v63 = vld [vmem:[#allocation72_spill] sm:$0xff]  ;;  %v5046_v49 = vld [vmem:[#allocation73_spill] sm:$0xff] }
 0x161   : > { %2180 = vtanh.f32 %v3420_v60 }
 0x16e   : > { %v2181_v47 = vpop.eup %2180 }
 0x16f   : > { %v3423_v61 = vmul.f32 %v2181_v47, %v2179_v58  ;;  %v5047_v58 = vld [vmem:[#allocation74_spill] sm:$0xff]  ;;  %v5048_v47 = vld [vmem:[#allocation75_spill] sm:$0xff] }
 0x171   : > { %733 = vmatmul.mubr.f32.vlgmr.msra.gmra.mxu0 %v3423_v61  ;;  %804 = vmatmul.mubr.f32.vlgmr.msra.gmra.mxu1 %v3423_v61 }
 0x172   : > { %845 = vmatpush1.msra.mxu0 %v2838_v2  ;;  %916 = vmatpush1.msra.mxu1 %v2865_v12  ;;  %v4987_v2 = vld [vmem:[#allocation15_spill] sm:$0xff] }
 0x173   : > { %846 = vmatprep.subr.mxu0 %v2840_v3  ;;  %917 = vmatprep.subr.mxu1 %v2871_v14  ;;  %v4988_v3 = vld [vmem:[#allocation21_spill] sm:$0xff]  ;;  %v4995_v12 = vld [vmem:[#allocation19_spill] sm:$0xff]  ;;  %v4997_v14 = vld [vmem:[#allocation20_spill] sm:$0xff] }
 0x174   : > { %847 = vmatpush1.msra.mxu0 %v2843_v4  ;;  %918 = vmatpush1.msra.mxu1 %v2873_v15  ;;  %v4989_v4 = vld [vmem:[#allocation16_spill] sm:$0xff] }
 0x175   : > { %848 = vmatprep.subr.mxu0 %v2847_v6  ;;  %919 = vmatprep.subr.mxu1 %v2879_v17  ;;  %v4990_v6 = vld [vmem:[#allocation23_spill] sm:$0xff]  ;;  %v4998_v15 = vld [vmem:[#allocation28_spill] sm:$0xff]  ;;  %v5000_v17 = vld [vmem:[#allocation29_spill] sm:$0xff] }
 0x176   : > { %849 = vmatpush1.msra.mxu0 %v2851_v7  ;;  %920 = vmatpush1.msra.mxu1 %v2885_v19  ;;  %v4991_v7 = vld [vmem:[#allocation17_spill] sm:$0xff]  ;;  %v5002_v19 = vmov 0.0  }
 0x177   : > { %850 = vmatprep.subr.mxu0 %v2854_v8  ;;  %921 = vmatprep.subr.mxu1 %v2887_v20  ;;  %v4992_v8 = vld [vmem:[#allocation25_spill] sm:$0xff]  ;;  %v5003_v20 = vld [vmem:[#allocation30_spill] sm:$0xff] }
 0x178   : > { %851 = vmatpush1.msra.mxu0 %v2857_v9  ;;  %922 = vmatpush1.msra.mxu1 %v2893_v22  ;;  %v4993_v9 = vld [vmem:[#allocation18_spill] sm:$0xff]  ;;  %v5005_v22 = vld [vmem:[#allocation32_spill] sm:$0xff] }
 0x179   : > { %852 = vmatprep.subr.mxu0 %v2862_v11  ;;  %923 = vmatprep.subr.mxu1 %v2899_v24  ;;  %v4994_v11 = vld [vmem:[#allocation26_spill] sm:$0xff] }
 0x17a   : > { %853 = vmatpush1.msra.mxu0 %v2868_v13  ;;  %924 = vmatpush1.msra.mxu1 %v2905_v26  ;;  %v4996_v13 = vld [vmem:[#allocation27_spill] sm:$0xff]  ;;  %v5007_v24 = vld [vmem:[#allocation34_spill] sm:$0xff]  ;;  %v5009_v26 = vld [vmem:[#allocation36_spill] sm:$0xff] }
 0x17b   : > { %854 = vmatprep.subr.mxu0 %v2876_v16  ;;  %925 = vmatprep.subr.mxu1 %v2911_v28  ;;  %v4999_v16 = vld [vmem:[#allocation22_spill] sm:$0xff] }
 0x17c   : > { %855 = vmatpush1.msra.mxu0 %v2882_v18  ;;  %926 = vmatpush1.msra.mxu1 %v2917_v30  ;;  %v5001_v18 = vld [vmem:[#allocation24_spill] sm:$0xff]  ;;  %v5011_v28 = vld [vmem:[#allocation38_spill] sm:$0xff] }
 0x17d   : > { %856 = vmatprep.subr.mxu0 %v2890_v21  ;;  %927 = vmatprep.subr.mxu1 %v2923_v32  ;;  %v5004_v21 = vld [vmem:[#allocation31_spill] sm:$0xff]  ;;  %v5013_v30 = vld [vmem:[#allocation40_spill] sm:$0xff]  ;;  %v5015_v32 = vld [vmem:[#allocation42_spill] sm:$0xff] }
 0x17e   : > { %857 = vmatpush1.msra.mxu0 %v2896_v23  ;;  %928 = vmatpush1.msra.mxu1 %v2929_v34  ;;  %v5006_v23 = vld [vmem:[#allocation33_spill] sm:$0xff]  ;;  %v5017_v34 = vld [vmem:[#allocation44_spill] sm:$0xff] }
 0x17f   : > { %858 = vmatprep.subr.mxu0 %v2902_v25  ;;  %929 = vmatprep.subr.mxu1 %v2935_v36  ;;  %v5008_v25 = vld [vmem:[#allocation35_spill] sm:$0xff]  ;;  %v5019_v36 = vld [vmem:[#allocation46_spill] sm:$0xff] }
 0x180   : > { %859 = vmatpush1.msra.mxu0 %v2908_v27  ;;  %930 = vmatpush1.msra.mxu1 %v2941_v38  ;;  %v5010_v27 = vld [vmem:[#allocation37_spill] sm:$0xff]  ;;  %v5021_v38 = vld [vmem:[#allocation48_spill] sm:$0xff] }
 0x181   : > { %860 = vmatprep.subr.mxu0 %v2914_v29  ;;  %931 = vmatprep.subr.mxu1 %v2947_v40  ;;  %v5012_v29 = vld [vmem:[#allocation39_spill] sm:$0xff]  ;;  %v5023_v40 = vld [vmem:[#allocation50_spill] sm:$0xff] }
 0x182   : > { %861 = vmatpush1.msra.mxu0 %v2920_v31  ;;  %932 = vmatpush1.msra.mxu1 %v2953_v42  ;;  %v5014_v31 = vld [vmem:[#allocation41_spill] sm:$0xff]  ;;  %v5025_v42 = vld [vmem:[#allocation52_spill] sm:$0xff] }
 0x183   : > { %862 = vmatprep.subr.mxu0 %v2926_v33  ;;  %933 = vmatprep.subr.mxu1 %v2959_v44  ;;  %v5016_v33 = vld [vmem:[#allocation43_spill] sm:$0xff]  ;;  %v5027_v44 = vld [vmem:[#allocation54_spill] sm:$0xff] }
 0x184   : > { %863 = vmatpush1.msra.mxu0 %v2932_v35  ;;  %934 = vmatpush1.msra.mxu1 %v2965_v46  ;;  %v5018_v35 = vld [vmem:[#allocation45_spill] sm:$0xff]  ;;  %v5029_v46 = vld [vmem:[#allocation56_spill] sm:$0xff] }
 0x185   : > { %864 = vmatprep.subr.mxu0 %v2938_v37  ;;  %935 = vmatprep.subr.mxu1 %v2971_v48  ;;  %v5020_v37 = vld [vmem:[#allocation47_spill] sm:$0xff]  ;;  %v5030_v48 = vld [vmem:[#allocation57_spill] sm:$0xff] }
 0x186   : > { %865 = vmatpush1.msra.mxu0 %v2944_v39  ;;  %936 = vmatpush1.msra.mxu1 %v2977_v50  ;;  %v5022_v39 = vld [vmem:[#allocation49_spill] sm:$0xff]  ;;  %v5031_v50 = vld [vmem:[#allocation58_spill] sm:$0xff] }
 0x187   : > { %866 = vmatprep.subr.mxu0 %v2950_v41  ;;  %937 = vmatprep.subr.mxu1 %v2983_v52  ;;  %v5024_v41 = vld [vmem:[#allocation51_spill] sm:$0xff] }
 0x188   : > { %867 = vmatpush1.msra.mxu0 %v2956_v43  ;;  %938 = vmatpush1.msra.mxu1 %v2989_v54  ;;  %v5026_v43 = vld [vmem:[#allocation53_spill] sm:$0xff]  ;;  %v5032_v52 = vld [vmem:[#allocation59_spill] sm:$0xff]  ;;  %v5033_v54 = vld [vmem:[#allocation60_spill] sm:$0xff] }
 0x189   : > { %868 = vmatprep.subr.mxu0 %v4987_v2  ;;  %939 = vmatprep.subr.mxu1 %v4988_v3  ;;  %v5050_v2 = vld [vmem:[#allocation77_spill] sm:$0xff]  ;;  %v5051_v3 = vld [vmem:[#allocation78_spill] sm:$0xff] }
 0x18a   : > { %869 = vmatpush1.msra.mxu0 %v4989_v4  ;;  %940 = vmatpush1.msra.mxu1 %v4990_v6  ;;  %v5052_v4 = vld [vmem:[#allocation79_spill] sm:$0xff]  ;;  %v5053_v6 = vld [vmem:[#allocation80_spill] sm:$0xff] }
 0x18b   : > { %870 = vmatprep.subr.mxu0 %v4991_v7  ;;  %941 = vmatprep.subr.mxu1 %v4992_v8  ;;  %v5054_v7 = vld [vmem:[#allocation81_spill] sm:$0xff]  ;;  %v5055_v8 = vld [vmem:[#allocation82_spill] sm:$0xff] }
 0x18c   : > { %871 = vmatpush1.msra.mxu0 %v4993_v9  ;;  %942 = vmatpush1.msra.mxu1 %v4994_v11  ;;  %v5056_v9 = vld [vmem:[#allocation83_spill] sm:$0xff]  ;;  %v5057_v11 = vld [vmem:[#allocation84_spill] sm:$0xff] }
 0x18d   : > { %872 = vmatprep.subr.mxu0 %v4995_v12  ;;  %943 = vmatprep.subr.mxu1 %v4996_v13  ;;  %v5058_v12 = vld [vmem:[#allocation85_spill] sm:$0xff]  ;;  %v5059_v13 = vld [vmem:[#allocation86_spill] sm:$0xff] }
 0x18e   : > { %873 = vmatpush1.msra.mxu0 %v4997_v14  ;;  %944 = vmatpush1.msra.mxu1 %v4998_v15  ;;  %v5060_v14 = vld [vmem:[#allocation87_spill] sm:$0xff]  ;;  %v5061_v15 = vld [vmem:[#allocation88_spill] sm:$0xff] }
 0x18f   : > { %874 = vmatprep.subr.mxu0 %v4999_v16  ;;  %945 = vmatprep.subr.mxu1 %v5000_v17  ;;  %v5062_v16 = vld [vmem:[#allocation89_spill] sm:$0xff]  ;;  %v5063_v17 = vld [vmem:[#allocation90_spill] sm:$0xff] }
 0x190   : > { %875 = vmatpush1.msra.mxu0 %v5001_v18  ;;  %908 = vmatprep.mubr.f32.mxu0 %v5002_v19  ;;  %v5064_v18 = vld [vmem:[#allocation91_spill] sm:$0xff] }
 0x191   : > { %946 = vmatpush1.msra.mxu1 %v5003_v20  ;;  %979 = vmatprep.mubr.f32.mxu1 %v5002_v19  ;;  %v5065_v20 = vld [vmem:[#allocation92_spill] sm:$0xff] }
 0x192   : > { %909 = vmatmul.mubr.f32.vlgmr.msra.gmra.mxu0 %v3423_v61  ;;  %980 = vmatmul.mubr.f32.vlgmr.msra.gmra.mxu1 %v3423_v61  ;;  %v5049_v61 = vld [vmem:[#allocation76_spill] sm:$0xff] }
 0x193   : > { %1019 = vmatprep.subr.mxu0 %v5004_v21  ;;  %1090 = vmatprep.subr.mxu1 %v5005_v22  ;;  %v5066_v21 = vld [vmem:[#allocation93_spill] sm:$0xff]  ;;  %v5067_v22 = vld [vmem:[#allocation94_spill] sm:$0xff] }
 0x194   : > { %1020 = vmatpush1.msra.mxu0 %v5006_v23  ;;  %1091 = vmatpush1.msra.mxu1 %v5007_v24  ;;  %v5068_v23 = vld [vmem:[#allocation95_spill] sm:$0xff]  ;;  %v5069_v24 = vld [vmem:[#allocation96_spill] sm:$0xff] }
 0x195   : > { %1021 = vmatprep.subr.mxu0 %v5008_v25  ;;  %1092 = vmatprep.subr.mxu1 %v5009_v26  ;;  %v5070_v25 = vld [vmem:[#allocation97_spill] sm:$0xff]  ;;  %v5071_v26 = vld [vmem:[#allocation98_spill] sm:$0xff] }
 0x196   : > { %1022 = vmatpush1.msra.mxu0 %v5010_v27  ;;  %1093 = vmatpush1.msra.mxu1 %v5011_v28  ;;  %v5072_v27 = vld [vmem:[#allocation99_spill] sm:$0xff]  ;;  %v5073_v28 = vld [vmem:[#allocation100_spill] sm:$0xff] }
 0x197   : > { %1023 = vmatprep.subr.mxu0 %v5012_v29  ;;  %1094 = vmatprep.subr.mxu1 %v5013_v30  ;;  %v5074_v29 = vld [vmem:[#allocation101_spill] sm:$0xff]  ;;  %v5075_v30 = vld [vmem:[#allocation102_spill] sm:$0xff] }
 0x198   : > { %1024 = vmatpush1.msra.mxu0 %v5014_v31  ;;  %1095 = vmatpush1.msra.mxu1 %v5015_v32  ;;  %v5076_v31 = vld [vmem:[#allocation103_spill] sm:$0xff]  ;;  %v5077_v32 = vld [vmem:[#allocation104_spill] sm:$0xff] }
 0x199   : > { %1025 = vmatprep.subr.mxu0 %v5016_v33  ;;  %1096 = vmatprep.subr.mxu1 %v5017_v34  ;;  %v5078_v33 = vld [vmem:[#allocation105_spill] sm:$0xff]  ;;  %v5079_v34 = vld [vmem:[#allocation106_spill] sm:$0xff] }
 0x19a   : > { %1026 = vmatpush1.msra.mxu0 %v5018_v35  ;;  %1097 = vmatpush1.msra.mxu1 %v5019_v36  ;;  %v5080_v35 = vld [vmem:[#allocation107_spill] sm:$0xff]  ;;  %v5081_v36 = vld [vmem:[#allocation108_spill] sm:$0xff] }
 0x19b   : > { %1027 = vmatprep.subr.mxu0 %v5020_v37  ;;  %1098 = vmatprep.subr.mxu1 %v5021_v38  ;;  %v5082_v37 = vld [vmem:[#allocation109_spill] sm:$0xff]  ;;  %v5083_v38 = vld [vmem:[#allocation110_spill] sm:$0xff] }
 0x19c   : > { %1028 = vmatpush1.msra.mxu0 %v5022_v39  ;;  %1099 = vmatpush1.msra.mxu1 %v5023_v40  ;;  %v5084_v39 = vld [vmem:[#allocation111_spill] sm:$0xff]  ;;  %v5085_v40 = vld [vmem:[#allocation112_spill] sm:$0xff] }
 0x19d   : > { %1029 = vmatprep.subr.mxu0 %v5024_v41  ;;  %1100 = vmatprep.subr.mxu1 %v5025_v42  ;;  %v5086_v41 = vld [vmem:[#allocation113_spill] sm:$0xff]  ;;  %v5087_v42 = vld [vmem:[#allocation114_spill] sm:$0xff] }
 0x19e   : > { %1030 = vmatpush1.msra.mxu0 %v5026_v43  ;;  %1101 = vmatpush1.msra.mxu1 %v5027_v44  ;;  %v5088_v43 = vld [vmem:[#allocation115_spill] sm:$0xff]  ;;  %v5089_v44 = vld [vmem:[#allocation116_spill] sm:$0xff] }
 0x19f   : > { %1031 = vmatprep.subr.mxu0 %v5028_v45  ;;  %1102 = vmatprep.subr.mxu1 %v5029_v46  ;;  %v5090_v45 = vld [vmem:[#allocation117_spill] sm:$0xff]  ;;  %v5091_v46 = vld [vmem:[#allocation118_spill] sm:$0xff] }
 0x1a0   : > { %1032 = vmatpush1.msra.mxu0 %v5030_v48  ;;  %1103 = vmatpush1.msra.mxu1 %v5031_v50  ;;  %v5092_v48 = vld [vmem:[#allocation119_spill] sm:$0xff]  ;;  %v5093_v50 = vld [vmem:[#allocation120_spill] sm:$0xff] }
 0x1a1   : > { %1033 = vmatprep.subr.mxu0 %v5032_v52  ;;  %1104 = vmatprep.subr.mxu1 %v5033_v54  ;;  %v5094_v52 = vld [vmem:[#allocation121_spill] sm:$0xff]  ;;  %v5095_v54 = vld [vmem:[#allocation122_spill] sm:$0xff] }
 0x1a2   : > { %1034 = vmatpush1.msra.mxu0 %v5034_v56  ;;  %1105 = vmatpush1.msra.mxu1 %v5035_v0  ;;  %v5096_v56 = vld [vmem:[#allocation123_spill] sm:$0xff]  ;;  %v5097_v0 = vld [vmem:[#allocation124_spill] sm:$0xff] }
 0x1a3   : > { %1035 = vmatprep.subr.mxu0 %v5036_v1  ;;  %1106 = vmatprep.subr.mxu1 %v5037_v10  ;;  %v5098_v1 = vld [vmem:[#allocation125_spill] sm:$0xff]  ;;  %v5099_v10 = vld [vmem:[#allocation126_spill] sm:$0xff] }
 0x1a4   : > { %1036 = vmatpush1.msra.mxu0 %v5038_v55  ;;  %1107 = vmatpush1.msra.mxu1 %v5039_v5  ;;  %v5100_v55 = vld [vmem:[#allocation127_spill] sm:$0xff]  ;;  %v5101_v5 = vld [vmem:[#allocation128_spill] sm:$0xff] }
 0x1a5   : > { %1037 = vmatprep.subr.mxu0 %v5040_v53  ;;  %1108 = vmatprep.subr.mxu1 %v5041_v51  ;;  %v5102_v53 = vld [vmem:[#allocation129_spill] sm:$0xff]  ;;  %v5103_v51 = vld [vmem:[#allocation130_spill] sm:$0xff] }
 0x1a6   : > { %1038 = vmatpush1.msra.mxu0 %v5042_v57  ;;  %1109 = vmatpush1.msra.mxu1 %v5043_v59  ;;  %v5104_v57 = vld [vmem:[#allocation131_spill] sm:$0xff]  ;;  %v5105_v59 = vld [vmem:[#allocation132_spill] sm:$0xff] }
 0x1a7   : > { %1039 = vmatprep.subr.mxu0 %v5044_v62  ;;  %1110 = vmatprep.subr.mxu1 %v5045_v63  ;;  %v5106_v62 = vld [vmem:[#allocation133_spill] sm:$0xff]  ;;  %v5107_v63 = vld [vmem:[#allocation134_spill] sm:$0xff] }
 0x1a8   : > { %1040 = vmatpush1.msra.mxu0 %v5046_v49  ;;  %1111 = vmatpush1.msra.mxu1 %v5047_v58  ;;  %v5108_v49 = vld [vmem:[#allocation135_spill] sm:$0xff]  ;;  %v5109_v58 = vld [vmem:[#allocation136_spill] sm:$0xff] }
 0x1a9   : > { %1041 = vmatprep.subr.mxu0 %v5048_v47  ;;  %1112 = vmatprep.subr.mxu1 %v5049_v61  ;;  %v5110_v47 = vld [vmem:[#allocation137_spill] sm:$0xff]  ;;  %v5111_v61 = vld [vmem:[#allocation138_spill] sm:$0xff] }
 0x1aa   : > { %1042 = vmatpush1.msra.mxu0 %v5050_v2  ;;  %1113 = vmatpush1.msra.mxu1 %v5051_v3  ;;  %v5112_v2 = vld [vmem:[#allocation139_spill] sm:$0xff]  ;;  %v5113_v3 = vld [vmem:[#allocation140_spill] sm:$0xff] }
 0x1ab   : > { %1043 = vmatprep.subr.mxu0 %v5052_v4  ;;  %1114 = vmatprep.subr.mxu1 %v5053_v6  ;;  %v5114_v4 = vld [vmem:[#allocation141_spill] sm:$0xff]  ;;  %v5115_v6 = vld [vmem:[#allocation142_spill] sm:$0xff] }
 0x1ac   : > { %1044 = vmatpush1.msra.mxu0 %v5054_v7  ;;  %1115 = vmatpush1.msra.mxu1 %v5055_v8  ;;  %v5116_v7 = vld [vmem:[#allocation143_spill] sm:$0xff]  ;;  %v5117_v8 = vld [vmem:[#allocation144_spill] sm:$0xff] }
 0x1ad   : > { %1045 = vmatprep.subr.mxu0 %v5056_v9  ;;  %1116 = vmatprep.subr.mxu1 %v5057_v11  ;;  %v5118_v9 = vld [vmem:[#allocation145_spill] sm:$0xff]  ;;  %v5119_v11 = vld [vmem:[#allocation146_spill] sm:$0xff] }
 0x1ae   : > { %1046 = vmatpush1.msra.mxu0 %v5058_v12  ;;  %1117 = vmatpush1.msra.mxu1 %v5059_v13  ;;  %v5120_v12 = vld [vmem:[#allocation147_spill] sm:$0xff]  ;;  %v5121_v13 = vld [vmem:[#allocation148_spill] sm:$0xff] }
 0x1af   : > { %1047 = vmatprep.subr.mxu0 %v5060_v14  ;;  %1118 = vmatprep.subr.mxu1 %v5061_v15  ;;  %v5122_v14 = vld [vmem:[#allocation149_spill] sm:$0xff]  ;;  %v5123_v15 = vld [vmem:[#allocation150_spill] sm:$0xff] }
 0x1b0   : > { %1048 = vmatpush1.msra.mxu0 %v5062_v16  ;;  %1119 = vmatpush1.msra.mxu1 %v5063_v17  ;;  %v5124_v16 = vld [vmem:[#allocation151_spill] sm:$0xff]  ;;  %v5125_v17 = vld [vmem:[#allocation152_spill] sm:$0xff] }
 0x1b1   : > { %1049 = vmatprep.subr.mxu0 %v5064_v18  ;;  %1120 = vmatprep.subr.mxu1 %v5065_v20  ;;  %v5126_v18 = vld [vmem:[#allocation153_spill] sm:$0xff]  ;;  %v5127_v20 = vld [vmem:[#allocation154_spill] sm:$0xff] }
 0x1b2   : > { %1050 = vmatpush1.msra.mxu0 %v5066_v21  ;;  %1121 = vmatpush1.msra.mxu1 %v5067_v22  ;;  %v5128_v21 = vld [vmem:[#allocation155_spill] sm:$0xff]  ;;  %v5129_v22 = vld [vmem:[#allocation156_spill] sm:$0xff] }
 0x1b3   : > { %1051 = vmatprep.subr.mxu0 %v5068_v23  ;;  %1122 = vmatprep.subr.mxu1 %v5069_v24  ;;  %v5130_v23 = vld [vmem:[#allocation157_spill] sm:$0xff]  ;;  %v5131_v24 = vld [vmem:[#allocation158_spill] sm:$0xff] }
 0x1b4   : > { %1052 = vmatpush2.msra.mxu0 %v5070_v25  ;;  %1123 = vmatpush2.msra.mxu1 %v5071_v26  ;;  %v3621_v25 = vld [vmem:[#allocation8 + $0x1e8] sm:$0xff]  ;;  %v3624_v26 = vld [vmem:[#allocation8 + $0x1f8] sm:$0xff] }
 0x1b5   : > { %1053 = vmatprep.subr.mxu0 %v5072_v27  ;;  %1124 = vmatprep.subr.mxu1 %v5073_v28  ;;  %v468_v27 = vlaneseq }
 0x1b6   : > { %1054 = vmatpush2.msra.mxu0 %v5074_v29  ;;  %1125 = vmatpush2.msra.mxu1 %v5075_v30  ;;  %v466_v30 = vld [vmem:[%s4527_s3] sm:$0xf] }
 0x1b7   : > { %1055 = vmatprep.subr.mxu0 %v5076_v31  ;;  %1126 = vmatprep.subr.mxu1 %v5077_v32  ;;  %v469_v28 = vshrl.u32 %v468_v27, 7 }
 0x1b8   : > { %1056 = vmatpush2.msra.mxu0 %v5078_v33  ;;  %1127 = vmatpush2.msra.mxu1 %v5079_v34 }
 0x1b9   : > { %1057 = vmatprep.subr.mxu0 %v5080_v35  ;;  %1128 = vmatprep.subr.mxu1 %v5081_v36  ;;  %v470_v29 = vsub.s32 0, %v469_v28  ;;  %v474_v31 = vsub.s32 1, %v469_v28 }
 0x1ba   : > { %1058 = vmatpush2.msra.mxu0 %v5082_v37  ;;  %1129 = vmatpush2.msra.mxu1 %v5083_v38  ;;  %v478_v38 = vsub.s32 2, %v469_v28 }
 0x1bb   : > { %1059 = vmatprep.subr.mxu0 %v5084_v39  ;;  %1130 = vmatprep.subr.mxu1 %v5085_v40  ;;  %v3630_v32 = vrot.slane %v466_v30, %v470_v29  ;;  %v3632_v33 = vrot.slane %v466_v30, %v474_v31 }
 0x1bc   : > { %1060 = vmatpush2.msra.mxu0 %v5086_v41  ;;  %1131 = vmatpush2.msra.mxu1 %v5087_v42  ;;  %v3636_v41 = vrot.slane %v466_v30, %v478_v38  ;;  %v3661_v38 = vld [vmem:[#allocation8 + $0x1f0] sm:$0xff] }
 0x1bd   : > { %1061 = vmatprep.subr.mxu0 %v5088_v43  ;;  %1132 = vmatprep.subr.mxu1 %v5089_v44  ;;  %5132 = vst [vmem:[#allocation15_spill] sm:$0xff] %v3630_v32  ;;  %5133 = vst [vmem:[#allocation21_spill] sm:$0xff] %v3632_v33  ;;  %v482_v43 = vsub.s32 3, %v469_v28 }
 0x1be   : > { %1062 = vmatpush2.msra.mxu0 %v5090_v45  ;;  %1133 = vmatpush2.msra.mxu1 %v5091_v46  ;;  %5134 = vst [vmem:[#allocation16_spill] sm:$0xff] %v3636_v41 }
 0x1bf   : > { %1063 = vmatprep.subr.mxu0 %v5092_v48  ;;  %1134 = vmatprep.subr.mxu1 %v5093_v50  ;;  %v3639_v45 = vrot.slane %v466_v30, %v482_v43  ;;  %v3676_v43 = vld [vmem:[#allocation8 + $0x1a8] sm:$0xff] }
 0x1c0   : > { %1064 = vmatpush2.msra.mxu0 %v5094_v52  ;;  %1135 = vmatpush2.msra.mxu1 %v5095_v54 }
 0x1c1   : > { %1065 = vmatprep.subr.mxu0 %v5096_v56  ;;  %1136 = vmatprep.subr.mxu1 %v5097_v0  ;;  %5135 = vst [vmem:[#allocation23_spill] sm:$0xff] %v3639_v45 }
 0x1c2   : > { %1066 = vmatpush2.msra.mxu0 %v5098_v1  ;;  %1137 = vmatpush2.msra.mxu1 %v5099_v10  ;;  %v2036_v1 = vld [vmem:[%s2822_s13 + $0x20] sm:$0xff] }
 0x1c3   : > { %1067 = vmatprep.subr.mxu0 %v5100_v55  ;;  %1138 = vmatprep.subr.mxu1 %v5101_v5  ;;  %v2037_v5 = vld [vmem:[%s2822_s13 + $0x28] sm:$0xff] }
 0x1c4   : > { %1068 = vmatpush2.msra.mxu0 %v5102_v53  ;;  %1139 = vmatpush2.msra.mxu1 %v5103_v51  ;;  %v810_v51 = vld [vmem:[#allocation4] sm:$0xff] }
 0x1c5   : > { %1069 = vmatprep.subr.mxu0 %v5104_v57  ;;  %1140 = vmatprep.subr.mxu1 %v5105_v59 }
 0x1c6   : > { %1070 = vmatpush2.msra.mxu0 %v5106_v62  ;;  %1141 = vmatpush2.msra.mxu1 %v5107_v63 }
 0x1c7   : > { %1071 = vmatprep.subr.mxu0 %v5108_v49  ;;  %1142 = vmatprep.subr.mxu1 %v5109_v58 }
 0x1c8   : > { %1072 = vmatpush2.msra.mxu0 %v5110_v47  ;;  %1143 = vmatpush2.msra.mxu1 %v5111_v61 }
 0x1c9   : > { %1073 = vmatprep.subr.mxu0 %v5112_v2  ;;  %1144 = vmatprep.subr.mxu1 %v5113_v3 }
 0x1ca   : > { %1074 = vmatpush2.msra.mxu0 %v5114_v4  ;;  %1145 = vmatpush2.msra.mxu1 %v5115_v6  ;;  %v2038_v6 = vld [vmem:[%s2822_s13 + $0x30] sm:$0xff] }
 0x1cb   : > { %1075 = vmatprep.subr.mxu0 %v5116_v7  ;;  %1146 = vmatprep.subr.mxu1 %v5117_v8 }
 0x1cc   : > { %1076 = vmatpush2.msra.mxu0 %v5118_v9  ;;  %1147 = vmatpush2.msra.mxu1 %v5119_v11  ;;  %v2039_v9 = vld [vmem:[%s2822_s13 + $0x38] sm:$0xff] }
 0x1cd   : > { %1077 = vmatprep.subr.mxu0 %v5120_v12  ;;  %1148 = vmatprep.subr.mxu1 %v5121_v13 }
 0x1ce   : > { %1078 = vmatpush2.msra.mxu0 %v5122_v14  ;;  %1149 = vmatpush2.msra.mxu1 %v5123_v15 }
 0x1cf   : > { %1079 = vmatprep.subr.mxu0 %v5124_v16  ;;  %1150 = vmatprep.subr.mxu1 %v5125_v17 }
 0x1d0   : > { %1080 = vmatpush2.msra.mxu0 %v5126_v18  ;;  %1151 = vmatpush2.msra.mxu1 %v5127_v20 }
 0x1d1   : > { %1081 = vmatprep.subr.mxu0 %v5128_v21  ;;  %1152 = vmatprep.subr.mxu1 %v5129_v22 }
 0x1d2   : > { %1082 = vmatpush2.msra.mxu0 %v5130_v23  ;;  %1153 = vmatpush2.msra.mxu1 %v5131_v24 }
 0x1d3   : > { %1196 = vmatprep.subr.mxu0 %v3621_v25  ;;  %1267 = vmatprep.subr.mxu1 %v3624_v26 }
 0x231   : > { %v734_v34 = vpop.f32.mrf.mxu0  ;;  %v805_v42 = vpop.f32.mrf.mxu1 }
 0x232   : > { %v735_v35 = vadd.f32 %v734_v34, %v3630_v32  ;;  %v806_v44 = vadd.f32 %v805_v42, %v3636_v41  ;;  %v3673_v42 = vld [vmem:[#allocation8 + $0x1d0] sm:$0xff] }
 0x233   : > { %v736_v36 = vpop.f32.mrf.mxu0  ;;  %v807_v48 = vpop.f32.mrf.mxu1 }
 0x234   : > { %v2033_v37 = vmul.f32 -1.442695, %v735_v35  ;;  %v737_v39 = vadd.f32 %v736_v36, %v3632_v33  ;;  %v2035_v46 = vmul.f32 -1.442695, %v806_v44  ;;  %v808_v52 = vadd.f32 %v807_v48, %v3639_v45  ;;  %v3679_v44 = vld [vmem:[#allocation8 + $0x1b8] sm:$0xff]  ;;  %v3685_v48 = vld [vmem:[#allocation8 + $0x1b0] sm:$0xff] }
 0x236   : > { %2182 = vpow2.f32 %v2033_v37  ;;  %v2034_v40 = vmul.f32 -1.442695, %v737_v39  ;;  %v3658_v37 = vld [vmem:[#allocation8 + $0x1e0] sm:$0xff]  ;;  %v3667_v39 = vld [vmem:[#allocation8 + $0x1d8] sm:$0xff] }
 0x238   : > { %2184 = vpow2.f32 %v2034_v40  ;;  %v3670_v40 = vld [vmem:[#allocation8 + $0x1c0] sm:$0xff] }
 0x239   : > { %2186 = vpow2.f32 %v2035_v46  ;;  %v3682_v46 = vld [vmem:[#allocation8 + $0x1a0] sm:$0xff] }
 0x243   : > { %v2183_v50 = vpop.eup %2182 }
 0x244   : > { %v820_v54 = vadd.f32 1.0, %v2183_v50  ;;  %v3688_v50 = vld [vmem:[#allocation8 + $0x188] sm:$0xff] }
 0x245   : > { %v2185_v56 = vpop.eup %2184 }
 0x246   : > { %2188 = vrcp.f32 %v820_v54  ;;  %v821_v0 = vadd.f32 1.0, %v2185_v56  ;;  %v2187_v10 = vpop.eup %2186  ;;  %v3694_v54 = vld [vmem:[#allocation8 + $0x180] sm:$0xff]  ;;  %v3697_v56 = vld [vmem:[#allocation8 + $0x190] sm:$0xff] }
 0x247   : > { %2190 = vtanh.f32 %v808_v52  ;;  %v822_v62 = vadd.f32 1.0, %v2187_v10  ;;  %v3691_v52 = vld [vmem:[#allocation8 + $0x198] sm:$0xff]  ;;  %v3706_v10 = vld [vmem:[#allocation8 + $0x160] sm:$0xff] }
 0x248   : > { %2192 = vrcp.f32 %v821_v0  ;;  %v3700_v0 = vld [vmem:[#allocation8 + $0x168] sm:$0xff] }
 0x252   : > { %v910_v55 = vpop.f32.mrf.mxu0  ;;  %v981_v7 = vpop.f32.mrf.mxu1 }
 0x253   : > { %v2189_v53 = vpop.eup %2188  ;;  %v986_v57 = vadd.f32 %v2036_v1, %v910_v55  ;;  %v988_v8 = vadd.f32 %v2038_v6, %v981_v7  ;;  %v3703_v1 = vld [vmem:[#allocation8 + $0x178] sm:$0xff]  ;;  %v3709_v55 = vld [vmem:[#allocation8 + $0x170] sm:$0xff]  ;;  %v3754_v7 = vld [vmem:[#allocation8 + $0xe0] sm:$0xff] }
 0x254   : > { %v2191_v59 = vpop.eup %2190  ;;  %v912_v63 = vpop.f32.mrf.mxu0  ;;  %v3751_v6 = vld [vmem:[#allocation8 + $0xf8] sm:$0xff] }
 0x255   : > { %v2193_v49 = vpop.eup %2192  ;;  %v2040_v58 = vmul.f32 -1.442695, %v986_v57  ;;  %v987_v47 = vadd.f32 %v2037_v5, %v912_v63  ;;  %v831_v2 = vmul.f32 %v2191_v59, %v2189_v53  ;;  %v983_v11 = vpop.f32.mrf.mxu1  ;;  %v2042_v12 = vmul.f32 -1.442695, %v988_v8  ;;  %v3712_v5 = vld [vmem:[#allocation8 + $0x148] sm:$0xff]  ;;  %v3715_v53 = vld [vmem:[#allocation8 + $0x158] sm:$0xff] }
 0x256   : > { %v830_v61 = vmul.f32 %v2193_v49, %v810_v51  ;;  %v989_v14 = vadd.f32 %v2039_v9, %v983_v11  ;;  %v3718_v51 = vld [vmem:[#allocation8 + $0x140] sm:$0xff]  ;;  %v3721_v57 = vld [vmem:[#allocation8 + $0x150] sm:$0xff]  ;;  %v3724_v59 = vld [vmem:[#allocation8 + $0x128] sm:$0xff] }
 0x257   : > { %2194 = vpow2.f32 %v2040_v58  ;;  %v2041_v3 = vmul.f32 -1.442695, %v987_v47  ;;  %v3730_v63 = vld [vmem:[#allocation8 + $0x120] sm:$0xff]  ;;  %v3733_v49 = vld [vmem:[#allocation8 + $0x130] sm:$0xff]  ;;  %v3736_v58 = vld [vmem:[#allocation8 + $0x108] sm:$0xff] }
 0x258   : > { %2196 = vrcp.f32 %v822_v62  ;;  %v3644_v4 = vadd.f32 %v831_v2, %v830_v61  ;;  %v3727_v62 = vld [vmem:[#allocation8 + $0x138] sm:$0xff]  ;;  %v3742_v61 = vld [vmem:[#allocation8 + $0x100] sm:$0xff]  ;;  %v3745_v2 = vld [vmem:[#allocation8 + $0x110] sm:$0xff] }
 0x259   : > { %2198 = vpow2.f32 %v2041_v3  ;;  %v3739_v47 = vld [vmem:[#allocation8 + $0x118] sm:$0xff]  ;;  %v3748_v3 = vld [vmem:[#allocation8 + $0xe8] sm:$0xff]  ;;  %v3757_v8 = vld [vmem:[#allocation8 + $0xf0] sm:$0xff] }
 0x25a   : > { %2200 = vtanh.f32 %v3644_v4  ;;  %v3760_v9 = vld [vmem:[#allocation8 + $0xc8] sm:$0xff]  ;;  %v3763_v11 = vld [vmem:[#allocation8 + $0xd8] sm:$0xff] }
 0x25b   : > { %2202 = vpow2.f32 %v2042_v12  ;;  %v3766_v12 = vld [vmem:[#allocation8 + $0xc0] sm:$0xff] }
 0x264   : > { %v2195_v13 = vpop.eup %2194 }
 0x265   : > { %v2197_v15 = vpop.eup %2196  ;;  %v1000_v16 = vadd.f32 1.0, %v2195_v13  ;;  %v3769_v13 = vld [vmem:[#allocation8 + $0xd0] sm:$0xff] }
 0x266   : > { %v2199_v17 = vpop.eup %2198 }
 0x267   : > { %v2201_v18 = vpop.eup %2200  ;;  %2204 = vrcp.f32 %v1000_v16  ;;  %v1001_v20 = vadd.f32 1.0, %v2199_v17  ;;  %v3778_v16 = vld [vmem:[#allocation8 + $0xa0] sm:$0xff]  ;;  %v3781_v17 = vld [vmem:[#allocation8 + $0xb0] sm:$0xff] }
 0x268   : > { %v834_v21 = vmul.f32 %v2201_v18, %v2197_v15  ;;  %2206 = vtanh.f32 %v989_v14  ;;  %v2203_v22 = vpop.eup %2202  ;;  %v3772_v14 = vld [vmem:[#allocation8 + $0xa8] sm:$0xff]  ;;  %v3775_v15 = vld [vmem:[#allocation8 + $0xb8] sm:$0xff] }
 0x269   : > { %2208 = vrcp.f32 %v1001_v20  ;;  %v1002_v28 = vadd.f32 1.0, %v2203_v22  ;;  %v3784_v18 = vld [vmem:[#allocation8 + $0x88] sm:$0xff]  ;;  %v3787_v20 = vld [vmem:[#allocation8 + $0x98] sm:$0xff]  ;;  %v3793_v22 = vld [vmem:[#allocation8 + $0x90] sm:$0xff] }
 0x26a   : > { %837 = vst [vmem:[%s2833_s8] sm:$0xff] %v834_v21  ;;  %1083 = vmatprep.mubr.f32.mxu0 %v834_v21  ;;  %1154 = vmatprep.mubr.f32.mxu1 %v834_v21  ;;  %5136 = vst [vmem:[#allocation17_spill] sm:$0xff] %v3787_v20  ;;  %v3790_v21 = vld [vmem:[#allocation8 + $0x80] sm:$0xff] }
 0x26b   : > { %2210 = vrcp.f32 %v1002_v28  ;;  %5137 = vst [vmem:[#allocation25_spill] sm:$0xff] %v3790_v21  ;;  %5138 = vst [vmem:[#allocation18_spill] sm:$0xff] %v3793_v22  ;;  %v3805_v28 = vld [vmem:[#allocation8 + $0x70] sm:$0xff] }
 0x26c   : > { %5142 = vst [vmem:[#allocation20_spill] sm:$0xff] %v3805_v28 }
 0x274   : > { %v2205_v23 = vpop.eup %2204 }
 0x275   : > { %v2207_v24 = vpop.eup %2206 }
 0x276   : > { %v2209_v27 = vpop.eup %2208  ;;  %v1011_v30 = vmul.f32 %v2207_v24, %v2205_v23  ;;  %v3796_v23 = vld [vmem:[#allocation8 + $0x68] sm:$0xff]  ;;  %v3799_v24 = vld [vmem:[#allocation8 + $0x78] sm:$0xff] }
 0x277   : > { %v1010_v29 = vmul.f32 %v2209_v27, %v3420_v60  ;;  %v3664_v60 = vld [vmem:[#allocation8 + $0x1c8] sm:$0xff]  ;;  %5139 = vst [vmem:[#allocation26_spill] sm:$0xff] %v3796_v23  ;;  %5140 = vst [vmem:[#allocation19_spill] sm:$0xff] %v3799_v24  ;;  %v3802_v27 = vld [vmem:[#allocation8 + $0x60] sm:$0xff] }
 0x278   : > { %v2211_v34 = vpop.eup %2210  ;;  %5141 = vst [vmem:[#allocation27_spill] sm:$0xff] %v3802_v27 }
 0x279   : > { %v3651_v31 = vadd.f32 %v1011_v30, %v1010_v29  ;;  %v3808_v29 = vld [vmem:[#allocation8 + $0x48] sm:$0xff]  ;;  %v3811_v30 = vld [vmem:[#allocation8 + $0x58] sm:$0xff] }
 0x27a   : > { %5143 = vst [vmem:[#allocation28_spill] sm:$0xff] %v3808_v29  ;;  %5144 = vst [vmem:[#allocation22_spill] sm:$0xff] %v3811_v30 }
 0x27b   : > { %2212 = vtanh.f32 %v3651_v31 }
 0x288   : > { %v2213_v35 = vpop.eup %2212 }
 0x289   : > { %v3654_v36 = vmul.f32 %v2213_v35, %v2211_v34  ;;  %v3814_v34 = vld [vmem:[#allocation8 + $0x40] sm:$0xff]  ;;  %v3817_v35 = vld [vmem:[#allocation8 + $0x50] sm:$0xff] }
 0x28a   : > { %5145 = vst [vmem:[#allocation29_spill] sm:$0xff] %v3814_v34  ;;  %5146 = vst [vmem:[#allocation24_spill] sm:$0xff] %v3817_v35 }
 0x28b   : > { %1084 = vmatmul.mubr.f32.vlgmr.msra.gmra.mxu0 %v3654_v36  ;;  %1155 = vmatmul.mubr.f32.vlgmr.msra.gmra.mxu1 %v3654_v36 }
 0x28c   : > { %1197 = vmatpush1.msra.mxu0 %v3658_v37  ;;  %1268 = vmatpush1.msra.mxu1 %v3661_v38 }
 0x28d   : > { %1198 = vmatprep.subr.mxu0 %v3664_v60  ;;  %1269 = vmatprep.subr.mxu1 %v3667_v39 }
 0x28e   : > { %1199 = vmatpush1.msra.mxu0 %v3670_v40  ;;  %1270 = vmatpush1.msra.mxu1 %v3673_v42 }
 0x28f   : > { %1200 = vmatprep.subr.mxu0 %v3676_v43  ;;  %1271 = vmatprep.subr.mxu1 %v3679_v44 }
 0x290   : > { %1201 = vmatpush1.msra.mxu0 %v3682_v46  ;;  %1272 = vmatpush1.msra.mxu1 %v3685_v48 }
 0x291   : > { %1202 = vmatprep.subr.mxu0 %v3688_v50  ;;  %1273 = vmatprep.subr.mxu1 %v3691_v52 }
 0x292   : > { %1203 = vmatpush1.msra.mxu0 %v3694_v54  ;;  %1274 = vmatpush1.msra.mxu1 %v3697_v56 }
 0x293   : > { %1204 = vmatprep.subr.mxu0 %v3700_v0  ;;  %1275 = vmatprep.subr.mxu1 %v3703_v1 }
 0x294   : > { %1205 = vmatpush1.msra.mxu0 %v3706_v10  ;;  %1276 = vmatpush1.msra.mxu1 %v3709_v55 }
 0x295   : > { %1206 = vmatprep.subr.mxu0 %v3712_v5  ;;  %1277 = vmatprep.subr.mxu1 %v3715_v53 }
 0x296   : > { %1207 = vmatpush1.msra.mxu0 %v3718_v51  ;;  %1278 = vmatpush1.msra.mxu1 %v3721_v57 }
 0x297   : > { %1208 = vmatprep.subr.mxu0 %v3724_v59  ;;  %1279 = vmatprep.subr.mxu1 %v3727_v62 }
 0x298   : > { %1209 = vmatpush1.msra.mxu0 %v3730_v63  ;;  %1280 = vmatpush1.msra.mxu1 %v3733_v49 }
 0x299   : > { %1210 = vmatprep.subr.mxu0 %v3736_v58  ;;  %1281 = vmatprep.subr.mxu1 %v3739_v47 }
 0x29a   : > { %1211 = vmatpush1.msra.mxu0 %v3742_v61  ;;  %1282 = vmatpush1.msra.mxu1 %v3745_v2 }
 0x29b   : > { %1212 = vmatprep.subr.mxu0 %v3748_v3  ;;  %1283 = vmatprep.subr.mxu1 %v3751_v6 }
 0x29c   : > { %1213 = vmatpush1.msra.mxu0 %v3754_v7  ;;  %1284 = vmatpush1.msra.mxu1 %v3757_v8 }
 0x29d   : > { %1214 = vmatprep.subr.mxu0 %v3760_v9  ;;  %1285 = vmatprep.subr.mxu1 %v3763_v11 }
 0x29e   : > { %1215 = vmatpush1.msra.mxu0 %v3766_v12  ;;  %1286 = vmatpush1.msra.mxu1 %v3769_v13 }
 0x29f   : > { %1216 = vmatprep.subr.mxu0 %v3772_v14  ;;  %1287 = vmatprep.subr.mxu1 %v3775_v15 }
 0x2a0   : > { %1217 = vmatpush1.msra.mxu0 %v3778_v16  ;;  %1288 = vmatpush1.msra.mxu1 %v3781_v17 }
 0x2a1   : > { %1218 = vmatprep.subr.mxu0 %v3784_v18  ;;  %1289 = vmatprep.subr.mxu1 %v3787_v20 }
 0x2a2   : > { %1219 = vmatpush1.msra.mxu0 %v3790_v21  ;;  %1290 = vmatpush1.msra.mxu1 %v3793_v22 }
 0x2a3   : > { %1220 = vmatprep.subr.mxu0 %v3796_v23  ;;  %1291 = vmatprep.subr.mxu1 %v3799_v24 }
 0x2a4   : > { %1221 = vmatpush1.msra.mxu0 %v3802_v27  ;;  %1292 = vmatpush1.msra.mxu1 %v3805_v28  ;;  %v3820_v27 = vld [vmem:[#allocation8 + $0x28] sm:$0xff]  ;;  %v3823_v28 = vld [vmem:[#allocation8 + $0x38] sm:$0xff] }
 0x2a5   : > { %1222 = vmatprep.subr.mxu0 %v3808_v29  ;;  %1293 = vmatprep.subr.mxu1 %v3811_v30  ;;  %5147 = vst [vmem:[#allocation30_spill] sm:$0xff] %v3820_v27  ;;  %5148 = vst [vmem:[#allocation31_spill] sm:$0xff] %v3823_v28  ;;  %v3826_v29 = vld [vmem:[#allocation8 + $0x20] sm:$0xff]  ;;  %v3829_v30 = vld [vmem:[#allocation8 + $0x30] sm:$0xff] }
 0x2a6   : > { %1223 = vmatpush1.msra.mxu0 %v3814_v34  ;;  %1294 = vmatpush1.msra.mxu1 %v3817_v35  ;;  %5149 = vst [vmem:[#allocation32_spill] sm:$0xff] %v3826_v29  ;;  %5150 = vst [vmem:[#allocation33_spill] sm:$0xff] %v3829_v30  ;;  %v3832_v34 = vld [vmem:[#allocation8 + $0x8] sm:$0xff]  ;;  %v3835_v35 = vld [vmem:[#allocation8 + $0x18] sm:$0xff] }
 0x2a7   : > { %1224 = vmatprep.subr.mxu0 %v3820_v27  ;;  %1295 = vmatprep.subr.mxu1 %v3823_v28  ;;  %5151 = vst [vmem:[#allocation34_spill] sm:$0xff] %v3832_v34  ;;  %5152 = vst [vmem:[#allocation35_spill] sm:$0xff] %v3835_v35  ;;  %v3838_v27 = vld [vmem:[#allocation8] sm:$0xff]  ;;  %v3842_v28 = vld [vmem:[#allocation8 + $0x10] sm:$0xff] }
 0x2a8   : > { %1225 = vmatpush1.msra.mxu0 %v3826_v29  ;;  %1296 = vmatpush1.msra.mxu1 %v3829_v30  ;;  %5153 = vst [vmem:[#allocation36_spill] sm:$0xff] %v3838_v27  ;;  %5154 = vst [vmem:[#allocation37_spill] sm:$0xff] %v3842_v28  ;;  %v3857_v30 = vld [vmem:[#allocation10 + $0x1f0] sm:$0xff] }
 0x2a9   : > { %1226 = vmatprep.subr.mxu0 %v3832_v34  ;;  %1297 = vmatprep.subr.mxu1 %v3835_v35  ;;  %v3848_v34 = vld [vmem:[#allocation10 + $0x1e8] sm:$0xff]  ;;  %v3851_v35 = vld [vmem:[#allocation10 + $0x1f8] sm:$0xff]  ;;  %5158 = vst [vmem:[#allocation41_spill] sm:$0xff] %v3857_v30 }
 0x2aa   : > { %1227 = vmatpush1.msra.mxu0 %v3838_v27  ;;  %1260 = vmatprep.mubr.f32.mxu0 %v5002_v19  ;;  %5155 = vst [vmem:[#allocation38_spill] sm:$0xff] %v3848_v34  ;;  %5156 = vst [vmem:[#allocation39_spill] sm:$0xff] %v3851_v35  ;;  %v3854_v27 = vld [vmem:[#allocation10 + $0x1e0] sm:$0xff] }
 0x2ab   : > { %1298 = vmatpush1.msra.mxu1 %v3842_v28  ;;  %1331 = vmatprep.mubr.f32.mxu1 %v5002_v19  ;;  %5157 = vst [vmem:[#allocation40_spill] sm:$0xff] %v3854_v27  ;;  %v3860_v28 = vld [vmem:[#allocation10 + $0x1c8] sm:$0xff] }
 0x2ac   : > { %1261 = vmatmul.mubr.f32.vlgmr.msra.gmra.mxu0 %v3654_v36  ;;  %1332 = vmatmul.mubr.f32.vlgmr.msra.gmra.mxu1 %v3654_v36  ;;  %5159 = vst [vmem:[#allocation42_spill] sm:$0xff] %v3860_v28  ;;  %v3863_v36 = vld [vmem:[#allocation10 + $0x1d8] sm:$0xff] }
 0x2ad   : > { %1371 = vmatprep.subr.mxu0 %v3848_v34  ;;  %1442 = vmatprep.subr.mxu1 %v3851_v35  ;;  %5160 = vst [vmem:[#allocation43_spill] sm:$0xff] %v3863_v36  ;;  %v3866_v34 = vld [vmem:[#allocation10 + $0x1c0] sm:$0xff]  ;;  %v3869_v35 = vld [vmem:[#allocation10 + $0x1d0] sm:$0xff] }
 0x2ae   : > { %1372 = vmatpush1.msra.mxu0 %v3854_v27  ;;  %1443 = vmatpush1.msra.mxu1 %v3857_v30  ;;  %5161 = vst [vmem:[#allocation44_spill] sm:$0xff] %v3866_v34  ;;  %5162 = vst [vmem:[#allocation45_spill] sm:$0xff] %v3869_v35  ;;  %v3872_v27 = vld [vmem:[#allocation10 + $0x1a8] sm:$0xff]  ;;  %v3875_v30 = vld [vmem:[#allocation10 + $0x1b8] sm:$0xff] }
 0x2af   : > { %1373 = vmatprep.subr.mxu0 %v3860_v28  ;;  %1444 = vmatprep.subr.mxu1 %v3863_v36  ;;  %5163 = vst [vmem:[#allocation46_spill] sm:$0xff] %v3872_v27  ;;  %5164 = vst [vmem:[#allocation47_spill] sm:$0xff] %v3875_v30  ;;  %v3878_v28 = vld [vmem:[#allocation10 + $0x1a0] sm:$0xff]  ;;  %v3881_v36 = vld [vmem:[#allocation10 + $0x1b0] sm:$0xff] }
 0x2b0   : > { %1374 = vmatpush1.msra.mxu0 %v3866_v34  ;;  %1445 = vmatpush1.msra.mxu1 %v3869_v35  ;;  %5165 = vst [vmem:[#allocation48_spill] sm:$0xff] %v3878_v28  ;;  %5166 = vst [vmem:[#allocation49_spill] sm:$0xff] %v3881_v36  ;;  %v3884_v34 = vld [vmem:[#allocation10 + $0x188] sm:$0xff]  ;;  %v3887_v35 = vld [vmem:[#allocation10 + $0x198] sm:$0xff] }
 0x2b1   : > { %1375 = vmatprep.subr.mxu0 %v3872_v27  ;;  %1446 = vmatprep.subr.mxu1 %v3875_v30  ;;  %5167 = vst [vmem:[#allocation50_spill] sm:$0xff] %v3884_v34  ;;  %5168 = vst [vmem:[#allocation51_spill] sm:$0xff] %v3887_v35  ;;  %v3890_v27 = vld [vmem:[#allocation10 + $0x180] sm:$0xff]  ;;  %v3893_v30 = vld [vmem:[#allocation10 + $0x190] sm:$0xff] }
 0x2b2   : > { %1376 = vmatpush1.msra.mxu0 %v3878_v28  ;;  %1447 = vmatpush1.msra.mxu1 %v3881_v36  ;;  %5169 = vst [vmem:[#allocation52_spill] sm:$0xff] %v3890_v27  ;;  %5170 = vst [vmem:[#allocation53_spill] sm:$0xff] %v3893_v30  ;;  %v3896_v28 = vld [vmem:[#allocation10 + $0x168] sm:$0xff]  ;;  %v3899_v36 = vld [vmem:[#allocation10 + $0x178] sm:$0xff] }
 0x2b3   : > { %1377 = vmatprep.subr.mxu0 %v3884_v34  ;;  %1448 = vmatprep.subr.mxu1 %v3887_v35  ;;  %5171 = vst [vmem:[#allocation54_spill] sm:$0xff] %v3896_v28  ;;  %5172 = vst [vmem:[#allocation55_spill] sm:$0xff] %v3899_v36  ;;  %v3902_v34 = vld [vmem:[#allocation10 + $0x160] sm:$0xff]  ;;  %v3905_v35 = vld [vmem:[#allocation10 + $0x170] sm:$0xff] }
 0x2b4   : > { %1378 = vmatpush1.msra.mxu0 %v3890_v27  ;;  %1449 = vmatpush1.msra.mxu1 %v3893_v30  ;;  %5173 = vst [vmem:[#allocation56_spill] sm:$0xff] %v3902_v34  ;;  %5174 = vst [vmem:[#allocation57_spill] sm:$0xff] %v3905_v35  ;;  %v3908_v27 = vld [vmem:[#allocation10 + $0x148] sm:$0xff]  ;;  %v3911_v30 = vld [vmem:[#allocation10 + $0x158] sm:$0xff] }
 0x2b5   : > { %1379 = vmatprep.subr.mxu0 %v3896_v28  ;;  %1450 = vmatprep.subr.mxu1 %v3899_v36  ;;  %5175 = vst [vmem:[#allocation58_spill] sm:$0xff] %v3908_v27  ;;  %5176 = vst [vmem:[#allocation59_spill] sm:$0xff] %v3911_v30  ;;  %v3914_v28 = vld [vmem:[#allocation10 + $0x140] sm:$0xff]  ;;  %v3917_v36 = vld [vmem:[#allocation10 + $0x150] sm:$0xff] }
 0x2b6   : > { %1380 = vmatpush1.msra.mxu0 %v3902_v34  ;;  %1451 = vmatpush1.msra.mxu1 %v3905_v35  ;;  %5177 = vst [vmem:[#allocation60_spill] sm:$0xff] %v3914_v28  ;;  %5178 = vst [vmem:[#allocation61_spill] sm:$0xff] %v3917_v36  ;;  %v3920_v34 = vld [vmem:[#allocation10 + $0x128] sm:$0xff]  ;;  %v3923_v35 = vld [vmem:[#allocation10 + $0x138] sm:$0xff] }
 0x2b7   : > { %1381 = vmatprep.subr.mxu0 %v3908_v27  ;;  %1452 = vmatprep.subr.mxu1 %v3911_v30  ;;  %5179 = vst [vmem:[#allocation62_spill] sm:$0xff] %v3920_v34  ;;  %5180 = vst [vmem:[#allocation63_spill] sm:$0xff] %v3923_v35  ;;  %v3926_v27 = vld [vmem:[#allocation10 + $0x120] sm:$0xff]  ;;  %v3929_v30 = vld [vmem:[#allocation10 + $0x130] sm:$0xff] }
 0x2b8   : > { %1382 = vmatpush1.msra.mxu0 %v3914_v28  ;;  %1453 = vmatpush1.msra.mxu1 %v3917_v36  ;;  %5181 = vst [vmem:[#allocation64_spill] sm:$0xff] %v3926_v27  ;;  %5182 = vst [vmem:[#allocation65_spill] sm:$0xff] %v3929_v30  ;;  %v3932_v28 = vld [vmem:[#allocation10 + $0x108] sm:$0xff]  ;;  %v3935_v36 = vld [vmem:[#allocation10 + $0x118] sm:$0xff] }
 0x2b9   : > { %1383 = vmatprep.subr.mxu0 %v3920_v34  ;;  %1454 = vmatprep.subr.mxu1 %v3923_v35  ;;  %5183 = vst [vmem:[#allocation66_spill] sm:$0xff] %v3932_v28  ;;  %5184 = vst [vmem:[#allocation67_spill] sm:$0xff] %v3935_v36  ;;  %v3938_v34 = vld [vmem:[#allocation10 + $0x100] sm:$0xff]  ;;  %v3941_v35 = vld [vmem:[#allocation10 + $0x110] sm:$0xff] }
 0x2ba   : > { %1384 = vmatpush1.msra.mxu0 %v3926_v27  ;;  %1455 = vmatpush1.msra.mxu1 %v3929_v30  ;;  %5185 = vst [vmem:[#allocation68_spill] sm:$0xff] %v3938_v34  ;;  %5186 = vst [vmem:[#allocation69_spill] sm:$0xff] %v3941_v35  ;;  %v3944_v27 = vld [vmem:[#allocation10 + $0xe8] sm:$0xff]  ;;  %v3947_v30 = vld [vmem:[#allocation10 + $0xf8] sm:$0xff] }
 0x2bb   : > { %1385 = vmatprep.subr.mxu0 %v3932_v28  ;;  %1456 = vmatprep.subr.mxu1 %v3935_v36  ;;  %5187 = vst [vmem:[#allocation70_spill] sm:$0xff] %v3944_v27  ;;  %5188 = vst [vmem:[#allocation71_spill] sm:$0xff] %v3947_v30  ;;  %v3950_v28 = vld [vmem:[#allocation10 + $0xe0] sm:$0xff]  ;;  %v3953_v36 = vld [vmem:[#allocation10 + $0xf0] sm:$0xff] }
 0x2bc   : > { %1386 = vmatpush1.msra.mxu0 %v3938_v34  ;;  %1457 = vmatpush1.msra.mxu1 %v3941_v35  ;;  %5189 = vst [vmem:[#allocation72_spill] sm:$0xff] %v3950_v28  ;;  %5190 = vst [vmem:[#allocation73_spill] sm:$0xff] %v3953_v36  ;;  %v3956_v34 = vld [vmem:[#allocation10 + $0xc8] sm:$0xff]  ;;  %v3959_v35 = vld [vmem:[#allocation10 + $0xd8] sm:$0xff] }
 0x2bd   : > { %1387 = vmatprep.subr.mxu0 %v3944_v27  ;;  %1458 = vmatprep.subr.mxu1 %v3947_v30  ;;  %5191 = vst [vmem:[#allocation74_spill] sm:$0xff] %v3956_v34  ;;  %5192 = vst [vmem:[#allocation75_spill] sm:$0xff] %v3959_v35  ;;  %v3962_v27 = vld [vmem:[#allocation10 + $0xc0] sm:$0xff]  ;;  %v3965_v30 = vld [vmem:[#allocation10 + $0xd0] sm:$0xff] }
 0x2be   : > { %1388 = vmatpush1.msra.mxu0 %v3950_v28  ;;  %1459 = vmatpush1.msra.mxu1 %v3953_v36  ;;  %5193 = vst [vmem:[#allocation76_spill] sm:$0xff] %v3962_v27  ;;  %5194 = vst [vmem:[#allocation77_spill] sm:$0xff] %v3965_v30  ;;  %v3968_v28 = vld [vmem:[#allocation10 + $0xa8] sm:$0xff]  ;;  %v3971_v36 = vld [vmem:[#allocation10 + $0xb8] sm:$0xff] }
 0x2bf   : > { %1389 = vmatprep.subr.mxu0 %v3956_v34  ;;  %1460 = vmatprep.subr.mxu1 %v3959_v35  ;;  %5195 = vst [vmem:[#allocation78_spill] sm:$0xff] %v3968_v28  ;;  %5196 = vst [vmem:[#allocation79_spill] sm:$0xff] %v3971_v36  ;;  %v3974_v34 = vld [vmem:[#allocation10 + $0xa0] sm:$0xff]  ;;  %v3977_v35 = vld [vmem:[#allocation10 + $0xb0] sm:$0xff] }
 0x2c0   : > { %1390 = vmatpush1.msra.mxu0 %v3962_v27  ;;  %1461 = vmatpush1.msra.mxu1 %v3965_v30  ;;  %5197 = vst [vmem:[#allocation80_spill] sm:$0xff] %v3974_v34  ;;  %5198 = vst [vmem:[#allocation81_spill] sm:$0xff] %v3977_v35  ;;  %v3980_v27 = vld [vmem:[#allocation10 + $0x88] sm:$0xff]  ;;  %v3983_v30 = vld [vmem:[#allocation10 + $0x98] sm:$0xff] }
 0x2c1   : > { %1391 = vmatprep.subr.mxu0 %v3968_v28  ;;  %1462 = vmatprep.subr.mxu1 %v3971_v36  ;;  %5199 = vst [vmem:[#allocation82_spill] sm:$0xff] %v3980_v27  ;;  %5200 = vst [vmem:[#allocation83_spill] sm:$0xff] %v3983_v30  ;;  %v3986_v28 = vld [vmem:[#allocation10 + $0x80] sm:$0xff]  ;;  %v3989_v36 = vld [vmem:[#allocation10 + $0x90] sm:$0xff] }
 0x2c2   : > { %1392 = vmatpush1.msra.mxu0 %v3974_v34  ;;  %1463 = vmatpush1.msra.mxu1 %v3977_v35  ;;  %5201 = vst [vmem:[#allocation84_spill] sm:$0xff] %v3986_v28  ;;  %5202 = vst [vmem:[#allocation85_spill] sm:$0xff] %v3989_v36  ;;  %v3992_v34 = vld [vmem:[#allocation10 + $0x68] sm:$0xff]  ;;  %v3995_v35 = vld [vmem:[#allocation10 + $0x78] sm:$0xff] }
 0x2c3   : > { %1393 = vmatprep.subr.mxu0 %v3980_v27  ;;  %1464 = vmatprep.subr.mxu1 %v3983_v30  ;;  %5203 = vst [vmem:[#allocation86_spill] sm:$0xff] %v3992_v34  ;;  %5204 = vst [vmem:[#allocation87_spill] sm:$0xff] %v3995_v35  ;;  %v3998_v27 = vld [vmem:[#allocation10 + $0x60] sm:$0xff]  ;;  %v4001_v30 = vld [vmem:[#allocation10 + $0x70] sm:$0xff] }
 0x2c4   : > { %1394 = vmatpush1.msra.mxu0 %v3986_v28  ;;  %1465 = vmatpush1.msra.mxu1 %v3989_v36  ;;  %5205 = vst [vmem:[#allocation88_spill] sm:$0xff] %v3998_v27  ;;  %5206 = vst [vmem:[#allocation89_spill] sm:$0xff] %v4001_v30  ;;  %v4004_v28 = vld [vmem:[#allocation10 + $0x48] sm:$0xff]  ;;  %v4007_v36 = vld [vmem:[#allocation10 + $0x58] sm:$0xff] }
 0x2c5   : > { %1395 = vmatprep.subr.mxu0 %v3992_v34  ;;  %1466 = vmatprep.subr.mxu1 %v3995_v35  ;;  %5207 = vst [vmem:[#allocation90_spill] sm:$0xff] %v4004_v28  ;;  %5208 = vst [vmem:[#allocation91_spill] sm:$0xff] %v4007_v36  ;;  %v4010_v34 = vld [vmem:[#allocation10 + $0x40] sm:$0xff]  ;;  %v4013_v35 = vld [vmem:[#allocation10 + $0x50] sm:$0xff] }
 0x2c6   : > { %1396 = vmatpush1.msra.mxu0 %v3998_v27  ;;  %1467 = vmatpush1.msra.mxu1 %v4001_v30  ;;  %5209 = vst [vmem:[#allocation92_spill] sm:$0xff] %v4010_v34  ;;  %5210 = vst [vmem:[#allocation93_spill] sm:$0xff] %v4013_v35  ;;  %v4016_v27 = vld [vmem:[#allocation10 + $0x28] sm:$0xff]  ;;  %v4019_v30 = vld [vmem:[#allocation10 + $0x38] sm:$0xff] }
 0x2c7   : > { %1397 = vmatprep.subr.mxu0 %v4004_v28  ;;  %1468 = vmatprep.subr.mxu1 %v4007_v36  ;;  %5211 = vst [vmem:[#allocation94_spill] sm:$0xff] %v4016_v27  ;;  %5212 = vst [vmem:[#allocation95_spill] sm:$0xff] %v4019_v30  ;;  %v4022_v28 = vld [vmem:[#allocation10 + $0x20] sm:$0xff]  ;;  %v4025_v36 = vld [vmem:[#allocation10 + $0x30] sm:$0xff] }
 0x2c8   : > { %1398 = vmatpush1.msra.mxu0 %v4010_v34  ;;  %1469 = vmatpush1.msra.mxu1 %v4013_v35  ;;  %5213 = vst [vmem:[#allocation96_spill] sm:$0xff] %v4022_v28  ;;  %5214 = vst [vmem:[#allocation97_spill] sm:$0xff] %v4025_v36  ;;  %v4028_v34 = vld [vmem:[#allocation10 + $0x8] sm:$0xff]  ;;  %v4031_v35 = vld [vmem:[#allocation10 + $0x18] sm:$0xff] }
 0x2c9   : > { %1399 = vmatprep.subr.mxu0 %v4016_v27  ;;  %1470 = vmatprep.subr.mxu1 %v4019_v30  ;;  %5215 = vst [vmem:[#allocation98_spill] sm:$0xff] %v4028_v34  ;;  %5216 = vst [vmem:[#allocation99_spill] sm:$0xff] %v4031_v35  ;;  %v4034_v27 = vld [vmem:[#allocation10] sm:$0xff]  ;;  %v4037_v30 = vld [vmem:[#allocation10 + $0x10] sm:$0xff] }
 0x2ca   : > { %1400 = vmatpush1.msra.mxu0 %v4022_v28  ;;  %1471 = vmatpush1.msra.mxu1 %v4025_v36  ;;  %5217 = vst [vmem:[#allocation100_spill] sm:$0xff] %v4034_v27  ;;  %5218 = vst [vmem:[#allocation101_spill] sm:$0xff] %v4037_v30  ;;  %v4040_v28 = vld [vmem:[#allocation10 + $0x3e8] sm:$0xff]  ;;  %v4043_v36 = vld [vmem:[#allocation10 + $0x3f8] sm:$0xff] }
 0x2cb   : > { %1401 = vmatprep.subr.mxu0 %v4028_v34  ;;  %1472 = vmatprep.subr.mxu1 %v4031_v35  ;;  %5219 = vst [vmem:[#allocation102_spill] sm:$0xff] %v4040_v28  ;;  %5220 = vst [vmem:[#allocation103_spill] sm:$0xff] %v4043_v36  ;;  %v4046_v34 = vld [vmem:[#allocation10 + $0x3e0] sm:$0xff]  ;;  %v4049_v35 = vld [vmem:[#allocation10 + $0x3f0] sm:$0xff] }
 0x2cc   : > { %1402 = vmatpush1.msra.mxu0 %v4034_v27  ;;  %1473 = vmatpush1.msra.mxu1 %v4037_v30  ;;  %5221 = vst [vmem:[#allocation104_spill] sm:$0xff] %v4046_v34  ;;  %5222 = vst [vmem:[#allocation105_spill] sm:$0xff] %v4049_v35  ;;  %v4052_v27 = vld [vmem:[#allocation10 + $0x3c8] sm:$0xff]  ;;  %v4055_v30 = vld [vmem:[#allocation10 + $0x3d8] sm:$0xff] }
 0x2cd   : > { %1403 = vmatprep.subr.mxu0 %v4040_v28  ;;  %1474 = vmatprep.subr.mxu1 %v4043_v36  ;;  %5223 = vst [vmem:[#allocation106_spill] sm:$0xff] %v4052_v27  ;;  %5224 = vst [vmem:[#allocation107_spill] sm:$0xff] %v4055_v30  ;;  %v4058_v28 = vld [vmem:[#allocation10 + $0x3c0] sm:$0xff]  ;;  %v4061_v36 = vld [vmem:[#allocation10 + $0x3d0] sm:$0xff] }
 0x2ce   : > { %1404 = vmatpush2.msra.mxu0 %v4046_v34  ;;  %1475 = vmatpush2.msra.mxu1 %v4049_v35  ;;  %5225 = vst [vmem:[#allocation108_spill] sm:$0xff] %v4058_v28  ;;  %5226 = vst [vmem:[#allocation109_spill] sm:$0xff] %v4061_v36  ;;  %v4064_v34 = vld [vmem:[#allocation10 + $0x3a8] sm:$0xff]  ;;  %v4067_v35 = vld [vmem:[#allocation10 + $0x3b8] sm:$0xff] }
 0x2cf   : > { %1405 = vmatprep.subr.mxu0 %v4052_v27  ;;  %1476 = vmatprep.subr.mxu1 %v4055_v30  ;;  %5227 = vst [vmem:[#allocation110_spill] sm:$0xff] %v4064_v34  ;;  %5228 = vst [vmem:[#allocation111_spill] sm:$0xff] %v4067_v35  ;;  %v4070_v27 = vld [vmem:[#allocation10 + $0x3a0] sm:$0xff]  ;;  %v4073_v30 = vld [vmem:[#allocation10 + $0x3b0] sm:$0xff] }
 0x2d0   : > { %1406 = vmatpush2.msra.mxu0 %v4058_v28  ;;  %1477 = vmatpush2.msra.mxu1 %v4061_v36  ;;  %5229 = vst [vmem:[#allocation112_spill] sm:$0xff] %v4070_v27  ;;  %5230 = vst [vmem:[#allocation113_spill] sm:$0xff] %v4073_v30  ;;  %v4076_v28 = vld [vmem:[#allocation10 + $0x388] sm:$0xff]  ;;  %v4079_v36 = vld [vmem:[#allocation10 + $0x398] sm:$0xff] }
 0x2d1   : > { %1407 = vmatprep.subr.mxu0 %v4064_v34  ;;  %1478 = vmatprep.subr.mxu1 %v4067_v35  ;;  %5231 = vst [vmem:[#allocation114_spill] sm:$0xff] %v4076_v28  ;;  %5232 = vst [vmem:[#allocation115_spill] sm:$0xff] %v4079_v36  ;;  %v4082_v34 = vld [vmem:[#allocation10 + $0x380] sm:$0xff]  ;;  %v4085_v35 = vld [vmem:[#allocation10 + $0x390] sm:$0xff] }
 0x2d2   : > { %1408 = vmatpush2.msra.mxu0 %v4070_v27  ;;  %1479 = vmatpush2.msra.mxu1 %v4073_v30  ;;  %5233 = vst [vmem:[#allocation116_spill] sm:$0xff] %v4082_v34  ;;  %5234 = vst [vmem:[#allocation117_spill] sm:$0xff] %v4085_v35  ;;  %v4088_v27 = vld [vmem:[#allocation10 + $0x368] sm:$0xff]  ;;  %v4091_v30 = vld [vmem:[#allocation10 + $0x378] sm:$0xff] }
 0x2d3   : > { %1409 = vmatprep.subr.mxu0 %v4076_v28  ;;  %1480 = vmatprep.subr.mxu1 %v4079_v36  ;;  %5235 = vst [vmem:[#allocation118_spill] sm:$0xff] %v4088_v27  ;;  %5236 = vst [vmem:[#allocation119_spill] sm:$0xff] %v4091_v30  ;;  %v4094_v28 = vld [vmem:[#allocation10 + $0x360] sm:$0xff]  ;;  %v4097_v36 = vld [vmem:[#allocation10 + $0x370] sm:$0xff] }
 0x2d4   : > { %1410 = vmatpush2.msra.mxu0 %v4082_v34  ;;  %1481 = vmatpush2.msra.mxu1 %v4085_v35  ;;  %5237 = vst [vmem:[#allocation120_spill] sm:$0xff] %v4094_v28  ;;  %5238 = vst [vmem:[#allocation121_spill] sm:$0xff] %v4097_v36  ;;  %v4100_v34 = vld [vmem:[#allocation10 + $0x348] sm:$0xff]  ;;  %v4103_v35 = vld [vmem:[#allocation10 + $0x358] sm:$0xff] }
 0x2d5   : > { %1411 = vmatprep.subr.mxu0 %v4088_v27  ;;  %1482 = vmatprep.subr.mxu1 %v4091_v30  ;;  %5239 = vst [vmem:[#allocation122_spill] sm:$0xff] %v4100_v34  ;;  %5240 = vst [vmem:[#allocation123_spill] sm:$0xff] %v4103_v35  ;;  %v4106_v27 = vld [vmem:[#allocation10 + $0x340] sm:$0xff]  ;;  %v4109_v30 = vld [vmem:[#allocation10 + $0x350] sm:$0xff] }
 0x2d6   : > { %1412 = vmatpush2.msra.mxu0 %v4094_v28  ;;  %1483 = vmatpush2.msra.mxu1 %v4097_v36  ;;  %5241 = vst [vmem:[#allocation124_spill] sm:$0xff] %v4106_v27  ;;  %5242 = vst [vmem:[#allocation125_spill] sm:$0xff] %v4109_v30  ;;  %v4112_v28 = vld [vmem:[#allocation10 + $0x328] sm:$0xff]  ;;  %v4115_v36 = vld [vmem:[#allocation10 + $0x338] sm:$0xff] }
 0x2d7   : > { %1413 = vmatprep.subr.mxu0 %v4100_v34  ;;  %1484 = vmatprep.subr.mxu1 %v4103_v35  ;;  %5243 = vst [vmem:[#allocation126_spill] sm:$0xff] %v4112_v28  ;;  %5244 = vst [vmem:[#allocation127_spill] sm:$0xff] %v4115_v36  ;;  %v4118_v34 = vld [vmem:[#allocation10 + $0x320] sm:$0xff]  ;;  %v4121_v35 = vld [vmem:[#allocation10 + $0x330] sm:$0xff] }
 0x2d8   : > { %1414 = vmatpush2.msra.mxu0 %v4106_v27  ;;  %1485 = vmatpush2.msra.mxu1 %v4109_v30  ;;  %5245 = vst [vmem:[#allocation128_spill] sm:$0xff] %v4118_v34  ;;  %5246 = vst [vmem:[#allocation129_spill] sm:$0xff] %v4121_v35  ;;  %v4124_v27 = vld [vmem:[#allocation10 + $0x308] sm:$0xff]  ;;  %v4127_v30 = vld [vmem:[#allocation10 + $0x318] sm:$0xff] }
 0x2d9   : > { %1415 = vmatprep.subr.mxu0 %v4112_v28  ;;  %1486 = vmatprep.subr.mxu1 %v4115_v36  ;;  %5247 = vst [vmem:[#allocation130_spill] sm:$0xff] %v4124_v27  ;;  %5248 = vst [vmem:[#allocation131_spill] sm:$0xff] %v4127_v30  ;;  %v4130_v28 = vld [vmem:[#allocation10 + $0x300] sm:$0xff]  ;;  %v4133_v36 = vld [vmem:[#allocation10 + $0x310] sm:$0xff] }
 0x2da   : > { %1416 = vmatpush2.msra.mxu0 %v4118_v34  ;;  %1487 = vmatpush2.msra.mxu1 %v4121_v35  ;;  %5249 = vst [vmem:[#allocation132_spill] sm:$0xff] %v4130_v28  ;;  %5250 = vst [vmem:[#allocation133_spill] sm:$0xff] %v4133_v36  ;;  %v4136_v34 = vld [vmem:[#allocation10 + $0x2e8] sm:$0xff]  ;;  %v4139_v35 = vld [vmem:[#allocation10 + $0x2f8] sm:$0xff] }
 0x2db   : > { %1417 = vmatprep.subr.mxu0 %v4124_v27  ;;  %1488 = vmatprep.subr.mxu1 %v4127_v30  ;;  %5251 = vst [vmem:[#allocation134_spill] sm:$0xff] %v4136_v34  ;;  %5252 = vst [vmem:[#allocation135_spill] sm:$0xff] %v4139_v35  ;;  %v4142_v27 = vld [vmem:[#allocation10 + $0x2e0] sm:$0xff]  ;;  %v4145_v30 = vld [vmem:[#allocation10 + $0x2f0] sm:$0xff] }
 0x2dc   : > { %1418 = vmatpush2.msra.mxu0 %v4130_v28  ;;  %1489 = vmatpush2.msra.mxu1 %v4133_v36  ;;  %5253 = vst [vmem:[#allocation136_spill] sm:$0xff] %v4142_v27  ;;  %5254 = vst [vmem:[#allocation137_spill] sm:$0xff] %v4145_v30  ;;  %v4148_v28 = vld [vmem:[#allocation10 + $0x2c8] sm:$0xff]  ;;  %v4151_v36 = vld [vmem:[#allocation10 + $0x2d8] sm:$0xff] }
 0x2dd   : > { %1419 = vmatprep.subr.mxu0 %v4136_v34  ;;  %1490 = vmatprep.subr.mxu1 %v4139_v35  ;;  %5255 = vst [vmem:[#allocation138_spill] sm:$0xff] %v4148_v28  ;;  %5256 = vst [vmem:[#allocation139_spill] sm:$0xff] %v4151_v36  ;;  %v4154_v34 = vld [vmem:[#allocation10 + $0x2c0] sm:$0xff]  ;;  %v4157_v35 = vld [vmem:[#allocation10 + $0x2d0] sm:$0xff] }
 0x2de   : > { %1420 = vmatpush2.msra.mxu0 %v4142_v27  ;;  %1491 = vmatpush2.msra.mxu1 %v4145_v30  ;;  %5257 = vst [vmem:[#allocation140_spill] sm:$0xff] %v4154_v34  ;;  %5258 = vst [vmem:[#allocation141_spill] sm:$0xff] %v4157_v35  ;;  %v4160_v27 = vld [vmem:[#allocation10 + $0x2a8] sm:$0xff]  ;;  %v4163_v30 = vld [vmem:[#allocation10 + $0x2b8] sm:$0xff] }
 0x2df   : > { %1421 = vmatprep.subr.mxu0 %v4148_v28  ;;  %1492 = vmatprep.subr.mxu1 %v4151_v36  ;;  %5259 = vst [vmem:[#allocation142_spill] sm:$0xff] %v4160_v27  ;;  %5260 = vst [vmem:[#allocation143_spill] sm:$0xff] %v4163_v30  ;;  %v4166_v28 = vld [vmem:[#allocation10 + $0x2a0] sm:$0xff]  ;;  %v4169_v36 = vld [vmem:[#allocation10 + $0x2b0] sm:$0xff] }
 0x2e0   : > { %1422 = vmatpush2.msra.mxu0 %v4154_v34  ;;  %1493 = vmatpush2.msra.mxu1 %v4157_v35  ;;  %5261 = vst [vmem:[#allocation144_spill] sm:$0xff] %v4166_v28  ;;  %5262 = vst [vmem:[#allocation145_spill] sm:$0xff] %v4169_v36  ;;  %v4172_v34 = vld [vmem:[#allocation10 + $0x288] sm:$0xff]  ;;  %v4175_v35 = vld [vmem:[#allocation10 + $0x298] sm:$0xff] }
 0x2e1   : > { %1423 = vmatprep.subr.mxu0 %v4160_v27  ;;  %1494 = vmatprep.subr.mxu1 %v4163_v30  ;;  %5263 = vst [vmem:[#allocation146_spill] sm:$0xff] %v4172_v34  ;;  %5264 = vst [vmem:[#allocation147_spill] sm:$0xff] %v4175_v35  ;;  %v4178_v27 = vld [vmem:[#allocation10 + $0x280] sm:$0xff]  ;;  %v4181_v30 = vld [vmem:[#allocation10 + $0x290] sm:$0xff] }
 0x2e2   : > { %1424 = vmatpush2.msra.mxu0 %v4166_v28  ;;  %1495 = vmatpush2.msra.mxu1 %v4169_v36  ;;  %5265 = vst [vmem:[#allocation148_spill] sm:$0xff] %v4178_v27  ;;  %5266 = vst [vmem:[#allocation149_spill] sm:$0xff] %v4181_v30  ;;  %v4184_v28 = vld [vmem:[#allocation10 + $0x268] sm:$0xff]  ;;  %v4187_v36 = vld [vmem:[#allocation10 + $0x278] sm:$0xff] }
 0x2e3   : > { %1425 = vmatprep.subr.mxu0 %v4172_v34  ;;  %1496 = vmatprep.subr.mxu1 %v4175_v35  ;;  %5267 = vst [vmem:[#allocation150_spill] sm:$0xff] %v4184_v28  ;;  %5268 = vst [vmem:[#allocation151_spill] sm:$0xff] %v4187_v36  ;;  %v4190_v34 = vld [vmem:[#allocation10 + $0x260] sm:$0xff]  ;;  %v4193_v35 = vld [vmem:[#allocation10 + $0x270] sm:$0xff] }
 0x2e4   : > { %1426 = vmatpush2.msra.mxu0 %v4178_v27  ;;  %1497 = vmatpush2.msra.mxu1 %v4181_v30  ;;  %5269 = vst [vmem:[#allocation152_spill] sm:$0xff] %v4190_v34  ;;  %5270 = vst [vmem:[#allocation153_spill] sm:$0xff] %v4193_v35  ;;  %v4196_v27 = vld [vmem:[#allocation10 + $0x248] sm:$0xff]  ;;  %v4199_v30 = vld [vmem:[#allocation10 + $0x258] sm:$0xff] }
 0x2e5   : > { %1427 = vmatprep.subr.mxu0 %v4184_v28  ;;  %1498 = vmatprep.subr.mxu1 %v4187_v36  ;;  %5271 = vst [vmem:[#allocation154_spill] sm:$0xff] %v4196_v27  ;;  %5272 = vst [vmem:[#allocation155_spill] sm:$0xff] %v4199_v30  ;;  %v4202_v28 = vld [vmem:[#allocation10 + $0x240] sm:$0xff]  ;;  %v4205_v36 = vld [vmem:[#allocation10 + $0x250] sm:$0xff] }
 0x2e6   : > { %1428 = vmatpush2.msra.mxu0 %v4190_v34  ;;  %1499 = vmatpush2.msra.mxu1 %v4193_v35  ;;  %5273 = vst [vmem:[#allocation156_spill] sm:$0xff] %v4202_v28  ;;  %5274 = vst [vmem:[#allocation157_spill] sm:$0xff] %v4205_v36  ;;  %v4208_v34 = vld [vmem:[#allocation10 + $0x228] sm:$0xff]  ;;  %v4211_v35 = vld [vmem:[#allocation10 + $0x238] sm:$0xff] }
 0x2e7   : > { %1429 = vmatprep.subr.mxu0 %v4196_v27  ;;  %1500 = vmatprep.subr.mxu1 %v4199_v30  ;;  %5275 = vst [vmem:[#allocation158_spill] sm:$0xff] %v4208_v34  ;;  %5276 = vst [vmem:[#allocation159_spill] sm:$0xff] %v4211_v35  ;;  %v4214_v27 = vld [vmem:[#allocation10 + $0x220] sm:$0xff]  ;;  %v4217_v30 = vld [vmem:[#allocation10 + $0x230] sm:$0xff] }
 0x2e8   : > { %1430 = vmatpush2.msra.mxu0 %v4202_v28  ;;  %1501 = vmatpush2.msra.mxu1 %v4205_v36  ;;  %5277 = vst [vmem:[#allocation160_spill] sm:$0xff] %v4214_v27  ;;  %5278 = vst [vmem:[#allocation161_spill] sm:$0xff] %v4217_v30  ;;  %v4220_v28 = vld [vmem:[#allocation10 + $0x208] sm:$0xff]  ;;  %v4223_v36 = vld [vmem:[#allocation10 + $0x218] sm:$0xff] }
 0x2e9   : > { %1431 = vmatprep.subr.mxu0 %v4208_v34  ;;  %1502 = vmatprep.subr.mxu1 %v4211_v35  ;;  %5279 = vst [vmem:[#allocation162_spill] sm:$0xff] %v4220_v28  ;;  %5280 = vst [vmem:[#allocation163_spill] sm:$0xff] %v4223_v36  ;;  %v4226_v34 = vld [vmem:[#allocation10 + $0x200] sm:$0xff]  ;;  %v4229_v35 = vld [vmem:[#allocation10 + $0x210] sm:$0xff] }
 0x2ea   : > { %1432 = vmatpush2.msra.mxu0 %v4214_v27  ;;  %1503 = vmatpush2.msra.mxu1 %v4217_v30  ;;  %5281 = vst [vmem:[#allocation164_spill] sm:$0xff] %v4226_v34  ;;  %5282 = vst [vmem:[#allocation165_spill] sm:$0xff] %v4229_v35 }
 0x2eb   : > { %1433 = vmatprep.subr.mxu0 %v4220_v28  ;;  %1504 = vmatprep.subr.mxu1 %v4223_v36 }
 0x2ec   : > { %1434 = vmatpush2.msra.mxu0 %v4226_v34  ;;  %1505 = vmatpush2.msra.mxu1 %v4229_v35 }
 0x2ed   : > { %1548 = vmatprep.subr.mxu0 %v3621_v25  ;;  %1619 = vmatprep.subr.mxu1 %v3624_v26 }
 0x34b   : > { %v1085_v30 = vpop.f32.mrf.mxu0  ;;  %v1156_v34 = vpop.f32.mrf.mxu1 }
 0x34c   : > { %v1086_v27 = vadd.f32 %v1085_v30, %v3630_v32  ;;  %v1157_v24 = vadd.f32 %v1156_v34, %v3636_v41 }
 0x34d   : > { %v1087_v28 = vpop.f32.mrf.mxu0  ;;  %v1158_v23 = vpop.f32.mrf.mxu1 }
 0x34e   : > { %v2043_v19 = vmul.f32 -1.442695, %v1086_v27  ;;  %v1088_v29 = vadd.f32 %v1087_v28, %v3632_v33  ;;  %v2045_v35 = vmul.f32 -1.442695, %v1157_v24  ;;  %v1159_v26 = vadd.f32 %v1158_v23, %v3639_v45 }
 0x350   : > { %2214 = vpow2.f32 %v2043_v19  ;;  %v2044_v36 = vmul.f32 -1.442695, %v1088_v29  ;;  %v2047_v19 = vld [vmem:[%s2822_s13 + $0x40] sm:$0xff] }
 0x352   : > { %2216 = vpow2.f32 %v2044_v36  ;;  %v2048_v36 = vld [vmem:[%s2822_s13 + $0x48] sm:$0xff] }
 0x353   : > { %2218 = vpow2.f32 %v2045_v35 }
 0x35d   : > { %v2215_v25 = vpop.eup %2214 }
 0x35e   : > { %v1171_v22 = vadd.f32 1.0, %v2215_v25 }
 0x35f   : > { %v2217_v30 = vpop.eup %2216 }
 0x360   : > { %2220 = vrcp.f32 %v1171_v22  ;;  %v1172_v27 = vadd.f32 1.0, %v2217_v30  ;;  %v2219_v28 = vpop.eup %2218 }
 0x361   : > { %2222 = vtanh.f32 %v1159_v26  ;;  %v1173_v24 = vadd.f32 1.0, %v2219_v28  ;;  %v2050_v28 = vld [vmem:[%s2822_s13 + $0x58] sm:$0xff] }
 0x362   : > { %2224 = vrcp.f32 %v1172_v27  ;;  %v2049_v27 = vld [vmem:[%s2822_s13 + $0x50] sm:$0xff] }
 0x36c   : > { %v1262_v29 = vpop.f32.mrf.mxu0 }
 0x36d   : > { %v2221_v33 = vpop.eup %2220  ;;  %v1338_v32 = vadd.f32 %v2047_v19, %v1262_v29  ;;  %v1333_v19 = vpop.f32.mrf.mxu1 }
 0x36e   : > { %v2223_v34 = vpop.eup %2222  ;;  %v1264_v41 = vpop.f32.mrf.mxu0  ;;  %v1340_v29 = vadd.f32 %v2049_v27, %v1333_v19 }
 0x36f   : > { %v2225_v21 = vpop.eup %2224  ;;  %v2051_v23 = vmul.f32 -1.442695, %v1338_v32  ;;  %v1339_v25 = vadd.f32 %v2048_v36, %v1264_v41  ;;  %v1182_v22 = vmul.f32 %v2223_v34, %v2221_v33  ;;  %v1335_v45 = vpop.f32.mrf.mxu1 }
 0x370   : > { %v1181_v35 = vmul.f32 %v2225_v21, %v3644_v4  ;;  %v2053_v20 = vmul.f32 -1.442695, %v1340_v29  ;;  %v1341_v41 = vadd.f32 %v2050_v28, %v1335_v45 }
 0x371   : > { %2226 = vpow2.f32 %v2051_v23  ;;  %v2052_v26 = vmul.f32 -1.442695, %v1339_v25 }
 0x372   : > { %2228 = vrcp.f32 %v1173_v24  ;;  %v4241_v30 = vadd.f32 %v1182_v22, %v1181_v35 }
 0x373   : > { %2230 = vpow2.f32 %v2052_v26 }
 0x374   : > { %2232 = vtanh.f32 %v4241_v30 }
 0x375   : > { %2234 = vpow2.f32 %v2053_v20 }
 0x37e   : > { %v2227_v32 = vpop.eup %2226 }
 0x37f   : > { %v2229_v36 = vpop.eup %2228  ;;  %v1352_v4 = vadd.f32 1.0, %v2227_v32  ;;  %v5327_v32 = vld [vmem:[#allocation62_spill] sm:$0xff] }
 0x380   : > { %v2231_v33 = vpop.eup %2230 }
 0x381   : > { %v2233_v21 = vpop.eup %2232  ;;  %2236 = vrcp.f32 %v1352_v4  ;;  %v1353_v34 = vadd.f32 1.0, %v2231_v33  ;;  %v5330_v4 = vld [vmem:[#allocation65_spill] sm:$0xff]  ;;  %v5331_v33 = vld [vmem:[#allocation66_spill] sm:$0xff] }
 0x382   : > { %v1185_v24 = vmul.f32 %v2233_v21, %v2229_v36  ;;  %2238 = vtanh.f32 %v1341_v41  ;;  %v2235_v23 = vpop.eup %2234  ;;  %v5328_v41 = vld [vmem:[#allocation63_spill] sm:$0xff]  ;;  %v5329_v36 = vld [vmem:[#allocation64_spill] sm:$0xff] }
 0x383   : > { %2240 = vrcp.f32 %v1353_v34  ;;  %v1354_v26 = vadd.f32 1.0, %v2235_v23  ;;  %v5332_v21 = vld [vmem:[#allocation67_spill] sm:$0xff]  ;;  %v5333_v34 = vld [vmem:[#allocation68_spill] sm:$0xff]  ;;  %v5335_v23 = vld [vmem:[#allocation70_spill] sm:$0xff] }
 0x384   : > { %2046 = vst [vmem:[%s2833_s8 + $0x8] sm:$0xff] %v1185_v24  ;;  %1435 = vmatprep.mubr.f32.mxu0 %v1185_v24  ;;  %1506 = vmatprep.mubr.f32.mxu1 %v1185_v24  ;;  %v5334_v24 = vld [vmem:[#allocation69_spill] sm:$0xff] }
 0x385   : > { %2242 = vrcp.f32 %v1354_v26  ;;  %v5339_v26 = vld [vmem:[#allocation74_spill] sm:$0xff] }
 0x38e   : > { %v2237_v25 = vpop.eup %2236 }
 0x38f   : > { %v2239_v35 = vpop.eup %2238 }
 0x390   : > { %v2241_v22 = vpop.eup %2240  ;;  %v1363_v27 = vmul.f32 %v2239_v35, %v2237_v25  ;;  %v5336_v25 = vld [vmem:[#allocation71_spill] sm:$0xff]  ;;  %v5337_v35 = vld [vmem:[#allocation72_spill] sm:$0xff] }
 0x391   : > { %v1362_v45 = vmul.f32 %v2241_v22, %v3651_v31  ;;  %v5283_v31 = vld [vmem:[#allocation17_spill] sm:$0xff] }
 0x392   : > { %v2243_v20 = vpop.eup %2242  ;;  %v5338_v22 = vld [vmem:[#allocation73_spill] sm:$0xff] }
 0x393   : > { %v4248_v19 = vadd.f32 %v1363_v27, %v1362_v45  ;;  %v5340_v45 = vld [vmem:[#allocation75_spill] sm:$0xff]  ;;  %v5341_v27 = vld [vmem:[#allocation76_spill] sm:$0xff] }
 0x395   : > { %2244 = vtanh.f32 %v4248_v19 }
 0x3a2   : > { %v2245_v29 = vpop.eup %2244 }
 0x3a3   : > { %v4251_v28 = vmul.f32 %v2245_v29, %v2243_v20  ;;  %v5342_v20 = vld [vmem:[#allocation77_spill] sm:$0xff]  ;;  %v5343_v29 = vld [vmem:[#allocation78_spill] sm:$0xff] }
 0x3a5   : > { %1436 = vmatmul.mubr.f32.vlgmr.msra.gmra.mxu0 %v4251_v28  ;;  %1507 = vmatmul.mubr.f32.vlgmr.msra.gmra.mxu1 %v4251_v28 }
 0x3a6   : > { %1549 = vmatpush1.msra.mxu0 %v3658_v37  ;;  %1620 = vmatpush1.msra.mxu1 %v3661_v38  ;;  %v5284_v37 = vld [vmem:[#allocation25_spill] sm:$0xff]  ;;  %v5285_v38 = vld [vmem:[#allocation18_spill] sm:$0xff] }
 0x3a7   : > { %1550 = vmatprep.subr.mxu0 %v3664_v60  ;;  %1621 = vmatprep.subr.mxu1 %v3667_v39  ;;  %v5286_v60 = vld [vmem:[#allocation26_spill] sm:$0xff]  ;;  %v5287_v39 = vld [vmem:[#allocation19_spill] sm:$0xff] }
 0x3a8   : > { %1551 = vmatpush1.msra.mxu0 %v3670_v40  ;;  %1622 = vmatpush1.msra.mxu1 %v3673_v42  ;;  %v5288_v40 = vld [vmem:[#allocation27_spill] sm:$0xff]  ;;  %v5289_v42 = vld [vmem:[#allocation20_spill] sm:$0xff] }
 0x3a9   : > { %1552 = vmatprep.subr.mxu0 %v3676_v43  ;;  %1623 = vmatprep.subr.mxu1 %v3679_v44  ;;  %v5290_v43 = vld [vmem:[#allocation28_spill] sm:$0xff]  ;;  %v5291_v44 = vld [vmem:[#allocation22_spill] sm:$0xff] }
 0x3aa   : > { %1553 = vmatpush1.msra.mxu0 %v3682_v46  ;;  %1624 = vmatpush1.msra.mxu1 %v3685_v48  ;;  %v5292_v46 = vld [vmem:[#allocation29_spill] sm:$0xff]  ;;  %v5293_v48 = vld [vmem:[#allocation24_spill] sm:$0xff] }
 0x3ab   : > { %1554 = vmatprep.subr.mxu0 %v3688_v50  ;;  %1625 = vmatprep.subr.mxu1 %v3691_v52  ;;  %v5294_v50 = vld [vmem:[#allocation30_spill] sm:$0xff]  ;;  %v5295_v52 = vld [vmem:[#allocation31_spill] sm:$0xff] }
 0x3ac   : > { %1555 = vmatpush1.msra.mxu0 %v3694_v54  ;;  %1626 = vmatpush1.msra.mxu1 %v3697_v56  ;;  %v5296_v54 = vld [vmem:[#allocation32_spill] sm:$0xff]  ;;  %v5297_v56 = vld [vmem:[#allocation33_spill] sm:$0xff] }
 0x3ad   : > { %1556 = vmatprep.subr.mxu0 %v3700_v0  ;;  %1627 = vmatprep.subr.mxu1 %v3703_v1  ;;  %v5298_v0 = vld [vmem:[#allocation34_spill] sm:$0xff]  ;;  %v5299_v1 = vld [vmem:[#allocation35_spill] sm:$0xff] }
 0x3ae   : > { %1557 = vmatpush1.msra.mxu0 %v3706_v10  ;;  %1628 = vmatpush1.msra.mxu1 %v3709_v55  ;;  %v5300_v10 = vld [vmem:[#allocation36_spill] sm:$0xff]  ;;  %v5301_v55 = vmov 0.0  }
 0x3af   : > { %1558 = vmatprep.subr.mxu0 %v3712_v5  ;;  %1629 = vmatprep.subr.mxu1 %v3715_v53  ;;  %v5302_v5 = vld [vmem:[#allocation37_spill] sm:$0xff]  ;;  %v5303_v53 = vld [vmem:[#allocation38_spill] sm:$0xff] }
 0x3b0   : > { %1559 = vmatpush1.msra.mxu0 %v3718_v51  ;;  %1630 = vmatpush1.msra.mxu1 %v3721_v57  ;;  %v5304_v51 = vld [vmem:[#allocation39_spill] sm:$0xff]  ;;  %v5305_v57 = vld [vmem:[#allocation40_spill] sm:$0xff] }
 0x3b1   : > { %1560 = vmatprep.subr.mxu0 %v3724_v59  ;;  %1631 = vmatprep.subr.mxu1 %v3727_v62  ;;  %v5306_v59 = vld [vmem:[#allocation41_spill] sm:$0xff]  ;;  %v5307_v62 = vld [vmem:[#allocation42_spill] sm:$0xff] }
 0x3b2   : > { %1561 = vmatpush1.msra.mxu0 %v3730_v63  ;;  %1632 = vmatpush1.msra.mxu1 %v3733_v49  ;;  %v5308_v63 = vld [vmem:[#allocation43_spill] sm:$0xff]  ;;  %v5309_v49 = vld [vmem:[#allocation44_spill] sm:$0xff] }
 0x3b3   : > { %1562 = vmatprep.subr.mxu0 %v3736_v58  ;;  %1633 = vmatprep.subr.mxu1 %v3739_v47  ;;  %v5310_v58 = vld [vmem:[#allocation45_spill] sm:$0xff]  ;;  %v5311_v47 = vld [vmem:[#allocation46_spill] sm:$0xff] }
 0x3b4   : > { %1563 = vmatpush1.msra.mxu0 %v3742_v61  ;;  %1634 = vmatpush1.msra.mxu1 %v3745_v2  ;;  %v5312_v61 = vld [vmem:[#allocation47_spill] sm:$0xff]  ;;  %v5313_v2 = vld [vmem:[#allocation48_spill] sm:$0xff] }
 0x3b5   : > { %1564 = vmatprep.subr.mxu0 %v3748_v3  ;;  %1635 = vmatprep.subr.mxu1 %v3751_v6  ;;  %v5314_v3 = vld [vmem:[#allocation49_spill] sm:$0xff]  ;;  %v5315_v6 = vld [vmem:[#allocation50_spill] sm:$0xff] }
 0x3b6   : > { %1565 = vmatpush1.msra.mxu0 %v3754_v7  ;;  %1636 = vmatpush1.msra.mxu1 %v3757_v8  ;;  %v5316_v7 = vld [vmem:[#allocation51_spill] sm:$0xff]  ;;  %v5317_v8 = vld [vmem:[#allocation52_spill] sm:$0xff] }
 0x3b7   : > { %1566 = vmatprep.subr.mxu0 %v3760_v9  ;;  %1637 = vmatprep.subr.mxu1 %v3763_v11  ;;  %v5318_v9 = vld [vmem:[#allocation53_spill] sm:$0xff]  ;;  %v5319_v11 = vld [vmem:[#allocation54_spill] sm:$0xff] }
 0x3b8   : > { %1567 = vmatpush1.msra.mxu0 %v3766_v12  ;;  %1638 = vmatpush1.msra.mxu1 %v3769_v13  ;;  %v5320_v12 = vld [vmem:[#allocation55_spill] sm:$0xff]  ;;  %v5321_v13 = vld [vmem:[#allocation56_spill] sm:$0xff] }
 0x3b9   : > { %1568 = vmatprep.subr.mxu0 %v3772_v14  ;;  %1639 = vmatprep.subr.mxu1 %v3775_v15  ;;  %v5322_v14 = vld [vmem:[#allocation57_spill] sm:$0xff]  ;;  %v5323_v15 = vld [vmem:[#allocation58_spill] sm:$0xff] }
 0x3ba   : > { %1569 = vmatpush1.msra.mxu0 %v3778_v16  ;;  %1640 = vmatpush1.msra.mxu1 %v3781_v17  ;;  %v5324_v16 = vld [vmem:[#allocation59_spill] sm:$0xff]  ;;  %v5325_v17 = vld [vmem:[#allocation60_spill] sm:$0xff] }
 0x3bb   : > { %1570 = vmatprep.subr.mxu0 %v3784_v18  ;;  %1641 = vmatprep.subr.mxu1 %v5283_v31  ;;  %v5326_v18 = vld [vmem:[#allocation61_spill] sm:$0xff]  ;;  %v5345_v31 = vld [vmem:[#allocation80_spill] sm:$0xff] }
 0x3bc   : > { %1571 = vmatpush1.msra.mxu0 %v5284_v37  ;;  %1642 = vmatpush1.msra.mxu1 %v5285_v38  ;;  %v5346_v37 = vld [vmem:[#allocation81_spill] sm:$0xff]  ;;  %v5347_v38 = vld [vmem:[#allocation82_spill] sm:$0xff] }
 0x3bd   : > { %1572 = vmatprep.subr.mxu0 %v5286_v60  ;;  %1643 = vmatprep.subr.mxu1 %v5287_v39  ;;  %v5348_v60 = vld [vmem:[#allocation83_spill] sm:$0xff]  ;;  %v5349_v39 = vld [vmem:[#allocation84_spill] sm:$0xff] }
 0x3be   : > { %1573 = vmatpush1.msra.mxu0 %v5288_v40  ;;  %1644 = vmatpush1.msra.mxu1 %v5289_v42  ;;  %v5350_v40 = vld [vmem:[#allocation85_spill] sm:$0xff]  ;;  %v5351_v42 = vld [vmem:[#allocation86_spill] sm:$0xff] }
 0x3bf   : > { %1574 = vmatprep.subr.mxu0 %v5290_v43  ;;  %1645 = vmatprep.subr.mxu1 %v5291_v44  ;;  %v5352_v43 = vld [vmem:[#allocation87_spill] sm:$0xff]  ;;  %v5353_v44 = vld [vmem:[#allocation88_spill] sm:$0xff] }
 0x3c0   : > { %1575 = vmatpush1.msra.mxu0 %v5292_v46  ;;  %1646 = vmatpush1.msra.mxu1 %v5293_v48  ;;  %v5354_v46 = vld [vmem:[#allocation89_spill] sm:$0xff]  ;;  %v5355_v48 = vld [vmem:[#allocation90_spill] sm:$0xff] }
 0x3c1   : > { %1576 = vmatprep.subr.mxu0 %v5294_v50  ;;  %1647 = vmatprep.subr.mxu1 %v5295_v52  ;;  %v5356_v50 = vld [vmem:[#allocation91_spill] sm:$0xff]  ;;  %v5357_v52 = vld [vmem:[#allocation92_spill] sm:$0xff] }
 0x3c2   : > { %1577 = vmatpush1.msra.mxu0 %v5296_v54  ;;  %1648 = vmatpush1.msra.mxu1 %v5297_v56  ;;  %v5358_v54 = vld [vmem:[#allocation93_spill] sm:$0xff]  ;;  %v5359_v56 = vld [vmem:[#allocation94_spill] sm:$0xff] }
 0x3c3   : > { %1578 = vmatprep.subr.mxu0 %v5298_v0  ;;  %1649 = vmatprep.subr.mxu1 %v5299_v1  ;;  %v5360_v0 = vld [vmem:[#allocation95_spill] sm:$0xff]  ;;  %v5361_v1 = vld [vmem:[#allocation96_spill] sm:$0xff] }
 0x3c4   : > { %1579 = vmatpush1.msra.mxu0 %v5300_v10  ;;  %1612 = vmatprep.mubr.f32.mxu0 %v5301_v55  ;;  %v5362_v10 = vld [vmem:[#allocation97_spill] sm:$0xff] }
 0x3c5   : > { %1650 = vmatpush1.msra.mxu1 %v5302_v5  ;;  %1683 = vmatprep.mubr.f32.mxu1 %v5301_v55  ;;  %v5363_v55 = vld [vmem:[#allocation98_spill] sm:$0xff]  ;;  %v5364_v5 = vld [vmem:[#allocation99_spill] sm:$0xff] }
 0x3c6   : > { %1613 = vmatmul.mubr.f32.vlgmr.msra.gmra.mxu0 %v4251_v28  ;;  %1684 = vmatmul.mubr.f32.vlgmr.msra.gmra.mxu1 %v4251_v28  ;;  %v5344_v28 = vld [vmem:[#allocation79_spill] sm:$0xff] }
 0x3c7   : > { %1723 = vmatprep.subr.mxu0 %v5303_v53  ;;  %1794 = vmatprep.subr.mxu1 %v5304_v51  ;;  %v5365_v53 = vld [vmem:[#allocation100_spill] sm:$0xff]  ;;  %v5366_v51 = vld [vmem:[#allocation101_spill] sm:$0xff] }
 0x3c8   : > { %1724 = vmatpush1.msra.mxu0 %v5305_v57  ;;  %1795 = vmatpush1.msra.mxu1 %v5306_v59  ;;  %v5367_v57 = vld [vmem:[#allocation102_spill] sm:$0xff]  ;;  %v5368_v59 = vld [vmem:[#allocation103_spill] sm:$0xff] }
 0x3c9   : > { %1725 = vmatprep.subr.mxu0 %v5307_v62  ;;  %1796 = vmatprep.subr.mxu1 %v5308_v63  ;;  %v5369_v62 = vld [vmem:[#allocation104_spill] sm:$0xff]  ;;  %v5370_v63 = vld [vmem:[#allocation105_spill] sm:$0xff] }
 0x3ca   : > { %1726 = vmatpush1.msra.mxu0 %v5309_v49  ;;  %1797 = vmatpush1.msra.mxu1 %v5310_v58  ;;  %v5371_v49 = vld [vmem:[#allocation106_spill] sm:$0xff]  ;;  %v5372_v58 = vld [vmem:[#allocation107_spill] sm:$0xff] }
 0x3cb   : > { %1727 = vmatprep.subr.mxu0 %v5311_v47  ;;  %1798 = vmatprep.subr.mxu1 %v5312_v61  ;;  %v5373_v47 = vld [vmem:[#allocation108_spill] sm:$0xff]  ;;  %v5374_v61 = vld [vmem:[#allocation109_spill] sm:$0xff] }
 0x3cc   : > { %1728 = vmatpush1.msra.mxu0 %v5313_v2  ;;  %1799 = vmatpush1.msra.mxu1 %v5314_v3  ;;  %v5375_v2 = vld [vmem:[#allocation110_spill] sm:$0xff]  ;;  %v5376_v3 = vld [vmem:[#allocation111_spill] sm:$0xff] }
 0x3cd   : > { %1729 = vmatprep.subr.mxu0 %v5315_v6  ;;  %1800 = vmatprep.subr.mxu1 %v5316_v7  ;;  %v5377_v6 = vld [vmem:[#allocation112_spill] sm:$0xff]  ;;  %v5378_v7 = vld [vmem:[#allocation113_spill] sm:$0xff] }
 0x3ce   : > { %1730 = vmatpush1.msra.mxu0 %v5317_v8  ;;  %1801 = vmatpush1.msra.mxu1 %v5318_v9  ;;  %v5379_v8 = vld [vmem:[#allocation114_spill] sm:$0xff]  ;;  %v5380_v9 = vld [vmem:[#allocation115_spill] sm:$0xff] }
 0x3cf   : > { %1731 = vmatprep.subr.mxu0 %v5319_v11  ;;  %1802 = vmatprep.subr.mxu1 %v5320_v12  ;;  %v5381_v11 = vld [vmem:[#allocation116_spill] sm:$0xff]  ;;  %v5382_v12 = vld [vmem:[#allocation117_spill] sm:$0xff] }
 0x3d0   : > { %1732 = vmatpush1.msra.mxu0 %v5321_v13  ;;  %1803 = vmatpush1.msra.mxu1 %v5322_v14  ;;  %v5383_v13 = vld [vmem:[#allocation118_spill] sm:$0xff]  ;;  %v5384_v14 = vld [vmem:[#allocation119_spill] sm:$0xff] }
 0x3d1   : > { %1733 = vmatprep.subr.mxu0 %v5323_v15  ;;  %1804 = vmatprep.subr.mxu1 %v5324_v16  ;;  %v5385_v15 = vld [vmem:[#allocation120_spill] sm:$0xff]  ;;  %v5386_v16 = vld [vmem:[#allocation121_spill] sm:$0xff] }
 0x3d2   : > { %1734 = vmatpush1.msra.mxu0 %v5325_v17  ;;  %1805 = vmatpush1.msra.mxu1 %v5326_v18  ;;  %v5387_v17 = vld [vmem:[#allocation122_spill] sm:$0xff]  ;;  %v5388_v18 = vld [vmem:[#allocation123_spill] sm:$0xff] }
 0x3d3   : > { %1735 = vmatprep.subr.mxu0 %v5327_v32  ;;  %1806 = vmatprep.subr.mxu1 %v5328_v41  ;;  %v5389_v32 = vld [vmem:[#allocation124_spill] sm:$0xff]  ;;  %v5390_v41 = vld [vmem:[#allocation125_spill] sm:$0xff] }
 0x3d4   : > { %1736 = vmatpush1.msra.mxu0 %v5329_v36  ;;  %1807 = vmatpush1.msra.mxu1 %v5330_v4  ;;  %v5391_v36 = vld [vmem:[#allocation126_spill] sm:$0xff]  ;;  %v5392_v4 = vld [vmem:[#allocation127_spill] sm:$0xff] }
 0x3d5   : > { %1737 = vmatprep.subr.mxu0 %v5331_v33  ;;  %1808 = vmatprep.subr.mxu1 %v5332_v21  ;;  %v5393_v33 = vld [vmem:[#allocation128_spill] sm:$0xff]  ;;  %v5394_v21 = vld [vmem:[#allocation129_spill] sm:$0xff] }
 0x3d6   : > { %1738 = vmatpush1.msra.mxu0 %v5333_v34  ;;  %1809 = vmatpush1.msra.mxu1 %v5334_v24  ;;  %v5395_v34 = vld [vmem:[#allocation130_spill] sm:$0xff]  ;;  %v5396_v24 = vld [vmem:[#allocation131_spill] sm:$0xff] }
 0x3d7   : > { %1739 = vmatprep.subr.mxu0 %v5335_v23  ;;  %1810 = vmatprep.subr.mxu1 %v5336_v25  ;;  %v5397_v23 = vld [vmem:[#allocation132_spill] sm:$0xff]  ;;  %v5398_v25 = vld [vmem:[#allocation133_spill] sm:$0xff] }
 0x3d8   : > { %1740 = vmatpush1.msra.mxu0 %v5337_v35  ;;  %1811 = vmatpush1.msra.mxu1 %v5338_v22  ;;  %v5399_v35 = vld [vmem:[#allocation134_spill] sm:$0xff]  ;;  %v5400_v22 = vld [vmem:[#allocation135_spill] sm:$0xff] }
 0x3d9   : > { %1741 = vmatprep.subr.mxu0 %v5339_v26  ;;  %1812 = vmatprep.subr.mxu1 %v5340_v45  ;;  %v5401_v26 = vld [vmem:[#allocation136_spill] sm:$0xff]  ;;  %v5402_v45 = vld [vmem:[#allocation137_spill] sm:$0xff] }
 0x3da   : > { %1742 = vmatpush1.msra.mxu0 %v5341_v27  ;;  %1813 = vmatpush1.msra.mxu1 %v5342_v20  ;;  %v5403_v27 = vld [vmem:[#allocation138_spill] sm:$0xff]  ;;  %v5404_v20 = vld [vmem:[#allocation139_spill] sm:$0xff] }
 0x3db   : > { %1743 = vmatprep.subr.mxu0 %v5343_v29  ;;  %1814 = vmatprep.subr.mxu1 %v5344_v28  ;;  %v5405_v29 = vld [vmem:[#allocation140_spill] sm:$0xff]  ;;  %v5406_v28 = vld [vmem:[#allocation141_spill] sm:$0xff] }
 0x3dc   : > { %1744 = vmatpush1.msra.mxu0 %v5345_v31  ;;  %1815 = vmatpush1.msra.mxu1 %v5346_v37  ;;  %v5407_v31 = vld [vmem:[#allocation142_spill] sm:$0xff]  ;;  %v5408_v37 = vld [vmem:[#allocation143_spill] sm:$0xff] }
 0x3dd   : > { %1745 = vmatprep.subr.mxu0 %v5347_v38  ;;  %1816 = vmatprep.subr.mxu1 %v5348_v60  ;;  %v5409_v38 = vld [vmem:[#allocation144_spill] sm:$0xff]  ;;  %v5410_v60 = vld [vmem:[#allocation145_spill] sm:$0xff] }
 0x3de   : > { %1746 = vmatpush1.msra.mxu0 %v5349_v39  ;;  %1817 = vmatpush1.msra.mxu1 %v5350_v40  ;;  %v5411_v39 = vld [vmem:[#allocation146_spill] sm:$0xff]  ;;  %v5412_v40 = vld [vmem:[#allocation147_spill] sm:$0xff] }
 0x3df   : > { %1747 = vmatprep.subr.mxu0 %v5351_v42  ;;  %1818 = vmatprep.subr.mxu1 %v5352_v43  ;;  %v5413_v42 = vld [vmem:[#allocation148_spill] sm:$0xff]  ;;  %v5414_v43 = vld [vmem:[#allocation149_spill] sm:$0xff] }
 0x3e0   : > { %1748 = vmatpush1.msra.mxu0 %v5353_v44  ;;  %1819 = vmatpush1.msra.mxu1 %v5354_v46  ;;  %v5415_v44 = vld [vmem:[#allocation150_spill] sm:$0xff]  ;;  %v5416_v46 = vld [vmem:[#allocation151_spill] sm:$0xff] }
 0x3e1   : > { %1749 = vmatprep.subr.mxu0 %v5355_v48  ;;  %1820 = vmatprep.subr.mxu1 %v5356_v50  ;;  %v5417_v48 = vld [vmem:[#allocation152_spill] sm:$0xff]  ;;  %v5418_v50 = vld [vmem:[#allocation153_spill] sm:$0xff] }
 0x3e2   : > { %1750 = vmatpush1.msra.mxu0 %v5357_v52  ;;  %1821 = vmatpush1.msra.mxu1 %v5358_v54  ;;  %v5419_v52 = vld [vmem:[#allocation154_spill] sm:$0xff]  ;;  %v5420_v54 = vld [vmem:[#allocation155_spill] sm:$0xff] }
 0x3e3   : > { %1751 = vmatprep.subr.mxu0 %v5359_v56  ;;  %1822 = vmatprep.subr.mxu1 %v5360_v0  ;;  %v5421_v56 = vld [vmem:[#allocation156_spill] sm:$0xff]  ;;  %v5422_v0 = vld [vmem:[#allocation157_spill] sm:$0xff] }
 0x3e4   : > { %1752 = vmatpush1.msra.mxu0 %v5361_v1  ;;  %1823 = vmatpush1.msra.mxu1 %v5362_v10  ;;  %v5423_v1 = vld [vmem:[#allocation158_spill] sm:$0xff]  ;;  %v5424_v10 = vld [vmem:[#allocation159_spill] sm:$0xff] }
 0x3e5   : > { %1753 = vmatprep.subr.mxu0 %v5363_v55  ;;  %1824 = vmatprep.subr.mxu1 %v5364_v5  ;;  %v5425_v55 = vld [vmem:[#allocation160_spill] sm:$0xff]  ;;  %v5426_v5 = vld [vmem:[#allocation161_spill] sm:$0xff] }
 0x3e6   : > { %1754 = vmatpush1.msra.mxu0 %v5365_v53  ;;  %1825 = vmatpush1.msra.mxu1 %v5366_v51  ;;  %v5427_v53 = vld [vmem:[#allocation162_spill] sm:$0xff]  ;;  %v5428_v51 = vld [vmem:[#allocation163_spill] sm:$0xff] }
 0x3e7   : > { %1755 = vmatprep.subr.mxu0 %v5367_v57  ;;  %1826 = vmatprep.subr.mxu1 %v5368_v59  ;;  %v5429_v57 = vld [vmem:[#allocation164_spill] sm:$0xff]  ;;  %v5430_v59 = vld [vmem:[#allocation165_spill] sm:$0xff] }
 0x3e8   : > { %1756 = vmatpush2.msra.mxu0 %v5369_v62  ;;  %1827 = vmatpush2.msra.mxu1 %v5370_v63  ;;  %v5431_v63 = vld [vmem:[#allocation15_spill] sm:$0xff] }
 0x3e9   : > { %1757 = vmatprep.subr.mxu0 %v5371_v49  ;;  %1828 = vmatprep.subr.mxu1 %v5372_v58 }
 0x3ea   : > { %1758 = vmatpush2.msra.mxu0 %v5373_v47  ;;  %1829 = vmatpush2.msra.mxu1 %v5374_v61  ;;  %v5432_v61 = vld [vmem:[#allocation21_spill] sm:$0xff] }
 0x3eb   : > { %1759 = vmatprep.subr.mxu0 %v5375_v2  ;;  %1830 = vmatprep.subr.mxu1 %v5376_v3 }
 0x3ec   : > { %1760 = vmatpush2.msra.mxu0 %v5377_v6  ;;  %1831 = vmatpush2.msra.mxu1 %v5378_v7  ;;  %v5433_v7 = vld [vmem:[#allocation16_spill] sm:$0xff] }
 0x3ed   : > { %1761 = vmatprep.subr.mxu0 %v5379_v8  ;;  %1832 = vmatprep.subr.mxu1 %v5380_v9 }
 0x3ee   : > { %1762 = vmatpush2.msra.mxu0 %v5381_v11  ;;  %1833 = vmatpush2.msra.mxu1 %v5382_v12 }
 0x3ef   : > { %1763 = vmatprep.subr.mxu0 %v5383_v13  ;;  %1834 = vmatprep.subr.mxu1 %v5384_v14  ;;  %v5434_v13 = vld [vmem:[#allocation23_spill] sm:$0xff] }
 0x3f0   : > { %1764 = vmatpush2.msra.mxu0 %v5385_v15  ;;  %1835 = vmatpush2.msra.mxu1 %v5386_v16 }
 0x3f1   : > { %1765 = vmatprep.subr.mxu0 %v5387_v17  ;;  %1836 = vmatprep.subr.mxu1 %v5388_v18  ;;  %v2058_v18 = vld [vmem:[%s2822_s13 + $0x60] sm:$0xff] }
 0x3f2   : > { %1766 = vmatpush2.msra.mxu0 %v5389_v32  ;;  %1837 = vmatpush2.msra.mxu1 %v5390_v41 }
 0x3f3   : > { %1767 = vmatprep.subr.mxu0 %v5391_v36  ;;  %1838 = vmatprep.subr.mxu1 %v5392_v4  ;;  %v2059_v36 = vld [vmem:[%s2822_s13 + $0x68] sm:$0xff] }
 0x3f4   : > { %1768 = vmatpush2.msra.mxu0 %v5393_v33  ;;  %1839 = vmatpush2.msra.mxu1 %v5394_v21 }
 0x3f5   : > { %1769 = vmatprep.subr.mxu0 %v5395_v34  ;;  %1840 = vmatprep.subr.mxu1 %v5396_v24 }
 0x3f6   : > { %1770 = vmatpush2.msra.mxu0 %v5397_v23  ;;  %1841 = vmatpush2.msra.mxu1 %v5398_v25 }
 0x3f7   : > { %1771 = vmatprep.subr.mxu0 %v5399_v35  ;;  %1842 = vmatprep.subr.mxu1 %v5400_v22 }
 0x3f8   : > { %1772 = vmatpush2.msra.mxu0 %v5401_v26  ;;  %1843 = vmatpush2.msra.mxu1 %v5402_v45 }
 0x3f9   : > { %1773 = vmatprep.subr.mxu0 %v5403_v27  ;;  %1844 = vmatprep.subr.mxu1 %v5404_v20  ;;  %v2060_v20 = vld [vmem:[%s2822_s13 + $0x70] sm:$0xff] }
 0x3fa   : > { %1774 = vmatpush2.msra.mxu0 %v5405_v29  ;;  %1845 = vmatpush2.msra.mxu1 %v5406_v28 }
 0x3fb   : > { %1775 = vmatprep.subr.mxu0 %v5407_v31  ;;  %1846 = vmatprep.subr.mxu1 %v5408_v37  ;;  %v2061_v31 = vld [vmem:[%s2822_s13 + $0x78] sm:$0xff] }
 0x3fc   : > { %1776 = vmatpush2.msra.mxu0 %v5409_v38  ;;  %1847 = vmatpush2.msra.mxu1 %v5410_v60 }
 0x3fd   : > { %1777 = vmatprep.subr.mxu0 %v5411_v39  ;;  %1848 = vmatprep.subr.mxu1 %v5412_v40 }
 0x3fe   : > { %1778 = vmatpush2.msra.mxu0 %v5413_v42  ;;  %1849 = vmatpush2.msra.mxu1 %v5414_v43 }
 0x3ff   : > { %1779 = vmatprep.subr.mxu0 %v5415_v44  ;;  %1850 = vmatprep.subr.mxu1 %v5416_v46 }
 0x400   : > { %1780 = vmatpush2.msra.mxu0 %v5417_v48  ;;  %1851 = vmatpush2.msra.mxu1 %v5418_v50 }
 0x401   : > { %1781 = vmatprep.subr.mxu0 %v5419_v52  ;;  %1852 = vmatprep.subr.mxu1 %v5420_v54 }
 0x402   : > { %1782 = vmatpush2.msra.mxu0 %v5421_v56  ;;  %1853 = vmatpush2.msra.mxu1 %v5422_v0 }
 0x403   : > { %1783 = vmatprep.subr.mxu0 %v5423_v1  ;;  %1854 = vmatprep.subr.mxu1 %v5424_v10 }
 0x404   : > { %1784 = vmatpush2.msra.mxu0 %v5425_v55  ;;  %1855 = vmatpush2.msra.mxu1 %v5426_v5 }
 0x405   : > { %1785 = vmatprep.subr.mxu0 %v5427_v53  ;;  %1856 = vmatprep.subr.mxu1 %v5428_v51 }
 0x406   : > { %1786 = vmatpush2.msra.mxu0 %v5429_v57  ;;  %1857 = vmatpush2.msra.mxu1 %v5430_v59 }
 0x465   : > { %v1437_v62 = vpop.f32.mrf.mxu0  ;;  %v1508_v6 = vpop.f32.mrf.mxu1 }
 0x466   : > { %v1438_v49 = vadd.f32 %v1437_v62, %v5431_v63  ;;  %v1509_v8 = vadd.f32 %v1508_v6, %v5433_v7 }
 0x467   : > { %v1439_v58 = vpop.f32.mrf.mxu0  ;;  %v1510_v11 = vpop.f32.mrf.mxu1 }
 0x468   : > { %v2054_v47 = vmul.f32 -1.442695, %v1438_v49  ;;  %v1440_v2 = vadd.f32 %v1439_v58, %v5432_v61  ;;  %v2056_v9 = vmul.f32 -1.442695, %v1509_v8  ;;  %v1511_v14 = vadd.f32 %v1510_v11, %v5434_v13 }
 0x46a   : > { %2246 = vpow2.f32 %v2054_v47  ;;  %v2055_v3 = vmul.f32 -1.442695, %v1440_v2 }
 0x46c   : > { %2248 = vpow2.f32 %v2055_v3 }
 0x46d   : > { %2250 = vpow2.f32 %v2056_v9 }
 0x477   : > { %v2247_v12 = vpop.eup %2246 }
 0x478   : > { %v1523_v15 = vadd.f32 1.0, %v2247_v12 }
 0x479   : > { %v2249_v16 = vpop.eup %2248 }
 0x47a   : > { %2252 = vrcp.f32 %v1523_v15  ;;  %v1524_v17 = vadd.f32 1.0, %v2249_v16  ;;  %v2251_v32 = vpop.eup %2250 }
 0x47b   : > { %2254 = vtanh.f32 %v1511_v14  ;;  %v1525_v34 = vadd.f32 1.0, %v2251_v32 }
 0x47c   : > { %2256 = vrcp.f32 %v1524_v17 }
 0x486   : > { %v1614_v41 = vpop.f32.mrf.mxu0  ;;  %v1685_v29 = vpop.f32.mrf.mxu1 }
 0x487   : > { %v2253_v4 = vpop.eup %2252  ;;  %v1690_v33 = vadd.f32 %v2058_v18, %v1614_v41  ;;  %v1692_v28 = vadd.f32 %v2060_v20, %v1685_v29 }
 0x488   : > { %v2255_v21 = vpop.eup %2254  ;;  %v1616_v24 = vpop.f32.mrf.mxu0 }
 0x489   : > { %v2257_v23 = vpop.eup %2256  ;;  %v2062_v25 = vmul.f32 -1.442695, %v1690_v33  ;;  %v1691_v35 = vadd.f32 %v2059_v36, %v1616_v24  ;;  %v1534_v26 = vmul.f32 %v2255_v21, %v2253_v4  ;;  %v1687_v37 = vpop.f32.mrf.mxu1  ;;  %v2064_v38 = vmul.f32 -1.442695, %v1692_v28 }
 0x48a   : > { %v1533_v22 = vmul.f32 %v2257_v23, %v4241_v30  ;;  %v1693_v39 = vadd.f32 %v2061_v31, %v1687_v37 }
 0x48b   : > { %2258 = vpow2.f32 %v2062_v25  ;;  %v2063_v45 = vmul.f32 -1.442695, %v1691_v35 }
 0x48c   : > { %2260 = vrcp.f32 %v1525_v34  ;;  %v4456_v27 = vadd.f32 %v1534_v26, %v1533_v22 }
 0x48d   : > { %2262 = vpow2.f32 %v2063_v45 }
 0x48e   : > { %2264 = vtanh.f32 %v4456_v27 }
 0x48f   : > { %2266 = vpow2.f32 %v2064_v38 }
 0x498   : > { %v2259_v60 = vpop.eup %2258 }
 0x499   : > { %v2261_v40 = vpop.eup %2260  ;;  %v1704_v30 = vadd.f32 1.0, %v2259_v60 }
 0x49a   : > { %v2263_v42 = vpop.eup %2262 }
 0x49b   : > { %v2265_v43 = vpop.eup %2264  ;;  %2268 = vrcp.f32 %v1704_v30  ;;  %v1705_v44 = vadd.f32 1.0, %v2263_v42 }
 0x49c   : > { %v1537_v46 = vmul.f32 %v2265_v43, %v2261_v40  ;;  %2270 = vtanh.f32 %v1693_v39  ;;  %v2267_v48 = vpop.eup %2266 }
 0x49d   : > { %2272 = vrcp.f32 %v1705_v44  ;;  %v1706_v56 = vadd.f32 1.0, %v2267_v48 }
 0x49e   : > { %2057 = vst [vmem:[%s2833_s8 + $0x10] sm:$0xff] %v1537_v46  ;;  %1787 = vmatprep.mubr.f32.mxu0 %v1537_v46  ;;  %1858 = vmatprep.mubr.f32.mxu1 %v1537_v46 }
 0x49f   : > { %2274 = vrcp.f32 %v1706_v56 }
 0x4a8   : > { %v2269_v50 = vpop.eup %2268 }
 0x4a9   : > { %v2271_v52 = vpop.eup %2270 }
 0x4aa   : > { %v2273_v54 = vpop.eup %2272  ;;  %v1715_v1 = vmul.f32 %v2271_v52, %v2269_v50 }
 0x4ab   : > { %v1714_v0 = vmul.f32 %v2273_v54, %v4248_v19 }
 0x4ac   : > { %v2275_v55 = vpop.eup %2274 }
 0x4ad   : > { %v1716_v10 = vadd.f32 %v1715_v1, %v1714_v0 }
 0x4af   : > { %2276 = vtanh.f32 %v1716_v10  ;;  %1720 = vst [vmem:[#allocation3] sm:$0xff] %v1716_v10 }
 0x4bc   : > { %v2277_v5 = vpop.eup %2276 }
 0x4bd   : > { %v1718_v53 = vmul.f32 %v2277_v5, %v2275_v55 }
 0x4bf   : > { %1719 = vst [vmem:[#allocation2] sm:$0xff] %v1718_v53  ;;  %1788 = vmatmul.mubr.f32.vlgmr.msra.gmra.mxu0 %v1718_v53  ;;  %1859 = vmatmul.mubr.f32.vlgmr.msra.gmra.mxu1 %v1718_v53 }
 0x57f   : > { %v1789_v51 = vpop.f32.mrf.mxu0  ;;  %v1860_v58 = vpop.f32.mrf.mxu1 }
 0x580   : > { %v1790_v57 = vadd.f32 %v1789_v51, %v5431_v63  ;;  %v1861_v47 = vadd.f32 %v1860_v58, %v5433_v7 }
 0x581   : > { %v1791_v59 = vpop.f32.mrf.mxu0  ;;  %v1862_v2 = vpop.f32.mrf.mxu1 }
 0x582   : > { %v2065_v62 = vmul.f32 -1.442695, %v1790_v57  ;;  %v1792_v49 = vadd.f32 %v1791_v59, %v5432_v61  ;;  %v2067_v3 = vmul.f32 -1.442695, %v1861_v47  ;;  %v1863_v8 = vadd.f32 %v1862_v2, %v5434_v13 }
 0x584   : > { %2278 = vpow2.f32 %v2065_v62  ;;  %v2066_v19 = vmul.f32 -1.442695, %v1792_v49 }
 0x586   : > { %2280 = vpow2.f32 %v2066_v19 }
 0x587   : > { %2282 = vpow2.f32 %v2067_v3 }
 0x591   : > { %v2279_v6 = vpop.eup %2278 }
 0x592   : > { %v1875_v9 = vadd.f32 1.0, %v2279_v6 }
 0x593   : > { %v2281_v11 = vpop.eup %2280 }
 0x594   : > { %2284 = vrcp.f32 %v1875_v9  ;;  %v1876_v63 = vadd.f32 1.0, %v2281_v11  ;;  %v2283_v61 = vpop.eup %2282 }
 0x595   : > { %2286 = vtanh.f32 %v1863_v8  ;;  %v1877_v7 = vadd.f32 1.0, %v2283_v61 }
 0x596   : > { %2288 = vrcp.f32 %v1876_v63 }
 0x597   : > { %2290 = vrcp.f32 %v1877_v7 }
 0x5a1   : > { %v2285_v12 = vpop.eup %2284 }
 0x5a2   : > { %v2287_v14 = vpop.eup %2286 }
 0x5a3   : > { %v2289_v15 = vpop.eup %2288  ;;  %v1886_v17 = vmul.f32 %v2287_v14, %v2285_v12 }
 0x5a4   : > { %v1885_v16 = vmul.f32 %v2289_v15, %v4456_v27  ;;  %v2291_v18 = vpop.eup %2290 }
 0x5a6   : > { %v1887_v13 = vadd.f32 %v1886_v17, %v1885_v16 }
 0x5a8   : > { %2292 = vtanh.f32 %v1887_v13  ;;  %1891 = vst [vmem:[#allocation4] sm:$0xff] %v1887_v13 }
 0x5b5   : > { %v2293_v32 = vpop.eup %2292 }
 0x5b6   : > { %v1889_v41 = vmul.f32 %v2293_v32, %v2291_v18 }
 0x5b8   : > { %1890 = vst [vmem:[#allocation2 + $0x8] sm:$0xff] %v1889_v41  ;;  %2068 = vst [vmem:[%s2833_s8 + $0x18] sm:$0xff] %v1889_v41 }
 0x5b9   : > { %2579 = shalt.err (!%p2576_p9)
}
 0x5ba   : > { %s2580_s11 = scalar_lea.hbm %s4473_s22, 512  ;;  %s2584_s8 = scalar_lea.hbm %s4528_s4, 1024 }
 0x5bb   : > { %p2581_p12 = scmp.ne.s32.totalorder %s4473_s22, %s2580_s11  ;;  %p2585_p7 = scmp.lt.s32.totalorder %s4473_s22, %s4528_s4 }
 0x5bc   : > { %p2586_p5 = scmp.lt.s32.totalorder %s2584_s8, %s2580_s11 }
 0x5bd   : > { %p2582_p13 = pnand %p2581_p12, %p2788_p3 }
 0x5be   : > { %p2587_p6 = por %p2586_p5, %p2585_p7 }
 0x5bf   : > { %p2583_p0 = pneg %p2582_p13 }
 0x5c1   : > { %p2588_p1 = pnand %p2587_p6, %p2583_p0 }
 0x5c3   : > { %2591 = shalt.err (!%p2588_p1)
}
 0x5c4   : > { %s2660_s12 = smov 128   ;;  %s2661_s24 = smov 8  }
 0x5c5   : > { %2087 = dma.vmem_to_hbm [thread:$0]  (%p2788_p3), %s4475_s14, 512, %s4473_s22, %s1895_s6, %s2660_s12, %s2660_s12, %s2661_s24  }
 0x5c6 PF: > { %s1924_s29 = sand.u32 1, %s2630_s15   ;;  %p5435_p4 = scmp.ne.s32.totalorder %s4836_s26, 0 }
 0x5c7   : > { %p5436_p8 = scmp.ge.s32.totalorder %s2650_s20, 2  ;;  %s1925_s5 = scalar_lea.sflag [#allocation7], %s1924_s29 }
 0x5c9   : > { %p2101_p10 = pnand %p5436_p8, %p5435_p4 }
 0x5cb   : > { %p2102_p11 = pneg %p2101_p10 }
 0x5cd   : > { %2625 = dma.done.wait (%p2102_p11), %s1925_s5, 512  }
 0x5ce   : > { %2627 = vsyncadd (%p2102_p11), %s1925_s5, 4294966784  ;;  %s21_s20 = sadd.s32 1, %s2650_s20   ;;  %s5437_s15 = smov %s2634_s16 }
 0x5cf   : > { %p18_p2 = scmp.ge.s32.totalorder %s21_s20, 4   ;;  %s5438_s16 = smov %s2638_s17 }
 0x5d0   : > { %s5439_s17 = smov %s2797_s7  ;;  %s5440_s18 = smov %s2646_s19 }
 0x5d1   : > { %s5441_s19 = smov %s5443_s21  ;;  %20 = sbr.rel (!%p18_p2) target bundleno = 7 (0x7), region = 99 }
 0x5d6   :  { %1930 = vsyncpa [#allocation6], 1 }
 0x5d7   :  { %1932 = vsyncpa [#allocation6 + $0x1], 1 }
 0x5d8   :  { %1933 = vsyncpa [#allocation9], 1 }
 0x5d9   :  { %1934 = vsyncpa [#allocation7], 1 }
 0x5da   :  { %1936 = vsyncpa [#allocation7 + $0x1], 1 }

// kernel: tpu_custom_call.1
= control target key start
LH: loop header
LB: loop body
LE: loop exit
PB: predicated region body
PF: predicated region fallthrough
CT: control target
= control target key end

     0   :  { %9 = vsyncpa [#allocation6], 0  ;;  %s4524_s0 = inlined_call_operand.hbm [shape: f32[8,8,512], index: 0, kind: input, shape index: {}]   ;;  %s4525_s1 = inlined_call_operand.hbm [shape: f32[128,512], index: 1, kind: input, shape index: {}]   ;;  %s4526_s2 = inlined_call_operand.hbm [shape: f32[256,512], index: 2, kind: input, shape index: {}]   ;;  %s4527_s3 = inlined_call_operand.vmem [shape: f32[1,512], index: 3, kind: input, shape index: {}]   ;;  %s4528_s4 = inlined_call_operand.hbm [shape: f32[8,8,128], index: 4, kind: output, shape index: {}]  }
   0x1   :  { %11 = vsyncpa [#allocation6 + $0x1], 0 }
   0x2   :  { %12 = vsyncpa [#allocation9], 0 }
   0x3   :  { %13 = vsyncpa [#allocation7], 0 }
   0x4   :  { %15 = vsyncpa [#allocation7 + $0x1], 0  ;;  %s2687_s15 = smov 0   ;;  %s2689_s16 = smov 0  }
   0x5   :  { %s2691_s17 = smov 0   ;;  %s2693_s18 = smov 0  }
   0x6   :  { %s2695_s19 = smov 0   ;;  %s2697_s20 = smov 0  }
   0x7 LB: > { %s2014_s21 = sadd.s32 4294967295, %s2650_s20   ;;  %s2015_s22 = sadd.s32 4294967294, %s2650_s20   ;;  %s2650_s20 = sphi %s2697_s20, %s21_s20   ;;  %s2646_s19 = sphi %s2695_s19, %s5441_s19   ;;  %s2642_s18 = sphi %s2693_s18, %s5440_s18   ;;  %s2638_s17 = sphi %s2691_s17, %s5439_s17   ;;  %s2634_s16 = sphi %s2689_s16, %s5438_s16   ;;  %s2630_s15 = sphi %s2687_s15, %s5437_s15  }
   0x8   : > { %p55_p0 = scmp.ne.s32.totalorder %s2634_s16, %s2630_s15  ;;  %p2721_p1 = scmp.eq.s32.totalorder %s2014_s21, 0 }
   0x9   : > { %p2725_p2 = scmp.eq.s32.totalorder %s2014_s21, 1  ;;  %p150_p3 = scmp.eq.s32.totalorder %s2015_s22, 1 }
   0xa   : > { %p2731_p4 = por %p2721_p1, %p55_p0  ;;  %p2016_p5 = scmp.ge.s32.totalorder %s2650_s20, 1 }
   0xb   : > { %p2736_p6 = por %p150_p3, %p55_p0  ;;  %p157_p7 = scmp.lt.s32.totalorder %s2650_s20, 3 }
   0xc   : > { %s2652_s28 = smov [#allocation8]   ;;  %s2653_s5 = smov [#allocation10]  }
   0xd   : > { %s4836_s26 = scalar_select %p2736_p6, 1, 0 }
   0xe   : > { %p2741_p8 = pnand %p2016_p5, %p157_p7  ;;  %s169_s29 = sshll.u32 %s2652_s28, 4  ;;  %s170_s29 = int_to_ptr.vmem [resolvable:$true] %s169_s29 }
   0xf   : > { %s182_s6 = sshll.u32 %s2653_s5, 4  ;;  %s2497_s7 = scalar_lea.vmem %s170_s29, 8192  ;;  %s183_s6 = int_to_ptr.vmem [resolvable:$true] %s182_s6 }
  0x10   : > { %p2089_p9 = pneg %p2741_p8  ;;  %p2498_p13 = scmp.ne.s32.totalorder %s170_s29, %s2497_s7 }
  0x11   : > { %p2505_p5 = scmp.lt.s32.totalorder %s170_s29, %s170_s29  ;;  %p2506_p7 = scmp.lt.s32.totalorder %s2497_s7, %s2497_s7 }
  0x12   : > { %p2750_p11 = pnand %p2089_p9, %p2721_p1 }
  0x13   : > { %p2507_p10 = por %p2506_p7, %p2505_p5 }
  0x14   : > { %p2488_p12 = pneg %p2750_p11 }
  0x16   : > { %p2500_p0 = pnand %p2498_p13, %p2488_p12 }
  0x18   : > { %p2501_p3 = pneg %p2500_p0 }
  0x1a   : > { %p2508_p9 = pnand %p2507_p10, %p2501_p3 }
  0x1c   : > { %2511 = shalt.err (!%p2508_p9)
}
  0x1d   : > { %s4529_s8 = smov 512   ;;  %s4530_s9 = smov 32  }
  0x1e   : > { %2092 = dma.hbm_to_vmem [thread:$0]  (!%p2750_p11), %s4525_s1, 8192, %s170_s29, [#allocation9], %s4529_s8, %s4529_s8, %s4530_s9  }
  0x1f   : > { %s2523_s12 = scalar_lea.vmem %s183_s6, 16384  ;;  %p2531_p10 = scmp.lt.s32.totalorder %s183_s6, %s183_s6 }
  0x20   : > { %p2524_p13 = scmp.ne.s32.totalorder %s183_s6, %s2523_s12  ;;  %p2532_p3 = scmp.lt.s32.totalorder %s2523_s12, %s2523_s12 }
  0x22   : > { %p2526_p0 = pnand %p2524_p13, %p2488_p12  ;;  %p2533_p7 = por %p2532_p3, %p2531_p10 }
  0x24   : > { %p2527_p5 = pneg %p2526_p0 }
  0x26   : > { %p2534_p9 = pnand %p2533_p7, %p2527_p5 }
  0x28   : > { %2537 = shalt.err (!%p2534_p9)
}
  0x29   : > { %2095 = dma.hbm_to_vmem [thread:$0]  (!%p2750_p11), %s4526_s2, 16384, %s183_s6, [#allocation9], %s4529_s8, %s4529_s8, %s4530_s9  }
  0x2a   : > { %s30_s21 = sadd.s32 1, %s2646_s19  ;;  %s42_s22 = sadd.s32 1, %s2638_s17 }
  0x2b   : > { %p31_p12 = scmp.ge.s32.totalorder %s30_s21, 2  ;;  %p49_p13 = scmp.ne.s32.totalorder %s2638_s17, %s2634_s16 }
  0x2c   : > { %p50_p0 = scmp.eq.s32.totalorder %s2650_s20, 0  ;;  %p2106_p5 = scmp.lt.s32.totalorder %s2650_s20, 2 }
  0x2d   : > { %s5443_s21 = smov (%p31_p12, %s30_s21), 0  ;;  %p2788_p3 = por %p2725_p2, %p49_p13 }
  0x2e   : > { %p51_p10 = por %p50_p0, %p49_p13  ;;  %s37_s29 = ssub.s32 %s2646_s19, %s5443_s21 }
  0x2f   : > { %s199_s30 = sand.u32 1, %s2638_s17   ;;  %p40_p7 = scmp.eq.s32.totalorder %s37_s29, 0 }
  0x30   : > { %s2020_s5 = sshll.u32 %s199_s30, 7  ;;  %s2075_s6 = sshll.u32 %s2646_s19, 11 }
  0x31   : > { %s2797_s7 = scalar_select %p40_p7, %s2638_s17, %s42_s22  }
  0x32   : > { %s212_s12 = scalar_lea.hbm %s4524_s0, %s2075_s6  ;;  %s203_s13 = scalar_lea.vmem [#allocation5], %s2020_s5 }
  0x33   : > { %s213_s14 = sshll.u32 %s203_s13, 4  ;;  %p2804_p11 = pnand %p2106_p5, %p51_p10  ;;  %s214_s14 = int_to_ptr.vmem [resolvable:$true] %s213_s14 }
  0x34   : > { %s200_s8 = scalar_lea.sflag [#allocation6], %s199_s30  ;;  %s2551_s29 = scalar_lea.vmem %s214_s14, 2048 }
  0x35   : > { %p2540_p2 = pneg %p2804_p11  ;;  %p2552_p9 = scmp.ne.s32.totalorder %s214_s14, %s2551_s29 }
  0x36   : > { %s2656_s22 = smov [#allocation5]  }
  0x37   : > { %p2554_p12 = pnand %p2552_p9, %p2540_p2  ;;  %s2556_s9 = sshll.u32 %s2656_s22, 4  ;;  %s2557_s9 = int_to_ptr.vmem [resolvable:$false] %s2556_s9 }
  0x38   : > { %s2558_s6 = scalar_lea.vmem %s2557_s9, 4096  ;;  %p2559_p0 = scmp.lt.s32.totalorder %s214_s14, %s2557_s9 }
  0x39   : > { %p2555_p13 = pneg %p2554_p12  ;;  %p2560_p7 = scmp.lt.s32.totalorder %s2558_s6, %s2551_s29 }
  0x3b   : > { %p2561_p6 = por %p2560_p7, %p2559_p0 }
  0x3d   : > { %p2562_p5 = pnand %p2561_p6, %p2555_p13 }
  0x3f   : > { %2565 = shalt.err (!%p2562_p5)
}
  0x40   : > { %s4841_s5 = smov 32   ;;  %s4842_s10 = smov 512  }
  0x41   : > { %2099 = dma.hbm_to_vmem [thread:$0]  (!%p2804_p11), %s212_s12, 2048, %s214_s14, %s200_s8, %s4842_s10, %s4842_s10, %s4841_s5  }
  0x42   : > { %225 = sbr.rel (%p2741_p8) target bundleno = 1478 (0x5c6), region = 36 }
  0x47   : > { %s2818_s30 = sand.u32 1, %s2634_s16  }
  0x48   : > { %s2025_s9 = sshll.u32 %s2818_s30, 7  ;;  %s228_s11 = scalar_lea.sflag [#allocation6], %s2818_s30 }
  0x49   : > { %s2822_s13 = scalar_lea.vmem [#allocation5], %s2025_s9 }
  0x4a   : > { %2617 = dma.done.wait (%p2731_p4), %s228_s11, 2048  }
  0x4b   : > { %2619 = vsyncadd (%p2731_p4), %s228_s11, 4294965248 }
  0x4c   : > { %2621 = dma.done.wait (%p2721_p1), [#allocation9], 24576  }
  0x4d   : > { %2623 = vsyncadd (%p2721_p1), [#allocation9], 4294942720  ;;  %s2028_s27 = sshll.u32 %s2818_s30, 5  ;;  %p2029_p6 = scmp.ne.s32.totalorder %s2642_s18, 0 }
  0x4e   : > { %s2833_s8 = scalar_lea.vmem [#allocation11], %s2028_s27 }
  0x4f   : > { %269 = sbr.rel (%p2029_p6) target bundleno = 87 (0x57), region = 52 }
  0x54   : > { %v2657_v0 = vmov 0.0  }
  0x55   : > { %270 = vst [vmem:[#allocation2] sm:$0xff] %v2657_v0  ;;  %271 = vst [vmem:[#allocation2 + $0x8] sm:$0xff] %v2657_v0 }
  0x56   : > { %272 = vst [vmem:[#allocation3] sm:$0xff] %v2657_v0  ;;  %273 = vst [vmem:[#allocation4] sm:$0xff] %v2657_v0 }
  0x57 PF: > { %v2836_v1 = vld [vmem:[#allocation8 + $0x1e8] sm:$0xff]  ;;  %v2838_v2 = vld [vmem:[#allocation8 + $0x1e0] sm:$0xff]  ;;  %v4531_v5 = vmov 0.0   ;;  %v2859_v10 = vld [vmem:[#allocation8 + $0x1f8] sm:$0xff]  ;;  %s2076_s12 = sshll.u32 %s2642_s18, 9  ;;  %s1909_s14 = sshll.u32 %s2833_s8, 4  ;;  %s4475_s14 = int_to_ptr.vmem [resolvable:$true] %s1909_s14 }
  0x58   : > { %v2840_v3 = vld [vmem:[#allocation8 + $0x1c8] sm:$0xff]  ;;  %493 = vmatprep.subr.mxu0 %v2836_v1  ;;  %v2843_v4 = vld [vmem:[#allocation8 + $0x1c0] sm:$0xff]  ;;  %557 = vmatprep.mubr.f32.mxu0 %v4531_v5  ;;  %v2865_v12 = vld [vmem:[#allocation8 + $0x1f0] sm:$0xff]  ;;  %s4473_s22 = scalar_lea.hbm %s4528_s4, %s2076_s12  ;;  %s1895_s6 = scalar_lea.sflag [#allocation7], %s2818_s30 }
  0x59   : > { %494 = vmatpush1.msra.mxu0 %v2838_v2  ;;  %v2847_v6 = vld [vmem:[#allocation8 + $0x1a8] sm:$0xff]  ;;  %628 = vmatprep.mubr.f32.mxu1 %v4531_v5  ;;  %v2851_v7 = vld [vmem:[#allocation8 + $0x1a0] sm:$0xff]  ;;  %v2871_v14 = vld [vmem:[#allocation8 + $0x1d8] sm:$0xff]  ;;  %s2566_s5 = scalar_lea.vmem %s4475_s14, 512  ;;  %s2659_s18 = smov [#allocation11]  }
  0x5a   : > { %495 = vmatprep.subr.mxu0 %v2840_v3  ;;  %v2854_v8 = vld [vmem:[#allocation8 + $0x188] sm:$0xff]  ;;  %v2857_v9 = vld [vmem:[#allocation8 + $0x180] sm:$0xff]  ;;  %564 = vmatprep.subr.mxu1 %v2859_v10  ;;  %v2873_v15 = vld [vmem:[#allocation8 + $0x1d0] sm:$0xff]  ;;  %p2567_p1 = scmp.ne.s32.totalorder %s4475_s14, %s2566_s5  ;;  %s2570_s10 = sshll.u32 %s2659_s18, 4  ;;  %s2571_s10 = int_to_ptr.vmem [resolvable:$false] %s2570_s10 }
  0x5b   : > { %496 = vmatpush1.msra.mxu0 %v2843_v4  ;;  %v2862_v11 = vld [vmem:[#allocation8 + $0x168] sm:$0xff]  ;;  %v2868_v13 = vld [vmem:[#allocation8 + $0x160] sm:$0xff]  ;;  %565 = vmatpush1.msra.mxu1 %v2865_v12  ;;  %v2879_v17 = vld [vmem:[#allocation8 + $0x1b8] sm:$0xff]  ;;  %s2572_s9 = scalar_lea.vmem %s2571_s10, 1024  ;;  %p2573_p10 = scmp.lt.s32.totalorder %s4475_s14, %s2571_s10 }
  0x5c   : > { %497 = vmatprep.subr.mxu0 %v2847_v6  ;;  %v2876_v16 = vld [vmem:[#allocation8 + $0x148] sm:$0xff]  ;;  %566 = vmatprep.subr.mxu1 %v2871_v14  ;;  %v2882_v18 = vld [vmem:[#allocation8 + $0x140] sm:$0xff]  ;;  %v2885_v19 = vld [vmem:[#allocation8 + $0x1b0] sm:$0xff]  ;;  %p2568_p4 = pnand %p2567_p1, %p2788_p3  ;;  %p2574_p11 = scmp.lt.s32.totalorder %s2572_s9, %s2566_s5 }
  0x5d   : > { %498 = vmatpush1.msra.mxu0 %v2851_v7  ;;  %567 = vmatpush1.msra.mxu1 %v2873_v15  ;;  %v2887_v20 = vld [vmem:[#allocation8 + $0x198] sm:$0xff]  ;;  %v2890_v21 = vld [vmem:[#allocation8 + $0x128] sm:$0xff]  ;;  %v2893_v22 = vld [vmem:[#allocation8 + $0x190] sm:$0xff] }
  0x5e   : > { %499 = vmatprep.subr.mxu0 %v2854_v8  ;;  %568 = vmatprep.subr.mxu1 %v2879_v17  ;;  %v2896_v23 = vld [vmem:[#allocation8 + $0x120] sm:$0xff]  ;;  %v2899_v24 = vld [vmem:[#allocation8 + $0x178] sm:$0xff]  ;;  %v2902_v25 = vld [vmem:[#allocation8 + $0x108] sm:$0xff]  ;;  %p2569_p8 = pneg %p2568_p4  ;;  %p2575_p2 = por %p2574_p11, %p2573_p10 }
  0x5f   : > { %500 = vmatpush1.msra.mxu0 %v2857_v9  ;;  %569 = vmatpush1.msra.mxu1 %v2885_v19  ;;  %v2905_v26 = vld [vmem:[#allocation8 + $0x170] sm:$0xff]  ;;  %v2908_v27 = vld [vmem:[#allocation8 + $0x100] sm:$0xff]  ;;  %v2911_v28 = vld [vmem:[#allocation8 + $0x158] sm:$0xff] }
  0x60   : > { %501 = vmatprep.subr.mxu0 %v2862_v11  ;;  %570 = vmatprep.subr.mxu1 %v2887_v20  ;;  %v2914_v29 = vld [vmem:[#allocation8 + $0xe8] sm:$0xff]  ;;  %v2917_v30 = vld [vmem:[#allocation8 + $0x150] sm:$0xff]  ;;  %v2920_v31 = vld [vmem:[#allocation8 + $0xe0] sm:$0xff]  ;;  %p2576_p9 = pnand %p2575_p2, %p2569_p8 }
  0x61   : > { %502 = vmatpush1.msra.mxu0 %v2868_v13  ;;  %571 = vmatpush1.msra.mxu1 %v2893_v22  ;;  %v2923_v32 = vld [vmem:[#allocation8 + $0x138] sm:$0xff]  ;;  %v2926_v33 = vld [vmem:[#allocation8 + $0xc8] sm:$0xff]  ;;  %v2929_v34 = vld [vmem:[#allocation8 + $0x130] sm:$0xff] }
  0x62   : > { %503 = vmatprep.subr.mxu0 %v2876_v16  ;;  %572 = vmatprep.subr.mxu1 %v2899_v24  ;;  %v2932_v35 = vld [vmem:[#allocation8 + $0xc0] sm:$0xff]  ;;  %v2935_v36 = vld [vmem:[#allocation8 + $0x118] sm:$0xff]  ;;  %v2938_v37 = vld [vmem:[#allocation8 + $0xa8] sm:$0xff] }
  0x63   : > { %504 = vmatpush1.msra.mxu0 %v2882_v18  ;;  %573 = vmatpush1.msra.mxu1 %v2905_v26  ;;  %v2941_v38 = vld [vmem:[#allocation8 + $0x110] sm:$0xff]  ;;  %v2944_v39 = vld [vmem:[#allocation8 + $0xa0] sm:$0xff]  ;;  %v2947_v40 = vld [vmem:[#allocation8 + $0xf8] sm:$0xff] }
  0x64   : > { %505 = vmatprep.subr.mxu0 %v2890_v21  ;;  %574 = vmatprep.subr.mxu1 %v2911_v28  ;;  %v2950_v41 = vld [vmem:[#allocation8 + $0x88] sm:$0xff]  ;;  %v2953_v42 = vld [vmem:[#allocation8 + $0xf0] sm:$0xff]  ;;  %v2956_v43 = vld [vmem:[#allocation8 + $0x80] sm:$0xff] }
  0x65   : > { %506 = vmatpush1.msra.mxu0 %v2896_v23  ;;  %575 = vmatpush1.msra.mxu1 %v2917_v30  ;;  %v2959_v44 = vld [vmem:[#allocation8 + $0xd8] sm:$0xff]  ;;  %v2962_v45 = vld [vmem:[#allocation8 + $0x68] sm:$0xff]  ;;  %v2965_v46 = vld [vmem:[#allocation8 + $0xd0] sm:$0xff] }
  0x66   : > { %507 = vmatprep.subr.mxu0 %v2902_v25  ;;  %576 = vmatprep.subr.mxu1 %v2923_v32  ;;  %4843 = vst [vmem:[#allocation15_spill] sm:$0xff] %v2962_v45  ;;  %v2968_v47 = vld [vmem:[#allocation8 + $0x60] sm:$0xff]  ;;  %v2971_v48 = vld [vmem:[#allocation8 + $0xb8] sm:$0xff]  ;;  %v2974_v49 = vld [vmem:[#allocation8 + $0x48] sm:$0xff] }
  0x67   : > { %508 = vmatpush1.msra.mxu0 %v2908_v27  ;;  %577 = vmatpush1.msra.mxu1 %v2929_v34  ;;  %4844 = vst [vmem:[#allocation16_spill] sm:$0xff] %v2968_v47  ;;  %4845 = vst [vmem:[#allocation17_spill] sm:$0xff] %v2974_v49  ;;  %v2977_v50 = vld [vmem:[#allocation8 + $0xb0] sm:$0xff]  ;;  %v2980_v51 = vld [vmem:[#allocation8 + $0x40] sm:$0xff] }
  0x68   : > { %509 = vmatprep.subr.mxu0 %v2914_v29  ;;  %578 = vmatprep.subr.mxu1 %v2935_v36  ;;  %4846 = vst [vmem:[#allocation18_spill] sm:$0xff] %v2980_v51  ;;  %v2983_v52 = vld [vmem:[#allocation8 + $0x98] sm:$0xff]  ;;  %v2986_v53 = vld [vmem:[#allocation8 + $0x28] sm:$0xff]  ;;  %v2989_v54 = vld [vmem:[#allocation8 + $0x90] sm:$0xff] }
  0x69   : > { %510 = vmatpush1.msra.mxu0 %v2920_v31  ;;  %579 = vmatpush1.msra.mxu1 %v2941_v38  ;;  %4847 = vst [vmem:[#allocation19_spill] sm:$0xff] %v2986_v53  ;;  %v2992_v55 = vld [vmem:[#allocation8 + $0x20] sm:$0xff]  ;;  %v2995_v56 = vld [vmem:[#allocation8 + $0x78] sm:$0xff]  ;;  %v2998_v57 = vld [vmem:[#allocation8 + $0x8] sm:$0xff] }
  0x6a   : > { %511 = vmatprep.subr.mxu0 %v2926_v33  ;;  %580 = vmatprep.subr.mxu1 %v2947_v40  ;;  %4848 = vst [vmem:[#allocation20_spill] sm:$0xff] %v2992_v55  ;;  %4849 = vst [vmem:[#allocation21_spill] sm:$0xff] %v2995_v56  ;;  %v3001_v58 = vld [vmem:[#allocation8 + $0x70] sm:$0xff]  ;;  %v3004_v59 = vld [vmem:[#allocation8] sm:$0xff] }
  0x6b   : > { %512 = vmatpush1.msra.mxu0 %v2932_v35  ;;  %581 = vmatpush1.msra.mxu1 %v2953_v42  ;;  %4850 = vst [vmem:[#allocation22_spill] sm:$0xff] %v2998_v57  ;;  %4851 = vst [vmem:[#allocation23_spill] sm:$0xff] %v3001_v58  ;;  %v3007_v60 = vld [vmem:[#allocation8 + $0x58] sm:$0xff]  ;;  %v488_v61 = vld [vmem:[#allocation2] sm:$0xff] }
  0x6c   : > { %513 = vmatprep.subr.mxu0 %v2938_v37  ;;  %582 = vmatprep.subr.mxu1 %v2959_v44  ;;  %4852 = vst [vmem:[#allocation24_spill] sm:$0xff] %v3004_v59  ;;  %4853 = vst [vmem:[#allocation25_spill] sm:$0xff] %v3007_v60  ;;  %v3011_v62 = vld [vmem:[#allocation8 + $0x50] sm:$0xff]  ;;  %v3015_v63 = vld [vmem:[#allocation8 + $0x38] sm:$0xff] }
  0x6d   : > { %514 = vmatpush1.msra.mxu0 %v2944_v39  ;;  %583 = vmatpush1.msra.mxu1 %v2965_v46  ;;  %4854 = vst [vmem:[#allocation26_spill] sm:$0xff] %v3011_v62  ;;  %4855 = vst [vmem:[#allocation27_spill] sm:$0xff] %v3015_v63  ;;  %v3019_v0 = vld [vmem:[#allocation8 + $0x30] sm:$0xff]  ;;  %v3022_v5 = vld [vmem:[#allocation8 + $0x18] sm:$0xff] }
  0x6e   : > { %515 = vmatprep.subr.mxu0 %v2950_v41  ;;  %584 = vmatprep.subr.mxu1 %v2971_v48  ;;  %4856 = vst [vmem:[#allocation28_spill] sm:$0xff] %v3019_v0  ;;  %4857 = vst [vmem:[#allocation29_spill] sm:$0xff] %v3022_v5 }
  0x6f   : > { %516 = vmatpush1.msra.mxu0 %v2956_v43  ;;  %585 = vmatpush1.msra.mxu1 %v2977_v50 }
  0x70   : > { %517 = vmatprep.subr.mxu0 %v2962_v45  ;;  %586 = vmatprep.subr.mxu1 %v2983_v52 }
  0x71   : > { %518 = vmatpush1.msra.mxu0 %v2968_v47  ;;  %587 = vmatpush1.msra.mxu1 %v2989_v54 }
  0x72   : > { %519 = vmatprep.subr.mxu0 %v2974_v49  ;;  %588 = vmatprep.subr.mxu1 %v2995_v56 }
  0x73   : > { %520 = vmatpush1.msra.mxu0 %v2980_v51  ;;  %589 = vmatpush1.msra.mxu1 %v3001_v58  ;;  %v492_v58 = vld [vmem:[%s2822_s13 + $0x18] sm:$0xff] }
  0x74   : > { %521 = vmatprep.subr.mxu0 %v2986_v53  ;;  %590 = vmatprep.subr.mxu1 %v3007_v60  ;;  %v3036_v53 = vld [vmem:[#allocation10 + $0x1e0] sm:$0xff]  ;;  %v491_v60 = vld [vmem:[%s2822_s13 + $0x10] sm:$0xff] }
  0x75   : > { %522 = vmatpush1.msra.mxu0 %v2992_v55  ;;  %591 = vmatpush1.msra.mxu1 %v3011_v62  ;;  %v3025_v55 = vld [vmem:[#allocation8 + $0x10] sm:$0xff]  ;;  %4861 = vst [vmem:[#allocation33_spill] sm:$0xff] %v3036_v53 }
  0x76   : > { %523 = vmatprep.subr.mxu0 %v2998_v57  ;;  %592 = vmatprep.subr.mxu1 %v3015_v63  ;;  %4858 = vst [vmem:[#allocation30_spill] sm:$0xff] %v3025_v55  ;;  %v3032_v57 = vld [vmem:[#allocation10 + $0x1f8] sm:$0xff]  ;;  %v3038_v63 = vld [vmem:[#allocation10 + $0x1f0] sm:$0xff] }
  0x77   : > { %524 = vmatpush1.msra.mxu0 %v3004_v59  ;;  %593 = vmatpush1.msra.mxu1 %v3019_v0  ;;  %v3030_v59 = vld [vmem:[#allocation10 + $0x1e8] sm:$0xff]  ;;  %4860 = vst [vmem:[#allocation32_spill] sm:$0xff] %v3032_v57  ;;  %4862 = vst [vmem:[#allocation34_spill] sm:$0xff] %v3038_v63  ;;  %v3199_v0 = vld [vmem:[#allocation10 + $0x38] sm:$0xff] }
  0x78   : > { %558 = vmatmul.mubr.f32.vlgmr.msra.gmra.mxu0 %v488_v61  ;;  %594 = vmatprep.subr.mxu1 %v3022_v5  ;;  %4859 = vst [vmem:[#allocation31_spill] sm:$0xff] %v3030_v59  ;;  %v3042_v5 = vld [vmem:[#allocation10 + $0x1c8] sm:$0xff]  ;;  %4916 = vst [vmem:[#allocation88_spill] sm:$0xff] %v3199_v0 }
  0x79   : > { %595 = vmatpush1.msra.mxu1 %v3025_v55  ;;  %668 = vmatprep.subr.mxu0 %v3030_v59  ;;  %4863 = vst [vmem:[#allocation35_spill] sm:$0xff] %v3042_v5  ;;  %v3044_v55 = vld [vmem:[#allocation10 + $0x1d8] sm:$0xff]  ;;  %v3050_v59 = vld [vmem:[#allocation10 + $0x1d0] sm:$0xff] }
  0x7a   : > { %629 = vmatmul.mubr.f32.vlgmr.msra.gmra.mxu1 %v488_v61  ;;  %739 = vmatprep.subr.mxu1 %v3032_v57  ;;  %4864 = vst [vmem:[#allocation36_spill] sm:$0xff] %v3044_v55  ;;  %v3048_v61 = vld [vmem:[#allocation10 + $0x1c0] sm:$0xff]  ;;  %4866 = vst [vmem:[#allocation38_spill] sm:$0xff] %v3050_v59  ;;  %v3054_v57 = vld [vmem:[#allocation10 + $0x1a8] sm:$0xff] }
  0x7b   : > { %669 = vmatpush1.msra.mxu0 %v3036_v53  ;;  %740 = vmatpush1.msra.mxu1 %v3038_v63  ;;  %4865 = vst [vmem:[#allocation37_spill] sm:$0xff] %v3048_v61  ;;  %4867 = vst [vmem:[#allocation39_spill] sm:$0xff] %v3054_v57  ;;  %v3056_v53 = vld [vmem:[#allocation10 + $0x1b8] sm:$0xff]  ;;  %v3060_v63 = vld [vmem:[#allocation10 + $0x1a0] sm:$0xff] }
  0x7c   : > { %670 = vmatprep.subr.mxu0 %v3042_v5  ;;  %741 = vmatprep.subr.mxu1 %v3044_v55  ;;  %4868 = vst [vmem:[#allocation40_spill] sm:$0xff] %v3056_v53  ;;  %4869 = vst [vmem:[#allocation41_spill] sm:$0xff] %v3060_v63  ;;  %v3062_v5 = vld [vmem:[#allocation10 + $0x1b0] sm:$0xff]  ;;  %v3066_v55 = vld [vmem:[#allocation10 + $0x188] sm:$0xff] }
  0x7d   : > { %671 = vmatpush1.msra.mxu0 %v3048_v61  ;;  %742 = vmatpush1.msra.mxu1 %v3050_v59  ;;  %4870 = vst [vmem:[#allocation42_spill] sm:$0xff] %v3062_v5  ;;  %4871 = vst [vmem:[#allocation43_spill] sm:$0xff] %v3066_v55  ;;  %v3068_v61 = vld [vmem:[#allocation10 + $0x198] sm:$0xff]  ;;  %v3072_v59 = vld [vmem:[#allocation10 + $0x180] sm:$0xff] }
  0x7e   : > { %672 = vmatprep.subr.mxu0 %v3054_v57  ;;  %743 = vmatprep.subr.mxu1 %v3056_v53  ;;  %4872 = vst [vmem:[#allocation44_spill] sm:$0xff] %v3068_v61  ;;  %4873 = vst [vmem:[#allocation45_spill] sm:$0xff] %v3072_v59  ;;  %v3074_v57 = vld [vmem:[#allocation10 + $0x190] sm:$0xff]  ;;  %v3078_v53 = vld [vmem:[#allocation10 + $0x168] sm:$0xff] }
  0x7f   : > { %673 = vmatpush1.msra.mxu0 %v3060_v63  ;;  %744 = vmatpush1.msra.mxu1 %v3062_v5  ;;  %4874 = vst [vmem:[#allocation46_spill] sm:$0xff] %v3074_v57  ;;  %4875 = vst [vmem:[#allocation47_spill] sm:$0xff] %v3078_v53  ;;  %v3080_v63 = vld [vmem:[#allocation10 + $0x178] sm:$0xff]  ;;  %v3084_v5 = vld [vmem:[#allocation10 + $0x160] sm:$0xff] }
  0x80   : > { %674 = vmatprep.subr.mxu0 %v3066_v55  ;;  %745 = vmatprep.subr.mxu1 %v3068_v61  ;;  %4876 = vst [vmem:[#allocation48_spill] sm:$0xff] %v3080_v63  ;;  %4877 = vst [vmem:[#allocation49_spill] sm:$0xff] %v3084_v5  ;;  %v3086_v55 = vld [vmem:[#allocation10 + $0x170] sm:$0xff]  ;;  %v3090_v61 = vld [vmem:[#allocation10 + $0x148] sm:$0xff] }
  0x81   : > { %675 = vmatpush1.msra.mxu0 %v3072_v59  ;;  %746 = vmatpush1.msra.mxu1 %v3074_v57  ;;  %4878 = vst [vmem:[#allocation50_spill] sm:$0xff] %v3086_v55  ;;  %4879 = vst [vmem:[#allocation51_spill] sm:$0xff] %v3090_v61  ;;  %v3092_v59 = vld [vmem:[#allocation10 + $0x158] sm:$0xff]  ;;  %v3096_v57 = vld [vmem:[#allocation10 + $0x140] sm:$0xff] }
  0x82   : > { %676 = vmatprep.subr.mxu0 %v3078_v53  ;;  %747 = vmatprep.subr.mxu1 %v3080_v63  ;;  %4880 = vst [vmem:[#allocation52_spill] sm:$0xff] %v3092_v59  ;;  %4881 = vst [vmem:[#allocation53_spill] sm:$0xff] %v3096_v57  ;;  %v3098_v53 = vld [vmem:[#allocation10 + $0x150] sm:$0xff]  ;;  %v3102_v63 = vld [vmem:[#allocation10 + $0x128] sm:$0xff] }
  0x83   : > { %677 = vmatpush1.msra.mxu0 %v3084_v5  ;;  %748 = vmatpush1.msra.mxu1 %v3086_v55  ;;  %4882 = vst [vmem:[#allocation54_spill] sm:$0xff] %v3098_v53  ;;  %4883 = vst [vmem:[#allocation55_spill] sm:$0xff] %v3102_v63  ;;  %v3104_v5 = vld [vmem:[#allocation10 + $0x138] sm:$0xff]  ;;  %v3108_v55 = vld [vmem:[#allocation10 + $0x120] sm:$0xff] }
  0x84   : > { %678 = vmatprep.subr.mxu0 %v3090_v61  ;;  %749 = vmatprep.subr.mxu1 %v3092_v59  ;;  %4884 = vst [vmem:[#allocation56_spill] sm:$0xff] %v3104_v5  ;;  %4885 = vst [vmem:[#allocation57_spill] sm:$0xff] %v3108_v55  ;;  %v3110_v61 = vld [vmem:[#allocation10 + $0x130] sm:$0xff]  ;;  %v3114_v59 = vld [vmem:[#allocation10 + $0x108] sm:$0xff] }
  0x85   : > { %679 = vmatpush1.msra.mxu0 %v3096_v57  ;;  %750 = vmatpush1.msra.mxu1 %v3098_v53  ;;  %4886 = vst [vmem:[#allocation58_spill] sm:$0xff] %v3110_v61  ;;  %4887 = vst [vmem:[#allocation59_spill] sm:$0xff] %v3114_v59  ;;  %v3116_v57 = vld [vmem:[#allocation10 + $0x118] sm:$0xff]  ;;  %v3120_v53 = vld [vmem:[#allocation10 + $0x100] sm:$0xff] }
  0x86   : > { %680 = vmatprep.subr.mxu0 %v3102_v63  ;;  %751 = vmatprep.subr.mxu1 %v3104_v5  ;;  %4888 = vst [vmem:[#allocation60_spill] sm:$0xff] %v3116_v57  ;;  %4889 = vst [vmem:[#allocation61_spill] sm:$0xff] %v3120_v53  ;;  %v3122_v63 = vld [vmem:[#allocation10 + $0x110] sm:$0xff]  ;;  %v3126_v5 = vld [vmem:[#allocation10 + $0xe8] sm:$0xff] }
  0x87   : > { %681 = vmatpush1.msra.mxu0 %v3108_v55  ;;  %752 = vmatpush1.msra.mxu1 %v3110_v61  ;;  %4890 = vst [vmem:[#allocation62_spill] sm:$0xff] %v3122_v63  ;;  %4891 = vst [vmem:[#allocation63_spill] sm:$0xff] %v3126_v5  ;;  %v3128_v55 = vld [vmem:[#allocation10 + $0xf8] sm:$0xff]  ;;  %v3132_v61 = vld [vmem:[#allocation10 + $0xe0] sm:$0xff] }
  0x88   : > { %682 = vmatprep.subr.mxu0 %v3114_v59  ;;  %753 = vmatprep.subr.mxu1 %v3116_v57  ;;  %4892 = vst [vmem:[#allocation64_spill] sm:$0xff] %v3128_v55  ;;  %4893 = vst [vmem:[#allocation65_spill] sm:$0xff] %v3132_v61  ;;  %v3134_v59 = vld [vmem:[#allocation10 + $0xf0] sm:$0xff]  ;;  %v3138_v57 = vld [vmem:[#allocation10 + $0xc8] sm:$0xff] }
  0x89   : > { %683 = vmatpush1.msra.mxu0 %v3120_v53  ;;  %754 = vmatpush1.msra.mxu1 %v3122_v63  ;;  %4894 = vst [vmem:[#allocation66_spill] sm:$0xff] %v3134_v59  ;;  %4895 = vst [vmem:[#allocation67_spill] sm:$0xff] %v3138_v57  ;;  %v3140_v53 = vld [vmem:[#allocation10 + $0xd8] sm:$0xff]  ;;  %v3144_v63 = vld [vmem:[#allocation10 + $0xc0] sm:$0xff] }
  0x8a   : > { %684 = vmatprep.subr.mxu0 %v3126_v5  ;;  %755 = vmatprep.subr.mxu1 %v3128_v55  ;;  %4896 = vst [vmem:[#allocation68_spill] sm:$0xff] %v3140_v53  ;;  %4897 = vst [vmem:[#allocation69_spill] sm:$0xff] %v3144_v63  ;;  %v3146_v5 = vld [vmem:[#allocation10 + $0xd0] sm:$0xff]  ;;  %v3150_v55 = vld [vmem:[#allocation10 + $0xa8] sm:$0xff] }
  0x8b   : > { %685 = vmatpush1.msra.mxu0 %v3132_v61  ;;  %756 = vmatpush1.msra.mxu1 %v3134_v59  ;;  %4898 = vst [vmem:[#allocation70_spill] sm:$0xff] %v3146_v5  ;;  %4899 = vst [vmem:[#allocation71_spill] sm:$0xff] %v3150_v55  ;;  %v3152_v61 = vld [vmem:[#allocation10 + $0xb8] sm:$0xff]  ;;  %v3156_v59 = vld [vmem:[#allocation10 + $0xa0] sm:$0xff] }
  0x8c   : > { %686 = vmatprep.subr.mxu0 %v3138_v57  ;;  %757 = vmatprep.subr.mxu1 %v3140_v53  ;;  %4900 = vst [vmem:[#allocation72_spill] sm:$0xff] %v3152_v61  ;;  %4901 = vst [vmem:[#allocation73_spill] sm:$0xff] %v3156_v59  ;;  %v3158_v57 = vld [vmem:[#allocation10 + $0xb0] sm:$0xff]  ;;  %v3162_v53 = vld [vmem:[#allocation10 + $0x88] sm:$0xff] }
  0x8d   : > { %687 = vmatpush1.msra.mxu0 %v3144_v63  ;;  %758 = vmatpush1.msra.mxu1 %v3146_v5  ;;  %4902 = vst [vmem:[#allocation74_spill] sm:$0xff] %v3158_v57  ;;  %4903 = vst [vmem:[#allocation75_spill] sm:$0xff] %v3162_v53  ;;  %v3164_v63 = vld [vmem:[#allocation10 + $0x98] sm:$0xff]  ;;  %v3168_v5 = vld [vmem:[#allocation10 + $0x80] sm:$0xff] }
  0x8e   : > { %688 = vmatprep.subr.mxu0 %v3150_v55  ;;  %759 = vmatprep.subr.mxu1 %v3152_v61  ;;  %4904 = vst [vmem:[#allocation76_spill] sm:$0xff] %v3164_v63  ;;  %4905 = vst [vmem:[#allocation77_spill] sm:$0xff] %v3168_v5  ;;  %v3170_v55 = vld [vmem:[#allocation10 + $0x90] sm:$0xff]  ;;  %v3174_v61 = vld [vmem:[#allocation10 + $0x68] sm:$0xff] }
  0x8f   : > { %689 = vmatpush1.msra.mxu0 %v3156_v59  ;;  %760 = vmatpush1.msra.mxu1 %v3158_v57  ;;  %4906 = vst [vmem:[#allocation78_spill] sm:$0xff] %v3170_v55  ;;  %4907 = vst [vmem:[#allocation79_spill] sm:$0xff] %v3174_v61  ;;  %v3176_v59 = vld [vmem:[#allocation10 + $0x78] sm:$0xff]  ;;  %v3180_v57 = vld [vmem:[#allocation10 + $0x60] sm:$0xff] }
  0x90   : > { %690 = vmatprep.subr.mxu0 %v3162_v53  ;;  %761 = vmatprep.subr.mxu1 %v3164_v63  ;;  %4908 = vst [vmem:[#allocation80_spill] sm:$0xff] %v3176_v59  ;;  %4909 = vst [vmem:[#allocation81_spill] sm:$0xff] %v3180_v57  ;;  %v3182_v53 = vld [vmem:[#allocation10 + $0x70] sm:$0xff]  ;;  %v3186_v63 = vld [vmem:[#allocation10 + $0x48] sm:$0xff] }
  0x91   : > { %691 = vmatpush1.msra.mxu0 %v3168_v5  ;;  %762 = vmatpush1.msra.mxu1 %v3170_v55  ;;  %4910 = vst [vmem:[#allocation82_spill] sm:$0xff] %v3182_v53  ;;  %4911 = vst [vmem:[#allocation83_spill] sm:$0xff] %v3186_v63  ;;  %v3188_v5 = vld [vmem:[#allocation10 + $0x58] sm:$0xff]  ;;  %v3192_v55 = vld [vmem:[#allocation10 + $0x40] sm:$0xff] }
  0x92   : > { %692 = vmatprep.subr.mxu0 %v3174_v61  ;;  %763 = vmatprep.subr.mxu1 %v3176_v59  ;;  %4912 = vst [vmem:[#allocation84_spill] sm:$0xff] %v3188_v5  ;;  %4913 = vst [vmem:[#allocation85_spill] sm:$0xff] %v3192_v55  ;;  %v3195_v59 = vld [vmem:[#allocation10 + $0x50] sm:$0xff]  ;;  %v3197_v61 = vld [vmem:[#allocation10 + $0x28] sm:$0xff] }
  0x93   : > { %693 = vmatpush1.msra.mxu0 %v3180_v57  ;;  %764 = vmatpush1.msra.mxu1 %v3182_v53  ;;  %4914 = vst [vmem:[#allocation86_spill] sm:$0xff] %v3195_v59  ;;  %4915 = vst [vmem:[#allocation87_spill] sm:$0xff] %v3197_v61  ;;  %v3203_v53 = vld [vmem:[#allocation10 + $0x20] sm:$0xff]  ;;  %v3205_v57 = vld [vmem:[#allocation10 + $0x30] sm:$0xff] }
  0x94   : > { %694 = vmatprep.subr.mxu0 %v3186_v63  ;;  %765 = vmatprep.subr.mxu1 %v3188_v5  ;;  %4917 = vst [vmem:[#allocation89_spill] sm:$0xff] %v3203_v53  ;;  %4918 = vst [vmem:[#allocation90_spill] sm:$0xff] %v3205_v57  ;;  %v3209_v5 = vld [vmem:[#allocation10 + $0x8] sm:$0xff]  ;;  %v3215_v63 = vld [vmem:[#allocation10] sm:$0xff] }
  0x95   : > { %695 = vmatpush1.msra.mxu0 %v3192_v55  ;;  %766 = vmatpush1.msra.mxu1 %v3195_v59  ;;  %4919 = vst [vmem:[#allocation91_spill] sm:$0xff] %v3209_v5  ;;  %v3211_v55 = vld [vmem:[#allocation10 + $0x18] sm:$0xff]  ;;  %4921 = vst [vmem:[#allocation93_spill] sm:$0xff] %v3215_v63  ;;  %v3217_v59 = vld [vmem:[#allocation10 + $0x10] sm:$0xff] }
  0x96   : > { %696 = vmatprep.subr.mxu0 %v3197_v61  ;;  %767 = vmatprep.subr.mxu1 %v3199_v0  ;;  %4920 = vst [vmem:[#allocation92_spill] sm:$0xff] %v3211_v55  ;;  %4922 = vst [vmem:[#allocation94_spill] sm:$0xff] %v3217_v59  ;;  %v3221_v61 = vld [vmem:[#allocation10 + $0x3e8] sm:$0xff]  ;;  %v3223_v0 = vld [vmem:[#allocation10 + $0x3f8] sm:$0xff] }
  0x97   : > { %697 = vmatpush1.msra.mxu0 %v3203_v53  ;;  %768 = vmatpush1.msra.mxu1 %v3205_v57  ;;  %4923 = vst [vmem:[#allocation95_spill] sm:$0xff] %v3221_v61  ;;  %4924 = vst [vmem:[#allocation96_spill] sm:$0xff] %v3223_v0  ;;  %v3227_v53 = vld [vmem:[#allocation10 + $0x3e0] sm:$0xff]  ;;  %v3229_v57 = vld [vmem:[#allocation10 + $0x3f0] sm:$0xff] }
  0x98   : > { %698 = vmatprep.subr.mxu0 %v3209_v5  ;;  %769 = vmatprep.subr.mxu1 %v3211_v55  ;;  %4925 = vst [vmem:[#allocation97_spill] sm:$0xff] %v3227_v53  ;;  %4926 = vst [vmem:[#allocation98_spill] sm:$0xff] %v3229_v57  ;;  %v3233_v5 = vld [vmem:[#allocation10 + $0x3c8] sm:$0xff]  ;;  %v3235_v55 = vld [vmem:[#allocation10 + $0x3d8] sm:$0xff] }
  0x99   : > { %699 = vmatpush1.msra.mxu0 %v3215_v63  ;;  %770 = vmatpush1.msra.mxu1 %v3217_v59  ;;  %4927 = vst [vmem:[#allocation99_spill] sm:$0xff] %v3233_v5  ;;  %4928 = vst [vmem:[#allocation100_spill] sm:$0xff] %v3235_v55  ;;  %v3239_v63 = vld [vmem:[#allocation10 + $0x3c0] sm:$0xff]  ;;  %v3241_v59 = vld [vmem:[#allocation10 + $0x3d0] sm:$0xff] }
  0x9a   : > { %700 = vmatprep.subr.mxu0 %v3221_v61  ;;  %771 = vmatprep.subr.mxu1 %v3223_v0  ;;  %4929 = vst [vmem:[#allocation101_spill] sm:$0xff] %v3239_v63  ;;  %4930 = vst [vmem:[#allocation102_spill] sm:$0xff] %v3241_v59  ;;  %v3245_v61 = vld [vmem:[#allocation10 + $0x3a8] sm:$0xff]  ;;  %v3247_v0 = vld [vmem:[#allocation10 + $0x3b8] sm:$0xff] }
  0x9b   : > { %701 = vmatpush2.msra.mxu0 %v3227_v53  ;;  %772 = vmatpush2.msra.mxu1 %v3229_v57  ;;  %4931 = vst [vmem:[#allocation103_spill] sm:$0xff] %v3245_v61  ;;  %4932 = vst [vmem:[#allocation104_spill] sm:$0xff] %v3247_v0  ;;  %v3251_v53 = vld [vmem:[#allocation10 + $0x3a0] sm:$0xff]  ;;  %v3253_v57 = vld [vmem:[#allocation10 + $0x3b0] sm:$0xff] }
  0x9c   : > { %702 = vmatprep.subr.mxu0 %v3233_v5  ;;  %773 = vmatprep.subr.mxu1 %v3235_v55  ;;  %4933 = vst [vmem:[#allocation105_spill] sm:$0xff] %v3251_v53  ;;  %4934 = vst [vmem:[#allocation106_spill] sm:$0xff] %v3253_v57  ;;  %v3257_v5 = vld [vmem:[#allocation10 + $0x388] sm:$0xff]  ;;  %v3259_v55 = vld [vmem:[#allocation10 + $0x398] sm:$0xff] }
  0x9d   : > { %703 = vmatpush2.msra.mxu0 %v3239_v63  ;;  %774 = vmatpush2.msra.mxu1 %v3241_v59  ;;  %4935 = vst [vmem:[#allocation107_spill] sm:$0xff] %v3257_v5  ;;  %4936 = vst [vmem:[#allocation108_spill] sm:$0xff] %v3259_v55  ;;  %v3263_v63 = vld [vmem:[#allocation10 + $0x380] sm:$0xff]  ;;  %v3265_v59 = vld [vmem:[#allocation10 + $0x390] sm:$0xff] }
  0x9e   : > { %704 = vmatprep.subr.mxu0 %v3245_v61  ;;  %775 = vmatprep.subr.mxu1 %v3247_v0  ;;  %4937 = vst [vmem:[#allocation109_spill] sm:$0xff] %v3263_v63  ;;  %4938 = vst [vmem:[#allocation110_spill] sm:$0xff] %v3265_v59  ;;  %v3269_v61 = vld [vmem:[#allocation10 + $0x368] sm:$0xff]  ;;  %v3271_v0 = vld [vmem:[#allocation10 + $0x378] sm:$0xff] }
  0x9f   : > { %705 = vmatpush2.msra.mxu0 %v3251_v53  ;;  %776 = vmatpush2.msra.mxu1 %v3253_v57  ;;  %4939 = vst [vmem:[#allocation111_spill] sm:$0xff] %v3269_v61  ;;  %4940 = vst [vmem:[#allocation112_spill] sm:$0xff] %v3271_v0  ;;  %v3275_v53 = vld [vmem:[#allocation10 + $0x360] sm:$0xff]  ;;  %v3277_v57 = vld [vmem:[#allocation10 + $0x370] sm:$0xff] }
  0xa0   : > { %706 = vmatprep.subr.mxu0 %v3257_v5  ;;  %777 = vmatprep.subr.mxu1 %v3259_v55  ;;  %4941 = vst [vmem:[#allocation113_spill] sm:$0xff] %v3275_v53  ;;  %4942 = vst [vmem:[#allocation114_spill] sm:$0xff] %v3277_v57  ;;  %v3281_v5 = vld [vmem:[#allocation10 + $0x348] sm:$0xff]  ;;  %v3283_v55 = vld [vmem:[#allocation10 + $0x358] sm:$0xff] }
  0xa1   : > { %707 = vmatpush2.msra.mxu0 %v3263_v63  ;;  %778 = vmatpush2.msra.mxu1 %v3265_v59  ;;  %4943 = vst [vmem:[#allocation115_spill] sm:$0xff] %v3281_v5  ;;  %4944 = vst [vmem:[#allocation116_spill] sm:$0xff] %v3283_v55  ;;  %v3287_v63 = vld [vmem:[#allocation10 + $0x340] sm:$0xff]  ;;  %v3289_v59 = vld [vmem:[#allocation10 + $0x350] sm:$0xff] }
  0xa2   : > { %708 = vmatprep.subr.mxu0 %v3269_v61  ;;  %779 = vmatprep.subr.mxu1 %v3271_v0  ;;  %4945 = vst [vmem:[#allocation117_spill] sm:$0xff] %v3287_v63  ;;  %4946 = vst [vmem:[#allocation118_spill] sm:$0xff] %v3289_v59  ;;  %v3293_v61 = vld [vmem:[#allocation10 + $0x328] sm:$0xff]  ;;  %v3295_v0 = vld [vmem:[#allocation10 + $0x338] sm:$0xff] }
  0xa3   : > { %709 = vmatpush2.msra.mxu0 %v3275_v53  ;;  %780 = vmatpush2.msra.mxu1 %v3277_v57  ;;  %4947 = vst [vmem:[#allocation119_spill] sm:$0xff] %v3293_v61  ;;  %4948 = vst [vmem:[#allocation120_spill] sm:$0xff] %v3295_v0  ;;  %v3299_v53 = vld [vmem:[#allocation10 + $0x320] sm:$0xff]  ;;  %v3301_v57 = vld [vmem:[#allocation10 + $0x330] sm:$0xff] }
  0xa4   : > { %710 = vmatprep.subr.mxu0 %v3281_v5  ;;  %781 = vmatprep.subr.mxu1 %v3283_v55  ;;  %4949 = vst [vmem:[#allocation121_spill] sm:$0xff] %v3299_v53  ;;  %4950 = vst [vmem:[#allocation122_spill] sm:$0xff] %v3301_v57  ;;  %v3305_v5 = vld [vmem:[#allocation10 + $0x308] sm:$0xff]  ;;  %v3307_v55 = vld [vmem:[#allocation10 + $0x318] sm:$0xff] }
  0xa5   : > { %711 = vmatpush2.msra.mxu0 %v3287_v63  ;;  %782 = vmatpush2.msra.mxu1 %v3289_v59  ;;  %4951 = vst [vmem:[#allocation123_spill] sm:$0xff] %v3305_v5  ;;  %4952 = vst [vmem:[#allocation124_spill] sm:$0xff] %v3307_v55  ;;  %v3311_v63 = vld [vmem:[#allocation10 + $0x300] sm:$0xff]  ;;  %v3313_v59 = vld [vmem:[#allocation10 + $0x310] sm:$0xff] }
  0xa6   : > { %712 = vmatprep.subr.mxu0 %v3293_v61  ;;  %783 = vmatprep.subr.mxu1 %v3295_v0  ;;  %4953 = vst [vmem:[#allocation125_spill] sm:$0xff] %v3311_v63  ;;  %4954 = vst [vmem:[#allocation126_spill] sm:$0xff] %v3313_v59  ;;  %v3317_v61 = vld [vmem:[#allocation10 + $0x2e8] sm:$0xff]  ;;  %v3319_v0 = vld [vmem:[#allocation10 + $0x2f8] sm:$0xff] }
  0xa7   : > { %713 = vmatpush2.msra.mxu0 %v3299_v53  ;;  %784 = vmatpush2.msra.mxu1 %v3301_v57  ;;  %4955 = vst [vmem:[#allocation127_spill] sm:$0xff] %v3317_v61  ;;  %4956 = vst [vmem:[#allocation128_spill] sm:$0xff] %v3319_v0  ;;  %v3323_v53 = vld [vmem:[#allocation10 + $0x2e0] sm:$0xff]  ;;  %v3325_v57 = vld [vmem:[#allocation10 + $0x2f0] sm:$0xff] }
  0xa8   : > { %714 = vmatprep.subr.mxu0 %v3305_v5  ;;  %785 = vmatprep.subr.mxu1 %v3307_v55  ;;  %4957 = vst [vmem:[#allocation129_spill] sm:$0xff] %v3323_v53  ;;  %4958 = vst [vmem:[#allocation130_spill] sm:$0xff] %v3325_v57  ;;  %v3329_v5 = vld [vmem:[#allocation10 + $0x2c8] sm:$0xff]  ;;  %v3331_v55 = vld [vmem:[#allocation10 + $0x2d8] sm:$0xff] }
  0xa9   : > { %715 = vmatpush2.msra.mxu0 %v3311_v63  ;;  %786 = vmatpush2.msra.mxu1 %v3313_v59  ;;  %4959 = vst [vmem:[#allocation131_spill] sm:$0xff] %v3329_v5  ;;  %4960 = vst [vmem:[#allocation132_spill] sm:$0xff] %v3331_v55  ;;  %v3335_v63 = vld [vmem:[#allocation10 + $0x2c0] sm:$0xff]  ;;  %v3337_v59 = vld [vmem:[#allocation10 + $0x2d0] sm:$0xff] }
  0xaa   : > { %716 = vmatprep.subr.mxu0 %v3317_v61  ;;  %787 = vmatprep.subr.mxu1 %v3319_v0  ;;  %4961 = vst [vmem:[#allocation133_spill] sm:$0xff] %v3335_v63  ;;  %4962 = vst [vmem:[#allocation134_spill] sm:$0xff] %v3337_v59  ;;  %v3341_v61 = vld [vmem:[#allocation10 + $0x2a8] sm:$0xff]  ;;  %v3343_v0 = vld [vmem:[#allocation10 + $0x2b8] sm:$0xff] }
  0xab   : > { %717 = vmatpush2.msra.mxu0 %v3323_v53  ;;  %788 = vmatpush2.msra.mxu1 %v3325_v57  ;;  %4963 = vst [vmem:[#allocation135_spill] sm:$0xff] %v3341_v61  ;;  %4964 = vst [vmem:[#allocation136_spill] sm:$0xff] %v3343_v0  ;;  %v3347_v53 = vld [vmem:[#allocation10 + $0x2a0] sm:$0xff]  ;;  %v3349_v57 = vld [vmem:[#allocation10 + $0x2b0] sm:$0xff] }
  0xac   : > { %718 = vmatprep.subr.mxu0 %v3329_v5  ;;  %789 = vmatprep.subr.mxu1 %v3331_v55  ;;  %4965 = vst [vmem:[#allocation137_spill] sm:$0xff] %v3347_v53  ;;  %4966 = vst [vmem:[#allocation138_spill] sm:$0xff] %v3349_v57  ;;  %v3353_v5 = vld [vmem:[#allocation10 + $0x288] sm:$0xff]  ;;  %v3355_v55 = vld [vmem:[#allocation10 + $0x298] sm:$0xff] }
  0xad   : > { %719 = vmatpush2.msra.mxu0 %v3335_v63  ;;  %790 = vmatpush2.msra.mxu1 %v3337_v59  ;;  %4967 = vst [vmem:[#allocation139_spill] sm:$0xff] %v3353_v5  ;;  %4968 = vst [vmem:[#allocation140_spill] sm:$0xff] %v3355_v55  ;;  %v3359_v63 = vld [vmem:[#allocation10 + $0x280] sm:$0xff]  ;;  %v3361_v59 = vld [vmem:[#allocation10 + $0x290] sm:$0xff] }
  0xae   : > { %720 = vmatprep.subr.mxu0 %v3341_v61  ;;  %791 = vmatprep.subr.mxu1 %v3343_v0  ;;  %4969 = vst [vmem:[#allocation141_spill] sm:$0xff] %v3359_v63  ;;  %4970 = vst [vmem:[#allocation142_spill] sm:$0xff] %v3361_v59  ;;  %v3365_v61 = vld [vmem:[#allocation10 + $0x268] sm:$0xff]  ;;  %v3367_v0 = vld [vmem:[#allocation10 + $0x278] sm:$0xff] }
  0xaf   : > { %721 = vmatpush2.msra.mxu0 %v3347_v53  ;;  %792 = vmatpush2.msra.mxu1 %v3349_v57  ;;  %4971 = vst [vmem:[#allocation143_spill] sm:$0xff] %v3365_v61  ;;  %4972 = vst [vmem:[#allocation144_spill] sm:$0xff] %v3367_v0  ;;  %v3371_v53 = vld [vmem:[#allocation10 + $0x260] sm:$0xff]  ;;  %v3373_v57 = vld [vmem:[#allocation10 + $0x270] sm:$0xff] }
  0xb0   : > { %722 = vmatprep.subr.mxu0 %v3353_v5  ;;  %793 = vmatprep.subr.mxu1 %v3355_v55  ;;  %4973 = vst [vmem:[#allocation145_spill] sm:$0xff] %v3371_v53  ;;  %4974 = vst [vmem:[#allocation146_spill] sm:$0xff] %v3373_v57  ;;  %v3377_v5 = vld [vmem:[#allocation10 + $0x248] sm:$0xff]  ;;  %v3379_v55 = vld [vmem:[#allocation10 + $0x258] sm:$0xff] }
  0xb1   : > { %723 = vmatpush2.msra.mxu0 %v3359_v63  ;;  %794 = vmatpush2.msra.mxu1 %v3361_v59  ;;  %4975 = vst [vmem:[#allocation147_spill] sm:$0xff] %v3377_v5  ;;  %4976 = vst [vmem:[#allocation148_spill] sm:$0xff] %v3379_v55  ;;  %v3383_v63 = vld [vmem:[#allocation10 + $0x240] sm:$0xff]  ;;  %v3385_v59 = vld [vmem:[#allocation10 + $0x250] sm:$0xff] }
  0xb2   : > { %724 = vmatprep.subr.mxu0 %v3365_v61  ;;  %795 = vmatprep.subr.mxu1 %v3367_v0  ;;  %4977 = vst [vmem:[#allocation149_spill] sm:$0xff] %v3383_v63  ;;  %4978 = vst [vmem:[#allocation150_spill] sm:$0xff] %v3385_v59  ;;  %v3389_v61 = vld [vmem:[#allocation10 + $0x228] sm:$0xff]  ;;  %v3391_v0 = vld [vmem:[#allocation10 + $0x238] sm:$0xff] }
  0xb3   : > { %725 = vmatpush2.msra.mxu0 %v3371_v53  ;;  %796 = vmatpush2.msra.mxu1 %v3373_v57  ;;  %4979 = vst [vmem:[#allocation151_spill] sm:$0xff] %v3389_v61  ;;  %4980 = vst [vmem:[#allocation152_spill] sm:$0xff] %v3391_v0  ;;  %v3395_v53 = vld [vmem:[#allocation10 + $0x220] sm:$0xff]  ;;  %v3397_v57 = vld [vmem:[#allocation10 + $0x230] sm:$0xff] }
  0xb4   : > { %726 = vmatprep.subr.mxu0 %v3377_v5  ;;  %797 = vmatprep.subr.mxu1 %v3379_v55  ;;  %4981 = vst [vmem:[#allocation153_spill] sm:$0xff] %v3395_v53  ;;  %4982 = vst [vmem:[#allocation154_spill] sm:$0xff] %v3397_v57  ;;  %v3401_v55 = vld [vmem:[#allocation10 + $0x208] sm:$0xff] }
  0xb5   : > { %727 = vmatpush2.msra.mxu0 %v3383_v63  ;;  %798 = vmatpush2.msra.mxu1 %v3385_v59  ;;  %4983 = vst [vmem:[#allocation155_spill] sm:$0xff] %v3401_v55  ;;  %v3403_v63 = vld [vmem:[#allocation10 + $0x218] sm:$0xff]  ;;  %v3407_v59 = vld [vmem:[#allocation10 + $0x200] sm:$0xff] }
  0xb6   : > { %728 = vmatprep.subr.mxu0 %v3389_v61  ;;  %799 = vmatprep.subr.mxu1 %v3391_v0  ;;  %4984 = vst [vmem:[#allocation156_spill] sm:$0xff] %v3403_v63  ;;  %4985 = vst [vmem:[#allocation157_spill] sm:$0xff] %v3407_v59  ;;  %v3409_v61 = vld [vmem:[#allocation10 + $0x210] sm:$0xff]  ;;  %v667_v0 = vld [vmem:[#allocation2 + $0x8] sm:$0xff] }
  0xb7   : > { %729 = vmatpush2.msra.mxu0 %v3395_v53  ;;  %800 = vmatpush2.msra.mxu1 %v3397_v57  ;;  %4986 = vst [vmem:[#allocation158_spill] sm:$0xff] %v3409_v61  ;;  %v490_v53 = vld [vmem:[%s2822_s13 + $0x8] sm:$0xff] }
  0xb8   : > { %730 = vmatprep.subr.mxu0 %v3401_v55  ;;  %801 = vmatprep.subr.mxu1 %v3403_v63  ;;  %v489_v55 = vld [vmem:[%s2822_s13] sm:$0xff] }
  0xb9   : > { %731 = vmatpush2.msra.mxu0 %v3407_v59  ;;  %802 = vmatpush2.msra.mxu1 %v3409_v61 }
  0xba   : > { %732 = vmatprep.mubr.f32.mxu0 %v667_v0  ;;  %803 = vmatprep.mubr.f32.mxu1 %v667_v0 }
  0xbb   : > { %844 = vmatprep.subr.mxu0 %v2836_v1  ;;  %915 = vmatprep.subr.mxu1 %v2859_v10 }
 0x138   : > { %v559_v57 = vpop.f32.mrf.mxu0 }
 0x139   : > { %v635_v5 = vadd.f32 %v559_v57, %v489_v55  ;;  %v639_v57 = vld [vmem:[#allocation3] sm:$0xff] }
 0x13a   : > { %v561_v62 = vpop.f32.mrf.mxu0  ;;  %v630_v49 = vpop.f32.mrf.mxu1 }
 0x13b   : > { %v2030_v51 = vmul.f32 -1.442695, %v635_v5  ;;  %v636_v63 = vadd.f32 %v561_v62, %v490_v53  ;;  %v637_v61 = vadd.f32 %v630_v49, %v491_v60 }
 0x13c   : > { %v632_v0 = vpop.f32.mrf.mxu1 }
 0x13d   : > { %2166 = vpow2.f32 %v2030_v51  ;;  %v2031_v59 = vmul.f32 -1.442695, %v636_v63  ;;  %v2032_v47 = vmul.f32 -1.442695, %v637_v61  ;;  %v638_v56 = vadd.f32 %v632_v0, %v492_v58  ;;  %v5035_v0 = vld [vmem:[#allocation62_spill] sm:$0xff] }
 0x13f   : > { %2168 = vpow2.f32 %v2031_v59 }
 0x140   : > { %2170 = vpow2.f32 %v2032_v47 }
 0x141   : > { %2172 = vtanh.f32 %v638_v56  ;;  %v5034_v56 = vld [vmem:[#allocation61_spill] sm:$0xff] }
 0x14a   : > { %v2167_v1 = vpop.eup %2166 }
 0x14b   : > { %v649_v45 = vadd.f32 1.0, %v2167_v1  ;;  %v5036_v1 = vld [vmem:[#allocation63_spill] sm:$0xff] }
 0x14c   : > { %v2169_v10 = vpop.eup %2168 }
 0x14d   : > { %2174 = vrcp.f32 %v649_v45  ;;  %v650_v55 = vadd.f32 1.0, %v2169_v10  ;;  %v2171_v5 = vpop.eup %2170  ;;  %v5028_v45 = vld [vmem:[#allocation55_spill] sm:$0xff]  ;;  %v5037_v10 = vld [vmem:[#allocation64_spill] sm:$0xff] }
 0x14e   : > { %v2173_v53 = vpop.eup %2172  ;;  %v651_v62 = vadd.f32 1.0, %v2171_v5  ;;  %v5039_v5 = vld [vmem:[#allocation66_spill] sm:$0xff] }
 0x14f   : > { %2176 = vrcp.f32 %v650_v55  ;;  %v5038_v55 = vld [vmem:[#allocation65_spill] sm:$0xff] }
 0x150   : > { %2178 = vrcp.f32 %v651_v62  ;;  %v5044_v62 = vld [vmem:[#allocation71_spill] sm:$0xff] }
 0x15a   : > { %v2175_v51 = vpop.eup %2174 }
 0x15b   : > { %v660_v49 = vmul.f32 %v2175_v51, %v2173_v53  ;;  %v5040_v53 = vld [vmem:[#allocation67_spill] sm:$0xff]  ;;  %v5041_v51 = vld [vmem:[#allocation68_spill] sm:$0xff] }
 0x15c   : > { %v2177_v59 = vpop.eup %2176 }
 0x15d   : > { %v659_v63 = vmul.f32 %v2177_v59, %v639_v57  ;;  %v2179_v58 = vpop.eup %2178  ;;  %v5042_v57 = vld [vmem:[#allocation69_spill] sm:$0xff]  ;;  %v5043_v59 = vld [vmem:[#allocation70_spill] sm:$0xff] }
 0x15f   : > { %v3420_v60 = vadd.f32 %v660_v49, %v659_v63  ;;  %v5045_v63 = vld [vmem:[#allocation72_spill] sm:$0xff]  ;;  %v5046_v49 = vld [vmem:[#allocation73_spill] sm:$0xff] }
 0x161   : > { %2180 = vtanh.f32 %v3420_v60 }
 0x16e   : > { %v2181_v47 = vpop.eup %2180 }
 0x16f   : > { %v3423_v61 = vmul.f32 %v2181_v47, %v2179_v58  ;;  %v5047_v58 = vld [vmem:[#allocation74_spill] sm:$0xff]  ;;  %v5048_v47 = vld [vmem:[#allocation75_spill] sm:$0xff] }
 0x171   : > { %733 = vmatmul.mubr.f32.vlgmr.msra.gmra.mxu0 %v3423_v61  ;;  %804 = vmatmul.mubr.f32.vlgmr.msra.gmra.mxu1 %v3423_v61 }
 0x172   : > { %845 = vmatpush1.msra.mxu0 %v2838_v2  ;;  %916 = vmatpush1.msra.mxu1 %v2865_v12  ;;  %v4987_v2 = vld [vmem:[#allocation15_spill] sm:$0xff] }
 0x173   : > { %846 = vmatprep.subr.mxu0 %v2840_v3  ;;  %917 = vmatprep.subr.mxu1 %v2871_v14  ;;  %v4988_v3 = vld [vmem:[#allocation21_spill] sm:$0xff]  ;;  %v4995_v12 = vld [vmem:[#allocation19_spill] sm:$0xff]  ;;  %v4997_v14 = vld [vmem:[#allocation20_spill] sm:$0xff] }
 0x174   : > { %847 = vmatpush1.msra.mxu0 %v2843_v4  ;;  %918 = vmatpush1.msra.mxu1 %v2873_v15  ;;  %v4989_v4 = vld [vmem:[#allocation16_spill] sm:$0xff] }
 0x175   : > { %848 = vmatprep.subr.mxu0 %v2847_v6  ;;  %919 = vmatprep.subr.mxu1 %v2879_v17  ;;  %v4990_v6 = vld [vmem:[#allocation23_spill] sm:$0xff]  ;;  %v4998_v15 = vld [vmem:[#allocation28_spill] sm:$0xff]  ;;  %v5000_v17 = vld [vmem:[#allocation29_spill] sm:$0xff] }
 0x176   : > { %849 = vmatpush1.msra.mxu0 %v2851_v7  ;;  %920 = vmatpush1.msra.mxu1 %v2885_v19  ;;  %v4991_v7 = vld [vmem:[#allocation17_spill] sm:$0xff]  ;;  %v5002_v19 = vmov 0.0  }
 0x177   : > { %850 = vmatprep.subr.mxu0 %v2854_v8  ;;  %921 = vmatprep.subr.mxu1 %v2887_v20  ;;  %v4992_v8 = vld [vmem:[#allocation25_spill] sm:$0xff]  ;;  %v5003_v20 = vld [vmem:[#allocation30_spill] sm:$0xff] }
 0x178   : > { %851 = vmatpush1.msra.mxu0 %v2857_v9  ;;  %922 = vmatpush1.msra.mxu1 %v2893_v22  ;;  %v4993_v9 = vld [vmem:[#allocation18_spill] sm:$0xff]  ;;  %v5005_v22 = vld [vmem:[#allocation32_spill] sm:$0xff] }
 0x179   : > { %852 = vmatprep.subr.mxu0 %v2862_v11  ;;  %923 = vmatprep.subr.mxu1 %v2899_v24  ;;  %v4994_v11 = vld [vmem:[#allocation26_spill] sm:$0xff] }
 0x17a   : > { %853 = vmatpush1.msra.mxu0 %v2868_v13  ;;  %924 = vmatpush1.msra.mxu1 %v2905_v26  ;;  %v4996_v13 = vld [vmem:[#allocation27_spill] sm:$0xff]  ;;  %v5007_v24 = vld [vmem:[#allocation34_spill] sm:$0xff]  ;;  %v5009_v26 = vld [vmem:[#allocation36_spill] sm:$0xff] }
 0x17b   : > { %854 = vmatprep.subr.mxu0 %v2876_v16  ;;  %925 = vmatprep.subr.mxu1 %v2911_v28  ;;  %v4999_v16 = vld [vmem:[#allocation22_spill] sm:$0xff] }
 0x17c   : > { %855 = vmatpush1.msra.mxu0 %v2882_v18  ;;  %926 = vmatpush1.msra.mxu1 %v2917_v30  ;;  %v5001_v18 = vld [vmem:[#allocation24_spill] sm:$0xff]  ;;  %v5011_v28 = vld [vmem:[#allocation38_spill] sm:$0xff] }
 0x17d   : > { %856 = vmatprep.subr.mxu0 %v2890_v21  ;;  %927 = vmatprep.subr.mxu1 %v2923_v32  ;;  %v5004_v21 = vld [vmem:[#allocation31_spill] sm:$0xff]  ;;  %v5013_v30 = vld [vmem:[#allocation40_spill] sm:$0xff]  ;;  %v5015_v32 = vld [vmem:[#allocation42_spill] sm:$0xff] }
 0x17e   : > { %857 = vmatpush1.msra.mxu0 %v2896_v23  ;;  %928 = vmatpush1.msra.mxu1 %v2929_v34  ;;  %v5006_v23 = vld [vmem:[#allocation33_spill] sm:$0xff]  ;;  %v5017_v34 = vld [vmem:[#allocation44_spill] sm:$0xff] }
 0x17f   : > { %858 = vmatprep.subr.mxu0 %v2902_v25  ;;  %929 = vmatprep.subr.mxu1 %v2935_v36  ;;  %v5008_v25 = vld [vmem:[#allocation35_spill] sm:$0xff]  ;;  %v5019_v36 = vld [vmem:[#allocation46_spill] sm:$0xff] }
 0x180   : > { %859 = vmatpush1.msra.mxu0 %v2908_v27  ;;  %930 = vmatpush1.msra.mxu1 %v2941_v38  ;;  %v5010_v27 = vld [vmem:[#allocation37_spill] sm:$0xff]  ;;  %v5021_v38 = vld [vmem:[#allocation48_spill] sm:$0xff] }
 0x181   : > { %860 = vmatprep.subr.mxu0 %v2914_v29  ;;  %931 = vmatprep.subr.mxu1 %v2947_v40  ;;  %v5012_v29 = vld [vmem:[#allocation39_spill] sm:$0xff]  ;;  %v5023_v40 = vld [vmem:[#allocation50_spill] sm:$0xff] }
 0x182   : > { %861 = vmatpush1.msra.mxu0 %v2920_v31  ;;  %932 = vmatpush1.msra.mxu1 %v2953_v42  ;;  %v5014_v31 = vld [vmem:[#allocation41_spill] sm:$0xff]  ;;  %v5025_v42 = vld [vmem:[#allocation52_spill] sm:$0xff] }
 0x183   : > { %862 = vmatprep.subr.mxu0 %v2926_v33  ;;  %933 = vmatprep.subr.mxu1 %v2959_v44  ;;  %v5016_v33 = vld [vmem:[#allocation43_spill] sm:$0xff]  ;;  %v5027_v44 = vld [vmem:[#allocation54_spill] sm:$0xff] }
 0x184   : > { %863 = vmatpush1.msra.mxu0 %v2932_v35  ;;  %934 = vmatpush1.msra.mxu1 %v2965_v46  ;;  %v5018_v35 = vld [vmem:[#allocation45_spill] sm:$0xff]  ;;  %v5029_v46 = vld [vmem:[#allocation56_spill] sm:$0xff] }
 0x185   : > { %864 = vmatprep.subr.mxu0 %v2938_v37  ;;  %935 = vmatprep.subr.mxu1 %v2971_v48  ;;  %v5020_v37 = vld [vmem:[#allocation47_spill] sm:$0xff]  ;;  %v5030_v48 = vld [vmem:[#allocation57_spill] sm:$0xff] }
 0x186   : > { %865 = vmatpush1.msra.mxu0 %v2944_v39  ;;  %936 = vmatpush1.msra.mxu1 %v2977_v50  ;;  %v5022_v39 = vld [vmem:[#allocation49_spill] sm:$0xff]  ;;  %v5031_v50 = vld [vmem:[#allocation58_spill] sm:$0xff] }
 0x187   : > { %866 = vmatprep.subr.mxu0 %v2950_v41  ;;  %937 = vmatprep.subr.mxu1 %v2983_v52  ;;  %v5024_v41 = vld [vmem:[#allocation51_spill] sm:$0xff] }
 0x188   : > { %867 = vmatpush1.msra.mxu0 %v2956_v43  ;;  %938 = vmatpush1.msra.mxu1 %v2989_v54  ;;  %v5026_v43 = vld [vmem:[#allocation53_spill] sm:$0xff]  ;;  %v5032_v52 = vld [vmem:[#allocation59_spill] sm:$0xff]  ;;  %v5033_v54 = vld [vmem:[#allocation60_spill] sm:$0xff] }
 0x189   : > { %868 = vmatprep.subr.mxu0 %v4987_v2  ;;  %939 = vmatprep.subr.mxu1 %v4988_v3  ;;  %v5050_v2 = vld [vmem:[#allocation77_spill] sm:$0xff]  ;;  %v5051_v3 = vld [vmem:[#allocation78_spill] sm:$0xff] }
 0x18a   : > { %869 = vmatpush1.msra.mxu0 %v4989_v4  ;;  %940 = vmatpush1.msra.mxu1 %v4990_v6  ;;  %v5052_v4 = vld [vmem:[#allocation79_spill] sm:$0xff]  ;;  %v5053_v6 = vld [vmem:[#allocation80_spill] sm:$0xff] }
 0x18b   : > { %870 = vmatprep.subr.mxu0 %v4991_v7  ;;  %941 = vmatprep.subr.mxu1 %v4992_v8  ;;  %v5054_v7 = vld [vmem:[#allocation81_spill] sm:$0xff]  ;;  %v5055_v8 = vld [vmem:[#allocation82_spill] sm:$0xff] }
 0x18c   : > { %871 = vmatpush1.msra.mxu0 %v4993_v9  ;;  %942 = vmatpush1.msra.mxu1 %v4994_v11  ;;  %v5056_v9 = vld [vmem:[#allocation83_spill] sm:$0xff]  ;;  %v5057_v11 = vld [vmem:[#allocation84_spill] sm:$0xff] }
 0x18d   : > { %872 = vmatprep.subr.mxu0 %v4995_v12  ;;  %943 = vmatprep.subr.mxu1 %v4996_v13  ;;  %v5058_v12 = vld [vmem:[#allocation85_spill] sm:$0xff]  ;;  %v5059_v13 = vld [vmem:[#allocation86_spill] sm:$0xff] }
 0x18e   : > { %873 = vmatpush1.msra.mxu0 %v4997_v14  ;;  %944 = vmatpush1.msra.mxu1 %v4998_v15  ;;  %v5060_v14 = vld [vmem:[#allocation87_spill] sm:$0xff]  ;;  %v5061_v15 = vld [vmem:[#allocation88_spill] sm:$0xff] }
 0x18f   : > { %874 = vmatprep.subr.mxu0 %v4999_v16  ;;  %945 = vmatprep.subr.mxu1 %v5000_v17  ;;  %v5062_v16 = vld [vmem:[#allocation89_spill] sm:$0xff]  ;;  %v5063_v17 = vld [vmem:[#allocation90_spill] sm:$0xff] }
 0x190   : > { %875 = vmatpush1.msra.mxu0 %v5001_v18  ;;  %908 = vmatprep.mubr.f32.mxu0 %v5002_v19  ;;  %v5064_v18 = vld [vmem:[#allocation91_spill] sm:$0xff] }
 0x191   : > { %946 = vmatpush1.msra.mxu1 %v5003_v20  ;;  %979 = vmatprep.mubr.f32.mxu1 %v5002_v19  ;;  %v5065_v20 = vld [vmem:[#allocation92_spill] sm:$0xff] }
 0x192   : > { %909 = vmatmul.mubr.f32.vlgmr.msra.gmra.mxu0 %v3423_v61  ;;  %980 = vmatmul.mubr.f32.vlgmr.msra.gmra.mxu1 %v3423_v61  ;;  %v5049_v61 = vld [vmem:[#allocation76_spill] sm:$0xff] }
 0x193   : > { %1019 = vmatprep.subr.mxu0 %v5004_v21  ;;  %1090 = vmatprep.subr.mxu1 %v5005_v22  ;;  %v5066_v21 = vld [vmem:[#allocation93_spill] sm:$0xff]  ;;  %v5067_v22 = vld [vmem:[#allocation94_spill] sm:$0xff] }
 0x194   : > { %1020 = vmatpush1.msra.mxu0 %v5006_v23  ;;  %1091 = vmatpush1.msra.mxu1 %v5007_v24  ;;  %v5068_v23 = vld [vmem:[#allocation95_spill] sm:$0xff]  ;;  %v5069_v24 = vld [vmem:[#allocation96_spill] sm:$0xff] }
 0x195   : > { %1021 = vmatprep.subr.mxu0 %v5008_v25  ;;  %1092 = vmatprep.subr.mxu1 %v5009_v26  ;;  %v5070_v25 = vld [vmem:[#allocation97_spill] sm:$0xff]  ;;  %v5071_v26 = vld [vmem:[#allocation98_spill] sm:$0xff] }
 0x196   : > { %1022 = vmatpush1.msra.mxu0 %v5010_v27  ;;  %1093 = vmatpush1.msra.mxu1 %v5011_v28  ;;  %v5072_v27 = vld [vmem:[#allocation99_spill] sm:$0xff]  ;;  %v5073_v28 = vld [vmem:[#allocation100_spill] sm:$0xff] }
 0x197   : > { %1023 = vmatprep.subr.mxu0 %v5012_v29  ;;  %1094 = vmatprep.subr.mxu1 %v5013_v30  ;;  %v5074_v29 = vld [vmem:[#allocation101_spill] sm:$0xff]  ;;  %v5075_v30 = vld [vmem:[#allocation102_spill] sm:$0xff] }
 0x198   : > { %1024 = vmatpush1.msra.mxu0 %v5014_v31  ;;  %1095 = vmatpush1.msra.mxu1 %v5015_v32  ;;  %v5076_v31 = vld [vmem:[#allocation103_spill] sm:$0xff]  ;;  %v5077_v32 = vld [vmem:[#allocation104_spill] sm:$0xff] }
 0x199   : > { %1025 = vmatprep.subr.mxu0 %v5016_v33  ;;  %1096 = vmatprep.subr.mxu1 %v5017_v34  ;;  %v5078_v33 = vld [vmem:[#allocation105_spill] sm:$0xff]  ;;  %v5079_v34 = vld [vmem:[#allocation106_spill] sm:$0xff] }
 0x19a   : > { %1026 = vmatpush1.msra.mxu0 %v5018_v35  ;;  %1097 = vmatpush1.msra.mxu1 %v5019_v36  ;;  %v5080_v35 = vld [vmem:[#allocation107_spill] sm:$0xff]  ;;  %v5081_v36 = vld [vmem:[#allocation108_spill] sm:$0xff] }
 0x19b   : > { %1027 = vmatprep.subr.mxu0 %v5020_v37  ;;  %1098 = vmatprep.subr.mxu1 %v5021_v38  ;;  %v5082_v37 = vld [vmem:[#allocation109_spill] sm:$0xff]  ;;  %v5083_v38 = vld [vmem:[#allocation110_spill] sm:$0xff] }
 0x19c   : > { %1028 = vmatpush1.msra.mxu0 %v5022_v39  ;;  %1099 = vmatpush1.msra.mxu1 %v5023_v40  ;;  %v5084_v39 = vld [vmem:[#allocation111_spill] sm:$0xff]  ;;  %v5085_v40 = vld [vmem:[#allocation112_spill] sm:$0xff] }
 0x19d   : > { %1029 = vmatprep.subr.mxu0 %v5024_v41  ;;  %1100 = vmatprep.subr.mxu1 %v5025_v42  ;;  %v5086_v41 = vld [vmem:[#allocation113_spill] sm:$0xff]  ;;  %v5087_v42 = vld [vmem:[#allocation114_spill] sm:$0xff] }
 0x19e   : > { %1030 = vmatpush1.msra.mxu0 %v5026_v43  ;;  %1101 = vmatpush1.msra.mxu1 %v5027_v44  ;;  %v5088_v43 = vld [vmem:[#allocation115_spill] sm:$0xff]  ;;  %v5089_v44 = vld [vmem:[#allocation116_spill] sm:$0xff] }
 0x19f   : > { %1031 = vmatprep.subr.mxu0 %v5028_v45  ;;  %1102 = vmatprep.subr.mxu1 %v5029_v46  ;;  %v5090_v45 = vld [vmem:[#allocation117_spill] sm:$0xff]  ;;  %v5091_v46 = vld [vmem:[#allocation118_spill] sm:$0xff] }
 0x1a0   : > { %1032 = vmatpush1.msra.mxu0 %v5030_v48  ;;  %1103 = vmatpush1.msra.mxu1 %v5031_v50  ;;  %v5092_v48 = vld [vmem:[#allocation119_spill] sm:$0xff]  ;;  %v5093_v50 = vld [vmem:[#allocation120_spill] sm:$0xff] }
 0x1a1   : > { %1033 = vmatprep.subr.mxu0 %v5032_v52  ;;  %1104 = vmatprep.subr.mxu1 %v5033_v54  ;;  %v5094_v52 = vld [vmem:[#allocation121_spill] sm:$0xff]  ;;  %v5095_v54 = vld [vmem:[#allocation122_spill] sm:$0xff] }
 0x1a2   : > { %1034 = vmatpush1.msra.mxu0 %v5034_v56  ;;  %1105 = vmatpush1.msra.mxu1 %v5035_v0  ;;  %v5096_v56 = vld [vmem:[#allocation123_spill] sm:$0xff]  ;;  %v5097_v0 = vld [vmem:[#allocation124_spill] sm:$0xff] }
 0x1a3   : > { %1035 = vmatprep.subr.mxu0 %v5036_v1  ;;  %1106 = vmatprep.subr.mxu1 %v5037_v10  ;;  %v5098_v1 = vld [vmem:[#allocation125_spill] sm:$0xff]  ;;  %v5099_v10 = vld [vmem:[#allocation126_spill] sm:$0xff] }
 0x1a4   : > { %1036 = vmatpush1.msra.mxu0 %v5038_v55  ;;  %1107 = vmatpush1.msra.mxu1 %v5039_v5  ;;  %v5100_v55 = vld [vmem:[#allocation127_spill] sm:$0xff]  ;;  %v5101_v5 = vld [vmem:[#allocation128_spill] sm:$0xff] }
 0x1a5   : > { %1037 = vmatprep.subr.mxu0 %v5040_v53  ;;  %1108 = vmatprep.subr.mxu1 %v5041_v51  ;;  %v5102_v53 = vld [vmem:[#allocation129_spill] sm:$0xff]  ;;  %v5103_v51 = vld [vmem:[#allocation130_spill] sm:$0xff] }
 0x1a6   : > { %1038 = vmatpush1.msra.mxu0 %v5042_v57  ;;  %1109 = vmatpush1.msra.mxu1 %v5043_v59  ;;  %v5104_v57 = vld [vmem:[#allocation131_spill] sm:$0xff]  ;;  %v5105_v59 = vld [vmem:[#allocation132_spill] sm:$0xff] }
 0x1a7   : > { %1039 = vmatprep.subr.mxu0 %v5044_v62  ;;  %1110 = vmatprep.subr.mxu1 %v5045_v63  ;;  %v5106_v62 = vld [vmem:[#allocation133_spill] sm:$0xff]  ;;  %v5107_v63 = vld [vmem:[#allocation134_spill] sm:$0xff] }
 0x1a8   : > { %1040 = vmatpush1.msra.mxu0 %v5046_v49  ;;  %1111 = vmatpush1.msra.mxu1 %v5047_v58  ;;  %v5108_v49 = vld [vmem:[#allocation135_spill] sm:$0xff]  ;;  %v5109_v58 = vld [vmem:[#allocation136_spill] sm:$0xff] }
 0x1a9   : > { %1041 = vmatprep.subr.mxu0 %v5048_v47  ;;  %1112 = vmatprep.subr.mxu1 %v5049_v61  ;;  %v5110_v47 = vld [vmem:[#allocation137_spill] sm:$0xff]  ;;  %v5111_v61 = vld [vmem:[#allocation138_spill] sm:$0xff] }
 0x1aa   : > { %1042 = vmatpush1.msra.mxu0 %v5050_v2  ;;  %1113 = vmatpush1.msra.mxu1 %v5051_v3  ;;  %v5112_v2 = vld [vmem:[#allocation139_spill] sm:$0xff]  ;;  %v5113_v3 = vld [vmem:[#allocation140_spill] sm:$0xff] }
 0x1ab   : > { %1043 = vmatprep.subr.mxu0 %v5052_v4  ;;  %1114 = vmatprep.subr.mxu1 %v5053_v6  ;;  %v5114_v4 = vld [vmem:[#allocation141_spill] sm:$0xff]  ;;  %v5115_v6 = vld [vmem:[#allocation142_spill] sm:$0xff] }
 0x1ac   : > { %1044 = vmatpush1.msra.mxu0 %v5054_v7  ;;  %1115 = vmatpush1.msra.mxu1 %v5055_v8  ;;  %v5116_v7 = vld [vmem:[#allocation143_spill] sm:$0xff]  ;;  %v5117_v8 = vld [vmem:[#allocation144_spill] sm:$0xff] }
 0x1ad   : > { %1045 = vmatprep.subr.mxu0 %v5056_v9  ;;  %1116 = vmatprep.subr.mxu1 %v5057_v11  ;;  %v5118_v9 = vld [vmem:[#allocation145_spill] sm:$0xff]  ;;  %v5119_v11 = vld [vmem:[#allocation146_spill] sm:$0xff] }
 0x1ae   : > { %1046 = vmatpush1.msra.mxu0 %v5058_v12  ;;  %1117 = vmatpush1.msra.mxu1 %v5059_v13  ;;  %v5120_v12 = vld [vmem:[#allocation147_spill] sm:$0xff]  ;;  %v5121_v13 = vld [vmem:[#allocation148_spill] sm:$0xff] }
 0x1af   : > { %1047 = vmatprep.subr.mxu0 %v5060_v14  ;;  %1118 = vmatprep.subr.mxu1 %v5061_v15  ;;  %v5122_v14 = vld [vmem:[#allocation149_spill] sm:$0xff]  ;;  %v5123_v15 = vld [vmem:[#allocation150_spill] sm:$0xff] }
 0x1b0   : > { %1048 = vmatpush1.msra.mxu0 %v5062_v16  ;;  %1119 = vmatpush1.msra.mxu1 %v5063_v17  ;;  %v5124_v16 = vld [vmem:[#allocation151_spill] sm:$0xff]  ;;  %v5125_v17 = vld [vmem:[#allocation152_spill] sm:$0xff] }
 0x1b1   : > { %1049 = vmatprep.subr.mxu0 %v5064_v18  ;;  %1120 = vmatprep.subr.mxu1 %v5065_v20  ;;  %v5126_v18 = vld [vmem:[#allocation153_spill] sm:$0xff]  ;;  %v5127_v20 = vld [vmem:[#allocation154_spill] sm:$0xff] }
 0x1b2   : > { %1050 = vmatpush1.msra.mxu0 %v5066_v21  ;;  %1121 = vmatpush1.msra.mxu1 %v5067_v22  ;;  %v5128_v21 = vld [vmem:[#allocation155_spill] sm:$0xff]  ;;  %v5129_v22 = vld [vmem:[#allocation156_spill] sm:$0xff] }
 0x1b3   : > { %1051 = vmatprep.subr.mxu0 %v5068_v23  ;;  %1122 = vmatprep.subr.mxu1 %v5069_v24  ;;  %v5130_v23 = vld [vmem:[#allocation157_spill] sm:$0xff]  ;;  %v5131_v24 = vld [vmem:[#allocation158_spill] sm:$0xff] }
 0x1b4   : > { %1052 = vmatpush2.msra.mxu0 %v5070_v25  ;;  %1123 = vmatpush2.msra.mxu1 %v5071_v26  ;;  %v3621_v25 = vld [vmem:[#allocation8 + $0x1e8] sm:$0xff]  ;;  %v3624_v26 = vld [vmem:[#allocation8 + $0x1f8] sm:$0xff] }
 0x1b5   : > { %1053 = vmatprep.subr.mxu0 %v5072_v27  ;;  %1124 = vmatprep.subr.mxu1 %v5073_v28  ;;  %v468_v27 = vlaneseq }
 0x1b6   : > { %1054 = vmatpush2.msra.mxu0 %v5074_v29  ;;  %1125 = vmatpush2.msra.mxu1 %v5075_v30  ;;  %v466_v30 = vld [vmem:[%s4527_s3] sm:$0xf] }
 0x1b7   : > { %1055 = vmatprep.subr.mxu0 %v5076_v31  ;;  %1126 = vmatprep.subr.mxu1 %v5077_v32  ;;  %v469_v28 = vshrl.u32 %v468_v27, 7 }
 0x1b8   : > { %1056 = vmatpush2.msra.mxu0 %v5078_v33  ;;  %1127 = vmatpush2.msra.mxu1 %v5079_v34 }
 0x1b9   : > { %1057 = vmatprep.subr.mxu0 %v5080_v35  ;;  %1128 = vmatprep.subr.mxu1 %v5081_v36  ;;  %v470_v29 = vsub.s32 0, %v469_v28  ;;  %v474_v31 = vsub.s32 1, %v469_v28 }
 0x1ba   : > { %1058 = vmatpush2.msra.mxu0 %v5082_v37  ;;  %1129 = vmatpush2.msra.mxu1 %v5083_v38  ;;  %v478_v38 = vsub.s32 2, %v469_v28 }
 0x1bb   : > { %1059 = vmatprep.subr.mxu0 %v5084_v39  ;;  %1130 = vmatprep.subr.mxu1 %v5085_v40  ;;  %v3630_v32 = vrot.slane %v466_v30, %v470_v29  ;;  %v3632_v33 = vrot.slane %v466_v30, %v474_v31 }
 0x1bc   : > { %1060 = vmatpush2.msra.mxu0 %v5086_v41  ;;  %1131 = vmatpush2.msra.mxu1 %v5087_v42  ;;  %v3636_v41 = vrot.slane %v466_v30, %v478_v38  ;;  %v3661_v38 = vld [vmem:[#allocation8 + $0x1f0] sm:$0xff] }
 0x1bd   : > { %1061 = vmatprep.subr.mxu0 %v5088_v43  ;;  %1132 = vmatprep.subr.mxu1 %v5089_v44  ;;  %5132 = vst [vmem:[#allocation15_spill] sm:$0xff] %v3630_v32  ;;  %5133 = vst [vmem:[#allocation21_spill] sm:$0xff] %v3632_v33  ;;  %v482_v43 = vsub.s32 3, %v469_v28 }
 0x1be   : > { %1062 = vmatpush2.msra.mxu0 %v5090_v45  ;;  %1133 = vmatpush2.msra.mxu1 %v5091_v46  ;;  %5134 = vst [vmem:[#allocation16_spill] sm:$0xff] %v3636_v41 }
 0x1bf   : > { %1063 = vmatprep.subr.mxu0 %v5092_v48  ;;  %1134 = vmatprep.subr.mxu1 %v5093_v50  ;;  %v3639_v45 = vrot.slane %v466_v30, %v482_v43  ;;  %v3676_v43 = vld [vmem:[#allocation8 + $0x1a8] sm:$0xff] }
 0x1c0   : > { %1064 = vmatpush2.msra.mxu0 %v5094_v52  ;;  %1135 = vmatpush2.msra.mxu1 %v5095_v54 }
 0x1c1   : > { %1065 = vmatprep.subr.mxu0 %v5096_v56  ;;  %1136 = vmatprep.subr.mxu1 %v5097_v0  ;;  %5135 = vst [vmem:[#allocation23_spill] sm:$0xff] %v3639_v45 }
 0x1c2   : > { %1066 = vmatpush2.msra.mxu0 %v5098_v1  ;;  %1137 = vmatpush2.msra.mxu1 %v5099_v10  ;;  %v2036_v1 = vld [vmem:[%s2822_s13 + $0x20] sm:$0xff] }
 0x1c3   : > { %1067 = vmatprep.subr.mxu0 %v5100_v55  ;;  %1138 = vmatprep.subr.mxu1 %v5101_v5  ;;  %v2037_v5 = vld [vmem:[%s2822_s13 + $0x28] sm:$0xff] }
 0x1c4   : > { %1068 = vmatpush2.msra.mxu0 %v5102_v53  ;;  %1139 = vmatpush2.msra.mxu1 %v5103_v51  ;;  %v810_v51 = vld [vmem:[#allocation4] sm:$0xff] }
 0x1c5   : > { %1069 = vmatprep.subr.mxu0 %v5104_v57  ;;  %1140 = vmatprep.subr.mxu1 %v5105_v59 }
 0x1c6   : > { %1070 = vmatpush2.msra.mxu0 %v5106_v62  ;;  %1141 = vmatpush2.msra.mxu1 %v5107_v63 }
 0x1c7   : > { %1071 = vmatprep.subr.mxu0 %v5108_v49  ;;  %1142 = vmatprep.subr.mxu1 %v5109_v58 }
 0x1c8   : > { %1072 = vmatpush2.msra.mxu0 %v5110_v47  ;;  %1143 = vmatpush2.msra.mxu1 %v5111_v61 }
 0x1c9   : > { %1073 = vmatprep.subr.mxu0 %v5112_v2  ;;  %1144 = vmatprep.subr.mxu1 %v5113_v3 }
 0x1ca   : > { %1074 = vmatpush2.msra.mxu0 %v5114_v4  ;;  %1145 = vmatpush2.msra.mxu1 %v5115_v6  ;;  %v2038_v6 = vld [vmem:[%s2822_s13 + $0x30] sm:$0xff] }
 0x1cb   : > { %1075 = vmatprep.subr.mxu0 %v5116_v7  ;;  %1146 = vmatprep.subr.mxu1 %v5117_v8 }
 0x1cc   : > { %1076 = vmatpush2.msra.mxu0 %v5118_v9  ;;  %1147 = vmatpush2.msra.mxu1 %v5119_v11  ;;  %v2039_v9 = vld [vmem:[%s2822_s13 + $0x38] sm:$0xff] }
 0x1cd   : > { %1077 = vmatprep.subr.mxu0 %v5120_v12  ;;  %1148 = vmatprep.subr.mxu1 %v5121_v13 }
 0x1ce   : > { %1078 = vmatpush2.msra.mxu0 %v5122_v14  ;;  %1149 = vmatpush2.msra.mxu1 %v5123_v15 }
 0x1cf   : > { %1079 = vmatprep.subr.mxu0 %v5124_v16  ;;  %1150 = vmatprep.subr.mxu1 %v5125_v17 }
 0x1d0   : > { %1080 = vmatpush2.msra.mxu0 %v5126_v18  ;;  %1151 = vmatpush2.msra.mxu1 %v5127_v20 }
 0x1d1   : > { %1081 = vmatprep.subr.mxu0 %v5128_v21  ;;  %1152 = vmatprep.subr.mxu1 %v5129_v22 }
 0x1d2   : > { %1082 = vmatpush2.msra.mxu0 %v5130_v23  ;;  %1153 = vmatpush2.msra.mxu1 %v5131_v24 }
 0x1d3   : > { %1196 = vmatprep.subr.mxu0 %v3621_v25  ;;  %1267 = vmatprep.subr.mxu1 %v3624_v26 }
 0x231   : > { %v734_v34 = vpop.f32.mrf.mxu0  ;;  %v805_v42 = vpop.f32.mrf.mxu1 }
 0x232   : > { %v735_v35 = vadd.f32 %v734_v34, %v3630_v32  ;;  %v806_v44 = vadd.f32 %v805_v42, %v3636_v41  ;;  %v3673_v42 = vld [vmem:[#allocation8 + $0x1d0] sm:$0xff] }
 0x233   : > { %v736_v36 = vpop.f32.mrf.mxu0  ;;  %v807_v48 = vpop.f32.mrf.mxu1 }
 0x234   : > { %v2033_v37 = vmul.f32 -1.442695, %v735_v35  ;;  %v737_v39 = vadd.f32 %v736_v36, %v3632_v33  ;;  %v2035_v46 = vmul.f32 -1.442695, %v806_v44  ;;  %v808_v52 = vadd.f32 %v807_v48, %v3639_v45  ;;  %v3679_v44 = vld [vmem:[#allocation8 + $0x1b8] sm:$0xff]  ;;  %v3685_v48 = vld [vmem:[#allocation8 + $0x1b0] sm:$0xff] }
 0x236   : > { %2182 = vpow2.f32 %v2033_v37  ;;  %v2034_v40 = vmul.f32 -1.442695, %v737_v39  ;;  %v3658_v37 = vld [vmem:[#allocation8 + $0x1e0] sm:$0xff]  ;;  %v3667_v39 = vld [vmem:[#allocation8 + $0x1d8] sm:$0xff] }
 0x238   : > { %2184 = vpow2.f32 %v2034_v40  ;;  %v3670_v40 = vld [vmem:[#allocation8 + $0x1c0] sm:$0xff] }
 0x239   : > { %2186 = vpow2.f32 %v2035_v46  ;;  %v3682_v46 = vld [vmem:[#allocation8 + $0x1a0] sm:$0xff] }
 0x243   : > { %v2183_v50 = vpop.eup %2182 }
 0x244   : > { %v820_v54 = vadd.f32 1.0, %v2183_v50  ;;  %v3688_v50 = vld [vmem:[#allocation8 + $0x188] sm:$0xff] }
 0x245   : > { %v2185_v56 = vpop.eup %2184 }
 0x246   : > { %2188 = vrcp.f32 %v820_v54  ;;  %v821_v0 = vadd.f32 1.0, %v2185_v56  ;;  %v2187_v10 = vpop.eup %2186  ;;  %v3694_v54 = vld [vmem:[#allocation8 + $0x180] sm:$0xff]  ;;  %v3697_v56 = vld [vmem:[#allocation8 + $0x190] sm:$0xff] }
 0x247   : > { %2190 = vtanh.f32 %v808_v52  ;;  %v822_v62 = vadd.f32 1.0, %v2187_v10  ;;  %v3691_v52 = vld [vmem:[#allocation8 + $0x198] sm:$0xff]  ;;  %v3706_v10 = vld [vmem:[#allocation8 + $0x160] sm:$0xff] }
 0x248   : > { %2192 = vrcp.f32 %v821_v0  ;;  %v3700_v0 = vld [vmem:[#allocation8 + $0x168] sm:$0xff] }
 0x252   : > { %v910_v55 = vpop.f32.mrf.mxu0  ;;  %v981_v7 = vpop.f32.mrf.mxu1 }
 0x253   : > { %v2189_v53 = vpop.eup %2188  ;;  %v986_v57 = vadd.f32 %v2036_v1, %v910_v55  ;;  %v988_v8 = vadd.f32 %v2038_v6, %v981_v7  ;;  %v3703_v1 = vld [vmem:[#allocation8 + $0x178] sm:$0xff]  ;;  %v3709_v55 = vld [vmem:[#allocation8 + $0x170] sm:$0xff]  ;;  %v3754_v7 = vld [vmem:[#allocation8 + $0xe0] sm:$0xff] }
 0x254   : > { %v2191_v59 = vpop.eup %2190  ;;  %v912_v63 = vpop.f32.mrf.mxu0  ;;  %v3751_v6 = vld [vmem:[#allocation8 + $0xf8] sm:$0xff] }
 0x255   : > { %v2193_v49 = vpop.eup %2192  ;;  %v2040_v58 = vmul.f32 -1.442695, %v986_v57  ;;  %v987_v47 = vadd.f32 %v2037_v5, %v912_v63  ;;  %v831_v2 = vmul.f32 %v2191_v59, %v2189_v53  ;;  %v983_v11 = vpop.f32.mrf.mxu1  ;;  %v2042_v12 = vmul.f32 -1.442695, %v988_v8  ;;  %v3712_v5 = vld [vmem:[#allocation8 + $0x148] sm:$0xff]  ;;  %v3715_v53 = vld [vmem:[#allocation8 + $0x158] sm:$0xff] }
 0x256   : > { %v830_v61 = vmul.f32 %v2193_v49, %v810_v51  ;;  %v989_v14 = vadd.f32 %v2039_v9, %v983_v11  ;;  %v3718_v51 = vld [vmem:[#allocation8 + $0x140] sm:$0xff]  ;;  %v3721_v57 = vld [vmem:[#allocation8 + $0x150] sm:$0xff]  ;;  %v3724_v59 = vld [vmem:[#allocation8 + $0x128] sm:$0xff] }
 0x257   : > { %2194 = vpow2.f32 %v2040_v58  ;;  %v2041_v3 = vmul.f32 -1.442695, %v987_v47  ;;  %v3730_v63 = vld [vmem:[#allocation8 + $0x120] sm:$0xff]  ;;  %v3733_v49 = vld [vmem:[#allocation8 + $0x130] sm:$0xff]  ;;  %v3736_v58 = vld [vmem:[#allocation8 + $0x108] sm:$0xff] }
 0x258   : > { %2196 = vrcp.f32 %v822_v62  ;;  %v3644_v4 = vadd.f32 %v831_v2, %v830_v61  ;;  %v3727_v62 = vld [vmem:[#allocation8 + $0x138] sm:$0xff]  ;;  %v3742_v61 = vld [vmem:[#allocation8 + $0x100] sm:$0xff]  ;;  %v3745_v2 = vld [vmem:[#allocation8 + $0x110] sm:$0xff] }
 0x259   : > { %2198 = vpow2.f32 %v2041_v3  ;;  %v3739_v47 = vld [vmem:[#allocation8 + $0x118] sm:$0xff]  ;;  %v3748_v3 = vld [vmem:[#allocation8 + $0xe8] sm:$0xff]  ;;  %v3757_v8 = vld [vmem:[#allocation8 + $0xf0] sm:$0xff] }
 0x25a   : > { %2200 = vtanh.f32 %v3644_v4  ;;  %v3760_v9 = vld [vmem:[#allocation8 + $0xc8] sm:$0xff]  ;;  %v3763_v11 = vld [vmem:[#allocation8 + $0xd8] sm:$0xff] }
 0x25b   : > { %2202 = vpow2.f32 %v2042_v12  ;;  %v3766_v12 = vld [vmem:[#allocation8 + $0xc0] sm:$0xff] }
 0x264   : > { %v2195_v13 = vpop.eup %2194 }
 0x265   : > { %v2197_v15 = vpop.eup %2196  ;;  %v1000_v16 = vadd.f32 1.0, %v2195_v13  ;;  %v3769_v13 = vld [vmem:[#allocation8 + $0xd0] sm:$0xff] }
 0x266   : > { %v2199_v17 = vpop.eup %2198 }
 0x267   : > { %v2201_v18 = vpop.eup %2200  ;;  %2204 = vrcp.f32 %v1000_v16  ;;  %v1001_v20 = vadd.f32 1.0, %v2199_v17  ;;  %v3778_v16 = vld [vmem:[#allocation8 + $0xa0] sm:$0xff]  ;;  %v3781_v17 = vld [vmem:[#allocation8 + $0xb0] sm:$0xff] }
 0x268   : > { %v834_v21 = vmul.f32 %v2201_v18, %v2197_v15  ;;  %2206 = vtanh.f32 %v989_v14  ;;  %v2203_v22 = vpop.eup %2202  ;;  %v3772_v14 = vld [vmem:[#allocation8 + $0xa8] sm:$0xff]  ;;  %v3775_v15 = vld [vmem:[#allocation8 + $0xb8] sm:$0xff] }
 0x269   : > { %2208 = vrcp.f32 %v1001_v20  ;;  %v1002_v28 = vadd.f32 1.0, %v2203_v22  ;;  %v3784_v18 = vld [vmem:[#allocation8 + $0x88] sm:$0xff]  ;;  %v3787_v20 = vld [vmem:[#allocation8 + $0x98] sm:$0xff]  ;;  %v3793_v22 = vld [vmem:[#allocation8 + $0x90] sm:$0xff] }
 0x26a   : > { %837 = vst [vmem:[%s2833_s8] sm:$0xff] %v834_v21  ;;  %1083 = vmatprep.mubr.f32.mxu0 %v834_v21  ;;  %1154 = vmatprep.mubr.f32.mxu1 %v834_v21  ;;  %5136 = vst [vmem:[#allocation17_spill] sm:$0xff] %v3787_v20  ;;  %v3790_v21 = vld [vmem:[#allocation8 + $0x80] sm:$0xff] }
 0x26b   : > { %2210 = vrcp.f32 %v1002_v28  ;;  %5137 = vst [vmem:[#allocation25_spill] sm:$0xff] %v3790_v21  ;;  %5138 = vst [vmem:[#allocation18_spill] sm:$0xff] %v3793_v22  ;;  %v3805_v28 = vld [vmem:[#allocation8 + $0x70] sm:$0xff] }
 0x26c   : > { %5142 = vst [vmem:[#allocation20_spill] sm:$0xff] %v3805_v28 }
 0x274   : > { %v2205_v23 = vpop.eup %2204 }
 0x275   : > { %v2207_v24 = vpop.eup %2206 }
 0x276   : > { %v2209_v27 = vpop.eup %2208  ;;  %v1011_v30 = vmul.f32 %v2207_v24, %v2205_v23  ;;  %v3796_v23 = vld [vmem:[#allocation8 + $0x68] sm:$0xff]  ;;  %v3799_v24 = vld [vmem:[#allocation8 + $0x78] sm:$0xff] }
 0x277   : > { %v1010_v29 = vmul.f32 %v2209_v27, %v3420_v60  ;;  %v3664_v60 = vld [vmem:[#allocation8 + $0x1c8] sm:$0xff]  ;;  %5139 = vst [vmem:[#allocation26_spill] sm:$0xff] %v3796_v23  ;;  %5140 = vst [vmem:[#allocation19_spill] sm:$0xff] %v3799_v24  ;;  %v3802_v27 = vld [vmem:[#allocation8 + $0x60] sm:$0xff] }
 0x278   : > { %v2211_v34 = vpop.eup %2210  ;;  %5141 = vst [vmem:[#allocation27_spill] sm:$0xff] %v3802_v27 }
 0x279   : > { %v3651_v31 = vadd.f32 %v1011_v30, %v1010_v29  ;;  %v3808_v29 = vld [vmem:[#allocation8 + $0x48] sm:$0xff]  ;;  %v3811_v30 = vld [vmem:[#allocation8 + $0x58] sm:$0xff] }
 0x27a   : > { %5143 = vst [vmem:[#allocation28_spill] sm:$0xff] %v3808_v29  ;;  %5144 = vst [vmem:[#allocation22_spill] sm:$0xff] %v3811_v30 }
 0x27b   : > { %2212 = vtanh.f32 %v3651_v31 }
 0x288   : > { %v2213_v35 = vpop.eup %2212 }
 0x289   : > { %v3654_v36 = vmul.f32 %v2213_v35, %v2211_v34  ;;  %v3814_v34 = vld [vmem:[#allocation8 + $0x40] sm:$0xff]  ;;  %v3817_v35 = vld [vmem:[#allocation8 + $0x50] sm:$0xff] }
 0x28a   : > { %5145 = vst [vmem:[#allocation29_spill] sm:$0xff] %v3814_v34  ;;  %5146 = vst [vmem:[#allocation24_spill] sm:$0xff] %v3817_v35 }
 0x28b   : > { %1084 = vmatmul.mubr.f32.vlgmr.msra.gmra.mxu0 %v3654_v36  ;;  %1155 = vmatmul.mubr.f32.vlgmr.msra.gmra.mxu1 %v3654_v36 }
 0x28c   : > { %1197 = vmatpush1.msra.mxu0 %v3658_v37  ;;  %1268 = vmatpush1.msra.mxu1 %v3661_v38 }
 0x28d   : > { %1198 = vmatprep.subr.mxu0 %v3664_v60  ;;  %1269 = vmatprep.subr.mxu1 %v3667_v39 }
 0x28e   : > { %1199 = vmatpush1.msra.mxu0 %v3670_v40  ;;  %1270 = vmatpush1.msra.mxu1 %v3673_v42 }
 0x28f   : > { %1200 = vmatprep.subr.mxu0 %v3676_v43  ;;  %1271 = vmatprep.subr.mxu1 %v3679_v44 }
 0x290   : > { %1201 = vmatpush1.msra.mxu0 %v3682_v46  ;;  %1272 = vmatpush1.msra.mxu1 %v3685_v48 }
 0x291   : > { %1202 = vmatprep.subr.mxu0 %v3688_v50  ;;  %1273 = vmatprep.subr.mxu1 %v3691_v52 }
 0x292   : > { %1203 = vmatpush1.msra.mxu0 %v3694_v54  ;;  %1274 = vmatpush1.msra.mxu1 %v3697_v56 }
 0x293   : > { %1204 = vmatprep.subr.mxu0 %v3700_v0  ;;  %1275 = vmatprep.subr.mxu1 %v3703_v1 }
 0x294   : > { %1205 = vmatpush1.msra.mxu0 %v3706_v10  ;;  %1276 = vmatpush1.msra.mxu1 %v3709_v55 }
 0x295   : > { %1206 = vmatprep.subr.mxu0 %v3712_v5  ;;  %1277 = vmatprep.subr.mxu1 %v3715_v53 }
 0x296   : > { %1207 = vmatpush1.msra.mxu0 %v3718_v51  ;;  %1278 = vmatpush1.msra.mxu1 %v3721_v57 }
 0x297   : > { %1208 = vmatprep.subr.mxu0 %v3724_v59  ;;  %1279 = vmatprep.subr.mxu1 %v3727_v62 }
 0x298   : > { %1209 = vmatpush1.msra.mxu0 %v3730_v63  ;;  %1280 = vmatpush1.msra.mxu1 %v3733_v49 }
 0x299   : > { %1210 = vmatprep.subr.mxu0 %v3736_v58  ;;  %1281 = vmatprep.subr.mxu1 %v3739_v47 }
 0x29a   : > { %1211 = vmatpush1.msra.mxu0 %v3742_v61  ;;  %1282 = vmatpush1.msra.mxu1 %v3745_v2 }
 0x29b   : > { %1212 = vmatprep.subr.mxu0 %v3748_v3  ;;  %1283 = vmatprep.subr.mxu1 %v3751_v6 }
 0x29c   : > { %1213 = vmatpush1.msra.mxu0 %v3754_v7  ;;  %1284 = vmatpush1.msra.mxu1 %v3757_v8 }
 0x29d   : > { %1214 = vmatprep.subr.mxu0 %v3760_v9  ;;  %1285 = vmatprep.subr.mxu1 %v3763_v11 }
 0x29e   : > { %1215 = vmatpush1.msra.mxu0 %v3766_v12  ;;  %1286 = vmatpush1.msra.mxu1 %v3769_v13 }
 0x29f   : > { %1216 = vmatprep.subr.mxu0 %v3772_v14  ;;  %1287 = vmatprep.subr.mxu1 %v3775_v15 }
 0x2a0   : > { %1217 = vmatpush1.msra.mxu0 %v3778_v16  ;;  %1288 = vmatpush1.msra.mxu1 %v3781_v17 }
 0x2a1   : > { %1218 = vmatprep.subr.mxu0 %v3784_v18  ;;  %1289 = vmatprep.subr.mxu1 %v3787_v20 }
 0x2a2   : > { %1219 = vmatpush1.msra.mxu0 %v3790_v21  ;;  %1290 = vmatpush1.msra.mxu1 %v3793_v22 }
 0x2a3   : > { %1220 = vmatprep.subr.mxu0 %v3796_v23  ;;  %1291 = vmatprep.subr.mxu1 %v3799_v24 }
 0x2a4   : > { %1221 = vmatpush1.msra.mxu0 %v3802_v27  ;;  %1292 = vmatpush1.msra.mxu1 %v3805_v28  ;;  %v3820_v27 = vld [vmem:[#allocation8 + $0x28] sm:$0xff]  ;;  %v3823_v28 = vld [vmem:[#allocation8 + $0x38] sm:$0xff] }
 0x2a5   : > { %1222 = vmatprep.subr.mxu0 %v3808_v29  ;;  %1293 = vmatprep.subr.mxu1 %v3811_v30  ;;  %5147 = vst [vmem:[#allocation30_spill] sm:$0xff] %v3820_v27  ;;  %5148 = vst [vmem:[#allocation31_spill] sm:$0xff] %v3823_v28  ;;  %v3826_v29 = vld [vmem:[#allocation8 + $0x20] sm:$0xff]  ;;  %v3829_v30 = vld [vmem:[#allocation8 + $0x30] sm:$0xff] }
 0x2a6   : > { %1223 = vmatpush1.msra.mxu0 %v3814_v34  ;;  %1294 = vmatpush1.msra.mxu1 %v3817_v35  ;;  %5149 = vst [vmem:[#allocation32_spill] sm:$0xff] %v3826_v29  ;;  %5150 = vst [vmem:[#allocation33_spill] sm:$0xff] %v3829_v30  ;;  %v3832_v34 = vld [vmem:[#allocation8 + $0x8] sm:$0xff]  ;;  %v3835_v35 = vld [vmem:[#allocation8 + $0x18] sm:$0xff] }
 0x2a7   : > { %1224 = vmatprep.subr.mxu0 %v3820_v27  ;;  %1295 = vmatprep.subr.mxu1 %v3823_v28  ;;  %5151 = vst [vmem:[#allocation34_spill] sm:$0xff] %v3832_v34  ;;  %5152 = vst [vmem:[#allocation35_spill] sm:$0xff] %v3835_v35  ;;  %v3838_v27 = vld [vmem:[#allocation8] sm:$0xff]  ;;  %v3842_v28 = vld [vmem:[#allocation8 + $0x10] sm:$0xff] }
 0x2a8   : > { %1225 = vmatpush1.msra.mxu0 %v3826_v29  ;;  %1296 = vmatpush1.msra.mxu1 %v3829_v30  ;;  %5153 = vst [vmem:[#allocation36_spill] sm:$0xff] %v3838_v27  ;;  %5154 = vst [vmem:[#allocation37_spill] sm:$0xff] %v3842_v28  ;;  %v3857_v30 = vld [vmem:[#allocation10 + $0x1f0] sm:$0xff] }
 0x2a9   : > { %1226 = vmatprep.subr.mxu0 %v3832_v34  ;;  %1297 = vmatprep.subr.mxu1 %v3835_v35  ;;  %v3848_v34 = vld [vmem:[#allocation10 + $0x1e8] sm:$0xff]  ;;  %v3851_v35 = vld [vmem:[#allocation10 + $0x1f8] sm:$0xff]  ;;  %5158 = vst [vmem:[#allocation41_spill] sm:$0xff] %v3857_v30 }
 0x2aa   : > { %1227 = vmatpush1.msra.mxu0 %v3838_v27  ;;  %1260 = vmatprep.mubr.f32.mxu0 %v5002_v19  ;;  %5155 = vst [vmem:[#allocation38_spill] sm:$0xff] %v3848_v34  ;;  %5156 = vst [vmem:[#allocation39_spill] sm:$0xff] %v3851_v35  ;;  %v3854_v27 = vld [vmem:[#allocation10 + $0x1e0] sm:$0xff] }
 0x2ab   : > { %1298 = vmatpush1.msra.mxu1 %v3842_v28  ;;  %1331 = vmatprep.mubr.f32.mxu1 %v5002_v19  ;;  %5157 = vst [vmem:[#allocation40_spill] sm:$0xff] %v3854_v27  ;;  %v3860_v28 = vld [vmem:[#allocation10 + $0x1c8] sm:$0xff] }
 0x2ac   : > { %1261 = vmatmul.mubr.f32.vlgmr.msra.gmra.mxu0 %v3654_v36  ;;  %1332 = vmatmul.mubr.f32.vlgmr.msra.gmra.mxu1 %v3654_v36  ;;  %5159 = vst [vmem:[#allocation42_spill] sm:$0xff] %v3860_v28  ;;  %v3863_v36 = vld [vmem:[#allocation10 + $0x1d8] sm:$0xff] }
 0x2ad   : > { %1371 = vmatprep.subr.mxu0 %v3848_v34  ;;  %1442 = vmatprep.subr.mxu1 %v3851_v35  ;;  %5160 = vst [vmem:[#allocation43_spill] sm:$0xff] %v3863_v36  ;;  %v3866_v34 = vld [vmem:[#allocation10 + $0x1c0] sm:$0xff]  ;;  %v3869_v35 = vld [vmem:[#allocation10 + $0x1d0] sm:$0xff] }
 0x2ae   : > { %1372 = vmatpush1.msra.mxu0 %v3854_v27  ;;  %1443 = vmatpush1.msra.mxu1 %v3857_v30  ;;  %5161 = vst [vmem:[#allocation44_spill] sm:$0xff] %v3866_v34  ;;  %5162 = vst [vmem:[#allocation45_spill] sm:$0xff] %v3869_v35  ;;  %v3872_v27 = vld [vmem:[#allocation10 + $0x1a8] sm:$0xff]  ;;  %v3875_v30 = vld [vmem:[#allocation10 + $0x1b8] sm:$0xff] }
 0x2af   : > { %1373 = vmatprep.subr.mxu0 %v3860_v28  ;;  %1444 = vmatprep.subr.mxu1 %v3863_v36  ;;  %5163 = vst [vmem:[#allocation46_spill] sm:$0xff] %v3872_v27  ;;  %5164 = vst [vmem:[#allocation47_spill] sm:$0xff] %v3875_v30  ;;  %v3878_v28 = vld [vmem:[#allocation10 + $0x1a0] sm:$0xff]  ;;  %v3881_v36 = vld [vmem:[#allocation10 + $0x1b0] sm:$0xff] }
 0x2b0   : > { %1374 = vmatpush1.msra.mxu0 %v3866_v34  ;;  %1445 = vmatpush1.msra.mxu1 %v3869_v35  ;;  %5165 = vst [vmem:[#allocation48_spill] sm:$0xff] %v3878_v28  ;;  %5166 = vst [vmem:[#allocation49_spill] sm:$0xff] %v3881_v36  ;;  %v3884_v34 = vld [vmem:[#allocation10 + $0x188] sm:$0xff]  ;;  %v3887_v35 = vld [vmem:[#allocation10 + $0x198] sm:$0xff] }
 0x2b1   : > { %1375 = vmatprep.subr.mxu0 %v3872_v27  ;;  %1446 = vmatprep.subr.mxu1 %v3875_v30  ;;  %5167 = vst [vmem:[#allocation50_spill] sm:$0xff] %v3884_v34  ;;  %5168 = vst [vmem:[#allocation51_spill] sm:$0xff] %v3887_v35  ;;  %v3890_v27 = vld [vmem:[#allocation10 + $0x180] sm:$0xff]  ;;  %v3893_v30 = vld [vmem:[#allocation10 + $0x190] sm:$0xff] }
 0x2b2   : > { %1376 = vmatpush1.msra.mxu0 %v3878_v28  ;;  %1447 = vmatpush1.msra.mxu1 %v3881_v36  ;;  %5169 = vst [vmem:[#allocation52_spill] sm:$0xff] %v3890_v27  ;;  %5170 = vst [vmem:[#allocation53_spill] sm:$0xff] %v3893_v30  ;;  %v3896_v28 = vld [vmem:[#allocation10 + $0x168] sm:$0xff]  ;;  %v3899_v36 = vld [vmem:[#allocation10 + $0x178] sm:$0xff] }
 0x2b3   : > { %1377 = vmatprep.subr.mxu0 %v3884_v34  ;;  %1448 = vmatprep.subr.mxu1 %v3887_v35  ;;  %5171 = vst [vmem:[#allocation54_spill] sm:$0xff] %v3896_v28  ;;  %5172 = vst [vmem:[#allocation55_spill] sm:$0xff] %v3899_v36  ;;  %v3902_v34 = vld [vmem:[#allocation10 + $0x160] sm:$0xff]  ;;  %v3905_v35 = vld [vmem:[#allocation10 + $0x170] sm:$0xff] }
 0x2b4   : > { %1378 = vmatpush1.msra.mxu0 %v3890_v27  ;;  %1449 = vmatpush1.msra.mxu1 %v3893_v30  ;;  %5173 = vst [vmem:[#allocation56_spill] sm:$0xff] %v3902_v34  ;;  %5174 = vst [vmem:[#allocation57_spill] sm:$0xff] %v3905_v35  ;;  %v3908_v27 = vld [vmem:[#allocation10 + $0x148] sm:$0xff]  ;;  %v3911_v30 = vld [vmem:[#allocation10 + $0x158] sm:$0xff] }
 0x2b5   : > { %1379 = vmatprep.subr.mxu0 %v3896_v28  ;;  %1450 = vmatprep.subr.mxu1 %v3899_v36  ;;  %5175 = vst [vmem:[#allocation58_spill] sm:$0xff] %v3908_v27  ;;  %5176 = vst [vmem:[#allocation59_spill] sm:$0xff] %v3911_v30  ;;  %v3914_v28 = vld [vmem:[#allocation10 + $0x140] sm:$0xff]  ;;  %v3917_v36 = vld [vmem:[#allocation10 + $0x150] sm:$0xff] }
 0x2b6   : > { %1380 = vmatpush1.msra.mxu0 %v3902_v34  ;;  %1451 = vmatpush1.msra.mxu1 %v3905_v35  ;;  %5177 = vst [vmem:[#allocation60_spill] sm:$0xff] %v3914_v28  ;;  %5178 = vst [vmem:[#allocation61_spill] sm:$0xff] %v3917_v36  ;;  %v3920_v34 = vld [vmem:[#allocation10 + $0x128] sm:$0xff]  ;;  %v3923_v35 = vld [vmem:[#allocation10 + $0x138] sm:$0xff] }
 0x2b7   : > { %1381 = vmatprep.subr.mxu0 %v3908_v27  ;;  %1452 = vmatprep.subr.mxu1 %v3911_v30  ;;  %5179 = vst [vmem:[#allocation62_spill] sm:$0xff] %v3920_v34  ;;  %5180 = vst [vmem:[#allocation63_spill] sm:$0xff] %v3923_v35  ;;  %v3926_v27 = vld [vmem:[#allocation10 + $0x120] sm:$0xff]  ;;  %v3929_v30 = vld [vmem:[#allocation10 + $0x130] sm:$0xff] }
 0x2b8   : > { %1382 = vmatpush1.msra.mxu0 %v3914_v28  ;;  %1453 = vmatpush1.msra.mxu1 %v3917_v36  ;;  %5181 = vst [vmem:[#allocation64_spill] sm:$0xff] %v3926_v27  ;;  %5182 = vst [vmem:[#allocation65_spill] sm:$0xff] %v3929_v30  ;;  %v3932_v28 = vld [vmem:[#allocation10 + $0x108] sm:$0xff]  ;;  %v3935_v36 = vld [vmem:[#allocation10 + $0x118] sm:$0xff] }
 0x2b9   : > { %1383 = vmatprep.subr.mxu0 %v3920_v34  ;;  %1454 = vmatprep.subr.mxu1 %v3923_v35  ;;  %5183 = vst [vmem:[#allocation66_spill] sm:$0xff] %v3932_v28  ;;  %5184 = vst [vmem:[#allocation67_spill] sm:$0xff] %v3935_v36  ;;  %v3938_v34 = vld [vmem:[#allocation10 + $0x100] sm:$0xff]  ;;  %v3941_v35 = vld [vmem:[#allocation10 + $0x110] sm:$0xff] }
 0x2ba   : > { %1384 = vmatpush1.msra.mxu0 %v3926_v27  ;;  %1455 = vmatpush1.msra.mxu1 %v3929_v30  ;;  %5185 = vst [vmem:[#allocation68_spill] sm:$0xff] %v3938_v34  ;;  %5186 = vst [vmem:[#allocation69_spill] sm:$0xff] %v3941_v35  ;;  %v3944_v27 = vld [vmem:[#allocation10 + $0xe8] sm:$0xff]  ;;  %v3947_v30 = vld [vmem:[#allocation10 + $0xf8] sm:$0xff] }
 0x2bb   : > { %1385 = vmatprep.subr.mxu0 %v3932_v28  ;;  %1456 = vmatprep.subr.mxu1 %v3935_v36  ;;  %5187 = vst [vmem:[#allocation70_spill] sm:$0xff] %v3944_v27  ;;  %5188 = vst [vmem:[#allocation71_spill] sm:$0xff] %v3947_v30  ;;  %v3950_v28 = vld [vmem:[#allocation10 + $0xe0] sm:$0xff]  ;;  %v3953_v36 = vld [vmem:[#allocation10 + $0xf0] sm:$0xff] }
 0x2bc   : > { %1386 = vmatpush1.msra.mxu0 %v3938_v34  ;;  %1457 = vmatpush1.msra.mxu1 %v3941_v35  ;;  %5189 = vst [vmem:[#allocation72_spill] sm:$0xff] %v3950_v28  ;;  %5190 = vst [vmem:[#allocation73_spill] sm:$0xff] %v3953_v36  ;;  %v3956_v34 = vld [vmem:[#allocation10 + $0xc8] sm:$0xff]  ;;  %v3959_v35 = vld [vmem:[#allocation10 + $0xd8] sm:$0xff] }
 0x2bd   : > { %1387 = vmatprep.subr.mxu0 %v3944_v27  ;;  %1458 = vmatprep.subr.mxu1 %v3947_v30  ;;  %5191 = vst [vmem:[#allocation74_spill] sm:$0xff] %v3956_v34  ;;  %5192 = vst [vmem:[#allocation75_spill] sm:$0xff] %v3959_v35  ;;  %v3962_v27 = vld [vmem:[#allocation10 + $0xc0] sm:$0xff]  ;;  %v3965_v30 = vld [vmem:[#allocation10 + $0xd0] sm:$0xff] }
 0x2be   : > { %1388 = vmatpush1.msra.mxu0 %v3950_v28  ;;  %1459 = vmatpush1.msra.mxu1 %v3953_v36  ;;  %5193 = vst [vmem:[#allocation76_spill] sm:$0xff] %v3962_v27  ;;  %5194 = vst [vmem:[#allocation77_spill] sm:$0xff] %v3965_v30  ;;  %v3968_v28 = vld [vmem:[#allocation10 + $0xa8] sm:$0xff]  ;;  %v3971_v36 = vld [vmem:[#allocation10 + $0xb8] sm:$0xff] }
 0x2bf   : > { %1389 = vmatprep.subr.mxu0 %v3956_v34  ;;  %1460 = vmatprep.subr.mxu1 %v3959_v35  ;;  %5195 = vst [vmem:[#allocation78_spill] sm:$0xff] %v3968_v28  ;;  %5196 = vst [vmem:[#allocation79_spill] sm:$0xff] %v3971_v36  ;;  %v3974_v34 = vld [vmem:[#allocation10 + $0xa0] sm:$0xff]  ;;  %v3977_v35 = vld [vmem:[#allocation10 + $0xb0] sm:$0xff] }
 0x2c0   : > { %1390 = vmatpush1.msra.mxu0 %v3962_v27  ;;  %1461 = vmatpush1.msra.mxu1 %v3965_v30  ;;  %5197 = vst [vmem:[#allocation80_spill] sm:$0xff] %v3974_v34  ;;  %5198 = vst [vmem:[#allocation81_spill] sm:$0xff] %v3977_v35  ;;  %v3980_v27 = vld [vmem:[#allocation10 + $0x88] sm:$0xff]  ;;  %v3983_v30 = vld [vmem:[#allocation10 + $0x98] sm:$0xff] }
 0x2c1   : > { %1391 = vmatprep.subr.mxu0 %v3968_v28  ;;  %1462 = vmatprep.subr.mxu1 %v3971_v36  ;;  %5199 = vst [vmem:[#allocation82_spill] sm:$0xff] %v3980_v27  ;;  %5200 = vst [vmem:[#allocation83_spill] sm:$0xff] %v3983_v30  ;;  %v3986_v28 = vld [vmem:[#allocation10 + $0x80] sm:$0xff]  ;;  %v3989_v36 = vld [vmem:[#allocation10 + $0x90] sm:$0xff] }
 0x2c2   : > { %1392 = vmatpush1.msra.mxu0 %v3974_v34  ;;  %1463 = vmatpush1.msra.mxu1 %v3977_v35  ;;  %5201 = vst [vmem:[#allocation84_spill] sm:$0xff] %v3986_v28  ;;  %5202 = vst [vmem:[#allocation85_spill] sm:$0xff] %v3989_v36  ;;  %v3992_v34 = vld [vmem:[#allocation10 + $0x68] sm:$0xff]  ;;  %v3995_v35 = vld [vmem:[#allocation10 + $0x78] sm:$0xff] }
 0x2c3   : > { %1393 = vmatprep.subr.mxu0 %v3980_v27  ;;  %1464 = vmatprep.subr.mxu1 %v3983_v30  ;;  %5203 = vst [vmem:[#allocation86_spill] sm:$0xff] %v3992_v34  ;;  %5204 = vst [vmem:[#allocation87_spill] sm:$0xff] %v3995_v35  ;;  %v3998_v27 = vld [vmem:[#allocation10 + $0x60] sm:$0xff]  ;;  %v4001_v30 = vld [vmem:[#allocation10 + $0x70] sm:$0xff] }
 0x2c4   : > { %1394 = vmatpush1.msra.mxu0 %v3986_v28  ;;  %1465 = vmatpush1.msra.mxu1 %v3989_v36  ;;  %5205 = vst [vmem:[#allocation88_spill] sm:$0xff] %v3998_v27  ;;  %5206 = vst [vmem:[#allocation89_spill] sm:$0xff] %v4001_v30  ;;  %v4004_v28 = vld [vmem:[#allocation10 + $0x48] sm:$0xff]  ;;  %v4007_v36 = vld [vmem:[#allocation10 + $0x58] sm:$0xff] }
 0x2c5   : > { %1395 = vmatprep.subr.mxu0 %v3992_v34  ;;  %1466 = vmatprep.subr.mxu1 %v3995_v35  ;;  %5207 = vst [vmem:[#allocation90_spill] sm:$0xff] %v4004_v28  ;;  %5208 = vst [vmem:[#allocation91_spill] sm:$0xff] %v4007_v36  ;;  %v4010_v34 = vld [vmem:[#allocation10 + $0x40] sm:$0xff]  ;;  %v4013_v35 = vld [vmem:[#allocation10 + $0x50] sm:$0xff] }
 0x2c6   : > { %1396 = vmatpush1.msra.mxu0 %v3998_v27  ;;  %1467 = vmatpush1.msra.mxu1 %v4001_v30  ;;  %5209 = vst [vmem:[#allocation92_spill] sm:$0xff] %v4010_v34  ;;  %5210 = vst [vmem:[#allocation93_spill] sm:$0xff] %v4013_v35  ;;  %v4016_v27 = vld [vmem:[#allocation10 + $0x28] sm:$0xff]  ;;  %v4019_v30 = vld [vmem:[#allocation10 + $0x38] sm:$0xff] }
 0x2c7   : > { %1397 = vmatprep.subr.mxu0 %v4004_v28  ;;  %1468 = vmatprep.subr.mxu1 %v4007_v36  ;;  %5211 = vst [vmem:[#allocation94_spill] sm:$0xff] %v4016_v27  ;;  %5212 = vst [vmem:[#allocation95_spill] sm:$0xff] %v4019_v30  ;;  %v4022_v28 = vld [vmem:[#allocation10 + $0x20] sm:$0xff]  ;;  %v4025_v36 = vld [vmem:[#allocation10 + $0x30] sm:$0xff] }
 0x2c8   : > { %1398 = vmatpush1.msra.mxu0 %v4010_v34  ;;  %1469 = vmatpush1.msra.mxu1 %v4013_v35  ;;  %5213 = vst [vmem:[#allocation96_spill] sm:$0xff] %v4022_v28  ;;  %5214 = vst [vmem:[#allocation97_spill] sm:$0xff] %v4025_v36  ;;  %v4028_v34 = vld [vmem:[#allocation10 + $0x8] sm:$0xff]  ;;  %v4031_v35 = vld [vmem:[#allocation10 + $0x18] sm:$0xff] }
 0x2c9   : > { %1399 = vmatprep.subr.mxu0 %v4016_v27  ;;  %1470 = vmatprep.subr.mxu1 %v4019_v30  ;;  %5215 = vst [vmem:[#allocation98_spill] sm:$0xff] %v4028_v34  ;;  %5216 = vst [vmem:[#allocation99_spill] sm:$0xff] %v4031_v35  ;;  %v4034_v27 = vld [vmem:[#allocation10] sm:$0xff]  ;;  %v4037_v30 = vld [vmem:[#allocation10 + $0x10] sm:$0xff] }
 0x2ca   : > { %1400 = vmatpush1.msra.mxu0 %v4022_v28  ;;  %1471 = vmatpush1.msra.mxu1 %v4025_v36  ;;  %5217 = vst [vmem:[#allocation100_spill] sm:$0xff] %v4034_v27  ;;  %5218 = vst [vmem:[#allocation101_spill] sm:$0xff] %v4037_v30  ;;  %v4040_v28 = vld [vmem:[#allocation10 + $0x3e8] sm:$0xff]  ;;  %v4043_v36 = vld [vmem:[#allocation10 + $0x3f8] sm:$0xff] }
 0x2cb   : > { %1401 = vmatprep.subr.mxu0 %v4028_v34  ;;  %1472 = vmatprep.subr.mxu1 %v4031_v35  ;;  %5219 = vst [vmem:[#allocation102_spill] sm:$0xff] %v4040_v28  ;;  %5220 = vst [vmem:[#allocation103_spill] sm:$0xff] %v4043_v36  ;;  %v4046_v34 = vld [vmem:[#allocation10 + $0x3e0] sm:$0xff]  ;;  %v4049_v35 = vld [vmem:[#allocation10 + $0x3f0] sm:$0xff] }
 0x2cc   : > { %1402 = vmatpush1.msra.mxu0 %v4034_v27  ;;  %1473 = vmatpush1.msra.mxu1 %v4037_v30  ;;  %5221 = vst [vmem:[#allocation104_spill] sm:$0xff] %v4046_v34  ;;  %5222 = vst [vmem:[#allocation105_spill] sm:$0xff] %v4049_v35  ;;  %v4052_v27 = vld [vmem:[#allocation10 + $0x3c8] sm:$0xff]  ;;  %v4055_v30 = vld [vmem:[#allocation10 + $0x3d8] sm:$0xff] }
 0x2cd   : > { %1403 = vmatprep.subr.mxu0 %v4040_v28  ;;  %1474 = vmatprep.subr.mxu1 %v4043_v36  ;;  %5223 = vst [vmem:[#allocation106_spill] sm:$0xff] %v4052_v27  ;;  %5224 = vst [vmem:[#allocation107_spill] sm:$0xff] %v4055_v30  ;;  %v4058_v28 = vld [vmem:[#allocation10 + $0x3c0] sm:$0xff]  ;;  %v4061_v36 = vld [vmem:[#allocation10 + $0x3d0] sm:$0xff] }
 0x2ce   : > { %1404 = vmatpush2.msra.mxu0 %v4046_v34  ;;  %1475 = vmatpush2.msra.mxu1 %v4049_v35  ;;  %5225 = vst [vmem:[#allocation108_spill] sm:$0xff] %v4058_v28  ;;  %5226 = vst [vmem:[#allocation109_spill] sm:$0xff] %v4061_v36  ;;  %v4064_v34 = vld [vmem:[#allocation10 + $0x3a8] sm:$0xff]  ;;  %v4067_v35 = vld [vmem:[#allocation10 + $0x3b8] sm:$0xff] }
 0x2cf   : > { %1405 = vmatprep.subr.mxu0 %v4052_v27  ;;  %1476 = vmatprep.subr.mxu1 %v4055_v30  ;;  %5227 = vst [vmem:[#allocation110_spill] sm:$0xff] %v4064_v34  ;;  %5228 = vst [vmem:[#allocation111_spill] sm:$0xff] %v4067_v35  ;;  %v4070_v27 = vld [vmem:[#allocation10 + $0x3a0] sm:$0xff]  ;;  %v4073_v30 = vld [vmem:[#allocation10 + $0x3b0] sm:$0xff] }
 0x2d0   : > { %1406 = vmatpush2.msra.mxu0 %v4058_v28  ;;  %1477 = vmatpush2.msra.mxu1 %v4061_v36  ;;  %5229 = vst [vmem:[#allocation112_spill] sm:$0xff] %v4070_v27  ;;  %5230 = vst [vmem:[#allocation113_spill] sm:$0xff] %v4073_v30  ;;  %v4076_v28 = vld [vmem:[#allocation10 + $0x388] sm:$0xff]  ;;  %v4079_v36 = vld [vmem:[#allocation10 + $0x398] sm:$0xff] }
 0x2d1   : > { %1407 = vmatprep.subr.mxu0 %v4064_v34  ;;  %1478 = vmatprep.subr.mxu1 %v4067_v35  ;;  %5231 = vst [vmem:[#allocation114_spill] sm:$0xff] %v4076_v28  ;;  %5232 = vst [vmem:[#allocation115_spill] sm:$0xff] %v4079_v36  ;;  %v4082_v34 = vld [vmem:[#allocation10 + $0x380] sm:$0xff]  ;;  %v4085_v35 = vld [vmem:[#allocation10 + $0x390] sm:$0xff] }
 0x2d2   : > { %1408 = vmatpush2.msra.mxu0 %v4070_v27  ;;  %1479 = vmatpush2.msra.mxu1 %v4073_v30  ;;  %5233 = vst [vmem:[#allocation116_spill] sm:$0xff] %v4082_v34  ;;  %5234 = vst [vmem:[#allocation117_spill] sm:$0xff] %v4085_v35  ;;  %v4088_v27 = vld [vmem:[#allocation10 + $0x368] sm:$0xff]  ;;  %v4091_v30 = vld [vmem:[#allocation10 + $0x378] sm:$0xff] }
 0x2d3   : > { %1409 = vmatprep.subr.mxu0 %v4076_v28  ;;  %1480 = vmatprep.subr.mxu1 %v4079_v36  ;;  %5235 = vst [vmem:[#allocation118_spill] sm:$0xff] %v4088_v27  ;;  %5236 = vst [vmem:[#allocation119_spill] sm:$0xff] %v4091_v30  ;;  %v4094_v28 = vld [vmem:[#allocation10 + $0x360] sm:$0xff]  ;;  %v4097_v36 = vld [vmem:[#allocation10 + $0x370] sm:$0xff] }
 0x2d4   : > { %1410 = vmatpush2.msra.mxu0 %v4082_v34  ;;  %1481 = vmatpush2.msra.mxu1 %v4085_v35  ;;  %5237 = vst [vmem:[#allocation120_spill] sm:$0xff] %v4094_v28  ;;  %5238 = vst [vmem:[#allocation121_spill] sm:$0xff] %v4097_v36  ;;  %v4100_v34 = vld [vmem:[#allocation10 + $0x348] sm:$0xff]  ;;  %v4103_v35 = vld [vmem:[#allocation10 + $0x358] sm:$0xff] }
 0x2d5   : > { %1411 = vmatprep.subr.mxu0 %v4088_v27  ;;  %1482 = vmatprep.subr.mxu1 %v4091_v30  ;;  %5239 = vst [vmem:[#allocation122_spill] sm:$0xff] %v4100_v34  ;;  %5240 = vst [vmem:[#allocation123_spill] sm:$0xff] %v4103_v35  ;;  %v4106_v27 = vld [vmem:[#allocation10 + $0x340] sm:$0xff]  ;;  %v4109_v30 = vld [vmem:[#allocation10 + $0x350] sm:$0xff] }
 0x2d6   : > { %1412 = vmatpush2.msra.mxu0 %v4094_v28  ;;  %1483 = vmatpush2.msra.mxu1 %v4097_v36  ;;  %5241 = vst [vmem:[#allocation124_spill] sm:$0xff] %v4106_v27  ;;  %5242 = vst [vmem:[#allocation125_spill] sm:$0xff] %v4109_v30  ;;  %v4112_v28 = vld [vmem:[#allocation10 + $0x328] sm:$0xff]  ;;  %v4115_v36 = vld [vmem:[#allocation10 + $0x338] sm:$0xff] }
 0x2d7   : > { %1413 = vmatprep.subr.mxu0 %v4100_v34  ;;  %1484 = vmatprep.subr.mxu1 %v4103_v35  ;;  %5243 = vst [vmem:[#allocation126_spill] sm:$0xff] %v4112_v28  ;;  %5244 = vst [vmem:[#allocation127_spill] sm:$0xff] %v4115_v36  ;;  %v4118_v34 = vld [vmem:[#allocation10 + $0x320] sm:$0xff]  ;;  %v4121_v35 = vld [vmem:[#allocation10 + $0x330] sm:$0xff] }
 0x2d8   : > { %1414 = vmatpush2.msra.mxu0 %v4106_v27  ;;  %1485 = vmatpush2.msra.mxu1 %v4109_v30  ;;  %5245 = vst [vmem:[#allocation128_spill] sm:$0xff] %v4118_v34  ;;  %5246 = vst [vmem:[#allocation129_spill] sm:$0xff] %v4121_v35  ;;  %v4124_v27 = vld [vmem:[#allocation10 + $0x308] sm:$0xff]  ;;  %v4127_v30 = vld [vmem:[#allocation10 + $0x318] sm:$0xff] }
 0x2d9   : > { %1415 = vmatprep.subr.mxu0 %v4112_v28  ;;  %1486 = vmatprep.subr.mxu1 %v4115_v36  ;;  %5247 = vst [vmem:[#allocation130_spill] sm:$0xff] %v4124_v27  ;;  %5248 = vst [vmem:[#allocation131_spill] sm:$0xff] %v4127_v30  ;;  %v4130_v28 = vld [vmem:[#allocation10 + $0x300] sm:$0xff]  ;;  %v4133_v36 = vld [vmem:[#allocation10 + $0x310] sm:$0xff] }
 0x2da   : > { %1416 = vmatpush2.msra.mxu0 %v4118_v34  ;;  %1487 = vmatpush2.msra.mxu1 %v4121_v35  ;;  %5249 = vst [vmem:[#allocation132_spill] sm:$0xff] %v4130_v28  ;;  %5250 = vst [vmem:[#allocation133_spill] sm:$0xff] %v4133_v36  ;;  %v4136_v34 = vld [vmem:[#allocation10 + $0x2e8] sm:$0xff]  ;;  %v4139_v35 = vld [vmem:[#allocation10 + $0x2f8] sm:$0xff] }
 0x2db   : > { %1417 = vmatprep.subr.mxu0 %v4124_v27  ;;  %1488 = vmatprep.subr.mxu1 %v4127_v30  ;;  %5251 = vst [vmem:[#allocation134_spill] sm:$0xff] %v4136_v34  ;;  %5252 = vst [vmem:[#allocation135_spill] sm:$0xff] %v4139_v35  ;;  %v4142_v27 = vld [vmem:[#allocation10 + $0x2e0] sm:$0xff]  ;;  %v4145_v30 = vld [vmem:[#allocation10 + $0x2f0] sm:$0xff] }
 0x2dc   : > { %1418 = vmatpush2.msra.mxu0 %v4130_v28  ;;  %1489 = vmatpush2.msra.mxu1 %v4133_v36  ;;  %5253 = vst [vmem:[#allocation136_spill] sm:$0xff] %v4142_v27  ;;  %5254 = vst [vmem:[#allocation137_spill] sm:$0xff] %v4145_v30  ;;  %v4148_v28 = vld [vmem:[#allocation10 + $0x2c8] sm:$0xff]  ;;  %v4151_v36 = vld [vmem:[#allocation10 + $0x2d8] sm:$0xff] }
 0x2dd   : > { %1419 = vmatprep.subr.mxu0 %v4136_v34  ;;  %1490 = vmatprep.subr.mxu1 %v4139_v35  ;;  %5255 = vst [vmem:[#allocation138_spill] sm:$0xff] %v4148_v28  ;;  %5256 = vst [vmem:[#allocation139_spill] sm:$0xff] %v4151_v36  ;;  %v4154_v34 = vld [vmem:[#allocation10 + $0x2c0] sm:$0xff]  ;;  %v4157_v35 = vld [vmem:[#allocation10 + $0x2d0] sm:$0xff] }
 0x2de   : > { %1420 = vmatpush2.msra.mxu0 %v4142_v27  ;;  %1491 = vmatpush2.msra.mxu1 %v4145_v30  ;;  %5257 = vst [vmem:[#allocation140_spill] sm:$0xff] %v4154_v34  ;;  %5258 = vst [vmem:[#allocation141_spill] sm:$0xff] %v4157_v35  ;;  %v4160_v27 = vld [vmem:[#allocation10 + $0x2a8] sm:$0xff]  ;;  %v4163_v30 = vld [vmem:[#allocation10 + $0x2b8] sm:$0xff] }
 0x2df   : > { %1421 = vmatprep.subr.mxu0 %v4148_v28  ;;  %1492 = vmatprep.subr.mxu1 %v4151_v36  ;;  %5259 = vst [vmem:[#allocation142_spill] sm:$0xff] %v4160_v27  ;;  %5260 = vst [vmem:[#allocation143_spill] sm:$0xff] %v4163_v30  ;;  %v4166_v28 = vld [vmem:[#allocation10 + $0x2a0] sm:$0xff]  ;;  %v4169_v36 = vld [vmem:[#allocation10 + $0x2b0] sm:$0xff] }
 0x2e0   : > { %1422 = vmatpush2.msra.mxu0 %v4154_v34  ;;  %1493 = vmatpush2.msra.mxu1 %v4157_v35  ;;  %5261 = vst [vmem:[#allocation144_spill] sm:$0xff] %v4166_v28  ;;  %5262 = vst [vmem:[#allocation145_spill] sm:$0xff] %v4169_v36  ;;  %v4172_v34 = vld [vmem:[#allocation10 + $0x288] sm:$0xff]  ;;  %v4175_v35 = vld [vmem:[#allocation10 + $0x298] sm:$0xff] }
 0x2e1   : > { %1423 = vmatprep.subr.mxu0 %v4160_v27  ;;  %1494 = vmatprep.subr.mxu1 %v4163_v30  ;;  %5263 = vst [vmem:[#allocation146_spill] sm:$0xff] %v4172_v34  ;;  %5264 = vst [vmem:[#allocation147_spill] sm:$0xff] %v4175_v35  ;;  %v4178_v27 = vld [vmem:[#allocation10 + $0x280] sm:$0xff]  ;;  %v4181_v30 = vld [vmem:[#allocation10 + $0x290] sm:$0xff] }
 0x2e2   : > { %1424 = vmatpush2.msra.mxu0 %v4166_v28  ;;  %1495 = vmatpush2.msra.mxu1 %v4169_v36  ;;  %5265 = vst [vmem:[#allocation148_spill] sm:$0xff] %v4178_v27  ;;  %5266 = vst [vmem:[#allocation149_spill] sm:$0xff] %v4181_v30  ;;  %v4184_v28 = vld [vmem:[#allocation10 + $0x268] sm:$0xff]  ;;  %v4187_v36 = vld [vmem:[#allocation10 + $0x278] sm:$0xff] }
 0x2e3   : > { %1425 = vmatprep.subr.mxu0 %v4172_v34  ;;  %1496 = vmatprep.subr.mxu1 %v4175_v35  ;;  %5267 = vst [vmem:[#allocation150_spill] sm:$0xff] %v4184_v28  ;;  %5268 = vst [vmem:[#allocation151_spill] sm:$0xff] %v4187_v36  ;;  %v4190_v34 = vld [vmem:[#allocation10 + $0x260] sm:$0xff]  ;;  %v4193_v35 = vld [vmem:[#allocation10 + $0x270] sm:$0xff] }
 0x2e4   : > { %1426 = vmatpush2.msra.mxu0 %v4178_v27  ;;  %1497 = vmatpush2.msra.mxu1 %v4181_v30  ;;  %5269 = vst [vmem:[#allocation152_spill] sm:$0xff] %v4190_v34  ;;  %5270 = vst [vmem:[#allocation153_spill] sm:$0xff] %v4193_v35  ;;  %v4196_v27 = vld [vmem:[#allocation10 + $0x248] sm:$0xff]  ;;  %v4199_v30 = vld [vmem:[#allocation10 + $0x258] sm:$0xff] }
 0x2e5   : > { %1427 = vmatprep.subr.mxu0 %v4184_v28  ;;  %1498 = vmatprep.subr.mxu1 %v4187_v36  ;;  %5271 = vst [vmem:[#allocation154_spill] sm:$0xff] %v4196_v27  ;;  %5272 = vst [vmem:[#allocation155_spill] sm:$0xff] %v4199_v30  ;;  %v4202_v28 = vld [vmem:[#allocation10 + $0x240] sm:$0xff]  ;;  %v4205_v36 = vld [vmem:[#allocation10 + $0x250] sm:$0xff] }
 0x2e6   : > { %1428 = vmatpush2.msra.mxu0 %v4190_v34  ;;  %1499 = vmatpush2.msra.mxu1 %v4193_v35  ;;  %5273 = vst [vmem:[#allocation156_spill] sm:$0xff] %v4202_v28  ;;  %5274 = vst [vmem:[#allocation157_spill] sm:$0xff] %v4205_v36  ;;  %v4208_v34 = vld [vmem:[#allocation10 + $0x228] sm:$0xff]  ;;  %v4211_v35 = vld [vmem:[#allocation10 + $0x238] sm:$0xff] }
 0x2e7   : > { %1429 = vmatprep.subr.mxu0 %v4196_v27  ;;  %1500 = vmatprep.subr.mxu1 %v4199_v30  ;;  %5275 = vst [vmem:[#allocation158_spill] sm:$0xff] %v4208_v34  ;;  %5276 = vst [vmem:[#allocation159_spill] sm:$0xff] %v4211_v35  ;;  %v4214_v27 = vld [vmem:[#allocation10 + $0x220] sm:$0xff]  ;;  %v4217_v30 = vld [vmem:[#allocation10 + $0x230] sm:$0xff] }
 0x2e8   : > { %1430 = vmatpush2.msra.mxu0 %v4202_v28  ;;  %1501 = vmatpush2.msra.mxu1 %v4205_v36  ;;  %5277 = vst [vmem:[#allocation160_spill] sm:$0xff] %v4214_v27  ;;  %5278 = vst [vmem:[#allocation161_spill] sm:$0xff] %v4217_v30  ;;  %v4220_v28 = vld [vmem:[#allocation10 + $0x208] sm:$0xff]  ;;  %v4223_v36 = vld [vmem:[#allocation10 + $0x218] sm:$0xff] }
 0x2e9   : > { %1431 = vmatprep.subr.mxu0 %v4208_v34  ;;  %1502 = vmatprep.subr.mxu1 %v4211_v35  ;;  %5279 = vst [vmem:[#allocation162_spill] sm:$0xff] %v4220_v28  ;;  %5280 = vst [vmem:[#allocation163_spill] sm:$0xff] %v4223_v36  ;;  %v4226_v34 = vld [vmem:[#allocation10 + $0x200] sm:$0xff]  ;;  %v4229_v35 = vld [vmem:[#allocation10 + $0x210] sm:$0xff] }
 0x2ea   : > { %1432 = vmatpush2.msra.mxu0 %v4214_v27  ;;  %1503 = vmatpush2.msra.mxu1 %v4217_v30  ;;  %5281 = vst [vmem:[#allocation164_spill] sm:$0xff] %v4226_v34  ;;  %5282 = vst [vmem:[#allocation165_spill] sm:$0xff] %v4229_v35 }
 0x2eb   : > { %1433 = vmatprep.subr.mxu0 %v4220_v28  ;;  %1504 = vmatprep.subr.mxu1 %v4223_v36 }
 0x2ec   : > { %1434 = vmatpush2.msra.mxu0 %v4226_v34  ;;  %1505 = vmatpush2.msra.mxu1 %v4229_v35 }
 0x2ed   : > { %1548 = vmatprep.subr.mxu0 %v3621_v25  ;;  %1619 = vmatprep.subr.mxu1 %v3624_v26 }
 0x34b   : > { %v1085_v30 = vpop.f32.mrf.mxu0  ;;  %v1156_v34 = vpop.f32.mrf.mxu1 }
 0x34c   : > { %v1086_v27 = vadd.f32 %v1085_v30, %v3630_v32  ;;  %v1157_v24 = vadd.f32 %v1156_v34, %v3636_v41 }
 0x34d   : > { %v1087_v28 = vpop.f32.mrf.mxu0  ;;  %v1158_v23 = vpop.f32.mrf.mxu1 }
 0x34e   : > { %v2043_v19 = vmul.f32 -1.442695, %v1086_v27  ;;  %v1088_v29 = vadd.f32 %v1087_v28, %v3632_v33  ;;  %v2045_v35 = vmul.f32 -1.442695, %v1157_v24  ;;  %v1159_v26 = vadd.f32 %v1158_v23, %v3639_v45 }
 0x350   : > { %2214 = vpow2.f32 %v2043_v19  ;;  %v2044_v36 = vmul.f32 -1.442695, %v1088_v29  ;;  %v2047_v19 = vld [vmem:[%s2822_s13 + $0x40] sm:$0xff] }
 0x352   : > { %2216 = vpow2.f32 %v2044_v36  ;;  %v2048_v36 = vld [vmem:[%s2822_s13 + $0x48] sm:$0xff] }
 0x353   : > { %2218 = vpow2.f32 %v2045_v35 }
 0x35d   : > { %v2215_v25 = vpop.eup %2214 }
 0x35e   : > { %v1171_v22 = vadd.f32 1.0, %v2215_v25 }
 0x35f   : > { %v2217_v30 = vpop.eup %2216 }
 0x360   : > { %2220 = vrcp.f32 %v1171_v22  ;;  %v1172_v27 = vadd.f32 1.0, %v2217_v30  ;;  %v2219_v28 = vpop.eup %2218 }
 0x361   : > { %2222 = vtanh.f32 %v1159_v26  ;;  %v1173_v24 = vadd.f32 1.0, %v2219_v28  ;;  %v2050_v28 = vld [vmem:[%s2822_s13 + $0x58] sm:$0xff] }
 0x362   : > { %2224 = vrcp.f32 %v1172_v27  ;;  %v2049_v27 = vld [vmem:[%s2822_s13 + $0x50] sm:$0xff] }
 0x36c   : > { %v1262_v29 = vpop.f32.mrf.mxu0 }
 0x36d   : > { %v2221_v33 = vpop.eup %2220  ;;  %v1338_v32 = vadd.f32 %v2047_v19, %v1262_v29  ;;  %v1333_v19 = vpop.f32.mrf.mxu1 }
 0x36e   : > { %v2223_v34 = vpop.eup %2222  ;;  %v1264_v41 = vpop.f32.mrf.mxu0  ;;  %v1340_v29 = vadd.f32 %v2049_v27, %v1333_v19 }
 0x36f   : > { %v2225_v21 = vpop.eup %2224  ;;  %v2051_v23 = vmul.f32 -1.442695, %v1338_v32  ;;  %v1339_v25 = vadd.f32 %v2048_v36, %v1264_v41  ;;  %v1182_v22 = vmul.f32 %v2223_v34, %v2221_v33  ;;  %v1335_v45 = vpop.f32.mrf.mxu1 }
 0x370   : > { %v1181_v35 = vmul.f32 %v2225_v21, %v3644_v4  ;;  %v2053_v20 = vmul.f32 -1.442695, %v1340_v29  ;;  %v1341_v41 = vadd.f32 %v2050_v28, %v1335_v45 }
 0x371   : > { %2226 = vpow2.f32 %v2051_v23  ;;  %v2052_v26 = vmul.f32 -1.442695, %v1339_v25 }
 0x372   : > { %2228 = vrcp.f32 %v1173_v24  ;;  %v4241_v30 = vadd.f32 %v1182_v22, %v1181_v35 }
 0x373   : > { %2230 = vpow2.f32 %v2052_v26 }
 0x374   : > { %2232 = vtanh.f32 %v4241_v30 }
 0x375   : > { %2234 = vpow2.f32 %v2053_v20 }
 0x37e   : > { %v2227_v32 = vpop.eup %2226 }
 0x37f   : > { %v2229_v36 = vpop.eup %2228  ;;  %v1352_v4 = vadd.f32 1.0, %v2227_v32  ;;  %v5327_v32 = vld [vmem:[#allocation62_spill] sm:$0xff] }
 0x380   : > { %v2231_v33 = vpop.eup %2230 }
 0x381   : > { %v2233_v21 = vpop.eup %2232  ;;  %2236 = vrcp.f32 %v1352_v4  ;;  %v1353_v34 = vadd.f32 1.0, %v2231_v33  ;;  %v5330_v4 = vld [vmem:[#allocation65_spill] sm:$0xff]  ;;  %v5331_v33 = vld [vmem:[#allocation66_spill] sm:$0xff] }
 0x382   : > { %v1185_v24 = vmul.f32 %v2233_v21, %v2229_v36  ;;  %2238 = vtanh.f32 %v1341_v41  ;;  %v2235_v23 = vpop.eup %2234  ;;  %v5328_v41 = vld [vmem:[#allocation63_spill] sm:$0xff]  ;;  %v5329_v36 = vld [vmem:[#allocation64_spill] sm:$0xff] }
 0x383   : > { %2240 = vrcp.f32 %v1353_v34  ;;  %v1354_v26 = vadd.f32 1.0, %v2235_v23  ;;  %v5332_v21 = vld [vmem:[#allocation67_spill] sm:$0xff]  ;;  %v5333_v34 = vld [vmem:[#allocation68_spill] sm:$0xff]  ;;  %v5335_v23 = vld [vmem:[#allocation70_spill] sm:$0xff] }
 0x384   : > { %2046 = vst [vmem:[%s2833_s8 + $0x8] sm:$0xff] %v1185_v24  ;;  %1435 = vmatprep.mubr.f32.mxu0 %v1185_v24  ;;  %1506 = vmatprep.mubr.f32.mxu1 %v1185_v24  ;;  %v5334_v24 = vld [vmem:[#allocation69_spill] sm:$0xff] }
 0x385   : > { %2242 = vrcp.f32 %v1354_v26  ;;  %v5339_v26 = vld [vmem:[#allocation74_spill] sm:$0xff] }
 0x38e   : > { %v2237_v25 = vpop.eup %2236 }
 0x38f   : > { %v2239_v35 = vpop.eup %2238 }
 0x390   : > { %v2241_v22 = vpop.eup %2240  ;;  %v1363_v27 = vmul.f32 %v2239_v35, %v2237_v25  ;;  %v5336_v25 = vld [vmem:[#allocation71_spill] sm:$0xff]  ;;  %v5337_v35 = vld [vmem:[#allocation72_spill] sm:$0xff] }
 0x391   : > { %v1362_v45 = vmul.f32 %v2241_v22, %v3651_v31  ;;  %v5283_v31 = vld [vmem:[#allocation17_spill] sm:$0xff] }
 0x392   : > { %v2243_v20 = vpop.eup %2242  ;;  %v5338_v22 = vld [vmem:[#allocation73_spill] sm:$0xff] }
 0x393   : > { %v4248_v19 = vadd.f32 %v1363_v27, %v1362_v45  ;;  %v5340_v45 = vld [vmem:[#allocation75_spill] sm:$0xff]  ;;  %v5341_v27 = vld [vmem:[#allocation76_spill] sm:$0xff] }
 0x395   : > { %2244 = vtanh.f32 %v4248_v19 }
 0x3a2   : > { %v2245_v29 = vpop.eup %2244 }
 0x3a3   : > { %v4251_v28 = vmul.f32 %v2245_v29, %v2243_v20  ;;  %v5342_v20 = vld [vmem:[#allocation77_spill] sm:$0xff]  ;;  %v5343_v29 = vld [vmem:[#allocation78_spill] sm:$0xff] }
 0x3a5   : > { %1436 = vmatmul.mubr.f32.vlgmr.msra.gmra.mxu0 %v4251_v28  ;;  %1507 = vmatmul.mubr.f32.vlgmr.msra.gmra.mxu1 %v4251_v28 }
 0x3a6   : > { %1549 = vmatpush1.msra.mxu0 %v3658_v37  ;;  %1620 = vmatpush1.msra.mxu1 %v3661_v38  ;;  %v5284_v37 = vld [vmem:[#allocation25_spill] sm:$0xff]  ;;  %v5285_v38 = vld [vmem:[#allocation18_spill] sm:$0xff] }
 0x3a7   : > { %1550 = vmatprep.subr.mxu0 %v3664_v60  ;;  %1621 = vmatprep.subr.mxu1 %v3667_v39  ;;  %v5286_v60 = vld [vmem:[#allocation26_spill] sm:$0xff]  ;;  %v5287_v39 = vld [vmem:[#allocation19_spill] sm:$0xff] }
 0x3a8   : > { %1551 = vmatpush1.msra.mxu0 %v3670_v40  ;;  %1622 = vmatpush1.msra.mxu1 %v3673_v42  ;;  %v5288_v40 = vld [vmem:[#allocation27_spill] sm:$0xff]  ;;  %v5289_v42 = vld [vmem:[#allocation20_spill] sm:$0xff] }
 0x3a9   : > { %1552 = vmatprep.subr.mxu0 %v3676_v43  ;;  %1623 = vmatprep.subr.mxu1 %v3679_v44  ;;  %v5290_v43 = vld [vmem:[#allocation28_spill] sm:$0xff]  ;;  %v5291_v44 = vld [vmem:[#allocation22_spill] sm:$0xff] }
 0x3aa   : > { %1553 = vmatpush1.msra.mxu0 %v3682_v46  ;;  %1624 = vmatpush1.msra.mxu1 %v3685_v48  ;;  %v5292_v46 = vld [vmem:[#allocation29_spill] sm:$0xff]  ;;  %v5293_v48 = vld [vmem:[#allocation24_spill] sm:$0xff] }
 0x3ab   : > { %1554 = vmatprep.subr.mxu0 %v3688_v50  ;;  %1625 = vmatprep.subr.mxu1 %v3691_v52  ;;  %v5294_v50 = vld [vmem:[#allocation30_spill] sm:$0xff]  ;;  %v5295_v52 = vld [vmem:[#allocation31_spill] sm:$0xff] }
 0x3ac   : > { %1555 = vmatpush1.msra.mxu0 %v3694_v54  ;;  %1626 = vmatpush1.msra.mxu1 %v3697_v56  ;;  %v5296_v54 = vld [vmem:[#allocation32_spill] sm:$0xff]  ;;  %v5297_v56 = vld [vmem:[#allocation33_spill] sm:$0xff] }
 0x3ad   : > { %1556 = vmatprep.subr.mxu0 %v3700_v0  ;;  %1627 = vmatprep.subr.mxu1 %v3703_v1  ;;  %v5298_v0 = vld [vmem:[#allocation34_spill] sm:$0xff]  ;;  %v5299_v1 = vld [vmem:[#allocation35_spill] sm:$0xff] }
 0x3ae   : > { %1557 = vmatpush1.msra.mxu0 %v3706_v10  ;;  %1628 = vmatpush1.msra.mxu1 %v3709_v55  ;;  %v5300_v10 = vld [vmem:[#allocation36_spill] sm:$0xff]  ;;  %v5301_v55 = vmov 0.0  }
 0x3af   : > { %1558 = vmatprep.subr.mxu0 %v3712_v5  ;;  %1629 = vmatprep.subr.mxu1 %v3715_v53  ;;  %v5302_v5 = vld [vmem:[#allocation37_spill] sm:$0xff]  ;;  %v5303_v53 = vld [vmem:[#allocation38_spill] sm:$0xff] }
 0x3b0   : > { %1559 = vmatpush1.msra.mxu0 %v3718_v51  ;;  %1630 = vmatpush1.msra.mxu1 %v3721_v57  ;;  %v5304_v51 = vld [vmem:[#allocation39_spill] sm:$0xff]  ;;  %v5305_v57 = vld [vmem:[#allocation40_spill] sm:$0xff] }
 0x3b1   : > { %1560 = vmatprep.subr.mxu0 %v3724_v59  ;;  %1631 = vmatprep.subr.mxu1 %v3727_v62  ;;  %v5306_v59 = vld [vmem:[#allocation41_spill] sm:$0xff]  ;;  %v5307_v62 = vld [vmem:[#allocation42_spill] sm:$0xff] }
 0x3b2   : > { %1561 = vmatpush1.msra.mxu0 %v3730_v63  ;;  %1632 = vmatpush1.msra.mxu1 %v3733_v49  ;;  %v5308_v63 = vld [vmem:[#allocation43_spill] sm:$0xff]  ;;  %v5309_v49 = vld [vmem:[#allocation44_spill] sm:$0xff] }
 0x3b3   : > { %1562 = vmatprep.subr.mxu0 %v3736_v58  ;;  %1633 = vmatprep.subr.mxu1 %v3739_v47  ;;  %v5310_v58 = vld [vmem:[#allocation45_spill] sm:$0xff]  ;;  %v5311_v47 = vld [vmem:[#allocation46_spill] sm:$0xff] }
 0x3b4   : > { %1563 = vmatpush1.msra.mxu0 %v3742_v61  ;;  %1634 = vmatpush1.msra.mxu1 %v3745_v2  ;;  %v5312_v61 = vld [vmem:[#allocation47_spill] sm:$0xff]  ;;  %v5313_v2 = vld [vmem:[#allocation48_spill] sm:$0xff] }
 0x3b5   : > { %1564 = vmatprep.subr.mxu0 %v3748_v3  ;;  %1635 = vmatprep.subr.mxu1 %v3751_v6  ;;  %v5314_v3 = vld [vmem:[#allocation49_spill] sm:$0xff]  ;;  %v5315_v6 = vld [vmem:[#allocation50_spill] sm:$0xff] }
 0x3b6   : > { %1565 = vmatpush1.msra.mxu0 %v3754_v7  ;;  %1636 = vmatpush1.msra.mxu1 %v3757_v8  ;;  %v5316_v7 = vld [vmem:[#allocation51_spill] sm:$0xff]  ;;  %v5317_v8 = vld [vmem:[#allocation52_spill] sm:$0xff] }
 0x3b7   : > { %1566 = vmatprep.subr.mxu0 %v3760_v9  ;;  %1637 = vmatprep.subr.mxu1 %v3763_v11  ;;  %v5318_v9 = vld [vmem:[#allocation53_spill] sm:$0xff]  ;;  %v5319_v11 = vld [vmem:[#allocation54_spill] sm:$0xff] }
 0x3b8   : > { %1567 = vmatpush1.msra.mxu0 %v3766_v12  ;;  %1638 = vmatpush1.msra.mxu1 %v3769_v13  ;;  %v5320_v12 = vld [vmem:[#allocation55_spill] sm:$0xff]  ;;  %v5321_v13 = vld [vmem:[#allocation56_spill] sm:$0xff] }
 0x3b9   : > { %1568 = vmatprep.subr.mxu0 %v3772_v14  ;;  %1639 = vmatprep.subr.mxu1 %v3775_v15  ;;  %v5322_v14 = vld [vmem:[#allocation57_spill] sm:$0xff]  ;;  %v5323_v15 = vld [vmem:[#allocation58_spill] sm:$0xff] }
 0x3ba   : > { %1569 = vmatpush1.msra.mxu0 %v3778_v16  ;;  %1640 = vmatpush1.msra.mxu1 %v3781_v17  ;;  %v5324_v16 = vld [vmem:[#allocation59_spill] sm:$0xff]  ;;  %v5325_v17 = vld [vmem:[#allocation60_spill] sm:$0xff] }
 0x3bb   : > { %1570 = vmatprep.subr.mxu0 %v3784_v18  ;;  %1641 = vmatprep.subr.mxu1 %v5283_v31  ;;  %v5326_v18 = vld [vmem:[#allocation61_spill] sm:$0xff]  ;;  %v5345_v31 = vld [vmem:[#allocation80_spill] sm:$0xff] }
 0x3bc   : > { %1571 = vmatpush1.msra.mxu0 %v5284_v37  ;;  %1642 = vmatpush1.msra.mxu1 %v5285_v38  ;;  %v5346_v37 = vld [vmem:[#allocation81_spill] sm:$0xff]  ;;  %v5347_v38 = vld [vmem:[#allocation82_spill] sm:$0xff] }
 0x3bd   : > { %1572 = vmatprep.subr.mxu0 %v5286_v60  ;;  %1643 = vmatprep.subr.mxu1 %v5287_v39  ;;  %v5348_v60 = vld [vmem:[#allocation83_spill] sm:$0xff]  ;;  %v5349_v39 = vld [vmem:[#allocation84_spill] sm:$0xff] }
 0x3be   : > { %1573 = vmatpush1.msra.mxu0 %v5288_v40  ;;  %1644 = vmatpush1.msra.mxu1 %v5289_v42  ;;  %v5350_v40 = vld [vmem:[#allocation85_spill] sm:$0xff]  ;;  %v5351_v42 = vld [vmem:[#allocation86_spill] sm:$0xff] }
 0x3bf   : > { %1574 = vmatprep.subr.mxu0 %v5290_v43  ;;  %1645 = vmatprep.subr.mxu1 %v5291_v44  ;;  %v5352_v43 = vld [vmem:[#allocation87_spill] sm:$0xff]  ;;  %v5353_v44 = vld [vmem:[#allocation88_spill] sm:$0xff] }
 0x3c0   : > { %1575 = vmatpush1.msra.mxu0 %v5292_v46  ;;  %1646 = vmatpush1.msra.mxu1 %v5293_v48  ;;  %v5354_v46 = vld [vmem:[#allocation89_spill] sm:$0xff]  ;;  %v5355_v48 = vld [vmem:[#allocation90_spill] sm:$0xff] }
 0x3c1   : > { %1576 = vmatprep.subr.mxu0 %v5294_v50  ;;  %1647 = vmatprep.subr.mxu1 %v5295_v52  ;;  %v5356_v50 = vld [vmem:[#allocation91_spill] sm:$0xff]  ;;  %v5357_v52 = vld [vmem:[#allocation92_spill] sm:$0xff] }
 0x3c2   : > { %1577 = vmatpush1.msra.mxu0 %v5296_v54  ;;  %1648 = vmatpush1.msra.mxu1 %v5297_v56  ;;  %v5358_v54 = vld [vmem:[#allocation93_spill] sm:$0xff]  ;;  %v5359_v56 = vld [vmem:[#allocation94_spill] sm:$0xff] }
 0x3c3   : > { %1578 = vmatprep.subr.mxu0 %v5298_v0  ;;  %1649 = vmatprep.subr.mxu1 %v5299_v1  ;;  %v5360_v0 = vld [vmem:[#allocation95_spill] sm:$0xff]  ;;  %v5361_v1 = vld [vmem:[#allocation96_spill] sm:$0xff] }
 0x3c4   : > { %1579 = vmatpush1.msra.mxu0 %v5300_v10  ;;  %1612 = vmatprep.mubr.f32.mxu0 %v5301_v55  ;;  %v5362_v10 = vld [vmem:[#allocation97_spill] sm:$0xff] }
 0x3c5   : > { %1650 = vmatpush1.msra.mxu1 %v5302_v5  ;;  %1683 = vmatprep.mubr.f32.mxu1 %v5301_v55  ;;  %v5363_v55 = vld [vmem:[#allocation98_spill] sm:$0xff]  ;;  %v5364_v5 = vld [vmem:[#allocation99_spill] sm:$0xff] }
 0x3c6   : > { %1613 = vmatmul.mubr.f32.vlgmr.msra.gmra.mxu0 %v4251_v28  ;;  %1684 = vmatmul.mubr.f32.vlgmr.msra.gmra.mxu1 %v4251_v28  ;;  %v5344_v28 = vld [vmem:[#allocation79_spill] sm:$0xff] }
 0x3c7   : > { %1723 = vmatprep.subr.mxu0 %v5303_v53  ;;  %1794 = vmatprep.subr.mxu1 %v5304_v51  ;;  %v5365_v53 = vld [vmem:[#allocation100_spill] sm:$0xff]  ;;  %v5366_v51 = vld [vmem:[#allocation101_spill] sm:$0xff] }
 0x3c8   : > { %1724 = vmatpush1.msra.mxu0 %v5305_v57  ;;  %1795 = vmatpush1.msra.mxu1 %v5306_v59  ;;  %v5367_v57 = vld [vmem:[#allocation102_spill] sm:$0xff]  ;;  %v5368_v59 = vld [vmem:[#allocation103_spill] sm:$0xff] }
 0x3c9   : > { %1725 = vmatprep.subr.mxu0 %v5307_v62  ;;  %1796 = vmatprep.subr.mxu1 %v5308_v63  ;;  %v5369_v62 = vld [vmem:[#allocation104_spill] sm:$0xff]  ;;  %v5370_v63 = vld [vmem:[#allocation105_spill] sm:$0xff] }
 0x3ca   : > { %1726 = vmatpush1.msra.mxu0 %v5309_v49  ;;  %1797 = vmatpush1.msra.mxu1 %v5310_v58  ;;  %v5371_v49 = vld [vmem:[#allocation106_spill] sm:$0xff]  ;;  %v5372_v58 = vld [vmem:[#allocation107_spill] sm:$0xff] }
 0x3cb   : > { %1727 = vmatprep.subr.mxu0 %v5311_v47  ;;  %1798 = vmatprep.subr.mxu1 %v5312_v61  ;;  %v5373_v47 = vld [vmem:[#allocation108_spill] sm:$0xff]  ;;  %v5374_v61 = vld [vmem:[#allocation109_spill] sm:$0xff] }
 0x3cc   : > { %1728 = vmatpush1.msra.mxu0 %v5313_v2  ;;  %1799 = vmatpush1.msra.mxu1 %v5314_v3  ;;  %v5375_v2 = vld [vmem:[#allocation110_spill] sm:$0xff]  ;;  %v5376_v3 = vld [vmem:[#allocation111_spill] sm:$0xff] }
 0x3cd   : > { %1729 = vmatprep.subr.mxu0 %v5315_v6  ;;  %1800 = vmatprep.subr.mxu1 %v5316_v7  ;;  %v5377_v6 = vld [vmem:[#allocation112_spill] sm:$0xff]  ;;  %v5378_v7 = vld [vmem:[#allocation113_spill] sm:$0xff] }
 0x3ce   : > { %1730 = vmatpush1.msra.mxu0 %v5317_v8  ;;  %1801 = vmatpush1.msra.mxu1 %v5318_v9  ;;  %v5379_v8 = vld [vmem:[#allocation114_spill] sm:$0xff]  ;;  %v5380_v9 = vld [vmem:[#allocation115_spill] sm:$0xff] }
 0x3cf   : > { %1731 = vmatprep.subr.mxu0 %v5319_v11  ;;  %1802 = vmatprep.subr.mxu1 %v5320_v12  ;;  %v5381_v11 = vld [vmem:[#allocation116_spill] sm:$0xff]  ;;  %v5382_v12 = vld [vmem:[#allocation117_spill] sm:$0xff] }
 0x3d0   : > { %1732 = vmatpush1.msra.mxu0 %v5321_v13  ;;  %1803 = vmatpush1.msra.mxu1 %v5322_v14  ;;  %v5383_v13 = vld [vmem:[#allocation118_spill] sm:$0xff]  ;;  %v5384_v14 = vld [vmem:[#allocation119_spill] sm:$0xff] }
 0x3d1   : > { %1733 = vmatprep.subr.mxu0 %v5323_v15  ;;  %1804 = vmatprep.subr.mxu1 %v5324_v16  ;;  %v5385_v15 = vld [vmem:[#allocation120_spill] sm:$0xff]  ;;  %v5386_v16 = vld [vmem:[#allocation121_spill] sm:$0xff] }
 0x3d2   : > { %1734 = vmatpush1.msra.mxu0 %v5325_v17  ;;  %1805 = vmatpush1.msra.mxu1 %v5326_v18  ;;  %v5387_v17 = vld [vmem:[#allocation122_spill] sm:$0xff]  ;;  %v5388_v18 = vld [vmem:[#allocation123_spill] sm:$0xff] }
 0x3d3   : > { %1735 = vmatprep.subr.mxu0 %v5327_v32  ;;  %1806 = vmatprep.subr.mxu1 %v5328_v41  ;;  %v5389_v32 = vld [vmem:[#allocation124_spill] sm:$0xff]  ;;  %v5390_v41 = vld [vmem:[#allocation125_spill] sm:$0xff] }
 0x3d4   : > { %1736 = vmatpush1.msra.mxu0 %v5329_v36  ;;  %1807 = vmatpush1.msra.mxu1 %v5330_v4  ;;  %v5391_v36 = vld [vmem:[#allocation126_spill] sm:$0xff]  ;;  %v5392_v4 = vld [vmem:[#allocation127_spill] sm:$0xff] }
 0x3d5   : > { %1737 = vmatprep.subr.mxu0 %v5331_v33  ;;  %1808 = vmatprep.subr.mxu1 %v5332_v21  ;;  %v5393_v33 = vld [vmem:[#allocation128_spill] sm:$0xff]  ;;  %v5394_v21 = vld [vmem:[#allocation129_spill] sm:$0xff] }
 0x3d6   : > { %1738 = vmatpush1.msra.mxu0 %v5333_v34  ;;  %1809 = vmatpush1.msra.mxu1 %v5334_v24  ;;  %v5395_v34 = vld [vmem:[#allocation130_spill] sm:$0xff]  ;;  %v5396_v24 = vld [vmem:[#allocation131_spill] sm:$0xff] }
 0x3d7   : > { %1739 = vmatprep.subr.mxu0 %v5335_v23  ;;  %1810 = vmatprep.subr.mxu1 %v5336_v25  ;;  %v5397_v23 = vld [vmem:[#allocation132_spill] sm:$0xff]  ;;  %v5398_v25 = vld [vmem:[#allocation133_spill] sm:$0xff] }
 0x3d8   : > { %1740 = vmatpush1.msra.mxu0 %v5337_v35  ;;  %1811 = vmatpush1.msra.mxu1 %v5338_v22  ;;  %v5399_v35 = vld [vmem:[#allocation134_spill] sm:$0xff]  ;;  %v5400_v22 = vld [vmem:[#allocation135_spill] sm:$0xff] }
 0x3d9   : > { %1741 = vmatprep.subr.mxu0 %v5339_v26  ;;  %1812 = vmatprep.subr.mxu1 %v5340_v45  ;;  %v5401_v26 = vld [vmem:[#allocation136_spill] sm:$0xff]  ;;  %v5402_v45 = vld [vmem:[#allocation137_spill] sm:$0xff] }
 0x3da   : > { %1742 = vmatpush1.msra.mxu0 %v5341_v27  ;;  %1813 = vmatpush1.msra.mxu1 %v5342_v20  ;;  %v5403_v27 = vld [vmem:[#allocation138_spill] sm:$0xff]  ;;  %v5404_v20 = vld [vmem:[#allocation139_spill] sm:$0xff] }
 0x3db   : > { %1743 = vmatprep.subr.mxu0 %v5343_v29  ;;  %1814 = vmatprep.subr.mxu1 %v5344_v28  ;;  %v5405_v29 = vld [vmem:[#allocation140_spill] sm:$0xff]  ;;  %v5406_v28 = vld [vmem:[#allocation141_spill] sm:$0xff] }
 0x3dc   : > { %1744 = vmatpush1.msra.mxu0 %v5345_v31  ;;  %1815 = vmatpush1.msra.mxu1 %v5346_v37  ;;  %v5407_v31 = vld [vmem:[#allocation142_spill] sm:$0xff]  ;;  %v5408_v37 = vld [vmem:[#allocation143_spill] sm:$0xff] }
 0x3dd   : > { %1745 = vmatprep.subr.mxu0 %v5347_v38  ;;  %1816 = vmatprep.subr.mxu1 %v5348_v60  ;;  %v5409_v38 = vld [vmem:[#allocation144_spill] sm:$0xff]  ;;  %v5410_v60 = vld [vmem:[#allocation145_spill] sm:$0xff] }
 0x3de   : > { %1746 = vmatpush1.msra.mxu0 %v5349_v39  ;;  %1817 = vmatpush1.msra.mxu1 %v5350_v40  ;;  %v5411_v39 = vld [vmem:[#allocation146_spill] sm:$0xff]  ;;  %v5412_v40 = vld [vmem:[#allocation147_spill] sm:$0xff] }
 0x3df   : > { %1747 = vmatprep.subr.mxu0 %v5351_v42  ;;  %1818 = vmatprep.subr.mxu1 %v5352_v43  ;;  %v5413_v42 = vld [vmem:[#allocation148_spill] sm:$0xff]  ;;  %v5414_v43 = vld [vmem:[#allocation149_spill] sm:$0xff] }
 0x3e0   : > { %1748 = vmatpush1.msra.mxu0 %v5353_v44  ;;  %1819 = vmatpush1.msra.mxu1 %v5354_v46  ;;  %v5415_v44 = vld [vmem:[#allocation150_spill] sm:$0xff]  ;;  %v5416_v46 = vld [vmem:[#allocation151_spill] sm:$0xff] }
 0x3e1   : > { %1749 = vmatprep.subr.mxu0 %v5355_v48  ;;  %1820 = vmatprep.subr.mxu1 %v5356_v50  ;;  %v5417_v48 = vld [vmem:[#allocation152_spill] sm:$0xff]  ;;  %v5418_v50 = vld [vmem:[#allocation153_spill] sm:$0xff] }
 0x3e2   : > { %1750 = vmatpush1.msra.mxu0 %v5357_v52  ;;  %1821 = vmatpush1.msra.mxu1 %v5358_v54  ;;  %v5419_v52 = vld [vmem:[#allocation154_spill] sm:$0xff]  ;;  %v5420_v54 = vld [vmem:[#allocation155_spill] sm:$0xff] }
 0x3e3   : > { %1751 = vmatprep.subr.mxu0 %v5359_v56  ;;  %1822 = vmatprep.subr.mxu1 %v5360_v0  ;;  %v5421_v56 = vld [vmem:[#allocation156_spill] sm:$0xff]  ;;  %v5422_v0 = vld [vmem:[#allocation157_spill] sm:$0xff] }
 0x3e4   : > { %1752 = vmatpush1.msra.mxu0 %v5361_v1  ;;  %1823 = vmatpush1.msra.mxu1 %v5362_v10  ;;  %v5423_v1 = vld [vmem:[#allocation158_spill] sm:$0xff]  ;;  %v5424_v10 = vld [vmem:[#allocation159_spill] sm:$0xff] }
 0x3e5   : > { %1753 = vmatprep.subr.mxu0 %v5363_v55  ;;  %1824 = vmatprep.subr.mxu1 %v5364_v5  ;;  %v5425_v55 = vld [vmem:[#allocation160_spill] sm:$0xff]  ;;  %v5426_v5 = vld [vmem:[#allocation161_spill] sm:$0xff] }
 0x3e6   : > { %1754 = vmatpush1.msra.mxu0 %v5365_v53  ;;  %1825 = vmatpush1.msra.mxu1 %v5366_v51  ;;  %v5427_v53 = vld [vmem:[#allocation162_spill] sm:$0xff]  ;;  %v5428_v51 = vld [vmem:[#allocation163_spill] sm:$0xff] }
 0x3e7   : > { %1755 = vmatprep.subr.mxu0 %v5367_v57  ;;  %1826 = vmatprep.subr.mxu1 %v5368_v59  ;;  %v5429_v57 = vld [vmem:[#allocation164_spill] sm:$0xff]  ;;  %v5430_v59 = vld [vmem:[#allocation165_spill] sm:$0xff] }
 0x3e8   : > { %1756 = vmatpush2.msra.mxu0 %v5369_v62  ;;  %1827 = vmatpush2.msra.mxu1 %v5370_v63  ;;  %v5431_v63 = vld [vmem:[#allocation15_spill] sm:$0xff] }
 0x3e9   : > { %1757 = vmatprep.subr.mxu0 %v5371_v49  ;;  %1828 = vmatprep.subr.mxu1 %v5372_v58 }
 0x3ea   : > { %1758 = vmatpush2.msra.mxu0 %v5373_v47  ;;  %1829 = vmatpush2.msra.mxu1 %v5374_v61  ;;  %v5432_v61 = vld [vmem:[#allocation21_spill] sm:$0xff] }
 0x3eb   : > { %1759 = vmatprep.subr.mxu0 %v5375_v2  ;;  %1830 = vmatprep.subr.mxu1 %v5376_v3 }
 0x3ec   : > { %1760 = vmatpush2.msra.mxu0 %v5377_v6  ;;  %1831 = vmatpush2.msra.mxu1 %v5378_v7  ;;  %v5433_v7 = vld [vmem:[#allocation16_spill] sm:$0xff] }
 0x3ed   : > { %1761 = vmatprep.subr.mxu0 %v5379_v8  ;;  %1832 = vmatprep.subr.mxu1 %v5380_v9 }
 0x3ee   : > { %1762 = vmatpush2.msra.mxu0 %v5381_v11  ;;  %1833 = vmatpush2.msra.mxu1 %v5382_v12 }
 0x3ef   : > { %1763 = vmatprep.subr.mxu0 %v5383_v13  ;;  %1834 = vmatprep.subr.mxu1 %v5384_v14  ;;  %v5434_v13 = vld [vmem:[#allocation23_spill] sm:$0xff] }
 0x3f0   : > { %1764 = vmatpush2.msra.mxu0 %v5385_v15  ;;  %1835 = vmatpush2.msra.mxu1 %v5386_v16 }
 0x3f1   : > { %1765 = vmatprep.subr.mxu0 %v5387_v17  ;;  %1836 = vmatprep.subr.mxu1 %v5388_v18  ;;  %v2058_v18 = vld [vmem:[%s2822_s13 + $0x60] sm:$0xff] }
 0x3f2   : > { %1766 = vmatpush2.msra.mxu0 %v5389_v32  ;;  %1837 = vmatpush2.msra.mxu1 %v5390_v41 }
 0x3f3   : > { %1767 = vmatprep.subr.mxu0 %v5391_v36  ;;  %1838 = vmatprep.subr.mxu1 %v5392_v4  ;;  %v2059_v36 = vld [vmem:[%s2822_s13 + $0x68] sm:$0xff] }
 0x3f4   : > { %1768 = vmatpush2.msra.mxu0 %v5393_v33  ;;  %1839 = vmatpush2.msra.mxu1 %v5394_v21 }
 0x3f5   : > { %1769 = vmatprep.subr.mxu0 %v5395_v34  ;;  %1840 = vmatprep.subr.mxu1 %v5396_v24 }
 0x3f6   : > { %1770 = vmatpush2.msra.mxu0 %v5397_v23  ;;  %1841 = vmatpush2.msra.mxu1 %v5398_v25 }
 0x3f7   : > { %1771 = vmatprep.subr.mxu0 %v5399_v35  ;;  %1842 = vmatprep.subr.mxu1 %v5400_v22 }
 0x3f8   : > { %1772 = vmatpush2.msra.mxu0 %v5401_v26  ;;  %1843 = vmatpush2.msra.mxu1 %v5402_v45 }
 0x3f9   : > { %1773 = vmatprep.subr.mxu0 %v5403_v27  ;;  %1844 = vmatprep.subr.mxu1 %v5404_v20  ;;  %v2060_v20 = vld [vmem:[%s2822_s13 + $0x70] sm:$0xff] }
 0x3fa   : > { %1774 = vmatpush2.msra.mxu0 %v5405_v29  ;;  %1845 = vmatpush2.msra.mxu1 %v5406_v28 }
 0x3fb   : > { %1775 = vmatprep.subr.mxu0 %v5407_v31  ;;  %1846 = vmatprep.subr.mxu1 %v5408_v37  ;;  %v2061_v31 = vld [vmem:[%s2822_s13 + $0x78] sm:$0xff] }
 0x3fc   : > { %1776 = vmatpush2.msra.mxu0 %v5409_v38  ;;  %1847 = vmatpush2.msra.mxu1 %v5410_v60 }
 0x3fd   : > { %1777 = vmatprep.subr.mxu0 %v5411_v39  ;;  %1848 = vmatprep.subr.mxu1 %v5412_v40 }
 0x3fe   : > { %1778 = vmatpush2.msra.mxu0 %v5413_v42  ;;  %1849 = vmatpush2.msra.mxu1 %v5414_v43 }
 0x3ff   : > { %1779 = vmatprep.subr.mxu0 %v5415_v44  ;;  %1850 = vmatprep.subr.mxu1 %v5416_v46 }
 0x400   : > { %1780 = vmatpush2.msra.mxu0 %v5417_v48  ;;  %1851 = vmatpush2.msra.mxu1 %v5418_v50 }
 0x401   : > { %1781 = vmatprep.subr.mxu0 %v5419_v52  ;;  %1852 = vmatprep.subr.mxu1 %v5420_v54 }
 0x402   : > { %1782 = vmatpush2.msra.mxu0 %v5421_v56  ;;  %1853 = vmatpush2.msra.mxu1 %v5422_v0 }
 0x403   : > { %1783 = vmatprep.subr.mxu0 %v5423_v1  ;;  %1854 = vmatprep.subr.mxu1 %v5424_v10 }
 0x404   : > { %1784 = vmatpush2.msra.mxu0 %v5425_v55  ;;  %1855 = vmatpush2.msra.mxu1 %v5426_v5 }
 0x405   : > { %1785 = vmatprep.subr.mxu0 %v5427_v53  ;;  %1856 = vmatprep.subr.mxu1 %v5428_v51 }
 0x406   : > { %1786 = vmatpush2.msra.mxu0 %v5429_v57  ;;  %1857 = vmatpush2.msra.mxu1 %v5430_v59 }
 0x465   : > { %v1437_v62 = vpop.f32.mrf.mxu0  ;;  %v1508_v6 = vpop.f32.mrf.mxu1 }
 0x466   : > { %v1438_v49 = vadd.f32 %v1437_v62, %v5431_v63  ;;  %v1509_v8 = vadd.f32 %v1508_v6, %v5433_v7 }
 0x467   : > { %v1439_v58 = vpop.f32.mrf.mxu0  ;;  %v1510_v11 = vpop.f32.mrf.mxu1 }
 0x468   : > { %v2054_v47 = vmul.f32 -1.442695, %v1438_v49  ;;  %v1440_v2 = vadd.f32 %v1439_v58, %v5432_v61  ;;  %v2056_v9 = vmul.f32 -1.442695, %v1509_v8  ;;  %v1511_v14 = vadd.f32 %v1510_v11, %v5434_v13 }
 0x46a   : > { %2246 = vpow2.f32 %v2054_v47  ;;  %v2055_v3 = vmul.f32 -1.442695, %v1440_v2 }
 0x46c   : > { %2248 = vpow2.f32 %v2055_v3 }
 0x46d   : > { %2250 = vpow2.f32 %v2056_v9 }
 0x477   : > { %v2247_v12 = vpop.eup %2246 }
 0x478   : > { %v1523_v15 = vadd.f32 1.0, %v2247_v12 }
 0x479   : > { %v2249_v16 = vpop.eup %2248 }
 0x47a   : > { %2252 = vrcp.f32 %v1523_v15  ;;  %v1524_v17 = vadd.f32 1.0, %v2249_v16  ;;  %v2251_v32 = vpop.eup %2250 }
 0x47b   : > { %2254 = vtanh.f32 %v1511_v14  ;;  %v1525_v34 = vadd.f32 1.0, %v2251_v32 }
 0x47c   : > { %2256 = vrcp.f32 %v1524_v17 }
 0x486   : > { %v1614_v41 = vpop.f32.mrf.mxu0  ;;  %v1685_v29 = vpop.f32.mrf.mxu1 }
 0x487   : > { %v2253_v4 = vpop.eup %2252  ;;  %v1690_v33 = vadd.f32 %v2058_v18, %v1614_v41  ;;  %v1692_v28 = vadd.f32 %v2060_v20, %v1685_v29 }
 0x488   : > { %v2255_v21 = vpop.eup %2254  ;;  %v1616_v24 = vpop.f32.mrf.mxu0 }
 0x489   : > { %v2257_v23 = vpop.eup %2256  ;;  %v2062_v25 = vmul.f32 -1.442695, %v1690_v33  ;;  %v1691_v35 = vadd.f32 %v2059_v36, %v1616_v24  ;;  %v1534_v26 = vmul.f32 %v2255_v21, %v2253_v4  ;;  %v1687_v37 = vpop.f32.mrf.mxu1  ;;  %v2064_v38 = vmul.f32 -1.442695, %v1692_v28 }
 0x48a   : > { %v1533_v22 = vmul.f32 %v2257_v23, %v4241_v30  ;;  %v1693_v39 = vadd.f32 %v2061_v31, %v1687_v37 }
 0x48b   : > { %2258 = vpow2.f32 %v2062_v25  ;;  %v2063_v45 = vmul.f32 -1.442695, %v1691_v35 }
 0x48c   : > { %2260 = vrcp.f32 %v1525_v34  ;;  %v4456_v27 = vadd.f32 %v1534_v26, %v1533_v22 }
 0x48d   : > { %2262 = vpow2.f32 %v2063_v45 }
 0x48e   : > { %2264 = vtanh.f32 %v4456_v27 }
 0x48f   : > { %2266 = vpow2.f32 %v2064_v38 }
 0x498   : > { %v2259_v60 = vpop.eup %2258 }
 0x499   : > { %v2261_v40 = vpop.eup %2260  ;;  %v1704_v30 = vadd.f32 1.0, %v2259_v60 }
 0x49a   : > { %v2263_v42 = vpop.eup %2262 }
 0x49b   : > { %v2265_v43 = vpop.eup %2264  ;;  %2268 = vrcp.f32 %v1704_v30  ;;  %v1705_v44 = vadd.f32 1.0, %v2263_v42 }
 0x49c   : > { %v1537_v46 = vmul.f32 %v2265_v43, %v2261_v40  ;;  %2270 = vtanh.f32 %v1693_v39  ;;  %v2267_v48 = vpop.eup %2266 }
 0x49d   : > { %2272 = vrcp.f32 %v1705_v44  ;;  %v1706_v56 = vadd.f32 1.0, %v2267_v48 }
 0x49e   : > { %2057 = vst [vmem:[%s2833_s8 + $0x10] sm:$0xff] %v1537_v46  ;;  %1787 = vmatprep.mubr.f32.mxu0 %v1537_v46  ;;  %1858 = vmatprep.mubr.f32.mxu1 %v1537_v46 }
 0x49f   : > { %2274 = vrcp.f32 %v1706_v56 }
 0x4a8   : > { %v2269_v50 = vpop.eup %2268 }
 0x4a9   : > { %v2271_v52 = vpop.eup %2270 }
 0x4aa   : > { %v2273_v54 = vpop.eup %2272  ;;  %v1715_v1 = vmul.f32 %v2271_v52, %v2269_v50 }
 0x4ab   : > { %v1714_v0 = vmul.f32 %v2273_v54, %v4248_v19 }
 0x4ac   : > { %v2275_v55 = vpop.eup %2274 }
 0x4ad   : > { %v1716_v10 = vadd.f32 %v1715_v1, %v1714_v0 }
 0x4af   : > { %2276 = vtanh.f32 %v1716_v10  ;;  %1720 = vst [vmem:[#allocation3] sm:$0xff] %v1716_v10 }
 0x4bc   : > { %v2277_v5 = vpop.eup %2276 }
 0x4bd   : > { %v1718_v53 = vmul.f32 %v2277_v5, %v2275_v55 }
 0x4bf   : > { %1719 = vst [vmem:[#allocation2] sm:$0xff] %v1718_v53  ;;  %1788 = vmatmul.mubr.f32.vlgmr.msra.gmra.mxu0 %v1718_v53  ;;  %1859 = vmatmul.mubr.f32.vlgmr.msra.gmra.mxu1 %v1718_v53 }
 0x57f   : > { %v1789_v51 = vpop.f32.mrf.mxu0  ;;  %v1860_v58 = vpop.f32.mrf.mxu1 }
 0x580   : > { %v1790_v57 = vadd.f32 %v1789_v51, %v5431_v63  ;;  %v1861_v47 = vadd.f32 %v1860_v58, %v5433_v7 }
 0x581   : > { %v1791_v59 = vpop.f32.mrf.mxu0  ;;  %v1862_v2 = vpop.f32.mrf.mxu1 }
 0x582   : > { %v2065_v62 = vmul.f32 -1.442695, %v1790_v57  ;;  %v1792_v49 = vadd.f32 %v1791_v59, %v5432_v61  ;;  %v2067_v3 = vmul.f32 -1.442695, %v1861_v47  ;;  %v1863_v8 = vadd.f32 %v1862_v2, %v5434_v13 }
 0x584   : > { %2278 = vpow2.f32 %v2065_v62  ;;  %v2066_v19 = vmul.f32 -1.442695, %v1792_v49 }
 0x586   : > { %2280 = vpow2.f32 %v2066_v19 }
 0x587   : > { %2282 = vpow2.f32 %v2067_v3 }
 0x591   : > { %v2279_v6 = vpop.eup %2278 }
 0x592   : > { %v1875_v9 = vadd.f32 1.0, %v2279_v6 }
 0x593   : > { %v2281_v11 = vpop.eup %2280 }
 0x594   : > { %2284 = vrcp.f32 %v1875_v9  ;;  %v1876_v63 = vadd.f32 1.0, %v2281_v11  ;;  %v2283_v61 = vpop.eup %2282 }
 0x595   : > { %2286 = vtanh.f32 %v1863_v8  ;;  %v1877_v7 = vadd.f32 1.0, %v2283_v61 }
 0x596   : > { %2288 = vrcp.f32 %v1876_v63 }
 0x597   : > { %2290 = vrcp.f32 %v1877_v7 }
 0x5a1   : > { %v2285_v12 = vpop.eup %2284 }
 0x5a2   : > { %v2287_v14 = vpop.eup %2286 }
 0x5a3   : > { %v2289_v15 = vpop.eup %2288  ;;  %v1886_v17 = vmul.f32 %v2287_v14, %v2285_v12 }
 0x5a4   : > { %v1885_v16 = vmul.f32 %v2289_v15, %v4456_v27  ;;  %v2291_v18 = vpop.eup %2290 }
 0x5a6   : > { %v1887_v13 = vadd.f32 %v1886_v17, %v1885_v16 }
 0x5a8   : > { %2292 = vtanh.f32 %v1887_v13  ;;  %1891 = vst [vmem:[#allocation4] sm:$0xff] %v1887_v13 }
 0x5b5   : > { %v2293_v32 = vpop.eup %2292 }
 0x5b6   : > { %v1889_v41 = vmul.f32 %v2293_v32, %v2291_v18 }
 0x5b8   : > { %1890 = vst [vmem:[#allocation2 + $0x8] sm:$0xff] %v1889_v41  ;;  %2068 = vst [vmem:[%s2833_s8 + $0x18] sm:$0xff] %v1889_v41 }
 0x5b9   : > { %2579 = shalt.err (!%p2576_p9)
}
 0x5ba   : > { %s2580_s11 = scalar_lea.hbm %s4473_s22, 512  ;;  %s2584_s8 = scalar_lea.hbm %s4528_s4, 1024 }
 0x5bb   : > { %p2581_p12 = scmp.ne.s32.totalorder %s4473_s22, %s2580_s11  ;;  %p2585_p7 = scmp.lt.s32.totalorder %s4473_s22, %s4528_s4 }
 0x5bc   : > { %p2586_p5 = scmp.lt.s32.totalorder %s2584_s8, %s2580_s11 }
 0x5bd   : > { %p2582_p13 = pnand %p2581_p12, %p2788_p3 }
 0x5be   : > { %p2587_p6 = por %p2586_p5, %p2585_p7 }
 0x5bf   : > { %p2583_p0 = pneg %p2582_p13 }
 0x5c1   : > { %p2588_p1 = pnand %p2587_p6, %p2583_p0 }
 0x5c3   : > { %2591 = shalt.err (!%p2588_p1)
}
 0x5c4   : > { %s2660_s12 = smov 128   ;;  %s2661_s24 = smov 8  }
 0x5c5   : > { %2087 = dma.vmem_to_hbm [thread:$0]  (%p2788_p3), %s4475_s14, 512, %s4473_s22, %s1895_s6, %s2660_s12, %s2660_s12, %s2661_s24  }
 0x5c6 PF: > { %s1924_s29 = sand.u32 1, %s2630_s15   ;;  %p5435_p4 = scmp.ne.s32.totalorder %s4836_s26, 0 }
 0x5c7   : > { %p5436_p8 = scmp.ge.s32.totalorder %s2650_s20, 2  ;;  %s1925_s5 = scalar_lea.sflag [#allocation7], %s1924_s29 }
 0x5c9   : > { %p2101_p10 = pnand %p5436_p8, %p5435_p4 }
 0x5cb   : > { %p2102_p11 = pneg %p2101_p10 }
 0x5cd   : > { %2625 = dma.done.wait (%p2102_p11), %s1925_s5, 512  }
 0x5ce   : > { %2627 = vsyncadd (%p2102_p11), %s1925_s5, 4294966784  ;;  %s21_s20 = sadd.s32 1, %s2650_s20   ;;  %s5437_s15 = smov %s2634_s16 }
 0x5cf   : > { %p18_p2 = scmp.ge.s32.totalorder %s21_s20, 4   ;;  %s5438_s16 = smov %s2638_s17 }
 0x5d0   : > { %s5439_s17 = smov %s2797_s7  ;;  %s5440_s18 = smov %s2646_s19 }
 0x5d1   : > { %s5441_s19 = smov %s5443_s21  ;;  %20 = sbr.rel (!%p18_p2) target bundleno = 7 (0x7), region = 99 }
 0x5d6   :  { %1930 = vsyncpa [#allocation6], 1 }
 0x5d7   :  { %1932 = vsyncpa [#allocation6 + $0x1], 1 }
 0x5d8   :  { %1933 = vsyncpa [#allocation9], 1 }
 0x5d9   :  { %1934 = vsyncpa [#allocation7], 1 }
 0x5da   :  { %1936 = vsyncpa [#allocation7 + $0x1], 1 }

</bundles_post_ra>
